<compile_context>
chip_gen: v7x
topology: tpu7x:2x2x1
jax: 0.10.0
libtpu: 0.0.40
codegen_flags: <defaults>
</compile_context>

<pallas_src>
import functools
import numpy as np
import jax
import jax.numpy as jnp
from jax.experimental import pallas as pl
from jax.experimental.pallas import tpu as pltpu

_EPS = 1e-5                      # PyTorch InstanceNorm2d default eps
_VMEM_LIMIT = 48 * 1024 * 1024   # safe on v5e/v6e (128 MiB) and v7x (64 MiB physical)
_TM_TARGET = 512                 # spatial tile (lanes); per-step VMEM stays ~ few MiB


# ------------------------------------------------------------------ helpers
def _choose_tm(M, target=_TM_TARGET):
    """Pick an M-tile that is a multiple of 128 and divides M (or the full extent)."""
    if M % 128 != 0:
        return M                      # small / irregular spatial sizes: full block
    tm = min(target, M)
    while M % tm != 0:
        tm -= 128
    return tm


def _reflect_index(H, pad, up):
    """Indices implementing nearest-upsample(x`up`) followed by ReflectionPad(pad)."""
    Hu = H * up
    p = np.arange(-pad, Hu + pad)
    p = np.where(p < 0, -p, p)
    p = np.where(p >= Hu, 2 * Hu - 2 - p, p)
    return (p // up).astype(np.int32)


def _im2col_nchw(xp, k, stride):
    """xp: (B, C, Hp, Wp) padded -> (B, k*k*C, Ho*Wo) channel-major patches."""
    B, C, H, W = xp.shape
    Ho = (H - k) // stride + 1
    Wo = (W - k) // stride + 1
    cols = []
    for ki in range(k):
        for kj in range(k):
            cols.append(xp[:, :,
                           ki:ki + (Ho - 1) * stride + 1:stride,
                           kj:kj + (Wo - 1) * stride + 1:stride])
    p = jnp.stack(cols, axis=1)                        # (B, k*k, C, Ho, Wo)
    return p.reshape(B, k * k * C, Ho * Wo), Ho, Wo


# ------------------------------------------------------------------ kernels
def _matmul_stats_kernel(p_ref, w_ref, y_ref, s_ref, q_ref):
    """Pass 1: y = W @ P (bf16 MXU, f32 acc); accumulate per-channel sum / sumsq
    across M-tiles (resident output accumulators, M axis is 'arbitrary')."""
    @pl.when(pl.program_id(1) == 0)
    def _init():
        s_ref[...] = jnp.zeros_like(s_ref)
        q_ref[...] = jnp.zeros_like(q_ref)

    y = jnp.dot(w_ref[...], p_ref[...], preferred_element_type=jnp.float32)  # (Cout, tm)
    y_ref[...] = y
    s_ref[...] += jnp.sum(y, axis=1, keepdims=True)          # (Cout, 1)
    q_ref[...] += jnp.sum(y * y, axis=1, keepdims=True)      # (Cout, 1)


def _make_affine_kernel(relu, has_residual):
    """Pass 2: y*scale + shift (+ residual) (+ ReLU), lane-dense tiles."""
    def kernel(*refs):
        if has_residual:
            y_ref, a_ref, c_ref, r_ref, o_ref = refs
        else:
            y_ref, a_ref, c_ref, o_ref = refs
        y = y_ref[...] * a_ref[...] + c_ref[...]
        if has_residual:
            y = y + r_ref[...].astype(jnp.float32)
        if relu:
            y = jnp.maximum(y, 0.0)
        o_ref[...] = y.astype(o_ref.dtype)
    return kernel


def _make_matmul_bias_kernel(relu):
    """Fused no-norm conv (final layer): y = W @ P + b (+ optional ReLU)."""
    def kernel(p_ref, w_ref, b_ref, o_ref):
        y = jnp.dot(w_ref[...], p_ref[...], preferred_element_type=jnp.float32)
        y = y + b_ref[...]
        if relu:
            y = jnp.maximum(y, 0.0)
        o_ref[...] = y.astype(o_ref.dtype)
    return kernel


# ------------------------------------------------------------------ conv block wrapper
def conv_block(x, w, b, gamma, beta, *, ksize, stride, upsample=1,
               norm=True, relu=True, residual=None, out_dtype=jnp.bfloat16):
    """ConvLayer / DeconvLayer: [nearest upsample] -> reflect-pad -> conv
    -> [InstanceNorm affine] (+ residual) (+ ReLU).  x is NCHW."""
    B, Cin, H, W = x.shape
    pad = ksize // 2
    ridx = _reflect_index(H, pad, upsample)
    cidx = _reflect_index(W, pad, upsample)
    # One gather implements upsample + reflection pad (no jnp.repeat / jnp.pad round trips).
    xp = x.astype(jnp.bfloat16)[:, :, ridx[:, None], cidx[None, :]]
    patches, Ho, Wo = _im2col_nchw(xp, ksize, stride)            # (B, K, M) bf16
    K = patches.shape[1]
    M = Ho * Wo
    Cout = w.shape[0]
    w2 = w.reshape(Cout, K).astype(jnp.bfloat16)                 # (Cout, K)
    tm = _choose_tm(M)
    grid = (B, M // tm)

    if not norm:
        out = pl.pallas_call(
            _make_matmul_bias_kernel(relu),
            grid=grid,
            in_specs=[
                pl.BlockSpec((None, K, tm), lambda i, j: (i, 0, j)),
                pl.BlockSpec((Cout, K), lambda i, j: (0, 0)),
                pl.BlockSpec((Cout, 1), lambda i, j: (0, 0)),
            ],
            out_specs=pl.BlockSpec((None, Cout, tm), lambda i, j: (i, 0, j)),
            out_shape=jax.ShapeDtypeStruct((B, Cout, M), out_dtype),
            compiler_params=pltpu.CompilerParams(
                dimension_semantics=("parallel", "parallel"),
                vmem_limit_bytes=_VMEM_LIMIT),
        )(patches, w2, b.reshape(Cout, 1).astype(jnp.float32))
        return out.reshape(B, Cout, Ho, Wo)

    # ---- pass 1: tiled matmul + per-channel sum / sumsq (bias skipped: IN cancels it)
    y_pre, ssum, ssq = pl.pallas_call(
        _matmul_stats_kernel,
        grid=grid,
        in_specs=[
            pl.BlockSpec((None, K, tm), lambda i, j: (i, 0, j)),
            pl.BlockSpec((Cout, K), lambda i, j: (0, 0)),
        ],
        out_specs=[
            pl.BlockSpec((None, Cout, tm), lambda i, j: (i, 0, j)),
            pl.BlockSpec((None, Cout, 1), lambda i, j: (i, 0, 0)),
            pl.BlockSpec((None, Cout, 1), lambda i, j: (i, 0, 0)),
        ],
        out_shape=[
            jax.ShapeDtypeStruct((B, Cout, M), jnp.float32),
            jax.ShapeDtypeStruct((B, Cout, 1), jnp.float32),
            jax.ShapeDtypeStruct((B, Cout, 1), jnp.float32),
        ],
        compiler_params=pltpu.CompilerParams(
            dimension_semantics=("parallel", "arbitrary"),
            vmem_limit_bytes=_VMEM_LIMIT),
    )(patches, w2)

    # Tiny per-(image, channel) scale/shift: var = E[y^2] - mean^2 (biased, eps=1e-5).
    mean = ssum[..., 0] / M                                     # (B, Cout)
    var = jnp.maximum(ssq[..., 0] / M - mean * mean, 0.0)
    inv = jax.lax.rsqrt(var + _EPS)
    scale = (gamma[None, :] * inv)[..., None]                   # (B, Cout, 1)
    shift = (beta[None, :] - mean * gamma[None, :] * inv)[..., None]

    # ---- pass 2: apply IN affine (+ residual) (+ ReLU), tile by tile
    operands = [y_pre, scale, shift]
    in_specs = [
        pl.BlockSpec((None, Cout, tm), lambda i, j: (i, 0, j)),
        pl.BlockSpec((None, Cout, 1), lambda i, j: (i, 0, 0)),
        pl.BlockSpec((None, Cout, 1), lambda i, j: (i, 0, 0)),
    ]
    if residual is not None:
        operands.append(residual.reshape(B, Cout, M))
        in_specs.append(pl.BlockSpec((None, Cout, tm), lambda i, j: (i, 0, j)))

    out = pl.pallas_call(
        _make_affine_kernel(relu, residual is not None),
        grid=grid,
        in_specs=in_specs,
        out_specs=pl.BlockSpec((None, Cout, tm), lambda i, j: (i, 0, j)),
        out_shape=jax.ShapeDtypeStruct((B, Cout, M), out_dtype),
        compiler_params=pltpu.CompilerParams(
            dimension_semantics=("parallel", "parallel"),
            vmem_limit_bytes=_VMEM_LIMIT),
    )(*operands)
    return out.reshape(B, Cout, Ho, Wo)


# ------------------------------------------------------------------ parameters
def _conv_params(key, cin, cout, k):
    kw, _ = jax.random.split(key)
    fan_in = cin * k * k
    return dict(
        w=jax.random.normal(kw, (cout, k, k, cin), jnp.float32) / np.sqrt(fan_in),
        b=jnp.zeros((cout,), jnp.float32),
        gamma=jnp.ones((cout,), jnp.float32),    # InstanceNorm affine weight
        beta=jnp.zeros((cout,), jnp.float32),    # InstanceNorm affine bias
    )


def init_stylenet_params(key, t=1.0, n=5):
    c1 = int(np.floor(t * 32))
    c2 = int(np.floor(t * 64))
    c3 = int(np.floor(t * 128))
    keys = jax.random.split(key, 6 + 2 * n)
    p = {
        'c1': _conv_params(keys[0], 3, c1, 9),
        'c2': _conv_params(keys[1], c1, c2, 3),
        'c3': _conv_params(keys[2], c2, c3, 3),
        'd1': _conv_params(keys[3], c3, c2, 3),
        'd2': _conv_params(keys[4], c2, c1, 3),
        'out': _conv_params(keys[5], c1, 3, 9),
    }
    for i in range(n):
        p[f'res{i}a'] = _conv_params(keys[6 + 2 * i], c3, c3, 3)
        p[f'res{i}b'] = _conv_params(keys[7 + 2 * i], c3, c3, 3)
    return p


# ------------------------------------------------------------------ forward
@functools.partial(jax.jit, static_argnums=(2,))
def stylenet_forward(params, x_nchw, n=5):
    x = x_nchw.astype(jnp.float32)                               # NCHW throughout

    # Encoder: ConvLayer + ReLU x3
    x = conv_block(x, **params['c1'], ksize=9, stride=1)
    x = conv_block(x, **params['c2'], ksize=3, stride=2)
    x = conv_block(x, **params['c3'], ksize=3, stride=2)

    # n residual layers (no ReLU after the residual add, Johnson-style)
    for i in range(n):
        r = x
        h = conv_block(x, **params[f'res{i}a'], ksize=3, stride=1)
        x = conv_block(h, **params[f'res{i}b'], ksize=3, stride=1,
                       relu=False, residual=r)

    # Decoder: DeconvLayer + ReLU x2 (upsample folded into the pad gather)
    x = conv_block(x, **params['d1'], ksize=3, stride=1, upsample=2)
    x = conv_block(x, **params['d2'], ksize=3, stride=1, upsample=2)

    # Output conv, norm='None', no activation, f32 result
    x = conv_block(x, **params['out'], ksize=9, stride=1,
                   norm=False, relu=False, out_dtype=jnp.float32)
    return x


if __name__ == "__main__":
    key = jax.random.PRNGKey(0)
    pkey, xkey = jax.random.split(key)
    params = init_stylenet_params(pkey, t=1.0, n=5)
    x = jax.random.normal(xkey, (2, 3, 16, 16), jnp.float32)     # NCHW input image
    y = stylenet_forward(params, x, 5)
    jax.block_until_ready(y)
    assert y.shape == (2, 3, 16, 16), y.shape
    assert bool(jnp.all(jnp.isfinite(y)))
    print("KERNEL_OK")
</pallas_src>

<mosaic_0001>
module attributes {stable_mosaic.version = 11 : i64} {
  func.func @_matmul_stats_kernel(%arg0: i32, %arg1: i32, %arg2: memref<1x243x256xbf16, #tpu.memory_space<vmem>>, %arg3: memref<32x243xbf16, #tpu.memory_space<vmem>>, %arg4: memref<1x32x256xf32, #tpu.memory_space<vmem>>, %arg5: memref<1x32x1xf32, #tpu.memory_space<vmem>>, %arg6: memref<1x32x1xf32, #tpu.memory_space<vmem>>) attributes {dimension_semantics = [#tpu.dimension_semantics<parallel>, #tpu.dimension_semantics<arbitrary>], iteration_bounds = array<i64: 2, 1>, scalar_prefetch = 0 : i64, scratch_operands = 0 : i64, tpu.core_type = #tpu.core_type<tc>, window_params = [{transform_indices = @transform_0, window_bounds = array<i64: 1, 243, 256>}, {pipeline_mode = #tpu.pipeline_mode<synchronous>, transform_indices = @transform_1, window_bounds = array<i64: 32, 243>}, {transform_indices = @transform_2, window_bounds = array<i64: 1, 32, 256>}, {transform_indices = @transform_3, window_bounds = array<i64: 1, 32, 1>}, {transform_indices = @transform_4, window_bounds = array<i64: 1, 32, 1>}]} {
    %c0_i32 = arith.constant 0 : i32
    %0 = arith.cmpi eq, %arg1, %c0_i32 : i32
    %1 = arith.extui %0 : i1 to i32
    %c0_i32_0 = arith.constant 0 : i32
    %2 = arith.cmpi ne, %1, %c0_i32_0 : i32
    scf.if %2 {
      %cst_22 = arith.constant 0.000000e+00 : f32
      %27 = vector.broadcast %cst_22 : f32 to vector<32x1xf32>
      %c0_23 = arith.constant 0 : index
      %c0_24 = arith.constant 0 : index
      %c0_25 = arith.constant 0 : index
      %28 = vector.load %arg5[%c0_23, %c0_24, %c0_25] : memref<1x32x1xf32, #tpu.memory_space<vmem>>, vector<1x32x1xf32>
      %29 = vector.shape_cast %28 : vector<1x32x1xf32> to vector<32x1xf32>
      %30 = vector.shape_cast %27 : vector<32x1xf32> to vector<1x32x1xf32>
      tpu.vector_store %arg5[%c0_23, %c0_24, %c0_25], %30 {strides = array<i32>} : memref<1x32x1xf32, #tpu.memory_space<vmem>>, vector<1x32x1xf32>,
      %cst_26 = arith.constant 0.000000e+00 : f32
      %31 = vector.broadcast %cst_26 : f32 to vector<32x1xf32>
      %c0_27 = arith.constant 0 : index
      %c0_28 = arith.constant 0 : index
      %c0_29 = arith.constant 0 : index
      %32 = vector.load %arg6[%c0_27, %c0_28, %c0_29] : memref<1x32x1xf32, #tpu.memory_space<vmem>>, vector<1x32x1xf32>
      %33 = vector.shape_cast %32 : vector<1x32x1xf32> to vector<32x1xf32>
      %34 = vector.shape_cast %31 : vector<32x1xf32> to vector<1x32x1xf32>
      tpu.vector_store %arg6[%c0_27, %c0_28, %c0_29], %34 {strides = array<i32>} : memref<1x32x1xf32, #tpu.memory_space<vmem>>, vector<1x32x1xf32>,
    } else {
    }
    %c0 = arith.constant 0 : index
    %c0_1 = arith.constant 0 : index
    %3 = vector.load %arg3[%c0, %c0_1] : memref<32x243xbf16, #tpu.memory_space<vmem>>, vector<32x243xbf16>
    %c0_2 = arith.constant 0 : index
    %c0_3 = arith.constant 0 : index
    %c0_4 = arith.constant 0 : index
    %4 = vector.load %arg2[%c0_2, %c0_3, %c0_4] : memref<1x243x256xbf16, #tpu.memory_space<vmem>>, vector<1x243x256xbf16>
    %5 = vector.shape_cast %4 : vector<1x243x256xbf16> to vector<243x256xbf16>
    %cst = arith.constant dense<0.000000e+00> : vector<32x256xf32>
    %6 = tpu.matmul %3, %5, %cst {dimension_numbers = #tpu.dot_dimension_numbers<[1], [0], [0], [1], [0, 0, 1, 1], [], []>} : vector<32x243xbf16>, vector<243x256xbf16>, vector<32x256xf32> -> vector<32x256xf32>
    %c0_5 = arith.constant 0 : index
    %c0_6 = arith.constant 0 : index
    %c0_7 = arith.constant 0 : index
    %7 = vector.load %arg4[%c0_5, %c0_6, %c0_7] : memref<1x32x256xf32, #tpu.memory_space<vmem>>, vector<1x32x256xf32>
    %8 = vector.shape_cast %7 : vector<1x32x256xf32> to vector<32x256xf32>
    %9 = vector.shape_cast %6 : vector<32x256xf32> to vector<1x32x256xf32>
    tpu.vector_store %arg4[%c0_5, %c0_6, %c0_7], %9 {strides = array<i32>} : memref<1x32x256xf32, #tpu.memory_space<vmem>>, vector<1x32x256xf32>,
    %c0_8 = arith.constant 0 : index
    %c0_9 = arith.constant 0 : index
    %c0_10 = arith.constant 0 : index
    %10 = vector.load %arg5[%c0_8, %c0_9, %c0_10] : memref<1x32x1xf32, #tpu.memory_space<vmem>>, vector<1x32x1xf32>
    %11 = vector.shape_cast %10 : vector<1x32x1xf32> to vector<32x1xf32>
    %cst_11 = arith.constant dense<0.000000e+00> : vector<32xf32>
    %12 = vector.multi_reduction <add>, %6, %cst_11 [1] : vector<32x256xf32> to vector<32xf32>
    %13 = vector.shape_cast %12 : vector<32xf32> to vector<32x1xf32>
    %14 = arith.addf %11, %13 : vector<32x1xf32>
    %c0_12 = arith.constant 0 : index
    %c0_13 = arith.constant 0 : index
    %c0_14 = arith.constant 0 : index
    %15 = vector.load %arg5[%c0_12, %c0_13, %c0_14] : memref<1x32x1xf32, #tpu.memory_space<vmem>>, vector<1x32x1xf32>
    %16 = vector.shape_cast %15 : vector<1x32x1xf32> to vector<32x1xf32>
    %17 = vector.shape_cast %14 : vector<32x1xf32> to vector<1x32x1xf32>
    tpu.vector_store %arg5[%c0_12, %c0_13, %c0_14], %17 {strides = array<i32>} : memref<1x32x1xf32, #tpu.memory_space<vmem>>, vector<1x32x1xf32>,
    %c0_15 = arith.constant 0 : index
    %c0_16 = arith.constant 0 : index
    %c0_17 = arith.constant 0 : index
    %18 = vector.load %arg6[%c0_15, %c0_16, %c0_17] : memref<1x32x1xf32, #tpu.memory_space<vmem>>, vector<1x32x1xf32>
    %19 = vector.shape_cast %18 : vector<1x32x1xf32> to vector<32x1xf32>
    %20 = arith.mulf %6, %6 : vector<32x256xf32>
    %cst_18 = arith.constant dense<0.000000e+00> : vector<32xf32>
    %21 = vector.multi_reduction <add>, %20, %cst_18 [1] : vector<32x256xf32> to vector<32xf32>
    %22 = vector.shape_cast %21 : vector<32xf32> to vector<32x1xf32>
    %23 = arith.addf %19, %22 : vector<32x1xf32>
    %c0_19 = arith.constant 0 : index
    %c0_20 = arith.constant 0 : index
    %c0_21 = arith.constant 0 : index
    %24 = vector.load %arg6[%c0_19, %c0_20, %c0_21] : memref<1x32x1xf32, #tpu.memory_space<vmem>>, vector<1x32x1xf32>
    %25 = vector.shape_cast %24 : vector<1x32x1xf32> to vector<32x1xf32>
    %26 = vector.shape_cast %23 : vector<32x1xf32> to vector<1x32x1xf32>
    tpu.vector_store %arg6[%c0_19, %c0_20, %c0_21], %26 {strides = array<i32>} : memref<1x32x1xf32, #tpu.memory_space<vmem>>, vector<1x32x1xf32>,
    return
  }
  func.func @transform_0(%arg0: i32, %arg1: i32) -> (i32, i32, i32) {
    %c0_i32 = arith.constant 0 : i32
    %c0_i32_0 = arith.constant 0 : i32
    return %arg0, %c0_i32, %arg1 : i32, i32, i32
  }
  func.func @transform_1(%arg0: i32, %arg1: i32) -> (i32, i32) {
    %c0_i32 = arith.constant 0 : i32
    %c0_i32_0 = arith.constant 0 : i32
    %c0_i32_1 = arith.constant 0 : i32
    return %c0_i32, %c0_i32_0 : i32, i32
  }
  func.func @transform_2(%arg0: i32, %arg1: i32) -> (i32, i32, i32) {
    %c0_i32 = arith.constant 0 : i32
    %c0_i32_0 = arith.constant 0 : i32
    return %arg0, %c0_i32, %arg1 : i32, i32, i32
  }
  func.func @transform_3(%arg0: i32, %arg1: i32) -> (i32, i32, i32) {
    %c0_i32 = arith.constant 0 : i32
    %c0_i32_0 = arith.constant 0 : i32
    %c0_i32_1 = arith.constant 0 : i32
    return %arg0, %c0_i32, %c0_i32_0 : i32, i32, i32
  }
  func.func @transform_4(%arg0: i32, %arg1: i32) -> (i32, i32, i32) {
    %c0_i32 = arith.constant 0 : i32
    %c0_i32_0 = arith.constant 0 : i32
    %c0_i32_1 = arith.constant 0 : i32
    return %arg0, %c0_i32, %c0_i32_0 : i32, i32, i32
  }
}

module attributes {stable_mosaic.version = 11 : i64} {
  func.func @kernel(%arg0: i32, %arg1: i32, %arg2: memref<1x32x256xf32, #tpu.memory_space<vmem>>, %arg3: memref<1x32x1xf32, #tpu.memory_space<vmem>>, %arg4: memref<1x32x1xf32, #tpu.memory_space<vmem>>, %arg5: memref<1x32x256xbf16, #tpu.memory_space<vmem>>) attributes {dimension_semantics = [#tpu.dimension_semantics<parallel>, #tpu.dimension_semantics<parallel>], iteration_bounds = array<i64: 2, 1>, scalar_prefetch = 0 : i64, scratch_operands = 0 : i64, tpu.core_type = #tpu.core_type<tc>, window_params = [{transform_indices = @transform_0, window_bounds = array<i64: 1, 32, 256>}, {transform_indices = @transform_1, window_bounds = array<i64: 1, 32, 1>}, {transform_indices = @transform_2, window_bounds = array<i64: 1, 32, 1>}, {transform_indices = @transform_3, window_bounds = array<i64: 1, 32, 256>}]} {
    %c0 = arith.constant 0 : index
    %c0_0 = arith.constant 0 : index
    %c0_1 = arith.constant 0 : index
    %0 = vector.load %arg2[%c0, %c0_0, %c0_1] : memref<1x32x256xf32, #tpu.memory_space<vmem>>, vector<1x32x256xf32>
    %1 = vector.shape_cast %0 : vector<1x32x256xf32> to vector<32x256xf32>
    %c0_2 = arith.constant 0 : index
    %c0_3 = arith.constant 0 : index
    %c0_4 = arith.constant 0 : index
    %2 = vector.load %arg3[%c0_2, %c0_3, %c0_4] : memref<1x32x1xf32, #tpu.memory_space<vmem>>, vector<1x32x1xf32>
    %3 = vector.shape_cast %2 : vector<1x32x1xf32> to vector<32x1xf32>
    %4 = vector.broadcast %3 : vector<32x1xf32> to vector<32x256xf32>
    %5 = arith.mulf %1, %4 : vector<32x256xf32>
    %c0_5 = arith.constant 0 : index
    %c0_6 = arith.constant 0 : index
    %c0_7 = arith.constant 0 : index
    %6 = vector.load %arg4[%c0_5, %c0_6, %c0_7] : memref<1x32x1xf32, #tpu.memory_space<vmem>>, vector<1x32x1xf32>
    %7 = vector.shape_cast %6 : vector<1x32x1xf32> to vector<32x1xf32>
    %8 = vector.broadcast %7 : vector<32x1xf32> to vector<32x256xf32>
    %9 = arith.addf %5, %8 : vector<32x256xf32>
    %cst = arith.constant 0.000000e+00 : f32
    %10 = vector.broadcast %cst : f32 to vector<32x256xf32>
    %11 = arith.maximumf %9, %10 : vector<32x256xf32>
    %12 = arith.truncf %11 : vector<32x256xf32> to vector<32x256xbf16>
    %c0_8 = arith.constant 0 : index
    %c0_9 = arith.constant 0 : index
    %c0_10 = arith.constant 0 : index
    %13 = vector.load %arg5[%c0_8, %c0_9, %c0_10] : memref<1x32x256xbf16, #tpu.memory_space<vmem>>, vector<1x32x256xbf16>
    %14 = vector.shape_cast %13 : vector<1x32x256xbf16> to vector<32x256xbf16>
    %15 = vector.shape_cast %12 : vector<32x256xbf16> to vector<1x32x256xbf16>
    tpu.vector_store %arg5[%c0_8, %c0_9, %c0_10], %15 {strides = array<i32>} : memref<1x32x256xbf16, #tpu.memory_space<vmem>>, vector<1x32x256xbf16>,
    return
  }
  func.func @transform_0(%arg0: i32, %arg1: i32) -> (i32, i32, i32) {
    %c0_i32 = arith.constant 0 : i32
    %c0_i32_0 = arith.constant 0 : i32
    return %arg0, %c0_i32, %arg1 : i32, i32, i32
  }
  func.func @transform_1(%arg0: i32, %arg1: i32) -> (i32, i32, i32) {
    %c0_i32 = arith.constant 0 : i32
    %c0_i32_0 = arith.constant 0 : i32
    %c0_i32_1 = arith.constant 0 : i32
    return %arg0, %c0_i32, %c0_i32_0 : i32, i32, i32
  }
  func.func @transform_2(%arg0: i32, %arg1: i32) -> (i32, i32, i32) {
    %c0_i32 = arith.constant 0 : i32
    %c0_i32_0 = arith.constant 0 : i32
    %c0_i32_1 = arith.constant 0 : i32
    return %arg0, %c0_i32, %c0_i32_0 : i32, i32, i32
  }
  func.func @transform_3(%arg0: i32, %arg1: i32) -> (i32, i32, i32) {
    %c0_i32 = arith.constant 0 : i32
    %c0_i32_0 = arith.constant 0 : i32
    return %arg0, %c0_i32, %arg1 : i32, i32, i32
  }
}

module attributes {stable_mosaic.version = 11 : i64} {
  func.func @_matmul_stats_kernel(%arg0: i32, %arg1: i32, %arg2: memref<1x288x64xbf16, #tpu.memory_space<vmem>>, %arg3: memref<64x288xbf16, #tpu.memory_space<vmem>>, %arg4: memref<1x64x64xf32, #tpu.memory_space<vmem>>, %arg5: memref<1x64x1xf32, #tpu.memory_space<vmem>>, %arg6: memref<1x64x1xf32, #tpu.memory_space<vmem>>) attributes {dimension_semantics = [#tpu.dimension_semantics<parallel>, #tpu.dimension_semantics<arbitrary>], iteration_bounds = array<i64: 2, 1>, scalar_prefetch = 0 : i64, scratch_operands = 0 : i64, tpu.core_type = #tpu.core_type<tc>, window_params = [{transform_indices = @transform_0, window_bounds = array<i64: 1, 288, 64>}, {pipeline_mode = #tpu.pipeline_mode<synchronous>, transform_indices = @transform_1, window_bounds = array<i64: 64, 288>}, {transform_indices = @transform_2, window_bounds = array<i64: 1, 64, 64>}, {transform_indices = @transform_3, window_bounds = array<i64: 1, 64, 1>}, {transform_indices = @transform_4, window_bounds = array<i64: 1, 64, 1>}]} {
    %c0_i32 = arith.constant 0 : i32
    %0 = arith.cmpi eq, %arg1, %c0_i32 : i32
    %1 = arith.extui %0 : i1 to i32
    %c0_i32_0 = arith.constant 0 : i32
    %2 = arith.cmpi ne, %1, %c0_i32_0 : i32
    scf.if %2 {
      %cst_22 = arith.constant 0.000000e+00 : f32
      %27 = vector.broadcast %cst_22 : f32 to vector<64x1xf32>
      %c0_23 = arith.constant 0 : index
      %c0_24 = arith.constant 0 : index
      %c0_25 = arith.constant 0 : index
      %28 = vector.load %arg5[%c0_23, %c0_24, %c0_25] : memref<1x64x1xf32, #tpu.memory_space<vmem>>, vector<1x64x1xf32>
      %29 = vector.shape_cast %28 : vector<1x64x1xf32> to vector<64x1xf32>
      %30 = vector.shape_cast %27 : vector<64x1xf32> to vector<1x64x1xf32>
      tpu.vector_store %arg5[%c0_23, %c0_24, %c0_25], %30 {strides = array<i32>} : memref<1x64x1xf32, #tpu.memory_space<vmem>>, vector<1x64x1xf32>,
      %cst_26 = arith.constant 0.000000e+00 : f32
      %31 = vector.broadcast %cst_26 : f32 to vector<64x1xf32>
      %c0_27 = arith.constant 0 : index
      %c0_28 = arith.constant 0 : index
      %c0_29 = arith.constant 0 : index
      %32 = vector.load %arg6[%c0_27, %c0_28, %c0_29] : memref<1x64x1xf32, #tpu.memory_space<vmem>>, vector<1x64x1xf32>
      %33 = vector.shape_cast %32 : vector<1x64x1xf32> to vector<64x1xf32>
      %34 = vector.shape_cast %31 : vector<64x1xf32> to vector<1x64x1xf32>
      tpu.vector_store %arg6[%c0_27, %c0_28, %c0_29], %34 {strides = array<i32>} : memref<1x64x1xf32, #tpu.memory_space<vmem>>, vector<1x64x1xf32>,
    } else {
    }
    %c0 = arith.constant 0 : index
    %c0_1 = arith.constant 0 : index
    %3 = vector.load %arg3[%c0, %c0_1] : memref<64x288xbf16, #tpu.memory_space<vmem>>, vector<64x288xbf16>
    %c0_2 = arith.constant 0 : index
    %c0_3 = arith.constant 0 : index
    %c0_4 = arith.constant 0 : index
    %4 = vector.load %arg2[%c0_2, %c0_3, %c0_4] : memref<1x288x64xbf16, #tpu.memory_space<vmem>>, vector<1x288x64xbf16>
    %5 = vector.shape_cast %4 : vector<1x288x64xbf16> to vector<288x64xbf16>
    %cst = arith.constant dense<0.000000e+00> : vector<64x64xf32>
    %6 = tpu.matmul %3, %5, %cst {dimension_numbers = #tpu.dot_dimension_numbers<[1], [0], [0], [1], [0, 0, 1, 1], [], []>} : vector<64x288xbf16>, vector<288x64xbf16>, vector<64x64xf32> -> vector<64x64xf32>
    %c0_5 = arith.constant 0 : index
    %c0_6 = arith.constant 0 : index
    %c0_7 = arith.constant 0 : index
    %7 = vector.load %arg4[%c0_5, %c0_6, %c0_7] : memref<1x64x64xf32, #tpu.memory_space<vmem>>, vector<1x64x64xf32>
    %8 = vector.shape_cast %7 : vector<1x64x64xf32> to vector<64x64xf32>
    %9 = vector.shape_cast %6 : vector<64x64xf32> to vector<1x64x64xf32>
    tpu.vector_store %arg4[%c0_5, %c0_6, %c0_7], %9 {strides = array<i32>} : memref<1x64x64xf32, #tpu.memory_space<vmem>>, vector<1x64x64xf32>,
    %c0_8 = arith.constant 0 : index
    %c0_9 = arith.constant 0 : index
    %c0_10 = arith.constant 0 : index
    %10 = vector.load %arg5[%c0_8, %c0_9, %c0_10] : memref<1x64x1xf32, #tpu.memory_space<vmem>>, vector<1x64x1xf32>
    %11 = vector.shape_cast %10 : vector<1x64x1xf32> to vector<64x1xf32>
    %cst_11 = arith.constant dense<0.000000e+00> : vector<64xf32>
    %12 = vector.multi_reduction <add>, %6, %cst_11 [1] : vector<64x64xf32> to vector<64xf32>
    %13 = vector.shape_cast %12 : vector<64xf32> to vector<64x1xf32>
    %14 = arith.addf %11, %13 : vector<64x1xf32>
    %c0_12 = arith.constant 0 : index
    %c0_13 = arith.constant 0 : index
    %c0_14 = arith.constant 0 : index
    %15 = vector.load %arg5[%c0_12, %c0_13, %c0_14] : memref<1x64x1xf32, #tpu.memory_space<vmem>>, vector<1x64x1xf32>
    %16 = vector.shape_cast %15 : vector<1x64x1xf32> to vector<64x1xf32>
    %17 = vector.shape_cast %14 : vector<64x1xf32> to vector<1x64x1xf32>
    tpu.vector_store %arg5[%c0_12, %c0_13, %c0_14], %17 {strides = array<i32>} : memref<1x64x1xf32, #tpu.memory_space<vmem>>, vector<1x64x1xf32>,
    %c0_15 = arith.constant 0 : index
    %c0_16 = arith.constant 0 : index
    %c0_17 = arith.constant 0 : index
    %18 = vector.load %arg6[%c0_15, %c0_16, %c0_17] : memref<1x64x1xf32, #tpu.memory_space<vmem>>, vector<1x64x1xf32>
    %19 = vector.shape_cast %18 : vector<1x64x1xf32> to vector<64x1xf32>
    %20 = arith.mulf %6, %6 : vector<64x64xf32>
    %cst_18 = arith.constant dense<0.000000e+00> : vector<64xf32>
    %21 = vector.multi_reduction <add>, %20, %cst_18 [1] : vector<64x64xf32> to vector<64xf32>
    %22 = vector.shape_cast %21 : vector<64xf32> to vector<64x1xf32>
    %23 = arith.addf %19, %22 : vector<64x1xf32>
    %c0_19 = arith.constant 0 : index
    %c0_20 = arith.constant 0 : index
    %c0_21 = arith.constant 0 : index
    %24 = vector.load %arg6[%c0_19, %c0_20, %c0_21] : memref<1x64x1xf32, #tpu.memory_space<vmem>>, vector<1x64x1xf32>
    %25 = vector.shape_cast %24 : vector<1x64x1xf32> to vector<64x1xf32>
    %26 = vector.shape_cast %23 : vector<64x1xf32> to vector<1x64x1xf32>
    tpu.vector_store %arg6[%c0_19, %c0_20, %c0_21], %26 {strides = array<i32>} : memref<1x64x1xf32, #tpu.memory_space<vmem>>, vector<1x64x1xf32>,
    return
  }
  func.func @transform_0(%arg0: i32, %arg1: i32) -> (i32, i32, i32) {
    %c0_i32 = arith.constant 0 : i32
    %c0_i32_0 = arith.constant 0 : i32
    return %arg0, %c0_i32, %arg1 : i32, i32, i32
  }
  func.func @transform_1(%arg0: i32, %arg1: i32) -> (i32, i32) {
    %c0_i32 = arith.constant 0 : i32
    %c0_i32_0 = arith.constant 0 : i32
    %c0_i32_1 = arith.constant 0 : i32
    return %c0_i32, %c0_i32_0 : i32, i32
  }
  func.func @transform_2(%arg0: i32, %arg1: i32) -> (i32, i32, i32) {
    %c0_i32 = arith.constant 0 : i32
    %c0_i32_0 = arith.constant 0 : i32
    return %arg0, %c0_i32, %arg1 : i32, i32, i32
  }
  func.func @transform_3(%arg0: i32, %arg1: i32) -> (i32, i32, i32) {
    %c0_i32 = arith.constant 0 : i32
    %c0_i32_0 = arith.constant 0 : i32
    %c0_i32_1 = arith.constant 0 : i32
    return %arg0, %c0_i32, %c0_i32_0 : i32, i32, i32
  }
  func.func @transform_4(%arg0: i32, %arg1: i32) -> (i32, i32, i32) {
    %c0_i32 = arith.constant 0 : i32
    %c0_i32_0 = arith.constant 0 : i32
    %c0_i32_1 = arith.constant 0 : i32
    return %arg0, %c0_i32, %c0_i32_0 : i32, i32, i32
  }
}

module attributes {stable_mosaic.version = 11 : i64} {
  func.func @kernel(%arg0: i32, %arg1: i32, %arg2: memref<1x64x64xf32, #tpu.memory_space<vmem>>, %arg3: memref<1x64x1xf32, #tpu.memory_space<vmem>>, %arg4: memref<1x64x1xf32, #tpu.memory_space<vmem>>, %arg5: memref<1x64x64xbf16, #tpu.memory_space<vmem>>) attributes {dimension_semantics = [#tpu.dimension_semantics<parallel>, #tpu.dimension_semantics<parallel>], iteration_bounds = array<i64: 2, 1>, scalar_prefetch = 0 : i64, scratch_operands = 0 : i64, tpu.core_type = #tpu.core_type<tc>, window_params = [{transform_indices = @transform_0, window_bounds = array<i64: 1, 64, 64>}, {transform_indices = @transform_1, window_bounds = array<i64: 1, 64, 1>}, {transform_indices = @transform_2, window_bounds = array<i64: 1, 64, 1>}, {transform_indices = @transform_3, window_bounds = array<i64: 1, 64, 64>}]} {
    %c0 = arith.constant 0 : index
    %c0_0 = arith.constant 0 : index
    %c0_1 = arith.constant 0 : index
    %0 = vector.load %arg2[%c0, %c0_0, %c0_1] : memref<1x64x64xf32, #tpu.memory_space<vmem>>, vector<1x64x64xf32>
    %1 = vector.shape_cast %0 : vector<1x64x64xf32> to vector<64x64xf32>
    %c0_2 = arith.constant 0 : index
    %c0_3 = arith.constant 0 : index
    %c0_4 = arith.constant 0 : index
    %2 = vector.load %arg3[%c0_2, %c0_3, %c0_4] : memref<1x64x1xf32, #tpu.memory_space<vmem>>, vector<1x64x1xf32>
    %3 = vector.shape_cast %2 : vector<1x64x1xf32> to vector<64x1xf32>
    %4 = vector.broadcast %3 : vector<64x1xf32> to vector<64x64xf32>
    %5 = arith.mulf %1, %4 : vector<64x64xf32>
    %c0_5 = arith.constant 0 : index
    %c0_6 = arith.constant 0 : index
    %c0_7 = arith.constant 0 : index
    %6 = vector.load %arg4[%c0_5, %c0_6, %c0_7] : memref<1x64x1xf32, #tpu.memory_space<vmem>>, vector<1x64x1xf32>
    %7 = vector.shape_cast %6 : vector<1x64x1xf32> to vector<64x1xf32>
    %8 = vector.broadcast %7 : vector<64x1xf32> to vector<64x64xf32>
    %9 = arith.addf %5, %8 : vector<64x64xf32>
    %cst = arith.constant 0.000000e+00 : f32
    %10 = vector.broadcast %cst : f32 to vector<64x64xf32>
    %11 = arith.maximumf %9, %10 : vector<64x64xf32>
    %12 = arith.truncf %11 : vector<64x64xf32> to vector<64x64xbf16>
    %c0_8 = arith.constant 0 : index
    %c0_9 = arith.constant 0 : index
    %c0_10 = arith.constant 0 : index
    %13 = vector.load %arg5[%c0_8, %c0_9, %c0_10] : memref<1x64x64xbf16, #tpu.memory_space<vmem>>, vector<1x64x64xbf16>
    %14 = vector.shape_cast %13 : vector<1x64x64xbf16> to vector<64x64xbf16>
    %15 = vector.shape_cast %12 : vector<64x64xbf16> to vector<1x64x64xbf16>
    tpu.vector_store %arg5[%c0_8, %c0_9, %c0_10], %15 {strides = array<i32>} : memref<1x64x64xbf16, #tpu.memory_space<vmem>>, vector<1x64x64xbf16>,
    return
  }
  func.func @transform_0(%arg0: i32, %arg1: i32) -> (i32, i32, i32) {
    %c0_i32 = arith.constant 0 : i32
    %c0_i32_0 = arith.constant 0 : i32
    return %arg0, %c0_i32, %arg1 : i32, i32, i32
  }
  func.func @transform_1(%arg0: i32, %arg1: i32) -> (i32, i32, i32) {
    %c0_i32 = arith.constant 0 : i32
    %c0_i32_0 = arith.constant 0 : i32
    %c0_i32_1 = arith.constant 0 : i32
    return %arg0, %c0_i32, %c0_i32_0 : i32, i32, i32
  }
  func.func @transform_2(%arg0: i32, %arg1: i32) -> (i32, i32, i32) {
    %c0_i32 = arith.constant 0 : i32
    %c0_i32_0 = arith.constant 0 : i32
    %c0_i32_1 = arith.constant 0 : i32
    return %arg0, %c0_i32, %c0_i32_0 : i32, i32, i32
  }
  func.func @transform_3(%arg0: i32, %arg1: i32) -> (i32, i32, i32) {
    %c0_i32 = arith.constant 0 : i32
    %c0_i32_0 = arith.constant 0 : i32
    return %arg0, %c0_i32, %arg1 : i32, i32, i32
  }
}

module attributes {stable_mosaic.version = 11 : i64} {
  func.func @_matmul_stats_kernel(%arg0: i32, %arg1: i32, %arg2: memref<1x576x16xbf16, #tpu.memory_space<vmem>>, %arg3: memref<128x576xbf16, #tpu.memory_space<vmem>>, %arg4: memref<1x128x16xf32, #tpu.memory_space<vmem>>, %arg5: memref<1x128x1xf32, #tpu.memory_space<vmem>>, %arg6: memref<1x128x1xf32, #tpu.memory_space<vmem>>) attributes {dimension_semantics = [#tpu.dimension_semantics<parallel>, #tpu.dimension_semantics<arbitrary>], iteration_bounds = array<i64: 2, 1>, scalar_prefetch = 0 : i64, scratch_operands = 0 : i64, tpu.core_type = #tpu.core_type<tc>, window_params = [{transform_indices = @transform_0, window_bounds = array<i64: 1, 576, 16>}, {pipeline_mode = #tpu.pipeline_mode<synchronous>, transform_indices = @transform_1, window_bounds = array<i64: 128, 576>}, {transform_indices = @transform_2, window_bounds = array<i64: 1, 128, 16>}, {transform_indices = @transform_3, window_bounds = array<i64: 1, 128, 1>}, {transform_indices = @transform_4, window_bounds = array<i64: 1, 128, 1>}]} {
    %c0_i32 = arith.constant 0 : i32
    %0 = arith.cmpi eq, %arg1, %c0_i32 : i32
    %1 = arith.extui %0 : i1 to i32
    %c0_i32_0 = arith.constant 0 : i32
    %2 = arith.cmpi ne, %1, %c0_i32_0 : i32
    scf.if %2 {
      %cst_22 = arith.constant 0.000000e+00 : f32
      %27 = vector.broadcast %cst_22 : f32 to vector<128x1xf32>
      %c0_23 = arith.constant 0 : index
      %c0_24 = arith.constant 0 : index
      %c0_25 = arith.constant 0 : index
      %28 = vector.load %arg5[%c0_23, %c0_24, %c0_25] : memref<1x128x1xf32, #tpu.memory_space<vmem>>, vector<1x128x1xf32>
      %29 = vector.shape_cast %28 : vector<1x128x1xf32> to vector<128x1xf32>
      %30 = vector.shape_cast %27 : vector<128x1xf32> to vector<1x128x1xf32>
      tpu.vector_store %arg5[%c0_23, %c0_24, %c0_25], %30 {strides = array<i32>} : memref<1x128x1xf32, #tpu.memory_space<vmem>>, vector<1x128x1xf32>,
      %cst_26 = arith.constant 0.000000e+00 : f32
      %31 = vector.broadcast %cst_26 : f32 to vector<128x1xf32>
      %c0_27 = arith.constant 0 : index
      %c0_28 = arith.constant 0 : index
      %c0_29 = arith.constant 0 : index
      %32 = vector.load %arg6[%c0_27, %c0_28, %c0_29] : memref<1x128x1xf32, #tpu.memory_space<vmem>>, vector<1x128x1xf32>
      %33 = vector.shape_cast %32 : vector<1x128x1xf32> to vector<128x1xf32>
      %34 = vector.shape_cast %31 : vector<128x1xf32> to vector<1x128x1xf32>
      tpu.vector_store %arg6[%c0_27, %c0_28, %c0_29], %34 {strides = array<i32>} : memref<1x128x1xf32, #tpu.memory_space<vmem>>, vector<1x128x1xf32>,
    } else {
    }
    %c0 = arith.constant 0 : index
    %c0_1 = arith.constant 0 : index
    %3 = vector.load %arg3[%c0, %c0_1] : memref<128x576xbf16, #tpu.memory_space<vmem>>, vector<128x576xbf16>
    %c0_2 = arith.constant 0 : index
    %c0_3 = arith.constant 0 : index
    %c0_4 = arith.constant 0 : index
    %4 = vector.load %arg2[%c0_2, %c0_3, %c0_4] : memref<1x576x16xbf16, #tpu.memory_space<vmem>>, vector<1x576x16xbf16>
    %5 = vector.shape_cast %4 : vector<1x576x16xbf16> to vector<576x16xbf16>
    %cst = arith.constant dense<0.000000e+00> : vector<128x16xf32>
    %6 = tpu.matmul %3, %5, %cst {dimension_numbers = #tpu.dot_dimension_numbers<[1], [0], [0], [1], [0, 0, 1, 1], [], []>} : vector<128x576xbf16>, vector<576x16xbf16>, vector<128x16xf32> -> vector<128x16xf32>
    %c0_5 = arith.constant 0 : index
    %c0_6 = arith.constant 0 : index
    %c0_7 = arith.constant 0 : index
    %7 = vector.load %arg4[%c0_5, %c0_6, %c0_7] : memref<1x128x16xf32, #tpu.memory_space<vmem>>, vector<1x128x16xf32>
    %8 = vector.shape_cast %7 : vector<1x128x16xf32> to vector<128x16xf32>
    %9 = vector.shape_cast %6 : vector<128x16xf32> to vector<1x128x16xf32>
    tpu.vector_store %arg4[%c0_5, %c0_6, %c0_7], %9 {strides = array<i32>} : memref<1x128x16xf32, #tpu.memory_space<vmem>>, vector<1x128x16xf32>,
    %c0_8 = arith.constant 0 : index
    %c0_9 = arith.constant 0 : index
    %c0_10 = arith.constant 0 : index
    %10 = vector.load %arg5[%c0_8, %c0_9, %c0_10] : memref<1x128x1xf32, #tpu.memory_space<vmem>>, vector<1x128x1xf32>
    %11 = vector.shape_cast %10 : vector<1x128x1xf32> to vector<128x1xf32>
    %cst_11 = arith.constant dense<0.000000e+00> : vector<128xf32>
    %12 = vector.multi_reduction <add>, %6, %cst_11 [1] : vector<128x16xf32> to vector<128xf32>
    %13 = vector.shape_cast %12 : vector<128xf32> to vector<128x1xf32>
    %14 = arith.addf %11, %13 : vector<128x1xf32>
    %c0_12 = arith.constant 0 : index
    %c0_13 = arith.constant 0 : index
    %c0_14 = arith.constant 0 : index
    %15 = vector.load %arg5[%c0_12, %c0_13, %c0_14] : memref<1x128x1xf32, #tpu.memory_space<vmem>>, vector<1x128x1xf32>
    %16 = vector.shape_cast %15 : vector<1x128x1xf32> to vector<128x1xf32>
    %17 = vector.shape_cast %14 : vector<128x1xf32> to vector<1x128x1xf32>
    tpu.vector_store %arg5[%c0_12, %c0_13, %c0_14], %17 {strides = array<i32>} : memref<1x128x1xf32, #tpu.memory_space<vmem>>, vector<1x128x1xf32>,
    %c0_15 = arith.constant 0 : index
    %c0_16 = arith.constant 0 : index
    %c0_17 = arith.constant 0 : index
    %18 = vector.load %arg6[%c0_15, %c0_16, %c0_17] : memref<1x128x1xf32, #tpu.memory_space<vmem>>, vector<1x128x1xf32>
    %19 = vector.shape_cast %18 : vector<1x128x1xf32> to vector<128x1xf32>
    %20 = arith.mulf %6, %6 : vector<128x16xf32>
    %cst_18 = arith.constant dense<0.000000e+00> : vector<128xf32>
    %21 = vector.multi_reduction <add>, %20, %cst_18 [1] : vector<128x16xf32> to vector<128xf32>
    %22 = vector.shape_cast %21 : vector<128xf32> to vector<128x1xf32>
    %23 = arith.addf %19, %22 : vector<128x1xf32>
    %c0_19 = arith.constant 0 : index
    %c0_20 = arith.constant 0 : index
    %c0_21 = arith.constant 0 : index
    %24 = vector.load %arg6[%c0_19, %c0_20, %c0_21] : memref<1x128x1xf32, #tpu.memory_space<vmem>>, vector<1x128x1xf32>
    %25 = vector.shape_cast %24 : vector<1x128x1xf32> to vector<128x1xf32>
    %26 = vector.shape_cast %23 : vector<128x1xf32> to vector<1x128x1xf32>
    tpu.vector_store %arg6[%c0_19, %c0_20, %c0_21], %26 {strides = array<i32>} : memref<1x128x1xf32, #tpu.memory_space<vmem>>, vector<1x128x1xf32>,
    return
  }
  func.func @transform_0(%arg0: i32, %arg1: i32) -> (i32, i32, i32) {
    %c0_i32 = arith.constant 0 : i32
    %c0_i32_0 = arith.constant 0 : i32
    return %arg0, %c0_i32, %arg1 : i32, i32, i32
  }
  func.func @transform_1(%arg0: i32, %arg1: i32) -> (i32, i32) {
    %c0_i32 = arith.constant 0 : i32
    %c0_i32_0 = arith.constant 0 : i32
    %c0_i32_1 = arith.constant 0 : i32
    return %c0_i32, %c0_i32_0 : i32, i32
  }
  func.func @transform_2(%arg0: i32, %arg1: i32) -> (i32, i32, i32) {
    %c0_i32 = arith.constant 0 : i32
    %c0_i32_0 = arith.constant 0 : i32
    return %arg0, %c0_i32, %arg1 : i32, i32, i32
  }
  func.func @transform_3(%arg0: i32, %arg1: i32) -> (i32, i32, i32) {
    %c0_i32 = arith.constant 0 : i32
    %c0_i32_0 = arith.constant 0 : i32
    %c0_i32_1 = arith.constant 0 : i32
    return %arg0, %c0_i32, %c0_i32_0 : i32, i32, i32
  }
  func.func @transform_4(%arg0: i32, %arg1: i32) -> (i32, i32, i32) {
    %c0_i32 = arith.constant 0 : i32
    %c0_i32_0 = arith.constant 0 : i32
    %c0_i32_1 = arith.constant 0 : i32
    return %arg0, %c0_i32, %c0_i32_0 : i32, i32, i32
  }
}

module attributes {stable_mosaic.version = 11 : i64} {
  func.func @kernel(%arg0: i32, %arg1: i32, %arg2: memref<1x128x16xf32, #tpu.memory_space<vmem>>, %arg3: memref<1x128x1xf32, #tpu.memory_space<vmem>>, %arg4: memref<1x128x1xf32, #tpu.memory_space<vmem>>, %arg5: memref<1x128x16xbf16, #tpu.memory_space<vmem>>) attributes {dimension_semantics = [#tpu.dimension_semantics<parallel>, #tpu.dimension_semantics<parallel>], iteration_bounds = array<i64: 2, 1>, scalar_prefetch = 0 : i64, scratch_operands = 0 : i64, tpu.core_type = #tpu.core_type<tc>, window_params = [{transform_indices = @transform_0, window_bounds = array<i64: 1, 128, 16>}, {transform_indices = @transform_1, window_bounds = array<i64: 1, 128, 1>}, {transform_indices = @transform_2, window_bounds = array<i64: 1, 128, 1>}, {transform_indices = @transform_3, window_bounds = array<i64: 1, 128, 16>}]} {
    %c0 = arith.constant 0 : index
    %c0_0 = arith.constant 0 : index
    %c0_1 = arith.constant 0 : index
    %0 = vector.load %arg2[%c0, %c0_0, %c0_1] : memref<1x128x16xf32, #tpu.memory_space<vmem>>, vector<1x128x16xf32>
    %1 = vector.shape_cast %0 : vector<1x128x16xf32> to vector<128x16xf32>
    %c0_2 = arith.constant 0 : index
    %c0_3 = arith.constant 0 : index
    %c0_4 = arith.constant 0 : index
    %2 = vector.load %arg3[%c0_2, %c0_3, %c0_4] : memref<1x128x1xf32, #tpu.memory_space<vmem>>, vector<1x128x1xf32>
    %3 = vector.shape_cast %2 : vector<1x128x1xf32> to vector<128x1xf32>
    %4 = vector.broadcast %3 : vector<128x1xf32> to vector<128x16xf32>
    %5 = arith.mulf %1, %4 : vector<128x16xf32>
    %c0_5 = arith.constant 0 : index
    %c0_6 = arith.constant 0 : index
    %c0_7 = arith.constant 0 : index
    %6 = vector.load %arg4[%c0_5, %c0_6, %c0_7] : memref<1x128x1xf32, #tpu.memory_space<vmem>>, vector<1x128x1xf32>
    %7 = vector.shape_cast %6 : vector<1x128x1xf32> to vector<128x1xf32>
    %8 = vector.broadcast %7 : vector<128x1xf32> to vector<128x16xf32>
    %9 = arith.addf %5, %8 : vector<128x16xf32>
    %cst = arith.constant 0.000000e+00 : f32
    %10 = vector.broadcast %cst : f32 to vector<128x16xf32>
    %11 = arith.maximumf %9, %10 : vector<128x16xf32>
    %12 = arith.truncf %11 : vector<128x16xf32> to vector<128x16xbf16>
    %c0_8 = arith.constant 0 : index
    %c0_9 = arith.constant 0 : index
    %c0_10 = arith.constant 0 : index
    %13 = vector.load %arg5[%c0_8, %c0_9, %c0_10] : memref<1x128x16xbf16, #tpu.memory_space<vmem>>, vector<1x128x16xbf16>
    %14 = vector.shape_cast %13 : vector<1x128x16xbf16> to vector<128x16xbf16>
    %15 = vector.shape_cast %12 : vector<128x16xbf16> to vector<1x128x16xbf16>
    tpu.vector_store %arg5[%c0_8, %c0_9, %c0_10], %15 {strides = array<i32>} : memref<1x128x16xbf16, #tpu.memory_space<vmem>>, vector<1x128x16xbf16>,
    return
  }
  func.func @transform_0(%arg0: i32, %arg1: i32) -> (i32, i32, i32) {
    %c0_i32 = arith.constant 0 : i32
    %c0_i32_0 = arith.constant 0 : i32
    return %arg0, %c0_i32, %arg1 : i32, i32, i32
  }
  func.func @transform_1(%arg0: i32, %arg1: i32) -> (i32, i32, i32) {
    %c0_i32 = arith.constant 0 : i32
    %c0_i32_0 = arith.constant 0 : i32
    %c0_i32_1 = arith.constant 0 : i32
    return %arg0, %c0_i32, %c0_i32_0 : i32, i32, i32
  }
  func.func @transform_2(%arg0: i32, %arg1: i32) -> (i32, i32, i32) {
    %c0_i32 = arith.constant 0 : i32
    %c0_i32_0 = arith.constant 0 : i32
    %c0_i32_1 = arith.constant 0 : i32
    return %arg0, %c0_i32, %c0_i32_0 : i32, i32, i32
  }
  func.func @transform_3(%arg0: i32, %arg1: i32) -> (i32, i32, i32) {
    %c0_i32 = arith.constant 0 : i32
    %c0_i32_0 = arith.constant 0 : i32
    return %arg0, %c0_i32, %arg1 : i32, i32, i32
  }
}

module attributes {stable_mosaic.version = 11 : i64} {
  func.func @_matmul_stats_kernel(%arg0: i32, %arg1: i32, %arg2: memref<1x1152x16xbf16, #tpu.memory_space<vmem>>, %arg3: memref<128x1152xbf16, #tpu.memory_space<vmem>>, %arg4: memref<1x128x16xf32, #tpu.memory_space<vmem>>, %arg5: memref<1x128x1xf32, #tpu.memory_space<vmem>>, %arg6: memref<1x128x1xf32, #tpu.memory_space<vmem>>) attributes {dimension_semantics = [#tpu.dimension_semantics<parallel>, #tpu.dimension_semantics<arbitrary>], iteration_bounds = array<i64: 2, 1>, scalar_prefetch = 0 : i64, scratch_operands = 0 : i64, tpu.core_type = #tpu.core_type<tc>, window_params = [{transform_indices = @transform_0, window_bounds = array<i64: 1, 1152, 16>}, {pipeline_mode = #tpu.pipeline_mode<synchronous>, transform_indices = @transform_1, window_bounds = array<i64: 128, 1152>}, {transform_indices = @transform_2, window_bounds = array<i64: 1, 128, 16>}, {transform_indices = @transform_3, window_bounds = array<i64: 1, 128, 1>}, {transform_indices = @transform_4, window_bounds = array<i64: 1, 128, 1>}]} {
    %c0_i32 = arith.constant 0 : i32
    %0 = arith.cmpi eq, %arg1, %c0_i32 : i32
    %1 = arith.extui %0 : i1 to i32
    %c0_i32_0 = arith.constant 0 : i32
    %2 = arith.cmpi ne, %1, %c0_i32_0 : i32
    scf.if %2 {
      %cst_22 = arith.constant 0.000000e+00 : f32
      %27 = vector.broadcast %cst_22 : f32 to vector<128x1xf32>
      %c0_23 = arith.constant 0 : index
      %c0_24 = arith.constant 0 : index
      %c0_25 = arith.constant 0 : index
      %28 = vector.load %arg5[%c0_23, %c0_24, %c0_25] : memref<1x128x1xf32, #tpu.memory_space<vmem>>, vector<1x128x1xf32>
      %29 = vector.shape_cast %28 : vector<1x128x1xf32> to vector<128x1xf32>
      %30 = vector.shape_cast %27 : vector<128x1xf32> to vector<1x128x1xf32>
      tpu.vector_store %arg5[%c0_23, %c0_24, %c0_25], %30 {strides = array<i32>} : memref<1x128x1xf32, #tpu.memory_space<vmem>>, vector<1x128x1xf32>,
      %cst_26 = arith.constant 0.000000e+00 : f32
      %31 = vector.broadcast %cst_26 : f32 to vector<128x1xf32>
      %c0_27 = arith.constant 0 : index
      %c0_28 = arith.constant 0 : index
      %c0_29 = arith.constant 0 : index
      %32 = vector.load %arg6[%c0_27, %c0_28, %c0_29] : memref<1x128x1xf32, #tpu.memory_space<vmem>>, vector<1x128x1xf32>
      %33 = vector.shape_cast %32 : vector<1x128x1xf32> to vector<128x1xf32>
      %34 = vector.shape_cast %31 : vector<128x1xf32> to vector<1x128x1xf32>
      tpu.vector_store %arg6[%c0_27, %c0_28, %c0_29], %34 {strides = array<i32>} : memref<1x128x1xf32, #tpu.memory_space<vmem>>, vector<1x128x1xf32>,
    } else {
    }
    %c0 = arith.constant 0 : index
    %c0_1 = arith.constant 0 : index
    %3 = vector.load %arg3[%c0, %c0_1] : memref<128x1152xbf16, #tpu.memory_space<vmem>>, vector<128x1152xbf16>
    %c0_2 = arith.constant 0 : index
    %c0_3 = arith.constant 0 : index
    %c0_4 = arith.constant 0 : index
    %4 = vector.load %arg2[%c0_2, %c0_3, %c0_4] : memref<1x1152x16xbf16, #tpu.memory_space<vmem>>, vector<1x1152x16xbf16>
    %5 = vector.shape_cast %4 : vector<1x1152x16xbf16> to vector<1152x16xbf16>
    %cst = arith.constant dense<0.000000e+00> : vector<128x16xf32>
    %6 = tpu.matmul %3, %5, %cst {dimension_numbers = #tpu.dot_dimension_numbers<[1], [0], [0], [1], [0, 0, 1, 1], [], []>} : vector<128x1152xbf16>, vector<1152x16xbf16>, vector<128x16xf32> -> vector<128x16xf32>
    %c0_5 = arith.constant 0 : index
    %c0_6 = arith.constant 0 : index
    %c0_7 = arith.constant 0 : index
    %7 = vector.load %arg4[%c0_5, %c0_6, %c0_7] : memref<1x128x16xf32, #tpu.memory_space<vmem>>, vector<1x128x16xf32>
    %8 = vector.shape_cast %7 : vector<1x128x16xf32> to vector<128x16xf32>
    %9 = vector.shape_cast %6 : vector<128x16xf32> to vector<1x128x16xf32>
    tpu.vector_store %arg4[%c0_5, %c0_6, %c0_7], %9 {strides = array<i32>} : memref<1x128x16xf32, #tpu.memory_space<vmem>>, vector<1x128x16xf32>,
    %c0_8 = arith.constant 0 : index
    %c0_9 = arith.constant 0 : index
    %c0_10 = arith.constant 0 : index
    %10 = vector.load %arg5[%c0_8, %c0_9, %c0_10] : memref<1x128x1xf32, #tpu.memory_space<vmem>>, vector<1x128x1xf32>
    %11 = vector.shape_cast %10 : vector<1x128x1xf32> to vector<128x1xf32>
    %cst_11 = arith.constant dense<0.000000e+00> : vector<128xf32>
    %12 = vector.multi_reduction <add>, %6, %cst_11 [1] : vector<128x16xf32> to vector<128xf32>
    %13 = vector.shape_cast %12 : vector<128xf32> to vector<128x1xf32>
    %14 = arith.addf %11, %13 : vector<128x1xf32>
    %c0_12 = arith.constant 0 : index
    %c0_13 = arith.constant 0 : index
    %c0_14 = arith.constant 0 : index
    %15 = vector.load %arg5[%c0_12, %c0_13, %c0_14] : memref<1x128x1xf32, #tpu.memory_space<vmem>>, vector<1x128x1xf32>
    %16 = vector.shape_cast %15 : vector<1x128x1xf32> to vector<128x1xf32>
    %17 = vector.shape_cast %14 : vector<128x1xf32> to vector<1x128x1xf32>
    tpu.vector_store %arg5[%c0_12, %c0_13, %c0_14], %17 {strides = array<i32>} : memref<1x128x1xf32, #tpu.memory_space<vmem>>, vector<1x128x1xf32>,
    %c0_15 = arith.constant 0 : index
    %c0_16 = arith.constant 0 : index
    %c0_17 = arith.constant 0 : index
    %18 = vector.load %arg6[%c0_15, %c0_16, %c0_17] : memref<1x128x1xf32, #tpu.memory_space<vmem>>, vector<1x128x1xf32>
    %19 = vector.shape_cast %18 : vector<1x128x1xf32> to vector<128x1xf32>
    %20 = arith.mulf %6, %6 : vector<128x16xf32>
    %cst_18 = arith.constant dense<0.000000e+00> : vector<128xf32>
    %21 = vector.multi_reduction <add>, %20, %cst_18 [1] : vector<128x16xf32> to vector<128xf32>
    %22 = vector.shape_cast %21 : vector<128xf32> to vector<128x1xf32>
    %23 = arith.addf %19, %22 : vector<128x1xf32>
    %c0_19 = arith.constant 0 : index
    %c0_20 = arith.constant 0 : index
    %c0_21 = arith.constant 0 : index
    %24 = vector.load %arg6[%c0_19, %c0_20, %c0_21] : memref<1x128x1xf32, #tpu.memory_space<vmem>>, vector<1x128x1xf32>
    %25 = vector.shape_cast %24 : vector<1x128x1xf32> to vector<128x1xf32>
    %26 = vector.shape_cast %23 : vector<128x1xf32> to vector<1x128x1xf32>
    tpu.vector_store %arg6[%c0_19, %c0_20, %c0_21], %26 {strides = array<i32>} : memref<1x128x1xf32, #tpu.memory_space<vmem>>, vector<1x128x1xf32>,
    return
  }
  func.func @transform_0(%arg0: i32, %arg1: i32) -> (i32, i32, i32) {
    %c0_i32 = arith.constant 0 : i32
    %c0_i32_0 = arith.constant 0 : i32
    return %arg0, %c0_i32, %arg1 : i32, i32, i32
  }
  func.func @transform_1(%arg0: i32, %arg1: i32) -> (i32, i32) {
    %c0_i32 = arith.constant 0 : i32
    %c0_i32_0 = arith.constant 0 : i32
    %c0_i32_1 = arith.constant 0 : i32
    return %c0_i32, %c0_i32_0 : i32, i32
  }
  func.func @transform_2(%arg0: i32, %arg1: i32) -> (i32, i32, i32) {
    %c0_i32 = arith.constant 0 : i32
    %c0_i32_0 = arith.constant 0 : i32
    return %arg0, %c0_i32, %arg1 : i32, i32, i32
  }
  func.func @transform_3(%arg0: i32, %arg1: i32) -> (i32, i32, i32) {
    %c0_i32 = arith.constant 0 : i32
    %c0_i32_0 = arith.constant 0 : i32
    %c0_i32_1 = arith.constant 0 : i32
    return %arg0, %c0_i32, %c0_i32_0 : i32, i32, i32
  }
  func.func @transform_4(%arg0: i32, %arg1: i32) -> (i32, i32, i32) {
    %c0_i32 = arith.constant 0 : i32
    %c0_i32_0 = arith.constant 0 : i32
    %c0_i32_1 = arith.constant 0 : i32
    return %arg0, %c0_i32, %c0_i32_0 : i32, i32, i32
  }
}

module attributes {stable_mosaic.version = 11 : i64} {
  func.func @kernel(%arg0: i32, %arg1: i32, %arg2: memref<1x128x16xf32, #tpu.memory_space<vmem>>, %arg3: memref<1x128x1xf32, #tpu.memory_space<vmem>>, %arg4: memref<1x128x1xf32, #tpu.memory_space<vmem>>, %arg5: memref<1x128x16xbf16, #tpu.memory_space<vmem>>, %arg6: memref<1x128x16xbf16, #tpu.memory_space<vmem>>) attributes {dimension_semantics = [#tpu.dimension_semantics<parallel>, #tpu.dimension_semantics<parallel>], iteration_bounds = array<i64: 2, 1>, scalar_prefetch = 0 : i64, scratch_operands = 0 : i64, tpu.core_type = #tpu.core_type<tc>, window_params = [{transform_indices = @transform_0, window_bounds = array<i64: 1, 128, 16>}, {transform_indices = @transform_1, window_bounds = array<i64: 1, 128, 1>}, {transform_indices = @transform_2, window_bounds = array<i64: 1, 128, 1>}, {transform_indices = @transform_3, window_bounds = array<i64: 1, 128, 16>}, {transform_indices = @transform_4, window_bounds = array<i64: 1, 128, 16>}]} {
    %c0 = arith.constant 0 : index
    %c0_0 = arith.constant 0 : index
    %c0_1 = arith.constant 0 : index
    %0 = vector.load %arg2[%c0, %c0_0, %c0_1] : memref<1x128x16xf32, #tpu.memory_space<vmem>>, vector<1x128x16xf32>
    %1 = vector.shape_cast %0 : vector<1x128x16xf32> to vector<128x16xf32>
    %c0_2 = arith.constant 0 : index
    %c0_3 = arith.constant 0 : index
    %c0_4 = arith.constant 0 : index
    %2 = vector.load %arg3[%c0_2, %c0_3, %c0_4] : memref<1x128x1xf32, #tpu.memory_space<vmem>>, vector<1x128x1xf32>
    %3 = vector.shape_cast %2 : vector<1x128x1xf32> to vector<128x1xf32>
    %4 = vector.broadcast %3 : vector<128x1xf32> to vector<128x16xf32>
    %5 = arith.mulf %1, %4 : vector<128x16xf32>
    %c0_5 = arith.constant 0 : index
    %c0_6 = arith.constant 0 : index
    %c0_7 = arith.constant 0 : index
    %6 = vector.load %arg4[%c0_5, %c0_6, %c0_7] : memref<1x128x1xf32, #tpu.memory_space<vmem>>, vector<1x128x1xf32>
    %7 = vector.shape_cast %6 : vector<1x128x1xf32> to vector<128x1xf32>
    %8 = vector.broadcast %7 : vector<128x1xf32> to vector<128x16xf32>
    %9 = arith.addf %5, %8 : vector<128x16xf32>
    %c0_8 = arith.constant 0 : index
    %c0_9 = arith.constant 0 : index
    %c0_10 = arith.constant 0 : index
    %10 = vector.load %arg5[%c0_8, %c0_9, %c0_10] : memref<1x128x16xbf16, #tpu.memory_space<vmem>>, vector<1x128x16xbf16>
    %11 = vector.shape_cast %10 : vector<1x128x16xbf16> to vector<128x16xbf16>
    %12 = arith.extf %11 : vector<128x16xbf16> to vector<128x16xf32>
    %13 = arith.addf %9, %12 : vector<128x16xf32>
    %14 = arith.truncf %13 : vector<128x16xf32> to vector<128x16xbf16>
    %c0_11 = arith.constant 0 : index
    %c0_12 = arith.constant 0 : index
    %c0_13 = arith.constant 0 : index
    %15 = vector.load %arg6[%c0_11, %c0_12, %c0_13] : memref<1x128x16xbf16, #tpu.memory_space<vmem>>, vector<1x128x16xbf16>
    %16 = vector.shape_cast %15 : vector<1x128x16xbf16> to vector<128x16xbf16>
    %17 = vector.shape_cast %14 : vector<128x16xbf16> to vector<1x128x16xbf16>
    tpu.vector_store %arg6[%c0_11, %c0_12, %c0_13], %17 {strides = array<i32>} : memref<1x128x16xbf16, #tpu.memory_space<vmem>>, vector<1x128x16xbf16>,
    return
  }
  func.func @transform_0(%arg0: i32, %arg1: i32) -> (i32, i32, i32) {
    %c0_i32 = arith.constant 0 : i32
    %c0_i32_0 = arith.constant 0 : i32
    return %arg0, %c0_i32, %arg1 : i32, i32, i32
  }
  func.func @transform_1(%arg0: i32, %arg1: i32) -> (i32, i32, i32) {
    %c0_i32 = arith.constant 0 : i32
    %c0_i32_0 = arith.constant 0 : i32
    %c0_i32_1 = arith.constant 0 : i32
    return %arg0, %c0_i32, %c0_i32_0 : i32, i32, i32
  }
  func.func @transform_2(%arg0: i32, %arg1: i32) -> (i32, i32, i32) {
    %c0_i32 = arith.constant 0 : i32
    %c0_i32_0 = arith.constant 0 : i32
    %c0_i32_1 = arith.constant 0 : i32
    return %arg0, %c0_i32, %c0_i32_0 : i32, i32, i32
  }
  func.func @transform_3(%arg0: i32, %arg1: i32) -> (i32, i32, i32) {
    %c0_i32 = arith.constant 0 : i32
    %c0_i32_0 = arith.constant 0 : i32
    return %arg0, %c0_i32, %arg1 : i32, i32, i32
  }
  func.func @transform_4(%arg0: i32, %arg1: i32) -> (i32, i32, i32) {
    %c0_i32 = arith.constant 0 : i32
    %c0_i32_0 = arith.constant 0 : i32
    return %arg0, %c0_i32, %arg1 : i32, i32, i32
  }
}

module attributes {stable_mosaic.version = 11 : i64} {
  func.func @_matmul_stats_kernel(%arg0: i32, %arg1: i32, %arg2: memref<1x1152x64xbf16, #tpu.memory_space<vmem>>, %arg3: memref<64x1152xbf16, #tpu.memory_space<vmem>>, %arg4: memref<1x64x64xf32, #tpu.memory_space<vmem>>, %arg5: memref<1x64x1xf32, #tpu.memory_space<vmem>>, %arg6: memref<1x64x1xf32, #tpu.memory_space<vmem>>) attributes {dimension_semantics = [#tpu.dimension_semantics<parallel>, #tpu.dimension_semantics<arbitrary>], iteration_bounds = array<i64: 2, 1>, scalar_prefetch = 0 : i64, scratch_operands = 0 : i64, tpu.core_type = #tpu.core_type<tc>, window_params = [{transform_indices = @transform_0, window_bounds = array<i64: 1, 1152, 64>}, {pipeline_mode = #tpu.pipeline_mode<synchronous>, transform_indices = @transform_1, window_bounds = array<i64: 64, 1152>}, {transform_indices = @transform_2, window_bounds = array<i64: 1, 64, 64>}, {transform_indices = @transform_3, window_bounds = array<i64: 1, 64, 1>}, {transform_indices = @transform_4, window_bounds = array<i64: 1, 64, 1>}]} {
    %c0_i32 = arith.constant 0 : i32
    %0 = arith.cmpi eq, %arg1, %c0_i32 : i32
    %1 = arith.extui %0 : i1 to i32
    %c0_i32_0 = arith.constant 0 : i32
    %2 = arith.cmpi ne, %1, %c0_i32_0 : i32
    scf.if %2 {
      %cst_22 = arith.constant 0.000000e+00 : f32
      %27 = vector.broadcast %cst_22 : f32 to vector<64x1xf32>
      %c0_23 = arith.constant 0 : index
      %c0_24 = arith.constant 0 : index
      %c0_25 = arith.constant 0 : index
      %28 = vector.load %arg5[%c0_23, %c0_24, %c0_25] : memref<1x64x1xf32, #tpu.memory_space<vmem>>, vector<1x64x1xf32>
      %29 = vector.shape_cast %28 : vector<1x64x1xf32> to vector<64x1xf32>
      %30 = vector.shape_cast %27 : vector<64x1xf32> to vector<1x64x1xf32>
      tpu.vector_store %arg5[%c0_23, %c0_24, %c0_25], %30 {strides = array<i32>} : memref<1x64x1xf32, #tpu.memory_space<vmem>>, vector<1x64x1xf32>,
      %cst_26 = arith.constant 0.000000e+00 : f32
      %31 = vector.broadcast %cst_26 : f32 to vector<64x1xf32>
      %c0_27 = arith.constant 0 : index
      %c0_28 = arith.constant 0 : index
      %c0_29 = arith.constant 0 : index
      %32 = vector.load %arg6[%c0_27, %c0_28, %c0_29] : memref<1x64x1xf32, #tpu.memory_space<vmem>>, vector<1x64x1xf32>
      %33 = vector.shape_cast %32 : vector<1x64x1xf32> to vector<64x1xf32>
      %34 = vector.shape_cast %31 : vector<64x1xf32> to vector<1x64x1xf32>
      tpu.vector_store %arg6[%c0_27, %c0_28, %c0_29], %34 {strides = array<i32>} : memref<1x64x1xf32, #tpu.memory_space<vmem>>, vector<1x64x1xf32>,
    } else {
    }
    %c0 = arith.constant 0 : index
    %c0_1 = arith.constant 0 : index
    %3 = vector.load %arg3[%c0, %c0_1] : memref<64x1152xbf16, #tpu.memory_space<vmem>>, vector<64x1152xbf16>
    %c0_2 = arith.constant 0 : index
    %c0_3 = arith.constant 0 : index
    %c0_4 = arith.constant 0 : index
    %4 = vector.load %arg2[%c0_2, %c0_3, %c0_4] : memref<1x1152x64xbf16, #tpu.memory_space<vmem>>, vector<1x1152x64xbf16>
    %5 = vector.shape_cast %4 : vector<1x1152x64xbf16> to vector<1152x64xbf16>
    %cst = arith.constant dense<0.000000e+00> : vector<64x64xf32>
    %6 = tpu.matmul %3, %5, %cst {dimension_numbers = #tpu.dot_dimension_numbers<[1], [0], [0], [1], [0, 0, 1, 1], [], []>} : vector<64x1152xbf16>, vector<1152x64xbf16>, vector<64x64xf32> -> vector<64x64xf32>
    %c0_5 = arith.constant 0 : index
    %c0_6 = arith.constant 0 : index
    %c0_7 = arith.constant 0 : index
    %7 = vector.load %arg4[%c0_5, %c0_6, %c0_7] : memref<1x64x64xf32, #tpu.memory_space<vmem>>, vector<1x64x64xf32>
    %8 = vector.shape_cast %7 : vector<1x64x64xf32> to vector<64x64xf32>
    %9 = vector.shape_cast %6 : vector<64x64xf32> to vector<1x64x64xf32>
    tpu.vector_store %arg4[%c0_5, %c0_6, %c0_7], %9 {strides = array<i32>} : memref<1x64x64xf32, #tpu.memory_space<vmem>>, vector<1x64x64xf32>,
    %c0_8 = arith.constant 0 : index
    %c0_9 = arith.constant 0 : index
    %c0_10 = arith.constant 0 : index
    %10 = vector.load %arg5[%c0_8, %c0_9, %c0_10] : memref<1x64x1xf32, #tpu.memory_space<vmem>>, vector<1x64x1xf32>
    %11 = vector.shape_cast %10 : vector<1x64x1xf32> to vector<64x1xf32>
    %cst_11 = arith.constant dense<0.000000e+00> : vector<64xf32>
    %12 = vector.multi_reduction <add>, %6, %cst_11 [1] : vector<64x64xf32> to vector<64xf32>
    %13 = vector.shape_cast %12 : vector<64xf32> to vector<64x1xf32>
    %14 = arith.addf %11, %13 : vector<64x1xf32>
    %c0_12 = arith.constant 0 : index
    %c0_13 = arith.constant 0 : index
    %c0_14 = arith.constant 0 : index
    %15 = vector.load %arg5[%c0_12, %c0_13, %c0_14] : memref<1x64x1xf32, #tpu.memory_space<vmem>>, vector<1x64x1xf32>
    %16 = vector.shape_cast %15 : vector<1x64x1xf32> to vector<64x1xf32>
    %17 = vector.shape_cast %14 : vector<64x1xf32> to vector<1x64x1xf32>
    tpu.vector_store %arg5[%c0_12, %c0_13, %c0_14], %17 {strides = array<i32>} : memref<1x64x1xf32, #tpu.memory_space<vmem>>, vector<1x64x1xf32>,
    %c0_15 = arith.constant 0 : index
    %c0_16 = arith.constant 0 : index
    %c0_17 = arith.constant 0 : index
    %18 = vector.load %arg6[%c0_15, %c0_16, %c0_17] : memref<1x64x1xf32, #tpu.memory_space<vmem>>, vector<1x64x1xf32>
    %19 = vector.shape_cast %18 : vector<1x64x1xf32> to vector<64x1xf32>
    %20 = arith.mulf %6, %6 : vector<64x64xf32>
    %cst_18 = arith.constant dense<0.000000e+00> : vector<64xf32>
    %21 = vector.multi_reduction <add>, %20, %cst_18 [1] : vector<64x64xf32> to vector<64xf32>
    %22 = vector.shape_cast %21 : vector<64xf32> to vector<64x1xf32>
    %23 = arith.addf %19, %22 : vector<64x1xf32>
    %c0_19 = arith.constant 0 : index
    %c0_20 = arith.constant 0 : index
    %c0_21 = arith.constant 0 : index
    %24 = vector.load %arg6[%c0_19, %c0_20, %c0_21] : memref<1x64x1xf32, #tpu.memory_space<vmem>>, vector<1x64x1xf32>
    %25 = vector.shape_cast %24 : vector<1x64x1xf32> to vector<64x1xf32>
    %26 = vector.shape_cast %23 : vector<64x1xf32> to vector<1x64x1xf32>
    tpu.vector_store %arg6[%c0_19, %c0_20, %c0_21], %26 {strides = array<i32>} : memref<1x64x1xf32, #tpu.memory_space<vmem>>, vector<1x64x1xf32>,
    return
  }
  func.func @transform_0(%arg0: i32, %arg1: i32) -> (i32, i32, i32) {
    %c0_i32 = arith.constant 0 : i32
    %c0_i32_0 = arith.constant 0 : i32
    return %arg0, %c0_i32, %arg1 : i32, i32, i32
  }
  func.func @transform_1(%arg0: i32, %arg1: i32) -> (i32, i32) {
    %c0_i32 = arith.constant 0 : i32
    %c0_i32_0 = arith.constant 0 : i32
    %c0_i32_1 = arith.constant 0 : i32
    return %c0_i32, %c0_i32_0 : i32, i32
  }
  func.func @transform_2(%arg0: i32, %arg1: i32) -> (i32, i32, i32) {
    %c0_i32 = arith.constant 0 : i32
    %c0_i32_0 = arith.constant 0 : i32
    return %arg0, %c0_i32, %arg1 : i32, i32, i32
  }
  func.func @transform_3(%arg0: i32, %arg1: i32) -> (i32, i32, i32) {
    %c0_i32 = arith.constant 0 : i32
    %c0_i32_0 = arith.constant 0 : i32
    %c0_i32_1 = arith.constant 0 : i32
    return %arg0, %c0_i32, %c0_i32_0 : i32, i32, i32
  }
  func.func @transform_4(%arg0: i32, %arg1: i32) -> (i32, i32, i32) {
    %c0_i32 = arith.constant 0 : i32
    %c0_i32_0 = arith.constant 0 : i32
    %c0_i32_1 = arith.constant 0 : i32
    return %arg0, %c0_i32, %c0_i32_0 : i32, i32, i32
  }
}

module attributes {stable_mosaic.version = 11 : i64} {
  func.func @_matmul_stats_kernel(%arg0: i32, %arg1: i32, %arg2: memref<1x576x256xbf16, #tpu.memory_space<vmem>>, %arg3: memref<32x576xbf16, #tpu.memory_space<vmem>>, %arg4: memref<1x32x256xf32, #tpu.memory_space<vmem>>, %arg5: memref<1x32x1xf32, #tpu.memory_space<vmem>>, %arg6: memref<1x32x1xf32, #tpu.memory_space<vmem>>) attributes {dimension_semantics = [#tpu.dimension_semantics<parallel>, #tpu.dimension_semantics<arbitrary>], iteration_bounds = array<i64: 2, 1>, scalar_prefetch = 0 : i64, scratch_operands = 0 : i64, tpu.core_type = #tpu.core_type<tc>, window_params = [{transform_indices = @transform_0, window_bounds = array<i64: 1, 576, 256>}, {pipeline_mode = #tpu.pipeline_mode<synchronous>, transform_indices = @transform_1, window_bounds = array<i64: 32, 576>}, {transform_indices = @transform_2, window_bounds = array<i64: 1, 32, 256>}, {transform_indices = @transform_3, window_bounds = array<i64: 1, 32, 1>}, {transform_indices = @transform_4, window_bounds = array<i64: 1, 32, 1>}]} {
    %c0_i32 = arith.constant 0 : i32
    %0 = arith.cmpi eq, %arg1, %c0_i32 : i32
    %1 = arith.extui %0 : i1 to i32
    %c0_i32_0 = arith.constant 0 : i32
    %2 = arith.cmpi ne, %1, %c0_i32_0 : i32
    scf.if %2 {
      %cst_22 = arith.constant 0.000000e+00 : f32
      %27 = vector.broadcast %cst_22 : f32 to vector<32x1xf32>
      %c0_23 = arith.constant 0 : index
      %c0_24 = arith.constant 0 : index
      %c0_25 = arith.constant 0 : index
      %28 = vector.load %arg5[%c0_23, %c0_24, %c0_25] : memref<1x32x1xf32, #tpu.memory_space<vmem>>, vector<1x32x1xf32>
      %29 = vector.shape_cast %28 : vector<1x32x1xf32> to vector<32x1xf32>
      %30 = vector.shape_cast %27 : vector<32x1xf32> to vector<1x32x1xf32>
      tpu.vector_store %arg5[%c0_23, %c0_24, %c0_25], %30 {strides = array<i32>} : memref<1x32x1xf32, #tpu.memory_space<vmem>>, vector<1x32x1xf32>,
      %cst_26 = arith.constant 0.000000e+00 : f32
      %31 = vector.broadcast %cst_26 : f32 to vector<32x1xf32>
      %c0_27 = arith.constant 0 : index
      %c0_28 = arith.constant 0 : index
      %c0_29 = arith.constant 0 : index
      %32 = vector.load %arg6[%c0_27, %c0_28, %c0_29] : memref<1x32x1xf32, #tpu.memory_space<vmem>>, vector<1x32x1xf32>
      %33 = vector.shape_cast %32 : vector<1x32x1xf32> to vector<32x1xf32>
      %34 = vector.shape_cast %31 : vector<32x1xf32> to vector<1x32x1xf32>
      tpu.vector_store %arg6[%c0_27, %c0_28, %c0_29], %34 {strides = array<i32>} : memref<1x32x1xf32, #tpu.memory_space<vmem>>, vector<1x32x1xf32>,
    } else {
    }
    %c0 = arith.constant 0 : index
    %c0_1 = arith.constant 0 : index
    %3 = vector.load %arg3[%c0, %c0_1] : memref<32x576xbf16, #tpu.memory_space<vmem>>, vector<32x576xbf16>
    %c0_2 = arith.constant 0 : index
    %c0_3 = arith.constant 0 : index
    %c0_4 = arith.constant 0 : index
    %4 = vector.load %arg2[%c0_2, %c0_3, %c0_4] : memref<1x576x256xbf16, #tpu.memory_space<vmem>>, vector<1x576x256xbf16>
    %5 = vector.shape_cast %4 : vector<1x576x256xbf16> to vector<576x256xbf16>
    %cst = arith.constant dense<0.000000e+00> : vector<32x256xf32>
    %6 = tpu.matmul %3, %5, %cst {dimension_numbers = #tpu.dot_dimension_numbers<[1], [0], [0], [1], [0, 0, 1, 1], [], []>} : vector<32x576xbf16>, vector<576x256xbf16>, vector<32x256xf32> -> vector<32x256xf32>
    %c0_5 = arith.constant 0 : index
    %c0_6 = arith.constant 0 : index
    %c0_7 = arith.constant 0 : index
    %7 = vector.load %arg4[%c0_5, %c0_6, %c0_7] : memref<1x32x256xf32, #tpu.memory_space<vmem>>, vector<1x32x256xf32>
    %8 = vector.shape_cast %7 : vector<1x32x256xf32> to vector<32x256xf32>
    %9 = vector.shape_cast %6 : vector<32x256xf32> to vector<1x32x256xf32>
    tpu.vector_store %arg4[%c0_5, %c0_6, %c0_7], %9 {strides = array<i32>} : memref<1x32x256xf32, #tpu.memory_space<vmem>>, vector<1x32x256xf32>,
    %c0_8 = arith.constant 0 : index
    %c0_9 = arith.constant 0 : index
    %c0_10 = arith.constant 0 : index
    %10 = vector.load %arg5[%c0_8, %c0_9, %c0_10] : memref<1x32x1xf32, #tpu.memory_space<vmem>>, vector<1x32x1xf32>
    %11 = vector.shape_cast %10 : vector<1x32x1xf32> to vector<32x1xf32>
    %cst_11 = arith.constant dense<0.000000e+00> : vector<32xf32>
    %12 = vector.multi_reduction <add>, %6, %cst_11 [1] : vector<32x256xf32> to vector<32xf32>
    %13 = vector.shape_cast %12 : vector<32xf32> to vector<32x1xf32>
    %14 = arith.addf %11, %13 : vector<32x1xf32>
    %c0_12 = arith.constant 0 : index
    %c0_13 = arith.constant 0 : index
    %c0_14 = arith.constant 0 : index
    %15 = vector.load %arg5[%c0_12, %c0_13, %c0_14] : memref<1x32x1xf32, #tpu.memory_space<vmem>>, vector<1x32x1xf32>
    %16 = vector.shape_cast %15 : vector<1x32x1xf32> to vector<32x1xf32>
    %17 = vector.shape_cast %14 : vector<32x1xf32> to vector<1x32x1xf32>
    tpu.vector_store %arg5[%c0_12, %c0_13, %c0_14], %17 {strides = array<i32>} : memref<1x32x1xf32, #tpu.memory_space<vmem>>, vector<1x32x1xf32>,
    %c0_15 = arith.constant 0 : index
    %c0_16 = arith.constant 0 : index
    %c0_17 = arith.constant 0 : index
    %18 = vector.load %arg6[%c0_15, %c0_16, %c0_17] : memref<1x32x1xf32, #tpu.memory_space<vmem>>, vector<1x32x1xf32>
    %19 = vector.shape_cast %18 : vector<1x32x1xf32> to vector<32x1xf32>
    %20 = arith.mulf %6, %6 : vector<32x256xf32>
    %cst_18 = arith.constant dense<0.000000e+00> : vector<32xf32>
    %21 = vector.multi_reduction <add>, %20, %cst_18 [1] : vector<32x256xf32> to vector<32xf32>
    %22 = vector.shape_cast %21 : vector<32xf32> to vector<32x1xf32>
    %23 = arith.addf %19, %22 : vector<32x1xf32>
    %c0_19 = arith.constant 0 : index
    %c0_20 = arith.constant 0 : index
    %c0_21 = arith.constant 0 : index
    %24 = vector.load %arg6[%c0_19, %c0_20, %c0_21] : memref<1x32x1xf32, #tpu.memory_space<vmem>>, vector<1x32x1xf32>
    %25 = vector.shape_cast %24 : vector<1x32x1xf32> to vector<32x1xf32>
    %26 = vector.shape_cast %23 : vector<32x1xf32> to vector<1x32x1xf32>
    tpu.vector_store %arg6[%c0_19, %c0_20, %c0_21], %26 {strides = array<i32>} : memref<1x32x1xf32, #tpu.memory_space<vmem>>, vector<1x32x1xf32>,
    return
  }
  func.func @transform_0(%arg0: i32, %arg1: i32) -> (i32, i32, i32) {
    %c0_i32 = arith.constant 0 : i32
    %c0_i32_0 = arith.constant 0 : i32
    return %arg0, %c0_i32, %arg1 : i32, i32, i32
  }
  func.func @transform_1(%arg0: i32, %arg1: i32) -> (i32, i32) {
    %c0_i32 = arith.constant 0 : i32
    %c0_i32_0 = arith.constant 0 : i32
    %c0_i32_1 = arith.constant 0 : i32
    return %c0_i32, %c0_i32_0 : i32, i32
  }
  func.func @transform_2(%arg0: i32, %arg1: i32) -> (i32, i32, i32) {
    %c0_i32 = arith.constant 0 : i32
    %c0_i32_0 = arith.constant 0 : i32
    return %arg0, %c0_i32, %arg1 : i32, i32, i32
  }
  func.func @transform_3(%arg0: i32, %arg1: i32) -> (i32, i32, i32) {
    %c0_i32 = arith.constant 0 : i32
    %c0_i32_0 = arith.constant 0 : i32
    %c0_i32_1 = arith.constant 0 : i32
    return %arg0, %c0_i32, %c0_i32_0 : i32, i32, i32
  }
  func.func @transform_4(%arg0: i32, %arg1: i32) -> (i32, i32, i32) {
    %c0_i32 = arith.constant 0 : i32
    %c0_i32_0 = arith.constant 0 : i32
    %c0_i32_1 = arith.constant 0 : i32
    return %arg0, %c0_i32, %c0_i32_0 : i32, i32, i32
  }
}

module attributes {stable_mosaic.version = 11 : i64} {
  func.func @kernel(%arg0: i32, %arg1: i32, %arg2: memref<1x2592x256xbf16, #tpu.memory_space<vmem>>, %arg3: memref<3x2592xbf16, #tpu.memory_space<vmem>>, %arg4: memref<3x1xf32, #tpu.memory_space<vmem>>, %arg5: memref<1x3x256xf32, #tpu.memory_space<vmem>>) attributes {dimension_semantics = [#tpu.dimension_semantics<parallel>, #tpu.dimension_semantics<parallel>], iteration_bounds = array<i64: 2, 1>, scalar_prefetch = 0 : i64, scratch_operands = 0 : i64, tpu.core_type = #tpu.core_type<tc>, window_params = [{transform_indices = @transform_0, window_bounds = array<i64: 1, 2592, 256>}, {pipeline_mode = #tpu.pipeline_mode<synchronous>, transform_indices = @transform_1, window_bounds = array<i64: 3, 2592>}, {pipeline_mode = #tpu.pipeline_mode<synchronous>, transform_indices = @transform_2, window_bounds = array<i64: 3, 1>}, {transform_indices = @transform_3, window_bounds = array<i64: 1, 3, 256>}]} {
    %c0 = arith.constant 0 : index
    %c0_0 = arith.constant 0 : index
    %0 = vector.load %arg3[%c0, %c0_0] : memref<3x2592xbf16, #tpu.memory_space<vmem>>, vector<3x2592xbf16>
    %c0_1 = arith.constant 0 : index
    %c0_2 = arith.constant 0 : index
    %c0_3 = arith.constant 0 : index
    %1 = vector.load %arg2[%c0_1, %c0_2, %c0_3] : memref<1x2592x256xbf16, #tpu.memory_space<vmem>>, vector<1x2592x256xbf16>
    %2 = vector.shape_cast %1 : vector<1x2592x256xbf16> to vector<2592x256xbf16>
    %cst = arith.constant dense<0.000000e+00> : vector<3x256xf32>
    %3 = tpu.matmul %0, %2, %cst {dimension_numbers = #tpu.dot_dimension_numbers<[1], [0], [0], [1], [0, 0, 1, 1], [], []>} : vector<3x2592xbf16>, vector<2592x256xbf16>, vector<3x256xf32> -> vector<3x256xf32>
    %c0_4 = arith.constant 0 : index
    %c0_5 = arith.constant 0 : index
    %4 = vector.load %arg4[%c0_4, %c0_5] : memref<3x1xf32, #tpu.memory_space<vmem>>, vector<3x1xf32>
    %5 = vector.broadcast %4 : vector<3x1xf32> to vector<3x256xf32>
    %6 = arith.addf %3, %5 : vector<3x256xf32>
    %c0_6 = arith.constant 0 : index
    %c0_7 = arith.constant 0 : index
    %c0_8 = arith.constant 0 : index
    %7 = vector.load %arg5[%c0_6, %c0_7, %c0_8] : memref<1x3x256xf32, #tpu.memory_space<vmem>>, vector<1x3x256xf32>
    %8 = vector.shape_cast %7 : vector<1x3x256xf32> to vector<3x256xf32>
    %9 = vector.shape_cast %6 : vector<3x256xf32> to vector<1x3x256xf32>
    tpu.vector_store %arg5[%c0_6, %c0_7, %c0_8], %9 {strides = array<i32>} : memref<1x3x256xf32, #tpu.memory_space<vmem>>, vector<1x3x256xf32>,
    return
  }
  func.func @transform_0(%arg0: i32, %arg1: i32) -> (i32, i32, i32) {
    %c0_i32 = arith.constant 0 : i32
    %c0_i32_0 = arith.constant 0 : i32
    return %arg0, %c0_i32, %arg1 : i32, i32, i32
  }
  func.func @transform_1(%arg0: i32, %arg1: i32) -> (i32, i32) {
    %c0_i32 = arith.constant 0 : i32
    %c0_i32_0 = arith.constant 0 : i32
    %c0_i32_1 = arith.constant 0 : i32
    return %c0_i32, %c0_i32_0 : i32, i32
  }
  func.func @transform_2(%arg0: i32, %arg1: i32) -> (i32, i32) {
    %c0_i32 = arith.constant 0 : i32
    %c0_i32_0 = arith.constant 0 : i32
    %c0_i32_1 = arith.constant 0 : i32
    return %c0_i32, %c0_i32_0 : i32, i32
  }
  func.func @transform_3(%arg0: i32, %arg1: i32) -> (i32, i32, i32) {
    %c0_i32 = arith.constant 0 : i32
    %c0_i32_0 = arith.constant 0 : i32
    return %arg0, %c0_i32, %arg1 : i32, i32, i32
  }
}

</mosaic_0001>

<bundles_post_ra>
// kernel: stylenet_forward.32
= control target key start
LH: loop header
LB: loop body
LE: loop exit
PB: predicated region body
PF: predicated region fallthrough
CT: control target
= control target key end

     0   :  { %s568_s12 = smov 0   ;;  %s570_s13 = smov 0   ;;  %s612_s0 = inlined_call_operand.vmem [shape: f32[2,32,256], index: 0, kind: input, shape index: {}]   ;;  %s613_s1 = inlined_call_operand.vmem [shape: f32[2,32,1], index: 1, kind: input, shape index: {}]   ;;  %s614_s2 = inlined_call_operand.vmem [shape: f32[2,32,1], index: 2, kind: input, shape index: {}]   ;;  %s615_s3 = inlined_call_operand.vmem [shape: bf16[2,32,256], index: 3, kind: output, shape index: {}]  }
   0x1   :  { %s572_s14 = smov 0  }
   0x2 LB: > { %s25_s15 = sadd.s32 1, %s541_s13  ;;  %p473_p0 = scmp.ge.s32.totalorder %s545_s14, 1  ;;  %s545_s14 = sphi %s572_s14, %s13_s14   ;;  %s541_s13 = sphi %s570_s13, %s617_s13   ;;  %s537_s12 = sphi %s568_s12, %s616_s12  }
   0x3   : > { %p27_p1 = scmp.ge.s32.totalorder %s25_s15, 2  ;;  %p178_p2 = scmp.lt.s32.totalorder %s545_s14, 3 }
   0x5   : > { %s619_s15 = smov (%p27_p1, %s25_s15), 0  ;;  %p179_p3 = pnand %p473_p0, %p178_p2 }
   0x6   : > { %p221_p4 = scmp.lt.s32.totalorder (!%p179_p3), %s537_s12, 1  ;;  %v547_v0 = vmov (!%p179_p3), 0  }
   0x7   : > { %182 = sbr.rel (%p179_p3) target bundleno = 166 (0xa6), region = 32  ;;  %522 = vset.pattern.permute.xlu1 (!%p179_p3), %v547_v0  ;;  %521 = vset.pattern.permute.xlu0 (!%p179_p3), %v547_v0 }
   0xe   : > { %s621_s12 = smov (!%p221_p4, %s537_s12), 1 }
   0xf   : > { %s586_s16 = sshll.u32 %s621_s12, 5  ;;  %s488_s23 = sshll.u32 %s621_s12, 6 }
  0x10   : > { %s234_s19 = scalar_lea.vmem %s613_s1, %s586_s16  ;;  %s239_s22 = scalar_lea.vmem %s614_s2, %s586_s16 }
  0x11   : > { %v260_v1 = vld [vmem:[%s234_s19 + $0x10] sm:$0xff]  ;;  %v258_v2 = vld [vmem:[%s234_s19] sm:$0xff]  ;;  %v261_v3 = vld [vmem:[%s234_s19 + $0x18] sm:$0xff]  ;;  %s228_s26 = scalar_lea.vmem %s612_s0, %s488_s23  ;;  %s248_s29 = scalar_lea.vmem %s615_s3, %s586_s16 }
  0x12   : > { %274 = vperm.xlu1 %522, %v260_v1   ;;  %264 = vperm.xlu0 %521, %v258_v2   ;;  %v259_v4 = vld [vmem:[%s234_s19 + $0x8] sm:$0xff]  ;;  %v290_v6 = vld [vmem:[%s239_s22] sm:$0xff]  ;;  %v293_v7 = vld [vmem:[%s239_s22 + $0x18] sm:$0xff] }
  0x13   : > { %v291_v5 = vld [vmem:[%s239_s22 + $0x8] sm:$0xff]  ;;  %v292_v8 = vld [vmem:[%s239_s22 + $0x10] sm:$0xff]  ;;  %v250_v11 = vld [vmem:[%s228_s26] sm:$0xff] }
  0x14   : > { %v251_v12 = vld [vmem:[%s228_s26 + $0x8] sm:$0xff]  ;;  %v252_v15 = vld [vmem:[%s228_s26 + $0x10] sm:$0xff]  ;;  %v253_v16 = vld [vmem:[%s228_s26 + $0x18] sm:$0xff] }
  0x15   : > { %v256_v19 = vld [vmem:[%s228_s26 + $0x30] sm:$0xff]  ;;  %v257_v20 = vld [vmem:[%s228_s26 + $0x38] sm:$0xff]  ;;  %v254_v25 = vld [vmem:[%s228_s26 + $0x20] sm:$0xff] }
  0x16   : > { %279 = vperm.xlu1 %522, %v261_v3   ;;  %269 = vperm.xlu0 %521, %v259_v4   ;;  %v255_v26 = vld [vmem:[%s228_s26 + $0x28] sm:$0xff] }
  0x1a   : > { %301 = vperm.xlu1 %522, %v291_v5   ;;  %296 = vperm.xlu0 %521, %v290_v6  }
  0x1e   : > { %311 = vperm.xlu1 %522, %v293_v7   ;;  %306 = vperm.xlu0 %521, %v292_v8  }
  0x91   : > { %v275_v9 = vpop.permute.xlu1 %274  ;;  %v265_v10 = vpop.permute.xlu0 %264 }
  0x92   : > { %v282_v17 = vmul.f32 %v265_v10, %v250_v11  ;;  %v283_v18 = vmul.f32 %v265_v10, %v251_v12  ;;  %v286_v37 = vmul.f32 %v275_v9, %v254_v25  ;;  %v287_v38 = vmul.f32 %v275_v9, %v255_v26 }
  0x95   : > { %v280_v13 = vpop.permute.xlu1 %279  ;;  %v270_v14 = vpop.permute.xlu0 %269 }
  0x96   : > { %v284_v21 = vmul.f32 %v270_v14, %v252_v15  ;;  %v285_v22 = vmul.f32 %v270_v14, %v253_v16  ;;  %v288_v31 = vmul.f32 %v280_v13, %v256_v19  ;;  %v289_v32 = vmul.f32 %v280_v13, %v257_v20 }
  0x99   : > { %v302_v23 = vpop.permute.xlu1 %301  ;;  %v297_v24 = vpop.permute.xlu0 %296 }
  0x9a   : > { %v316_v27 = vadd.f32 %v302_v23, %v284_v21  ;;  %v317_v28 = vadd.f32 %v302_v23, %v285_v22  ;;  %v314_v29 = vadd.f32 %v297_v24, %v282_v17  ;;  %v315_v30 = vadd.f32 %v297_v24, %v283_v18 }
  0x9c   : > { %v324_v33 = vmax.f32 %v316_v27, 0.0  ;;  %v325_v34 = vmax.f32 %v317_v28, 0.0  ;;  %v322_v35 = vmax.f32 %v314_v29, 0.0  ;;  %v323_v36 = vmax.f32 %v315_v30, 0.0 }
  0x9d   : > { %v312_v39 = vpop.permute.xlu1 %311  ;;  %v307_v40 = vpop.permute.xlu0 %306 }
  0x9e   : > { %v493_v41 = vpack.c.bf16 %v325_v34, %v324_v33  ;;  %v492_v42 = vpack.c.bf16 %v323_v36, %v322_v35  ;;  %v320_v43 = vadd.f32 %v312_v39, %v288_v31  ;;  %v321_v44 = vadd.f32 %v312_v39, %v289_v32 }
  0x9f   : > { %v318_v45 = vadd.f32 %v307_v40, %v286_v37  ;;  %v319_v46 = vadd.f32 %v307_v40, %v287_v38 }
  0xa0   : > { %355 = vst [vmem:[%s248_s29 + $0x8] sm:$0xff] %v493_v41  ;;  %354 = vst [vmem:[%s248_s29] sm:$0xff] %v492_v42  ;;  %v328_v47 = vmax.f32 %v320_v43, 0.0  ;;  %v329_v48 = vmax.f32 %v321_v44, 0.0 }
  0xa1   : > { %v326_v49 = vmax.f32 %v318_v45, 0.0  ;;  %v327_v50 = vmax.f32 %v319_v46, 0.0 }
  0xa2   : > { %v495_v51 = vpack.c.bf16 %v329_v48, %v328_v47 }
  0xa3   : > { %v494_v52 = vpack.c.bf16 %v327_v50, %v326_v49 }
  0xa4   : > { %357 = vst [vmem:[%s248_s29 + $0x18] sm:$0xff] %v495_v51 }
  0xa5   : > { %356 = vst [vmem:[%s248_s29 + $0x10] sm:$0xff] %v494_v52 }
  0xa6 PF: > { %s13_s14 = sadd.s32 1, %s545_s14   ;;  %s616_s12 = smov %s541_s13 }
  0xa7   : > { %p10_p5 = scmp.ge.s32.totalorder %s13_s14, 4   ;;  %s617_s13 = smov %s619_s15 }
  0xa9   :  { %12 = sbr.rel (!%p10_p5) target bundleno = 2 (0x2), region = 68 }

// kernel: stylenet_forward.31
= control target key start
LH: loop header
LB: loop body
LE: loop exit
PB: predicated region body
PF: predicated region fallthrough
CT: control target
= control target key end

     0   :  { %s989_s15 = smov 0   ;;  %s991_s16 = smov 0   ;;  %s1126_s0 = inlined_call_operand.vmem [shape: bf16[2,243,256], index: 0, kind: input, shape index: {}]   ;;  %s1127_s1 = inlined_call_operand.vmem [shape: bf16[32,243], index: 1, kind: input, shape index: {}]   ;;  %s1128_s2 = inlined_call_operand.vmem [shape: f32[2,32,256], index: 2, kind: output, shape index: {0}]   ;;  %s1129_s3 = inlined_call_operand.vmem [shape: f32[2,32,1], index: 3, kind: output, shape index: {1}]   ;;  %s1130_s4 = inlined_call_operand.vmem [shape: f32[2,32,1], index: 4, kind: output, shape index: {2}]  }
   0x1   :  { %s993_s17 = smov 0  }
   0x2 LB: > { %s27_s18 = sadd.s32 1, %s956_s16  ;;  %p775_p0 = scmp.ge.s32.totalorder %s960_s17, 1  ;;  %s960_s17 = sphi %s993_s17, %s15_s17   ;;  %s956_s16 = sphi %s991_s16, %s1132_s16   ;;  %s952_s15 = sphi %s989_s15, %s1131_s15  }
   0x3   : > { %p29_p1 = scmp.ge.s32.totalorder %s27_s18, 2  ;;  %p188_p2 = scmp.lt.s32.totalorder %s960_s17, 3 }
   0x5   : > { %s1134_s18 = smov (%p29_p1, %s27_s18), 0  ;;  %p189_p3 = pnand %p775_p0, %p188_p2 }
   0x6   : > { %p233_p4 = scmp.lt.s32.totalorder (!%p189_p3), %s952_s15, 1  ;;  %v934_v0 = vld [vmem:[%s1127_s1 + $0x4] ss:$8 sps:$4 sm:$0xff] (!%p189_p3)   ;;  %vm483_vm0 = vcmask (!%p189_p3), 941056   ;;  %v937_v1 = vld [vmem:[%s1127_s1 + $0x14] ss:$8 sps:$4 sm:$0xff] (!%p189_p3)  }
   0x7   : > { %192 = sbr.rel (%p189_p3) target bundleno = 455 (0x1c7), region = 28  ;;  %819 = vmatprep.mubr.msk.bf16.mxu0 (!%p189_p3), %vm483_vm0, %v934_v0  ;;  %820 = vmatprep.mubr.msk.bf16.mxu1 (!%p189_p3), %vm483_vm0, %v937_v1  ;;  %vm490_vm1 = vcmask (!%p189_p3), 1040384   ;;  %vm491_vm2 = vcmask (!%p189_p3), 1041408   ;;  %v962_v30 = vmov (!%p189_p3), 65535   ;;  %v932_v40 = vld [vmem:[%s1127_s1] ss:$8 sps:$4 sm:$0xff] (!%p189_p3)  }
   0x8   : > { %v492_v31 = vsel (!%p189_p3), %vm490_vm1, 4294967295, %v962_v30  ;;  %v935_v41 = vld [vmem:[%s1127_s1 + $0x10] ss:$8 sps:$4 sm:$0xff] (!%p189_p3)   ;;  %vm266_vm3 = vcmask (!%p189_p3), 7168   ;;  %v963_v42 = vmov (!%p189_p3), 0.0  }
   0x9   : > { %v493_v35 = vsel (!%p189_p3), %vm491_vm2, %v492_v31, 0 }
   0xe   : > { %s1136_s15 = smov (!%p233_p4, %s952_s15), 1 }
   0xf   : > { %s858_s23 = smul.u32 248, %s1136_s15  ;;  %s824_s5 = sshll.u32 %s1136_s15, 5 }
  0x10   : > { %s1064_s8 = scalar_lea.vmem %s1129_s3, %s824_s5  ;;  %s823_s9 = sshll.u32 %s1136_s15, 6 }
  0x11   : > { %s1019_s26 = scalar_lea.vmem %s1126_s0, %s858_s23  ;;  %269 = vst.msk [vmem:[%s1064_s8 + $0x10] sm:$0xff] %vm266_vm3, %v963_v42  ;;  %267 = vst.msk [vmem:[%s1064_s8] sm:$0xff] %vm266_vm3, %v963_v42  ;;  %s250_s12 = scalar_lea.vmem %s1128_s2, %s823_s9 }
  0x12   : > { %v885_v2 = vld [vmem:[%s1019_s26 + $0x4] ss:$8 sps:$4 sm:$0xff]   ;;  %v887_v3 = vld [vmem:[%s1019_s26] ss:$8 sps:$4 sm:$0xff]   ;;  %v888_v4 = vld [vmem:[%s1019_s26 + $0x14] ss:$8 sps:$4 sm:$0xff]   ;;  %s1083_s19 = scalar_lea.vmem %s1130_s4, %s824_s5 }
  0x13   : > { %500 = vmatprep.subr.bf16.mxu0 %v885_v2  ;;  %826 = vmatprep.subr.bf16.mxu1 %v885_v2  ;;  %v890_v5 = vld [vmem:[%s1019_s26 + $0x10] ss:$8 sps:$4 sm:$0xff]   ;;  %v891_v6 = vld [vmem:[%s1019_s26 + $0x24] ss:$8 sps:$4 sm:$0xff]   ;;  %v893_v7 = vld [vmem:[%s1019_s26 + $0x20] ss:$8 sps:$4 sm:$0xff]  }
  0x14   : > { %501 = vmatpush1.bf16.msra.mxu0 %v887_v3  ;;  %842 = vmatpush1.bf16.msra.mxu1 %v887_v3  ;;  %v894_v8 = vld [vmem:[%s1019_s26 + $0x34] ss:$8 sps:$4 sm:$0xff]   ;;  %v896_v9 = vld [vmem:[%s1019_s26 + $0x30] ss:$8 sps:$4 sm:$0xff]   ;;  %v897_v10 = vld [vmem:[%s1019_s26 + $0x44] ss:$8 sps:$4 sm:$0xff]  }
  0x15   : > { %502 = vmatprep.subr.bf16.mxu0 %v888_v4  ;;  %827 = vmatprep.subr.bf16.mxu1 %v888_v4  ;;  %v899_v11 = vld [vmem:[%s1019_s26 + $0x40] ss:$8 sps:$4 sm:$0xff]   ;;  %v900_v12 = vld [vmem:[%s1019_s26 + $0x54] ss:$8 sps:$4 sm:$0xff]   ;;  %v902_v13 = vld [vmem:[%s1019_s26 + $0x50] ss:$8 sps:$4 sm:$0xff]  }
  0x16   : > { %v903_v14 = vld [vmem:[%s1019_s26 + $0x64] ss:$8 sps:$4 sm:$0xff]   ;;  %v905_v15 = vld [vmem:[%s1019_s26 + $0x60] ss:$8 sps:$4 sm:$0xff]   ;;  %v906_v16 = vld [vmem:[%s1019_s26 + $0x74] ss:$8 sps:$4 sm:$0xff]  }
  0x17   : > { %v908_v17 = vld [vmem:[%s1019_s26 + $0x70] ss:$8 sps:$4 sm:$0xff]   ;;  %v909_v18 = vld [vmem:[%s1019_s26 + $0x84] ss:$8 sps:$4 sm:$0xff]   ;;  %v911_v19 = vld [vmem:[%s1019_s26 + $0x80] ss:$8 sps:$4 sm:$0xff]  }
  0x18   : > { %503 = vmatpush1.bf16.msra.mxu0 %v890_v5  ;;  %843 = vmatpush1.bf16.msra.mxu1 %v890_v5  ;;  %v912_v20 = vld [vmem:[%s1019_s26 + $0x94] ss:$8 sps:$4 sm:$0xff]   ;;  %v914_v21 = vld [vmem:[%s1019_s26 + $0x90] ss:$8 sps:$4 sm:$0xff]   ;;  %v915_v22 = vld [vmem:[%s1019_s26 + $0xa4] ss:$8 sps:$4 sm:$0xff]  }
  0x19   : > { %504 = vmatprep.subr.bf16.mxu0 %v891_v6  ;;  %828 = vmatprep.subr.bf16.mxu1 %v891_v6  ;;  %v917_v23 = vld [vmem:[%s1019_s26 + $0xa0] ss:$8 sps:$4 sm:$0xff]   ;;  %v918_v24 = vld [vmem:[%s1019_s26 + $0xb4] ss:$8 sps:$4 sm:$0xff]   ;;  %v920_v25 = vld [vmem:[%s1019_s26 + $0xb0] ss:$8 sps:$4 sm:$0xff]  }
  0x1a   : > { %v921_v26 = vld [vmem:[%s1019_s26 + $0xc4] ss:$8 sps:$4 sm:$0xff]   ;;  %v923_v27 = vld [vmem:[%s1019_s26 + $0xc0] ss:$8 sps:$4 sm:$0xff]   ;;  %v924_v28 = vld [vmem:[%s1019_s26 + $0xd4] ss:$8 sps:$4 sm:$0xff]  }
  0x1b   : > { %v309_v29 = vld [vmem:[%s1019_s26 + $0xf0] sm:$0x33]  ;;  %v927_v33 = vld [vmem:[%s1019_s26 + $0xe4] ss:$8 sps:$4 sm:$0xff]   ;;  %v929_v36 = vld [vmem:[%s1019_s26 + $0xe0] ss:$8 sps:$4 sm:$0xff]  }
  0x1c   : > { %505 = vmatpush1.bf16.msra.mxu0 %v893_v7  ;;  %844 = vmatpush1.bf16.msra.mxu1 %v893_v7  ;;  %v926_v32 = vld [vmem:[%s1019_s26 + $0xd0] ss:$8 sps:$4 sm:$0xff]   ;;  %v818_v34 = vcombine.high %v309_v29, %v309_v29  ;;  %v817_v37 = vcombine.low %v309_v29, %v309_v29  ;;  %268 = vst.msk [vmem:[%s1064_s8 + $0x8] sm:$0xff] %vm266_vm3, %v963_v42  ;;  %270 = vst.msk [vmem:[%s1064_s8 + $0x18] sm:$0xff] %vm266_vm3, %v963_v42  ;;  %v561_v4 = vld [vmem:[%s1064_s8] sm:$0xff] }
  0x1d   : > { %506 = vmatprep.subr.bf16.mxu0 %v894_v8  ;;  %829 = vmatprep.subr.bf16.mxu1 %v894_v8  ;;  %272 = vst.msk [vmem:[%s1083_s19 + $0x8] sm:$0xff] %vm266_vm3, %v963_v42  ;;  %271 = vst.msk [vmem:[%s1083_s19] sm:$0xff] %vm266_vm3, %v963_v42  ;;  %v563_v3 = vld [vmem:[%s1064_s8 + $0x10] sm:$0xff] }
  0x1e   : > { %v498_v38 = vand.u32 %v818_v34, %v493_v35  ;;  %v495_v39 = vand.u32 %v817_v37, %v493_v35  ;;  %273 = vst.msk [vmem:[%s1083_s19 + $0x10] sm:$0xff] %vm266_vm3, %v963_v42  ;;  %274 = vst.msk [vmem:[%s1083_s19 + $0x18] sm:$0xff] %vm266_vm3, %v963_v42 }
  0x20   : > { %507 = vmatpush1.bf16.msra.mxu0 %v896_v9  ;;  %845 = vmatpush1.bf16.msra.mxu1 %v896_v9 }
  0x21   : > { %508 = vmatprep.subr.bf16.mxu0 %v897_v10  ;;  %830 = vmatprep.subr.bf16.mxu1 %v897_v10 }
  0x23   : > { %v564_v9 = vld [vmem:[%s1064_s8 + $0x18] sm:$0xff]  ;;  %v562_v10 = vld [vmem:[%s1064_s8 + $0x8] sm:$0xff] }
  0x24   : > { %509 = vmatpush1.bf16.msra.mxu0 %v899_v11  ;;  %846 = vmatpush1.bf16.msra.mxu1 %v899_v11 }
  0x25   : > { %510 = vmatprep.subr.bf16.mxu0 %v900_v12  ;;  %831 = vmatprep.subr.bf16.mxu1 %v900_v12 }
  0x28   : > { %511 = vmatpush1.bf16.msra.mxu0 %v902_v13  ;;  %847 = vmatpush1.bf16.msra.mxu1 %v902_v13 }
  0x29   : > { %512 = vmatprep.subr.bf16.mxu0 %v903_v14  ;;  %832 = vmatprep.subr.bf16.mxu1 %v903_v14 }
  0x2c   : > { %513 = vmatpush1.bf16.msra.mxu0 %v905_v15  ;;  %848 = vmatpush1.bf16.msra.mxu1 %v905_v15  ;;  %v587_v15 = vld [vmem:[%s1083_s19 + $0x8] sm:$0xff] }
  0x2d   : > { %514 = vmatprep.subr.bf16.mxu0 %v906_v16  ;;  %833 = vmatprep.subr.bf16.mxu1 %v906_v16  ;;  %v586_v16 = vld [vmem:[%s1083_s19] sm:$0xff] }
  0x30   : > { %515 = vmatpush1.bf16.msra.mxu0 %v908_v17  ;;  %849 = vmatpush1.bf16.msra.mxu1 %v908_v17 }
  0x31   : > { %516 = vmatprep.subr.bf16.mxu0 %v909_v18  ;;  %834 = vmatprep.subr.bf16.mxu1 %v909_v18 }
  0x34   : > { %517 = vmatpush1.bf16.msra.mxu0 %v911_v19  ;;  %850 = vmatpush1.bf16.msra.mxu1 %v911_v19 }
  0x35   : > { %518 = vmatprep.subr.bf16.mxu0 %v912_v20  ;;  %835 = vmatprep.subr.bf16.mxu1 %v912_v20 }
  0x38   : > { %519 = vmatpush1.bf16.msra.mxu0 %v914_v21  ;;  %851 = vmatpush1.bf16.msra.mxu1 %v914_v21  ;;  %v589_v21 = vld [vmem:[%s1083_s19 + $0x18] sm:$0xff] }
  0x39   : > { %520 = vmatprep.subr.bf16.mxu0 %v915_v22  ;;  %836 = vmatprep.subr.bf16.mxu1 %v915_v22  ;;  %v588_v22 = vld [vmem:[%s1083_s19 + $0x10] sm:$0xff] }
  0x3c   : > { %521 = vmatpush1.bf16.msra.mxu0 %v917_v23  ;;  %852 = vmatpush1.bf16.msra.mxu1 %v917_v23 }
  0x3d   : > { %522 = vmatprep.subr.bf16.mxu0 %v918_v24  ;;  %837 = vmatprep.subr.bf16.mxu1 %v918_v24 }
  0x40   : > { %523 = vmatpush1.bf16.msra.mxu0 %v920_v25  ;;  %853 = vmatpush1.bf16.msra.mxu1 %v920_v25 }
  0x41   : > { %524 = vmatprep.subr.bf16.mxu0 %v921_v26  ;;  %838 = vmatprep.subr.bf16.mxu1 %v921_v26 }
  0x44   : > { %525 = vmatpush1.bf16.msra.mxu0 %v923_v27  ;;  %854 = vmatpush1.bf16.msra.mxu1 %v923_v27 }
  0x45   : > { %526 = vmatprep.subr.bf16.mxu0 %v924_v28  ;;  %839 = vmatprep.subr.bf16.mxu1 %v924_v28 }
  0x48   : > { %527 = vmatpush1.bf16.msra.mxu0 %v926_v32  ;;  %855 = vmatpush1.bf16.msra.mxu1 %v926_v32 }
  0x49   : > { %528 = vmatprep.subr.bf16.mxu0 %v927_v33  ;;  %840 = vmatprep.subr.bf16.mxu1 %v927_v33 }
  0x4c   : > { %529 = vmatpush1.bf16.msra.mxu0 %v929_v36  ;;  %856 = vmatpush1.bf16.msra.mxu1 %v929_v36 }
  0x4d   : > { %530 = vmatprep.subr.bf16.mxu0 %v498_v38  ;;  %841 = vmatprep.subr.bf16.mxu1 %v498_v38 }
  0x50   : > { %531 = vmatpush1.bf16.msra.mxu0 %v495_v39  ;;  %857 = vmatpush1.bf16.msra.mxu1 %v495_v39 }
  0x53   : > { %533 = vmatmul.mubr.bf16.vlgmr.msra.gmra.mrb[0].mxu0 %v932_v40  ;;  %543 = vmatmul.mubr.bf16.vlgmr.msra.gmra.mrb[0].mxu1 %v935_v41 }
 0x126   : > { %v534_v43 = vpop.f32.mrb[0].mxu0  ;;  %v544_v44 = vpop.f32.mrb[0].mxu1 }
 0x127   : > { %553 = vst [vmem:[%s250_s12] sm:$0xff] %v534_v43  ;;  %557 = vst [vmem:[%s250_s12 + $0x20] sm:$0xff] %v544_v44  ;;  %v536_v45 = vpop.f32.mrb[1].mxu0  ;;  %v546_v46 = vpop.f32.mrb[1].mxu1  ;;  %v590_v47 = vmul.f32 %v534_v43, %v534_v43  ;;  %v594_v48 = vmul.f32 %v544_v44, %v544_v44 }
 0x128   : > { %554 = vst [vmem:[%s250_s12 + $0x8] sm:$0xff] %v536_v45  ;;  %558 = vst [vmem:[%s250_s12 + $0x28] sm:$0xff] %v546_v46  ;;  %v538_v49 = vpop.f32.mrb[2].mxu0  ;;  %v548_v50 = vpop.f32.mrb[2].mxu1  ;;  %v571_v51 = vadd.f32 %v546_v46, %v544_v44  ;;  %v565_v52 = vadd.f32 %v536_v45, %v534_v43  ;;  %v591_v53 = vmul.f32 %v536_v45, %v536_v45 }
 0x129   : > { %v595_v54 = vmul.f32 %v546_v46, %v546_v46  ;;  %555 = vst [vmem:[%s250_s12 + $0x10] sm:$0xff] %v538_v49  ;;  %559 = vst [vmem:[%s250_s12 + $0x30] sm:$0xff] %v548_v50  ;;  %v540_v55 = vpop.f32.mrb[3].mxu0  ;;  %v550_v56 = vpop.f32.mrb[3].mxu1  ;;  %v592_v57 = vmul.f32 %v538_v49, %v538_v49  ;;  %v596_v58 = vmul.f32 %v548_v50, %v548_v50 }
 0x12a   : > { %556 = vst [vmem:[%s250_s12 + $0x18] sm:$0xff] %v540_v55  ;;  %v593_v59 = vmul.f32 %v540_v55, %v540_v55  ;;  %560 = vst [vmem:[%s250_s12 + $0x38] sm:$0xff] %v550_v56  ;;  %v597_v60 = vmul.f32 %v550_v56, %v550_v56  ;;  %572 = vadd.xlane.f32.xlu1 %v571_v51  ;;  %566 = vadd.xlane.f32.xlu0 %v565_v52 }
 0x12b   : > { %v574_v61 = vadd.f32 %v550_v56, %v548_v50  ;;  %v568_v62 = vadd.f32 %v540_v55, %v538_v49  ;;  %v598_v63 = vadd.f32 %v591_v53, %v590_v47  ;;  %v604_v0 = vadd.f32 %v595_v54, %v594_v48 }
 0x12c   : > { %v601_v1 = vadd.f32 %v593_v59, %v592_v57  ;;  %v607_v2 = vadd.f32 %v597_v60, %v596_v58 }
 0x12e   : > { %575 = vadd.xlane.f32.xlu1 %v574_v61  ;;  %569 = vadd.xlane.f32.xlu0 %v568_v62 }
 0x132   : > { %602 = vadd.xlane.f32.xlu1 %v601_v1  ;;  %599 = vadd.xlane.f32.xlu0 %v598_v63 }
 0x136   : > { %608 = vadd.xlane.f32.xlu1 %v607_v2  ;;  %605 = vadd.xlane.f32.xlu0 %v604_v0 }
 0x1b7   : > { %v573_v5 = vpop.xlane.xlu1 %572  ;;  %v567_v6 = vpop.xlane.xlu0 %566 }
 0x1b8   : > { %v579_v7 = vadd.f32 %v573_v5, %v563_v3  ;;  %v577_v8 = vadd.f32 %v567_v6, %v561_v4 }
 0x1ba   : > { %584 = vst.msk [vmem:[%s1064_s8 + $0x10] sm:$0xff] %vm266_vm3, %v579_v7  ;;  %582 = vst.msk [vmem:[%s1064_s8] sm:$0xff] %vm266_vm3, %v577_v8 }
 0x1bb   : > { %v576_v11 = vpop.xlane.xlu1 %575  ;;  %v570_v12 = vpop.xlane.xlu0 %569 }
 0x1bc   : > { %v580_v13 = vadd.f32 %v576_v11, %v564_v9  ;;  %v578_v14 = vadd.f32 %v570_v12, %v562_v10 }
 0x1be   : > { %585 = vst.msk [vmem:[%s1064_s8 + $0x18] sm:$0xff] %vm266_vm3, %v580_v13  ;;  %583 = vst.msk [vmem:[%s1064_s8 + $0x8] sm:$0xff] %vm266_vm3, %v578_v14 }
 0x1bf   : > { %v603_v17 = vpop.xlane.xlu1 %602  ;;  %v600_v18 = vpop.xlane.xlu0 %599 }
 0x1c0   : > { %v611_v19 = vadd.f32 %v603_v17, %v587_v15  ;;  %v610_v20 = vadd.f32 %v600_v18, %v586_v16 }
 0x1c2   : > { %615 = vst.msk [vmem:[%s1083_s19 + $0x8] sm:$0xff] %vm266_vm3, %v611_v19  ;;  %614 = vst.msk [vmem:[%s1083_s19] sm:$0xff] %vm266_vm3, %v610_v20 }
 0x1c3   : > { %v609_v23 = vpop.xlane.xlu1 %608  ;;  %v606_v24 = vpop.xlane.xlu0 %605 }
 0x1c4   : > { %v613_v25 = vadd.f32 %v609_v23, %v589_v21  ;;  %v612_v26 = vadd.f32 %v606_v24, %v588_v22 }
 0x1c6   : > { %617 = vst.msk [vmem:[%s1083_s19 + $0x18] sm:$0xff] %vm266_vm3, %v613_v25  ;;  %616 = vst.msk [vmem:[%s1083_s19 + $0x10] sm:$0xff] %vm266_vm3, %v612_v26 }
 0x1c7 PF: > { %s15_s17 = sadd.s32 1, %s960_s17   ;;  %s1131_s15 = smov %s956_s16 }
 0x1c8   : > { %p12_p5 = scmp.ge.s32.totalorder %s15_s17, 4   ;;  %s1132_s16 = smov %s1134_s18 }
 0x1ca   :  { %14 = sbr.rel (!%p12_p5) target bundleno = 2 (0x2), region = 86 }

// kernel: stylenet_forward.33
= control target key start
LH: loop header
LB: loop body
LE: loop exit
PB: predicated region body
PF: predicated region fallthrough
CT: control target
= control target key end

     0   :  { %s1137_s15 = smov 0   ;;  %s1139_s16 = smov 0   ;;  %s1363_s0 = inlined_call_operand.vmem [shape: bf16[2,288,64], index: 0, kind: input, shape index: {}]   ;;  %s1364_s1 = inlined_call_operand.vmem [shape: bf16[64,288], index: 1, kind: input, shape index: {}]   ;;  %s1365_s2 = inlined_call_operand.vmem [shape: f32[2,64,64], index: 2, kind: output, shape index: {0}]   ;;  %s1366_s3 = inlined_call_operand.vmem [shape: f32[2,64,1], index: 3, kind: output, shape index: {1}]   ;;  %s1367_s4 = inlined_call_operand.vmem [shape: f32[2,64,1], index: 4, kind: output, shape index: {2}]  }
   0x1   :  { %s1141_s17 = smov 0  }
   0x2 LB: > { %s27_s18 = sadd.s32 1, %s1105_s16  ;;  %p906_p0 = scmp.ge.s32.totalorder %s1109_s17, 1  ;;  %s1109_s17 = sphi %s1141_s17, %s15_s17   ;;  %s1105_s16 = sphi %s1139_s16, %s1369_s16   ;;  %s1101_s15 = sphi %s1137_s15, %s1368_s15  }
   0x3   : > { %p29_p1 = scmp.ge.s32.totalorder %s27_s18, 2  ;;  %p186_p2 = scmp.lt.s32.totalorder %s1109_s17, 3 }
   0x5   : > { %s1371_s18 = smov (%p29_p1, %s27_s18), 0  ;;  %p187_p3 = pnand %p906_p0, %p186_p2 }
   0x6   : > { %p228_p4 = scmp.lt.s32.totalorder (!%p187_p3), %s1101_s15, 1  ;;  %v1071_v0 = vld [vmem:[%s1364_s1 + $0x4] ss:$12 sps:$4 sm:$0xff] (!%p187_p3)   ;;  %v1074_v1 = vld [vmem:[%s1364_s1 + $0x4c] ss:$12 sps:$4 sm:$0xff] (!%p187_p3)   ;;  %vm496_vm0 = vcmask (!%p187_p3), 261120  }
   0x7   : > { %190 = sbr.rel (%p187_p3) target bundleno = 450 (0x1c2), region = 28  ;;  %541 = vmatprep.mubr.bf16.mxu0 (!%p187_p3), %v1071_v0  ;;  %565 = vmatprep.mubr.bf16.mxu1 (!%p187_p3), %v1074_v1  ;;  %v1069_v19 = vld [vmem:[%s1364_s1] ss:$12 sps:$4 sm:$0xff] (!%p187_p3)   ;;  %v1072_v20 = vld [vmem:[%s1364_s1 + $0x48] ss:$12 sps:$4 sm:$0xff] (!%p187_p3)   ;;  %vm259_vm1 = vcmask (!%p187_p3), 7168  }
   0x8   : > { %v1077_v21 = vld [vmem:[%s1364_s1 + $0x1c] ss:$12 sps:$4 sm:$0xff] (!%p187_p3)   ;;  %v1080_v24 = vld [vmem:[%s1364_s1 + $0x18] ss:$12 sps:$4 sm:$0xff] (!%p187_p3)   ;;  %v1081_v25 = vld [vmem:[%s1364_s1 + $0x20] ss:$12 sps:$4 sm:$0xff] (!%p187_p3)  }
   0x9   : > { %v1079_v23 = vld [vmem:[%s1364_s1 + $0x8] ss:$12 sps:$4 sm:$0xff] (!%p187_p3)   ;;  %v1082_v26 = vld [vmem:[%s1364_s1 + $0x38] ss:$12 sps:$4 sm:$0xff] (!%p187_p3)   ;;  %v1083_v28 = vld [vmem:[%s1364_s1 + $0x50] ss:$12 sps:$4 sm:$0xff] (!%p187_p3)  }
   0xa   : > { %v1084_v27 = vld [vmem:[%s1364_s1 + $0x34] ss:$12 sps:$4 sm:$0xff] (!%p187_p3)   ;;  %v1086_v29 = vld [vmem:[%s1364_s1 + $0x30] ss:$12 sps:$4 sm:$0xff] (!%p187_p3)   ;;  %v1111_v30 = vmov (!%p187_p3), 0.0   ;;  %vm639_vm2 = vcmask (!%p187_p3), 523264  }
   0xe   : > { %s1373_s15 = smov (!%p228_p4, %s1101_s15), 1 }
   0xf   : > { %s1027_s23 = smul.u32 144, %s1373_s15  ;;  %s1222_s25 = sshll.u32 %s1373_s15, 6 }
  0x10   : > { %s1228_s28 = scalar_lea.vmem %s1366_s3, %s1222_s25  ;;  %s1234_s15 = scalar_lea.vmem %s1367_s4, %s1222_s25 }
  0x11   : > { %s1167_s26 = scalar_lea.vmem %s1363_s0, %s1027_s23  ;;  %260 = vst.msk [vmem:[%s1228_s28] sm:$0xff] %vm259_vm1, %v1111_v30  ;;  %261 = vst.msk [vmem:[%s1228_s28 + $0x8] sm:$0xff] %vm259_vm1, %v1111_v30  ;;  %s1272_s7 = scalar_lea.vmem %s1365_s2, %s1222_s25 }
  0x12   : > { %v1053_v2 = vld [vmem:[%s1167_s26 + $0x40] sm:$0xff]   ;;  %v1055_v4 = vld [vmem:[%s1167_s26 + $0x48] sm:$0xff]   ;;  %v1057_v6 = vld [vmem:[%s1167_s26 + $0x50] sm:$0xff]   ;;  %262 = vst.msk [vmem:[%s1228_s28 + $0x10] sm:$0xff] %vm259_vm1, %v1111_v30 }
  0x13   : > { %v1054_v3 = vld [vmem:[%s1167_s26] sm:$0xff]   ;;  %953 = vmatprep.subr.bf16.mxu0 %v1053_v2  ;;  %1011 = vmatprep.subr.bf16.mxu1 %v1053_v2  ;;  %v1056_v5 = vld [vmem:[%s1167_s26 + $0x8] sm:$0xff]   ;;  %v1058_v7 = vld [vmem:[%s1167_s26 + $0x10] sm:$0xff]   ;;  %263 = vst.msk [vmem:[%s1228_s28 + $0x18] sm:$0xff] %vm259_vm1, %v1111_v30 }
  0x14   : > { %954 = vmatpush3.bf16.msra.mxu0 %v1054_v3  ;;  %1019 = vmatpush3.bf16.msra.mxu1 %v1054_v3  ;;  %v1059_v8 = vld [vmem:[%s1167_s26 + $0x58] sm:$0xff]   ;;  %v1061_v10 = vld [vmem:[%s1167_s26 + $0x60] sm:$0xff]   ;;  %v1063_v12 = vld [vmem:[%s1167_s26 + $0x68] sm:$0xff]   ;;  %264 = vst.msk [vmem:[%s1228_s28 + $0x20] sm:$0xff] %vm259_vm1, %v1111_v30 }
  0x15   : > { %955 = vmatprep.subr.bf16.mxu0 %v1055_v4  ;;  %1012 = vmatprep.subr.bf16.mxu1 %v1055_v4  ;;  %v1060_v9 = vld [vmem:[%s1167_s26 + $0x18] sm:$0xff]   ;;  %v1062_v11 = vld [vmem:[%s1167_s26 + $0x20] sm:$0xff]   ;;  %v1064_v13 = vld [vmem:[%s1167_s26 + $0x28] sm:$0xff]   ;;  %265 = vst.msk [vmem:[%s1228_s28 + $0x28] sm:$0xff] %vm259_vm1, %v1111_v30 }
  0x16   : > { %v1065_v14 = vld [vmem:[%s1167_s26 + $0x70] sm:$0xff]   ;;  %v1067_v16 = vld [vmem:[%s1167_s26 + $0x78] sm:$0xff]   ;;  %v1075_v18 = vld [vmem:[%s1167_s26 + $0x80] sm:$0xff]   ;;  %266 = vst.msk [vmem:[%s1228_s28 + $0x30] sm:$0xff] %vm259_vm1, %v1111_v30 }
  0x17   : > { %v1066_v15 = vld [vmem:[%s1167_s26 + $0x30] sm:$0xff]   ;;  %v1068_v17 = vld [vmem:[%s1167_s26 + $0x38] sm:$0xff]   ;;  %v1076_v22 = vld [vmem:[%s1167_s26 + $0x88] sm:$0xff]   ;;  %267 = vst.msk [vmem:[%s1228_s28 + $0x38] sm:$0xff] %vm259_vm1, %v1111_v30 }
  0x18   : > { %956 = vmatpush3.bf16.msra.mxu0 %v1056_v5  ;;  %1020 = vmatpush3.bf16.msra.mxu1 %v1056_v5  ;;  %268 = vst.msk [vmem:[%s1234_s15] sm:$0xff] %vm259_vm1, %v1111_v30  ;;  %269 = vst.msk [vmem:[%s1234_s15 + $0x8] sm:$0xff] %vm259_vm1, %v1111_v30 }
  0x19   : > { %957 = vmatprep.subr.bf16.mxu0 %v1057_v6  ;;  %1013 = vmatprep.subr.bf16.mxu1 %v1057_v6  ;;  %270 = vst.msk [vmem:[%s1234_s15 + $0x10] sm:$0xff] %vm259_vm1, %v1111_v30  ;;  %271 = vst.msk [vmem:[%s1234_s15 + $0x18] sm:$0xff] %vm259_vm1, %v1111_v30 }
  0x1a   : > { %272 = vst.msk [vmem:[%s1234_s15 + $0x20] sm:$0xff] %vm259_vm1, %v1111_v30  ;;  %273 = vst.msk [vmem:[%s1234_s15 + $0x28] sm:$0xff] %vm259_vm1, %v1111_v30 }
  0x1b   : > { %274 = vst.msk [vmem:[%s1234_s15 + $0x30] sm:$0xff] %vm259_vm1, %v1111_v30  ;;  %275 = vst.msk [vmem:[%s1234_s15 + $0x38] sm:$0xff] %vm259_vm1, %v1111_v30 }
  0x1c   : > { %958 = vmatpush3.bf16.msra.mxu0 %v1058_v7  ;;  %1021 = vmatpush3.bf16.msra.mxu1 %v1058_v7 }
  0x1d   : > { %959 = vmatprep.subr.bf16.mxu0 %v1059_v8  ;;  %1014 = vmatprep.subr.bf16.mxu1 %v1059_v8 }
  0x20   : > { %960 = vmatpush3.bf16.msra.mxu0 %v1060_v9  ;;  %1022 = vmatpush3.bf16.msra.mxu1 %v1060_v9 }
  0x21   : > { %961 = vmatprep.subr.bf16.mxu0 %v1061_v10  ;;  %1015 = vmatprep.subr.bf16.mxu1 %v1061_v10 }
  0x24   : > { %962 = vmatpush3.bf16.msra.mxu0 %v1062_v11  ;;  %1023 = vmatpush3.bf16.msra.mxu1 %v1062_v11 }
  0x25   : > { %963 = vmatprep.subr.bf16.mxu0 %v1063_v12  ;;  %1016 = vmatprep.subr.bf16.mxu1 %v1063_v12 }
  0x28   : > { %964 = vmatpush3.bf16.msra.mxu0 %v1064_v13  ;;  %1024 = vmatpush3.bf16.msra.mxu1 %v1064_v13 }
  0x29   : > { %965 = vmatprep.subr.bf16.mxu0 %v1065_v14  ;;  %1017 = vmatprep.subr.bf16.mxu1 %v1065_v14 }
  0x2c   : > { %966 = vmatpush3.bf16.msra.mxu0 %v1066_v15  ;;  %1025 = vmatpush3.bf16.msra.mxu1 %v1066_v15 }
  0x2d   : > { %967 = vmatprep.subr.bf16.mxu0 %v1067_v16  ;;  %1018 = vmatprep.subr.bf16.mxu1 %v1067_v16 }
  0x30   : > { %968 = vmatpush3.bf16.msra.mxu0 %v1068_v17  ;;  %1026 = vmatpush3.bf16.msra.mxu1 %v1068_v17 }
  0x31   : > { %999 = vmatprep.subr.bf16.mxu1 %v1075_v18 }
  0x33   : > { %542 = vmatmul.mubr.bf16.vlgmr.msra.gmra.mrb[0].mxu0 %v1069_v19  ;;  %566 = vmatmul.mubr.bf16.vlgmr.msra.gmra.mrb[0].mxu1 %v1072_v20 }
  0x34   : > { %1000 = vmatpush3.bf16.msra.mxu1 %v1075_v18  ;;  %549 = vmatprep.mubr.bf16.mxu0 %v1077_v21 }
  0x35   : > { %1001 = vmatprep.subr.bf16.mxu1 %v1076_v22  ;;  %1003 = vmatprep.mubr.msk.bf16.mxu1 %vm496_vm0, %v1079_v23 }
  0x38   : > { %1002 = vmatpush3.bf16.msra.mxu1 %v1076_v22 }
  0x3b   : > { %550 = vmatmul.mubr.bf16.gmra.mrb[4].mxu0 %v1080_v24  ;;  %1004 = vmatmul.mubr.msk.bf16.vlgmr.msra.gmra.mrb[4].mxu1 %vm496_vm0, %v1081_v25 }
  0x3c   : > { %1007 = vmatprep.mubr.msk.bf16.mxu1 %vm496_vm0, %v1082_v26  ;;  %557 = vmatprep.mubr.bf16.mxu0 %v1084_v27 }
  0x43   : > { %1008 = vmatmul.mubr.msk.bf16.gmra.mrb[8].mxu1 %vm496_vm0, %v1083_v28  ;;  %558 = vmatmul.mubr.bf16.gmra.mrb[8].mxu0 %v1086_v29 }
 0x106   : > { %v969_v31 = vpop.f32.mrb[0].mxu0  ;;  %v987_v32 = vpop.f32.mrb[0].mxu1 }
 0x107   : > { %v970_v33 = vpop.f32.mrb[1].mxu0  ;;  %v988_v34 = vpop.f32.mrb[1].mxu1 }
 0x108   : > { %v971_v35 = vadd.f32 %v970_v33, %v969_v31  ;;  %v989_v36 = vadd.f32 %v988_v34, %v987_v32  ;;  %v972_v37 = vpop.f32.mrb[2].mxu0  ;;  %v990_v38 = vpop.f32.mrb[2].mxu1  ;;  %v648_v31 = vld [vmem:[%s1228_s28] sm:$0xff]  ;;  %v650_v33 = vld [vmem:[%s1228_s28 + $0x10] sm:$0xff] }
 0x109   : > { %v973_v39 = vpop.f32.mrb[3].mxu0  ;;  %v991_v40 = vpop.f32.mrb[3].mxu1 }
 0x10a   : > { %v974_v41 = vadd.f32 %v973_v39, %v972_v37  ;;  %v992_v42 = vadd.f32 %v991_v40, %v990_v38  ;;  %v651_v39 = vld [vmem:[%s1228_s28 + $0x18] sm:$0xff] }
 0x10e   : > { %v975_v43 = vpop.f32.mrb[4].mxu0  ;;  %v1005_v44 = vpop.f32.mrb[4].mxu1 }
 0x10f   : > { %v976_v45 = vpop.f32.mrb[5].mxu0  ;;  %v608_v46 = vpop.f32.mrb[5].mxu1 }
 0x110   : > { %v977_v47 = vadd.f32 %v976_v45, %v975_v43  ;;  %v609_v48 = vadd.f32 %v971_v35, %v608_v46  ;;  %v978_v49 = vpop.f32.mrb[6].mxu0  ;;  %v1006_v50 = vpop.f32.mrb[6].mxu1  ;;  %v698_v45 = vld [vmem:[%s1234_s15 + $0x8] sm:$0xff] }
 0x111   : > { %v979_v51 = vpop.f32.mrb[7].mxu0  ;;  %v611_v52 = vpop.f32.mrb[7].mxu1 }
 0x112   : > { %v617_v53 = vadd.f32 %v1005_v44, %v977_v47  ;;  %640 = vst.msk [vmem:[%s1272_s7] sm:$0xff] %vm639_vm2, %v609_v48  ;;  %v980_v54 = vadd.f32 %v979_v51, %v978_v49  ;;  %v612_v55 = vadd.f32 %v974_v41, %v611_v52  ;;  %v656_v56 = vsel %vm639_vm2, %v609_v48, 0.0  ;;  %v700_v51 = vld [vmem:[%s1234_s15 + $0x18] sm:$0xff] }
 0x113   : > { %657 = vadd.xlane.f32.xlu0 %v656_v56  ;;  %v705_v62 = vmul.f32 %v609_v48, %v609_v48  ;;  %v699_v48 = vld [vmem:[%s1234_s15 + $0x10] sm:$0xff] }
 0x114   : > { %642 = vst.msk [vmem:[%s1272_s7 + $0x10] sm:$0xff] %vm639_vm2, %v617_v53  ;;  %v620_v57 = vadd.f32 %v1006_v50, %v980_v54  ;;  %641 = vst.msk [vmem:[%s1272_s7 + $0x8] sm:$0xff] %vm639_vm2, %v612_v55  ;;  %v662_v58 = vsel %vm639_vm2, %v617_v53, 0.0  ;;  %v659_v60 = vsel %vm639_vm2, %v612_v55, 0.0  ;;  %v706_v6 = vmul.f32 %v612_v55, %v612_v55  ;;  %v654_v54 = vld [vmem:[%s1228_s28 + $0x30] sm:$0xff] }
 0x115   : > { %663 = vadd.xlane.f32.xlu1 %v662_v58  ;;  %v713_v11 = vsel %vm639_vm2, %v705_v62, 0.0  ;;  %v707_v13 = vmul.f32 %v617_v53, %v617_v53 }
 0x116   : > { %643 = vst.msk [vmem:[%s1272_s7 + $0x18] sm:$0xff] %vm639_vm2, %v620_v57  ;;  %v1009_v59 = vpop.f32.mrb[8].mxu1  ;;  %v981_v61 = vpop.f32.mrb[8].mxu0  ;;  %v665_v3 = vsel %vm639_vm2, %v620_v57, 0.0  ;;  %v716_v14 = vsel %vm639_vm2, %v706_v6, 0.0  ;;  %v708_v16 = vmul.f32 %v620_v57, %v620_v57  ;;  %v655_v57 = vld [vmem:[%s1228_s28 + $0x38] sm:$0xff] }
 0x117   : > { %v633_v63 = vadd.f32 %v1009_v59, %v989_v36  ;;  %v624_v0 = vpop.f32.mrb[9].mxu1  ;;  %660 = vadd.xlane.f32.xlu0 %v659_v60  ;;  %v982_v1 = vpop.f32.mrb[9].mxu0  ;;  %v719_v17 = vsel %vm639_vm2, %v707_v13, 0.0  ;;  %v649_v36 = vld [vmem:[%s1228_s28 + $0x8] sm:$0xff]  ;;  %v652_v60 = vld [vmem:[%s1228_s28 + $0x20] sm:$0xff] }
 0x118   : > { %v1010_v2 = vpop.f32.mrb[10].mxu1  ;;  %v983_v4 = vadd.f32 %v982_v1, %v981_v61  ;;  %v984_v5 = vpop.f32.mrb[10].mxu0  ;;  %v722_v18 = vsel %vm639_vm2, %v708_v16, 0.0 }
 0x119   : > { %646 = vst.msk [vmem:[%s1272_s7 + $0x30] sm:$0xff] %vm639_vm2, %v633_v63  ;;  %v636_v7 = vadd.f32 %v1010_v2, %v992_v42  ;;  %666 = vadd.xlane.f32.xlu1 %v665_v3  ;;  %v985_v8 = vpop.f32.mrb[11].mxu0  ;;  %v627_v9 = vpop.f32.mrb[11].mxu1  ;;  %v674_v19 = vsel %vm639_vm2, %v633_v63, 0.0  ;;  %v711_v26 = vmul.f32 %v633_v63, %v633_v63  ;;  %v697_v42 = vld [vmem:[%s1234_s15] sm:$0xff]  ;;  %v653_v63 = vld [vmem:[%s1228_s28 + $0x28] sm:$0xff] }
 0x11a   : > { %v625_v10 = vadd.f32 %v983_v4, %v624_v0  ;;  %v986_v12 = vadd.f32 %v985_v8, %v984_v5  ;;  %v701_v2 = vld [vmem:[%s1234_s15 + $0x20] sm:$0xff]  ;;  %v702_v5 = vld [vmem:[%s1234_s15 + $0x28] sm:$0xff]  ;;  %v703_v8 = vld [vmem:[%s1234_s15 + $0x30] sm:$0xff] }
 0x11b   : > { %647 = vst.msk [vmem:[%s1272_s7 + $0x38] sm:$0xff] %vm639_vm2, %v636_v7  ;;  %714 = vadd.xlane.f32.xlu0 %v713_v11  ;;  %v677_v20 = vsel %vm639_vm2, %v636_v7, 0.0  ;;  %v712_v28 = vmul.f32 %v636_v7, %v636_v7  ;;  %v731_v29 = vsel %vm639_vm2, %v711_v26, 0.0  ;;  %v704_v11 = vld [vmem:[%s1234_s15 + $0x38] sm:$0xff] }
 0x11c   : > { %644 = vst.msk [vmem:[%s1272_s7 + $0x20] sm:$0xff] %vm639_vm2, %v625_v10  ;;  %v628_v15 = vadd.f32 %v986_v12, %v627_v9  ;;  %v668_v21 = vsel %vm639_vm2, %v625_v10, 0.0  ;;  %v709_v22 = vmul.f32 %v625_v10, %v625_v10 }
 0x11d   : > { %717 = vadd.xlane.f32.xlu1 %v716_v14  ;;  %v734_v30 = vsel %vm639_vm2, %v712_v28, 0.0 }
 0x11e   : > { %645 = vst.msk [vmem:[%s1272_s7 + $0x28] sm:$0xff] %vm639_vm2, %v628_v15  ;;  %v671_v23 = vsel %vm639_vm2, %v628_v15, 0.0  ;;  %v710_v24 = vmul.f32 %v628_v15, %v628_v15  ;;  %v725_v25 = vsel %vm639_vm2, %v709_v22, 0.0 }
 0x11f   : > { %720 = vadd.xlane.f32.xlu0 %v719_v17 }
 0x120   : > { %v728_v27 = vsel %vm639_vm2, %v710_v24, 0.0 }
 0x121   : > { %723 = vadd.xlane.f32.xlu1 %v722_v18 }
 0x123   : > { %675 = vadd.xlane.f32.xlu0 %v674_v19 }
 0x125   : > { %678 = vadd.xlane.f32.xlu1 %v677_v20 }
 0x127   : > { %669 = vadd.xlane.f32.xlu0 %v668_v21 }
 0x129   : > { %672 = vadd.xlane.f32.xlu1 %v671_v23 }
 0x12b   : > { %726 = vadd.xlane.f32.xlu0 %v725_v25 }
 0x12d   : > { %729 = vadd.xlane.f32.xlu1 %v728_v27 }
 0x12f   : > { %732 = vadd.xlane.f32.xlu0 %v731_v29 }
 0x131   : > { %735 = vadd.xlane.f32.xlu1 %v734_v30 }
 0x1a0   : > { %v658_v32 = vpop.xlane.xlu0 %657 }
 0x1a1   : > { %v680_v34 = vadd.f32 %v658_v32, %v648_v31 }
 0x1a2   : > { %v664_v35 = vpop.xlane.xlu1 %663 }
 0x1a3   : > { %689 = vst.msk [vmem:[%s1228_s28] sm:$0xff] %vm259_vm1, %v680_v34  ;;  %v682_v37 = vadd.f32 %v664_v35, %v650_v33 }
 0x1a4   : > { %v661_v38 = vpop.xlane.xlu0 %660 }
 0x1a5   : > { %691 = vst.msk [vmem:[%s1228_s28 + $0x10] sm:$0xff] %vm259_vm1, %v682_v37  ;;  %v681_v40 = vadd.f32 %v661_v38, %v649_v36 }
 0x1a6   : > { %v667_v41 = vpop.xlane.xlu1 %666 }
 0x1a7   : > { %690 = vst.msk [vmem:[%s1228_s28 + $0x8] sm:$0xff] %vm259_vm1, %v681_v40  ;;  %v683_v43 = vadd.f32 %v667_v41, %v651_v39 }
 0x1a8   : > { %v715_v44 = vpop.xlane.xlu0 %714 }
 0x1a9   : > { %692 = vst.msk [vmem:[%s1228_s28 + $0x18] sm:$0xff] %vm259_vm1, %v683_v43  ;;  %v737_v46 = vadd.f32 %v715_v44, %v697_v42 }
 0x1aa   : > { %v718_v47 = vpop.xlane.xlu1 %717 }
 0x1ab   : > { %745 = vst.msk [vmem:[%s1234_s15] sm:$0xff] %vm259_vm1, %v737_v46  ;;  %v738_v49 = vadd.f32 %v718_v47, %v698_v45 }
 0x1ac   : > { %v721_v50 = vpop.xlane.xlu0 %720 }
 0x1ad   : > { %746 = vst.msk [vmem:[%s1234_s15 + $0x8] sm:$0xff] %vm259_vm1, %v738_v49  ;;  %v739_v52 = vadd.f32 %v721_v50, %v699_v48 }
 0x1ae   : > { %v724_v53 = vpop.xlane.xlu1 %723 }
 0x1af   : > { %747 = vst.msk [vmem:[%s1234_s15 + $0x10] sm:$0xff] %vm259_vm1, %v739_v52  ;;  %v740_v55 = vadd.f32 %v724_v53, %v700_v51 }
 0x1b0   : > { %v676_v56 = vpop.xlane.xlu0 %675 }
 0x1b1   : > { %748 = vst.msk [vmem:[%s1234_s15 + $0x18] sm:$0xff] %vm259_vm1, %v740_v55  ;;  %v686_v58 = vadd.f32 %v676_v56, %v654_v54 }
 0x1b2   : > { %v679_v59 = vpop.xlane.xlu1 %678 }
 0x1b3   : > { %695 = vst.msk [vmem:[%s1228_s28 + $0x30] sm:$0xff] %vm259_vm1, %v686_v58  ;;  %v687_v61 = vadd.f32 %v679_v59, %v655_v57 }
 0x1b4   : > { %v670_v62 = vpop.xlane.xlu0 %669 }
 0x1b5   : > { %696 = vst.msk [vmem:[%s1228_s28 + $0x38] sm:$0xff] %vm259_vm1, %v687_v61  ;;  %v684_v0 = vadd.f32 %v670_v62, %v652_v60 }
 0x1b6   : > { %v673_v1 = vpop.xlane.xlu1 %672 }
 0x1b7   : > { %693 = vst.msk [vmem:[%s1228_s28 + $0x20] sm:$0xff] %vm259_vm1, %v684_v0  ;;  %v685_v3 = vadd.f32 %v673_v1, %v653_v63 }
 0x1b8   : > { %v727_v4 = vpop.xlane.xlu0 %726 }
 0x1b9   : > { %694 = vst.msk [vmem:[%s1228_s28 + $0x28] sm:$0xff] %vm259_vm1, %v685_v3  ;;  %v741_v6 = vadd.f32 %v727_v4, %v701_v2 }
 0x1ba   : > { %v730_v7 = vpop.xlane.xlu1 %729 }
 0x1bb   : > { %749 = vst.msk [vmem:[%s1234_s15 + $0x20] sm:$0xff] %vm259_vm1, %v741_v6  ;;  %v742_v9 = vadd.f32 %v730_v7, %v702_v5 }
 0x1bc   : > { %v733_v10 = vpop.xlane.xlu0 %732 }
 0x1bd   : > { %750 = vst.msk [vmem:[%s1234_s15 + $0x28] sm:$0xff] %vm259_vm1, %v742_v9  ;;  %v743_v12 = vadd.f32 %v733_v10, %v703_v8 }
 0x1be   : > { %v736_v13 = vpop.xlane.xlu1 %735 }
 0x1bf   : > { %751 = vst.msk [vmem:[%s1234_s15 + $0x30] sm:$0xff] %vm259_vm1, %v743_v12  ;;  %v744_v14 = vadd.f32 %v736_v13, %v704_v11 }
 0x1c1   : > { %752 = vst.msk [vmem:[%s1234_s15 + $0x38] sm:$0xff] %vm259_vm1, %v744_v14 }
 0x1c2 PF: > { %s15_s17 = sadd.s32 1, %s1109_s17   ;;  %s1368_s15 = smov %s1105_s16 }
 0x1c3   : > { %p12_p5 = scmp.ge.s32.totalorder %s15_s17, 4   ;;  %s1369_s16 = smov %s1371_s18 }
 0x1c5   :  { %14 = sbr.rel (!%p12_p5) target bundleno = 2 (0x2), region = 86 }

// kernel: stylenet_forward.34
= control target key start
LH: loop header
LB: loop body
LE: loop exit
PB: predicated region body
PF: predicated region fallthrough
CT: control target
= control target key end

     0   :  { %s625_s12 = smov 0   ;;  %s627_s13 = smov 0   ;;  %s701_s0 = inlined_call_operand.vmem [shape: f32[2,64,64], index: 0, kind: input, shape index: {}]   ;;  %s702_s1 = inlined_call_operand.vmem [shape: f32[2,64,1], index: 1, kind: input, shape index: {}]   ;;  %s703_s2 = inlined_call_operand.vmem [shape: f32[2,64,1], index: 2, kind: input, shape index: {}]   ;;  %s704_s3 = inlined_call_operand.vmem [shape: bf16[2,64,64], index: 3, kind: output, shape index: {}]  }
   0x1   :  { %s629_s14 = smov 0  }
   0x2 LB: > { %s25_s15 = sadd.s32 1, %s598_s13  ;;  %p522_p0 = scmp.ge.s32.totalorder %s602_s14, 1  ;;  %s602_s14 = sphi %s629_s14, %s13_s14   ;;  %s598_s13 = sphi %s627_s13, %s706_s13   ;;  %s594_s12 = sphi %s625_s12, %s705_s12  }
   0x3   : > { %p27_p1 = scmp.ge.s32.totalorder %s25_s15, 2  ;;  %p176_p2 = scmp.lt.s32.totalorder %s602_s14, 3 }
   0x5   : > { %s708_s15 = smov (%p27_p1, %s25_s15), 0  ;;  %p177_p3 = pnand %p522_p0, %p176_p2 }
   0x6   : > { %p216_p4 = scmp.lt.s32.totalorder (!%p177_p3), %s594_s12, 1  ;;  %v604_v0 = vmov (!%p177_p3), 0   ;;  %vm402_vm0 = vcmask (!%p177_p3), 519168  }
   0x7   : > { %180 = sbr.rel (%p177_p3) target bundleno = 181 (0xb5), region = 32  ;;  %579 = vset.pattern.permute.xlu1 (!%p177_p3), %v604_v0  ;;  %578 = vset.pattern.permute.xlu0 (!%p177_p3), %v604_v0 }
   0xe   : > { %s710_s12 = smov (!%p216_p4, %s594_s12), 1 }
   0xf   : > { %s646_s16 = sshll.u32 %s710_s12, 6  ;;  %s544_s26 = sshll.u32 %s710_s12, 5 }
  0x10   : > { %s228_s19 = scalar_lea.vmem %s702_s1, %s646_s16  ;;  %s233_s22 = scalar_lea.vmem %s703_s2, %s646_s16 }
  0x11   : > { %v252_v1 = vld [vmem:[%s228_s19 + $0x10] sm:$0xff]  ;;  %v250_v2 = vld [vmem:[%s228_s19] sm:$0xff]  ;;  %v253_v3 = vld [vmem:[%s228_s19 + $0x18] sm:$0xff]  ;;  %s660_s25 = scalar_lea.vmem %s701_s0, %s646_s16  ;;  %s672_s29 = scalar_lea.vmem %s704_s3, %s544_s26 }
  0x12   : > { %270 = vperm.xlu1 %579, %v252_v1   ;;  %260 = vperm.xlu0 %578, %v250_v2   ;;  %v251_v4 = vld [vmem:[%s228_s19 + $0x8] sm:$0xff]  ;;  %v254_v6 = vld [vmem:[%s228_s19 + $0x20] sm:$0xff]  ;;  %v257_v7 = vld [vmem:[%s228_s19 + $0x38] sm:$0xff] }
  0x13   : > { %v255_v5 = vld [vmem:[%s228_s19 + $0x28] sm:$0xff]  ;;  %v256_v8 = vld [vmem:[%s228_s19 + $0x30] sm:$0xff]  ;;  %v306_v10 = vld [vmem:[%s233_s22] sm:$0xff] }
  0x14   : > { %v307_v9 = vld [vmem:[%s233_s22 + $0x8] sm:$0xff]  ;;  %v309_v11 = vld [vmem:[%s233_s22 + $0x18] sm:$0xff]  ;;  %v308_v12 = vld [vmem:[%s233_s22 + $0x10] sm:$0xff] }
  0x15   : > { %v311_v13 = vld [vmem:[%s233_s22 + $0x28] sm:$0xff]  ;;  %v310_v14 = vld [vmem:[%s233_s22 + $0x20] sm:$0xff]  ;;  %v313_v15 = vld [vmem:[%s233_s22 + $0x38] sm:$0xff] }
  0x16   : > { %275 = vperm.xlu1 %579, %v253_v3   ;;  %265 = vperm.xlu0 %578, %v251_v4   ;;  %v312_v16 = vld [vmem:[%s233_s22 + $0x30] sm:$0xff]  ;;  %v242_v23 = vld [vmem:[%s660_s25] sm:$0xff]  ;;  %v243_v24 = vld [vmem:[%s660_s25 + $0x8] sm:$0xff] }
  0x17   : > { %v244_v29 = vld [vmem:[%s660_s25 + $0x10] sm:$0xff]  ;;  %v245_v30 = vld [vmem:[%s660_s25 + $0x18] sm:$0xff]  ;;  %v247_v39 = vld [vmem:[%s660_s25 + $0x28] sm:$0xff] }
  0x18   : > { %v246_v40 = vld [vmem:[%s660_s25 + $0x20] sm:$0xff]  ;;  %v249_v51 = vld [vmem:[%s660_s25 + $0x38] sm:$0xff]  ;;  %v248_v52 = vld [vmem:[%s660_s25 + $0x30] sm:$0xff] }
  0x1a   : > { %285 = vperm.xlu1 %579, %v255_v5   ;;  %280 = vperm.xlu0 %578, %v254_v6  }
  0x1e   : > { %295 = vperm.xlu1 %579, %v257_v7   ;;  %290 = vperm.xlu0 %578, %v256_v8  }
  0x22   : > { %321 = vperm.xlu1 %579, %v307_v9   ;;  %316 = vperm.xlu0 %578, %v306_v10  }
  0x26   : > { %331 = vperm.xlu1 %579, %v309_v11   ;;  %326 = vperm.xlu0 %578, %v308_v12  }
  0x2a   : > { %341 = vperm.xlu1 %579, %v311_v13   ;;  %336 = vperm.xlu0 %578, %v310_v14  }
  0x2e   : > { %351 = vperm.xlu1 %579, %v313_v15   ;;  %346 = vperm.xlu0 %578, %v312_v16  }
  0x91   : > { %v271_v17 = vpop.permute.xlu1 %270  ;;  %v261_v18 = vpop.permute.xlu0 %260 }
  0x92   : > { %v298_v27 = vmul.f32 %v261_v18, %v242_v23  ;;  %v300_v35 = vmul.f32 %v271_v17, %v244_v29 }
  0x95   : > { %v276_v19 = vpop.permute.xlu1 %275  ;;  %v266_v20 = vpop.permute.xlu0 %265 }
  0x96   : > { %v299_v28 = vmul.f32 %v266_v20, %v243_v24  ;;  %v301_v36 = vmul.f32 %v276_v19, %v245_v30 }
  0x99   : > { %v286_v21 = vpop.permute.xlu1 %285  ;;  %v281_v22 = vpop.permute.xlu0 %280 }
  0x9a   : > { %v303_v47 = vmul.f32 %v286_v21, %v247_v39  ;;  %v302_v48 = vmul.f32 %v281_v22, %v246_v40 }
  0x9d   : > { %v296_v25 = vpop.permute.xlu1 %295  ;;  %v291_v26 = vpop.permute.xlu0 %290 }
  0x9e   : > { %v305_v59 = vmul.f32 %v296_v25, %v249_v51  ;;  %v304_v60 = vmul.f32 %v291_v26, %v248_v52 }
  0xa1   : > { %v322_v31 = vpop.permute.xlu1 %321  ;;  %v317_v32 = vpop.permute.xlu0 %316 }
  0xa2   : > { %v355_v33 = vadd.f32 %v322_v31, %v299_v28  ;;  %v354_v34 = vadd.f32 %v317_v32, %v298_v27 }
  0xa4   : > { %v363_v37 = vmax.f32 %v355_v33, 0.0  ;;  %v362_v38 = vmax.f32 %v354_v34, 0.0 }
  0xa5   : > { %v332_v41 = vpop.permute.xlu1 %331  ;;  %v327_v42 = vpop.permute.xlu0 %326 }
  0xa6   : > { %v546_v43 = vpack.c.bf16 %v363_v37, %v363_v37  ;;  %v545_v44 = vpack.c.bf16 %v362_v38, %v362_v38  ;;  %v357_v45 = vadd.f32 %v332_v41, %v301_v36  ;;  %v356_v46 = vadd.f32 %v327_v42, %v300_v35 }
  0xa8   : > { %404 = vst.msk [vmem:[%s672_s29 + $0x4] sm:$0xf] %vm402_vm0, %v546_v43  ;;  %403 = vst.msk [vmem:[%s672_s29] sm:$0xf] %vm402_vm0, %v545_v44  ;;  %v365_v49 = vmax.f32 %v357_v45, 0.0  ;;  %v364_v50 = vmax.f32 %v356_v46, 0.0 }
  0xa9   : > { %v342_v53 = vpop.permute.xlu1 %341  ;;  %v337_v54 = vpop.permute.xlu0 %336 }
  0xaa   : > { %v548_v55 = vpack.c.bf16 %v365_v49, %v365_v49  ;;  %v547_v56 = vpack.c.bf16 %v364_v50, %v364_v50  ;;  %v359_v57 = vadd.f32 %v342_v53, %v303_v47  ;;  %v358_v58 = vadd.f32 %v337_v54, %v302_v48 }
  0xac   : > { %406 = vst.msk [vmem:[%s672_s29 + $0xc] sm:$0xf] %vm402_vm0, %v548_v55  ;;  %405 = vst.msk [vmem:[%s672_s29 + $0x8] sm:$0xf] %vm402_vm0, %v547_v56  ;;  %v367_v61 = vmax.f32 %v359_v57, 0.0  ;;  %v366_v62 = vmax.f32 %v358_v58, 0.0 }
  0xad   : > { %v352_v63 = vpop.permute.xlu1 %351  ;;  %v347_v0 = vpop.permute.xlu0 %346 }
  0xae   : > { %v550_v1 = vpack.c.bf16 %v367_v61, %v367_v61  ;;  %v549_v2 = vpack.c.bf16 %v366_v62, %v366_v62  ;;  %v361_v3 = vadd.f32 %v352_v63, %v305_v59  ;;  %v360_v4 = vadd.f32 %v347_v0, %v304_v60 }
  0xb0   : > { %408 = vst.msk [vmem:[%s672_s29 + $0x14] sm:$0xf] %vm402_vm0, %v550_v1  ;;  %407 = vst.msk [vmem:[%s672_s29 + $0x10] sm:$0xf] %vm402_vm0, %v549_v2  ;;  %v369_v5 = vmax.f32 %v361_v3, 0.0  ;;  %v368_v6 = vmax.f32 %v360_v4, 0.0 }
  0xb2   : > { %v552_v7 = vpack.c.bf16 %v369_v5, %v369_v5  ;;  %v551_v8 = vpack.c.bf16 %v368_v6, %v368_v6 }
  0xb4   : > { %410 = vst.msk [vmem:[%s672_s29 + $0x1c] sm:$0xf] %vm402_vm0, %v552_v7  ;;  %409 = vst.msk [vmem:[%s672_s29 + $0x18] sm:$0xf] %vm402_vm0, %v551_v8 }
  0xb5 PF: > { %s13_s14 = sadd.s32 1, %s602_s14   ;;  %s705_s12 = smov %s598_s13 }
  0xb6   : > { %p10_p5 = scmp.ge.s32.totalorder %s13_s14, 4   ;;  %s706_s13 = smov %s708_s15 }
  0xb8   :  { %12 = sbr.rel (!%p10_p5) target bundleno = 2 (0x2), region = 68 }

// kernel: stylenet_forward.35
= control target key start
LH: loop header
LB: loop body
LE: loop exit
PB: predicated region body
PF: predicated region fallthrough
CT: control target
= control target key end

     0   :  { %s1960_s15 = smov 0   ;;  %s1962_s16 = smov 0   ;;  %s2476_s0 = inlined_call_operand.vmem [shape: bf16[2,576,16], index: 0, kind: input, shape index: {}]   ;;  %s2477_s1 = inlined_call_operand.vmem [shape: bf16[128,576], index: 1, kind: input, shape index: {}]   ;;  %s2478_s2 = inlined_call_operand.vmem [shape: f32[2,128,16], index: 2, kind: output, shape index: {0}]   ;;  %s2479_s3 = inlined_call_operand.vmem [shape: f32[2,128,1], index: 3, kind: output, shape index: {1}]   ;;  %s2480_s4 = inlined_call_operand.vmem [shape: f32[2,128,1], index: 4, kind: output, shape index: {2}]  }
   0x1   :  { %s1964_s17 = smov 0  }
   0x2 LB: > { %s27_s18 = sadd.s32 1, %s1928_s16  ;;  %p1523_p0 = scmp.ge.s32.totalorder %s1932_s17, 1  ;;  %s1932_s17 = sphi %s1964_s17, %s15_s17   ;;  %s1928_s16 = sphi %s1962_s16, %s2482_s16   ;;  %s1924_s15 = sphi %s1960_s15, %s2481_s15  }
   0x3   : > { %p29_p1 = scmp.ge.s32.totalorder %s27_s18, 2  ;;  %p186_p2 = scmp.lt.s32.totalorder %s1932_s17, 3 }
   0x5   : > { %s2484_s18 = smov (%p29_p1, %s27_s18), 0  ;;  %p187_p3 = pnand %p1523_p0, %p186_p2 }
   0x6   : > { %p228_p4 = scmp.lt.s32.totalorder (!%p187_p3), %s1924_s15, 1  ;;  %v1852_v0 = vld [vmem:[%s2477_s1 + $0x4] ss:$20 sps:$4 sm:$0xff] (!%p187_p3)   ;;  %v1855_v1 = vld [vmem:[%s2477_s1 + $0xc] ss:$20 sps:$4 sm:$0xff] (!%p187_p3)   ;;  %vm828_vm0 = vcmask (!%p187_p3), 523264  }
   0x7   : > { %190 = sbr.rel (%p187_p3) target bundleno = 537 (0x219), region = 28  ;;  %885 = vmatprep.mubr.bf16.mxu0 (!%p187_p3), %v1852_v0  ;;  %982 = vmatprep.mubr.bf16.mxu1 (!%p187_p3), %v1855_v1  ;;  %v1850_v32 = vld [vmem:[%s2477_s1] ss:$20 sps:$4 sm:$0xff] (!%p187_p3)   ;;  %v1853_v34 = vld [vmem:[%s2477_s1 + $0x8] ss:$20 sps:$4 sm:$0xff] (!%p187_p3)   ;;  %vm259_vm1 = vcmask (!%p187_p3), 7168  }
   0x8   : > { %v1857_v37 = vld [vmem:[%s2477_s1 + $0x2c] ss:$20 sps:$4 sm:$0xff] (!%p187_p3)   ;;  %v1859_v38 = vld [vmem:[%s2477_s1 + $0x34] ss:$20 sps:$4 sm:$0xff] (!%p187_p3)   ;;  %v1862_v41 = vld [vmem:[%s2477_s1 + $0x30] ss:$20 sps:$4 sm:$0xff] (!%p187_p3)  }
   0x9   : > { %v1861_v40 = vld [vmem:[%s2477_s1 + $0x28] ss:$20 sps:$4 sm:$0xff] (!%p187_p3)   ;;  %v1867_v45 = vld [vmem:[%s2477_s1 + $0x50] ss:$20 sps:$4 sm:$0xff] (!%p187_p3)   ;;  %v1868_v46 = vld [vmem:[%s2477_s1 + $0x58] ss:$20 sps:$4 sm:$0xff] (!%p187_p3)  }
   0xa   : > { %v1863_v42 = vld [vmem:[%s2477_s1 + $0x54] ss:$20 sps:$4 sm:$0xff] (!%p187_p3)   ;;  %v1865_v43 = vld [vmem:[%s2477_s1 + $0x5c] ss:$20 sps:$4 sm:$0xff] (!%p187_p3)   ;;  %v1872_v49 = vld [vmem:[%s2477_s1 + $0x84] ss:$20 sps:$4 sm:$0xff] (!%p187_p3)  }
   0xb   : > { %v1870_v48 = vld [vmem:[%s2477_s1 + $0x7c] ss:$20 sps:$4 sm:$0xff] (!%p187_p3)   ;;  %v1874_v50 = vld [vmem:[%s2477_s1 + $0x78] ss:$20 sps:$4 sm:$0xff] (!%p187_p3)   ;;  %v1875_v51 = vld [vmem:[%s2477_s1 + $0x80] ss:$20 sps:$4 sm:$0xff] (!%p187_p3)  }
   0xc   : > { %v1876_v52 = vld [vmem:[%s2477_s1 + $0xa4] ss:$20 sps:$4 sm:$0xff] (!%p187_p3)   ;;  %v1878_v53 = vld [vmem:[%s2477_s1 + $0xac] ss:$20 sps:$4 sm:$0xff] (!%p187_p3)   ;;  %v1881_v55 = vld [vmem:[%s2477_s1 + $0xa8] ss:$20 sps:$4 sm:$0xff] (!%p187_p3)  }
   0xd   : > { %v1880_v54 = vld [vmem:[%s2477_s1 + $0xa0] ss:$20 sps:$4 sm:$0xff] (!%p187_p3)   ;;  %v1887_v58 = vld [vmem:[%s2477_s1 + $0xc8] ss:$20 sps:$4 sm:$0xff] (!%p187_p3)   ;;  %v1888_v59 = vld [vmem:[%s2477_s1 + $0xd0] ss:$20 sps:$4 sm:$0xff] (!%p187_p3)  }
   0xe   : > { %s2486_s15 = smov (!%p228_p4, %s1924_s15), 1  ;;  %v1883_v56 = vld [vmem:[%s2477_s1 + $0xcc] ss:$20 sps:$4 sm:$0xff]   ;;  %v1885_v57 = vld [vmem:[%s2477_s1 + $0xd4] ss:$20 sps:$4 sm:$0xff]   ;;  %vm1144_vm2 = vcmask 130048  }
   0xf   : > { %s1792_s23 = smul.u32 288, %s2486_s15  ;;  %v1889_v60 = vld [vmem:[%s2477_s1 + $0xf4] ss:$20 sps:$4 sm:$0xff]   ;;  %v1891_v61 = vld [vmem:[%s2477_s1 + $0xfc] ss:$20 sps:$4 sm:$0xff]   ;;  %s2151_s11 = sshll.u32 %s2486_s15, 7 }
  0x10   : > { %v1893_v62 = vld [vmem:[%s2477_s1 + $0xf0] ss:$20 sps:$4 sm:$0xff]   ;;  %v1894_v63 = vld [vmem:[%s2477_s1 + $0xf8] ss:$20 sps:$4 sm:$0xff]   ;;  %s2157_s14 = scalar_lea.vmem %s2479_s3, %s2151_s11  ;;  %s2163_s21 = scalar_lea.vmem %s2480_s4, %s2151_s11 }
  0x11   : > { %s1990_s26 = scalar_lea.vmem %s2476_s0, %s1792_s23  ;;  %v1896_v0 = vld [vmem:[%s2477_s1 + $0x11c] ss:$20 sps:$4 sm:$0xff]   ;;  %v1898_v1 = vld [vmem:[%s2477_s1 + $0x124] ss:$20 sps:$4 sm:$0xff]   ;;  %s2253_s23 = scalar_lea.vmem %s2478_s2, %s2151_s11 }
  0x12   : > { %v1818_v2 = vld [vmem:[%s1990_s26 + $0x40] sm:$0xff]   ;;  %v1822_v6 = vld [vmem:[%s1990_s26 + $0x48] sm:$0xff]   ;;  %v1826_v10 = vld [vmem:[%s1990_s26 + $0x50] sm:$0xff]  }
  0x13   : > { %v1819_v3 = vld [vmem:[%s1990_s26 + $0xc0] sm:$0xff]   ;;  %1620 = vmatprep.subr.bf16.mxu0 %v1818_v2  ;;  %v1823_v7 = vld [vmem:[%s1990_s26 + $0xc8] sm:$0xff]   ;;  %v1827_v11 = vld [vmem:[%s1990_s26 + $0xd0] sm:$0xff]  }
  0x14   : > { %v1820_v4 = vld [vmem:[%s1990_s26] sm:$0xff]   ;;  %1684 = vmatprep.subr.bf16.mxu1 %v1819_v3  ;;  %v1824_v8 = vld [vmem:[%s1990_s26 + $0x8] sm:$0xff]   ;;  %v1828_v12 = vld [vmem:[%s1990_s26 + $0x10] sm:$0xff]  }
  0x15   : > { %v1821_v5 = vld [vmem:[%s1990_s26 + $0x80] sm:$0xff]   ;;  %1621 = vmatpush3.bf16.msra.mxu0 %v1820_v4  ;;  %v1825_v9 = vld [vmem:[%s1990_s26 + $0x88] sm:$0xff]   ;;  %v1829_v13 = vld [vmem:[%s1990_s26 + $0x90] sm:$0xff]  }
  0x16   : > { %1685 = vmatpush3.bf16.msra.mxu1 %v1821_v5  ;;  %1622 = vmatprep.subr.bf16.mxu0 %v1822_v6  ;;  %v1830_v14 = vld [vmem:[%s1990_s26 + $0x58] sm:$0xff]   ;;  %v1834_v18 = vld [vmem:[%s1990_s26 + $0x60] sm:$0xff]   ;;  %v1838_v22 = vld [vmem:[%s1990_s26 + $0x68] sm:$0xff]  }
  0x17   : > { %1686 = vmatprep.subr.bf16.mxu1 %v1823_v7  ;;  %v1831_v15 = vld [vmem:[%s1990_s26 + $0xd8] sm:$0xff]   ;;  %v1835_v19 = vld [vmem:[%s1990_s26 + $0xe0] sm:$0xff]   ;;  %v1839_v23 = vld [vmem:[%s1990_s26 + $0xe8] sm:$0xff]  }
  0x18   : > { %v1832_v16 = vld [vmem:[%s1990_s26 + $0x18] sm:$0xff]   ;;  %v1836_v20 = vld [vmem:[%s1990_s26 + $0x20] sm:$0xff]   ;;  %v1840_v24 = vld [vmem:[%s1990_s26 + $0x28] sm:$0xff]  }
  0x19   : > { %1623 = vmatpush3.bf16.msra.mxu0 %v1824_v8  ;;  %v1833_v17 = vld [vmem:[%s1990_s26 + $0x98] sm:$0xff]   ;;  %v1837_v21 = vld [vmem:[%s1990_s26 + $0xa0] sm:$0xff]   ;;  %v1841_v25 = vld [vmem:[%s1990_s26 + $0xa8] sm:$0xff]  }
  0x1a   : > { %1687 = vmatpush3.bf16.msra.mxu1 %v1825_v9  ;;  %1624 = vmatprep.subr.bf16.mxu0 %v1826_v10  ;;  %v1842_v26 = vld [vmem:[%s1990_s26 + $0x70] sm:$0xff]   ;;  %v1846_v30 = vld [vmem:[%s1990_s26 + $0x78] sm:$0xff]   ;;  %v1856_v36 = vld [vmem:[%s1990_s26 + $0x100] sm:$0xff]  }
  0x1b   : > { %1688 = vmatprep.subr.bf16.mxu1 %v1827_v11  ;;  %v1843_v27 = vld [vmem:[%s1990_s26 + $0xf0] sm:$0xff]   ;;  %v1847_v31 = vld [vmem:[%s1990_s26 + $0xf8] sm:$0xff]   ;;  %v1869_v39 = vld [vmem:[%s1990_s26 + $0x108] sm:$0xff]  }
  0x1c   : > { %v1844_v28 = vld [vmem:[%s1990_s26 + $0x30] sm:$0xff]   ;;  %v1848_v33 = vld [vmem:[%s1990_s26 + $0x38] sm:$0xff]  }
  0x1d   : > { %1625 = vmatpush3.bf16.msra.mxu0 %v1828_v12  ;;  %v1845_v29 = vld [vmem:[%s1990_s26 + $0xb0] sm:$0xff]   ;;  %v1849_v35 = vld [vmem:[%s1990_s26 + $0xb8] sm:$0xff]  }
  0x1e   : > { %1689 = vmatpush3.bf16.msra.mxu1 %v1829_v13  ;;  %1626 = vmatprep.subr.bf16.mxu0 %v1830_v14  ;;  %v1882_v44 = vld [vmem:[%s1990_s26 + $0x110] sm:$0xff]   ;;  %v1895_v47 = vld [vmem:[%s1990_s26 + $0x118] sm:$0xff]  }
  0x1f   : > { %1690 = vmatprep.subr.bf16.mxu1 %v1831_v15  ;;  %v1900_v2 = vld [vmem:[%s2477_s1 + $0x118] ss:$20 sps:$4 sm:$0xff]   ;;  %v1901_v3 = vld [vmem:[%s2477_s1 + $0x120] ss:$20 sps:$4 sm:$0xff]   ;;  %v1902_v4 = vld [vmem:[%s2477_s1 + $0x10] ss:$20 sps:$4 sm:$0xff]  }
  0x20   : > { %v1903_v5 = vld [vmem:[%s2477_s1 + $0xb0] ss:$20 sps:$4 sm:$0xff]   ;;  %v1904_v6 = vld [vmem:[%s2477_s1 + $0x38] ss:$20 sps:$4 sm:$0xff]   ;;  %v1906_v8 = vld [vmem:[%s2477_s1 + $0x60] ss:$20 sps:$4 sm:$0xff]  }
  0x21   : > { %1627 = vmatpush3.bf16.msra.mxu0 %v1832_v16  ;;  %v1905_v7 = vld [vmem:[%s2477_s1 + $0xd8] ss:$20 sps:$4 sm:$0xff]   ;;  %v1907_v9 = vld [vmem:[%s2477_s1 + $0x100] ss:$20 sps:$4 sm:$0xff]   ;;  %v1908_v10 = vld [vmem:[%s2477_s1 + $0x88] ss:$20 sps:$4 sm:$0xff]  }
  0x22   : > { %1691 = vmatpush3.bf16.msra.mxu1 %v1833_v17  ;;  %1628 = vmatprep.subr.bf16.mxu0 %v1834_v18  ;;  %v1909_v11 = vld [vmem:[%s2477_s1 + $0x128] ss:$20 sps:$4 sm:$0xff]   ;;  %v1934_v18 = vmov 0.0  }
  0x23   : > { %1692 = vmatprep.subr.bf16.mxu1 %v1835_v19  ;;  %270 = vst.msk [vmem:[%s2157_s14 + $0x50] sm:$0xff] %vm259_vm1, %v1934_v18  ;;  %260 = vst.msk [vmem:[%s2157_s14] sm:$0xff] %vm259_vm1, %v1934_v18 }
  0x24   : > { %261 = vst.msk [vmem:[%s2157_s14 + $0x8] sm:$0xff] %vm259_vm1, %v1934_v18  ;;  %262 = vst.msk [vmem:[%s2157_s14 + $0x10] sm:$0xff] %vm259_vm1, %v1934_v18 }
  0x25   : > { %1629 = vmatpush3.bf16.msra.mxu0 %v1836_v20  ;;  %263 = vst.msk [vmem:[%s2157_s14 + $0x18] sm:$0xff] %vm259_vm1, %v1934_v18  ;;  %264 = vst.msk [vmem:[%s2157_s14 + $0x20] sm:$0xff] %vm259_vm1, %v1934_v18 }
  0x26   : > { %1693 = vmatpush3.bf16.msra.mxu1 %v1837_v21  ;;  %1630 = vmatprep.subr.bf16.mxu0 %v1838_v22  ;;  %265 = vst.msk [vmem:[%s2157_s14 + $0x28] sm:$0xff] %vm259_vm1, %v1934_v18  ;;  %266 = vst.msk [vmem:[%s2157_s14 + $0x30] sm:$0xff] %vm259_vm1, %v1934_v18 }
  0x27   : > { %1694 = vmatprep.subr.bf16.mxu1 %v1839_v23  ;;  %267 = vst.msk [vmem:[%s2157_s14 + $0x38] sm:$0xff] %vm259_vm1, %v1934_v18  ;;  %268 = vst.msk [vmem:[%s2157_s14 + $0x40] sm:$0xff] %vm259_vm1, %v1934_v18 }
  0x28   : > { %269 = vst.msk [vmem:[%s2157_s14 + $0x48] sm:$0xff] %vm259_vm1, %v1934_v18  ;;  %271 = vst.msk [vmem:[%s2157_s14 + $0x58] sm:$0xff] %vm259_vm1, %v1934_v18 }
  0x29   : > { %1631 = vmatpush3.bf16.msra.mxu0 %v1840_v24  ;;  %272 = vst.msk [vmem:[%s2157_s14 + $0x60] sm:$0xff] %vm259_vm1, %v1934_v18  ;;  %273 = vst.msk [vmem:[%s2157_s14 + $0x68] sm:$0xff] %vm259_vm1, %v1934_v18 }
  0x2a   : > { %1695 = vmatpush3.bf16.msra.mxu1 %v1841_v25  ;;  %1632 = vmatprep.subr.bf16.mxu0 %v1842_v26  ;;  %274 = vst.msk [vmem:[%s2157_s14 + $0x70] sm:$0xff] %vm259_vm1, %v1934_v18  ;;  %275 = vst.msk [vmem:[%s2157_s14 + $0x78] sm:$0xff] %vm259_vm1, %v1934_v18 }
  0x2b   : > { %1696 = vmatprep.subr.bf16.mxu1 %v1843_v27  ;;  %276 = vst.msk [vmem:[%s2163_s21] sm:$0xff] %vm259_vm1, %v1934_v18  ;;  %277 = vst.msk [vmem:[%s2163_s21 + $0x8] sm:$0xff] %vm259_vm1, %v1934_v18 }
  0x2c   : > { %278 = vst.msk [vmem:[%s2163_s21 + $0x10] sm:$0xff] %vm259_vm1, %v1934_v18  ;;  %279 = vst.msk [vmem:[%s2163_s21 + $0x18] sm:$0xff] %vm259_vm1, %v1934_v18 }
  0x2d   : > { %1633 = vmatpush3.bf16.msra.mxu0 %v1844_v28  ;;  %280 = vst.msk [vmem:[%s2163_s21 + $0x20] sm:$0xff] %vm259_vm1, %v1934_v18  ;;  %281 = vst.msk [vmem:[%s2163_s21 + $0x28] sm:$0xff] %vm259_vm1, %v1934_v18 }
  0x2e   : > { %1697 = vmatpush3.bf16.msra.mxu1 %v1845_v29  ;;  %1634 = vmatprep.subr.bf16.mxu0 %v1846_v30  ;;  %282 = vst.msk [vmem:[%s2163_s21 + $0x30] sm:$0xff] %vm259_vm1, %v1934_v18  ;;  %283 = vst.msk [vmem:[%s2163_s21 + $0x38] sm:$0xff] %vm259_vm1, %v1934_v18 }
  0x2f   : > { %1698 = vmatprep.subr.bf16.mxu1 %v1847_v31  ;;  %284 = vst.msk [vmem:[%s2163_s21 + $0x40] sm:$0xff] %vm259_vm1, %v1934_v18  ;;  %285 = vst.msk [vmem:[%s2163_s21 + $0x48] sm:$0xff] %vm259_vm1, %v1934_v18 }
  0x30   : > { %286 = vst.msk [vmem:[%s2163_s21 + $0x50] sm:$0xff] %vm259_vm1, %v1934_v18  ;;  %287 = vst.msk [vmem:[%s2163_s21 + $0x58] sm:$0xff] %vm259_vm1, %v1934_v18 }
  0x31   : > { %1635 = vmatpush3.bf16.msra.mxu0 %v1848_v33  ;;  %288 = vst.msk [vmem:[%s2163_s21 + $0x60] sm:$0xff] %vm259_vm1, %v1934_v18  ;;  %289 = vst.msk [vmem:[%s2163_s21 + $0x68] sm:$0xff] %vm259_vm1, %v1934_v18 }
  0x32   : > { %1699 = vmatpush3.bf16.msra.mxu1 %v1849_v35  ;;  %1760 = vmatprep.subr.bf16.mxu0 %v1856_v36  ;;  %290 = vst.msk [vmem:[%s2163_s21 + $0x70] sm:$0xff] %vm259_vm1, %v1934_v18  ;;  %291 = vst.msk [vmem:[%s2163_s21 + $0x78] sm:$0xff] %vm259_vm1, %v1934_v18 }
  0x33   : > { %1784 = vmatprep.subr.bf16.mxu1 %v1856_v36 }
  0x34   : > { %886 = vmatmul.mubr.bf16.vlgmr.msra.gmra.mrb[0].mxu0 %v1850_v32 }
  0x35   : > { %983 = vmatmul.mubr.bf16.vlgmr.msra.gmra.mrb[0].mxu1 %v1853_v34  ;;  %1761 = vmatpush3.bf16.msra.mxu0 %v1856_v36 }
  0x36   : > { %1788 = vmatpush3.bf16.msra.mxu1 %v1856_v36  ;;  %893 = vmatprep.mubr.bf16.mxu0 %v1857_v37 }
  0x37   : > { %990 = vmatprep.mubr.bf16.mxu1 %v1859_v38  ;;  %1762 = vmatprep.subr.bf16.mxu0 %v1869_v39 }
  0x38   : > { %1785 = vmatprep.subr.bf16.mxu1 %v1869_v39 }
  0x39   : > { %1763 = vmatpush3.bf16.msra.mxu0 %v1869_v39 }
  0x3a   : > { %1789 = vmatpush3.bf16.msra.mxu1 %v1869_v39  ;;  %1764 = vmatprep.subr.bf16.mxu0 %v1882_v44 }
  0x3b   : > { %1786 = vmatprep.subr.bf16.mxu1 %v1882_v44 }
  0x3c   : > { %894 = vmatmul.mubr.bf16.gmra.mrb[4].mxu0 %v1861_v40 }
  0x3d   : > { %991 = vmatmul.mubr.bf16.gmra.mrb[4].mxu1 %v1862_v41  ;;  %901 = vmatprep.mubr.bf16.mxu0 %v1863_v42 }
  0x3e   : > { %998 = vmatprep.mubr.bf16.mxu1 %v1865_v43  ;;  %1765 = vmatpush3.bf16.msra.mxu0 %v1882_v44 }
  0x3f   : > { %1790 = vmatpush3.bf16.msra.mxu1 %v1882_v44  ;;  %1766 = vmatprep.subr.bf16.mxu0 %v1895_v47 }
  0x40   : > { %1787 = vmatprep.subr.bf16.mxu1 %v1895_v47 }
  0x42   : > { %1767 = vmatpush3.bf16.msra.mxu0 %v1895_v47 }
  0x43   : > { %1791 = vmatpush3.bf16.msra.mxu1 %v1895_v47 }
  0x44   : > { %902 = vmatmul.mubr.bf16.gmra.mrb[8].mxu0 %v1867_v45 }
  0x45   : > { %999 = vmatmul.mubr.bf16.gmra.mrb[8].mxu1 %v1868_v46  ;;  %909 = vmatprep.mubr.bf16.mxu0 %v1870_v48 }
  0x46   : > { %1006 = vmatprep.mubr.bf16.mxu1 %v1872_v49 }
  0x4c   : > { %910 = vmatmul.mubr.bf16.gmra.mrb[12].mxu0 %v1874_v50 }
  0x4d   : > { %1007 = vmatmul.mubr.bf16.gmra.mrb[12].mxu1 %v1875_v51  ;;  %917 = vmatprep.mubr.bf16.mxu0 %v1876_v52 }
  0x4e   : > { %1014 = vmatprep.mubr.bf16.mxu1 %v1878_v53 }
  0x54   : > { %918 = vmatmul.mubr.bf16.gmra.mrb[16].mxu0 %v1880_v54 }
  0x55   : > { %1015 = vmatmul.mubr.bf16.gmra.mrb[16].mxu1 %v1881_v55  ;;  %925 = vmatprep.mubr.bf16.mxu0 %v1883_v56 }
  0x56   : > { %1022 = vmatprep.mubr.bf16.mxu1 %v1885_v57 }
  0x5c   : > { %926 = vmatmul.mubr.bf16.gmra.mrb[20].mxu0 %v1887_v58 }
  0x5d   : > { %1023 = vmatmul.mubr.bf16.gmra.mrb[20].mxu1 %v1888_v59  ;;  %933 = vmatprep.mubr.bf16.mxu0 %v1889_v60 }
  0x5e   : > { %1030 = vmatprep.mubr.bf16.mxu1 %v1891_v61 }
  0x64   : > { %934 = vmatmul.mubr.bf16.gmra.mrb[24].mxu0 %v1893_v62 }
  0x65   : > { %1031 = vmatmul.mubr.bf16.gmra.mrb[24].mxu1 %v1894_v63  ;;  %941 = vmatprep.mubr.bf16.mxu0 %v1896_v0 }
  0x66   : > { %1038 = vmatprep.mubr.bf16.mxu1 %v1898_v1 }
  0x6c   : > { %942 = vmatmul.mubr.bf16.gmra.mrb[28].mxu0 %v1900_v2 }
  0x6d   : > { %1039 = vmatmul.mubr.bf16.gmra.mrb[28].mxu1 %v1901_v3  ;;  %1768 = vmatprep.mubr.msk.bf16.mxu0 %vm828_vm0, %v1902_v4 }
  0x6e   : > { %1776 = vmatprep.mubr.msk.bf16.mxu1 %vm828_vm0, %v1903_v5 }
  0x74   : > { %1769 = vmatmul.mubr.msk.bf16.vlgmr.msra.gmra.mrb[32].mxu0 %vm828_vm0, %v1904_v6 }
  0x75   : > { %1777 = vmatmul.mubr.msk.bf16.vlgmr.msra.gmra.mrb[32].mxu1 %vm828_vm0, %v1905_v7  ;;  %1772 = vmatprep.mubr.msk.bf16.mxu0 %vm828_vm0, %v1906_v8 }
  0x76   : > { %1780 = vmatprep.mubr.msk.bf16.mxu1 %vm828_vm0, %v1907_v9 }
  0x7c   : > { %1773 = vmatmul.mubr.msk.bf16.gmra.mrb[36].mxu0 %vm828_vm0, %v1908_v10 }
  0x7d   : > { %1781 = vmatmul.mubr.msk.bf16.gmra.mrb[36].mxu1 %vm828_vm0, %v1909_v11 }
 0x107   : > { %v1636_v12 = vpop.f32.mrb[0].mxu0 }
 0x108   : > { %v1700_v13 = vpop.f32.mrb[0].mxu1  ;;  %v1637_v14 = vpop.f32.mrb[1].mxu0 }
 0x109   : > { %v1638_v15 = vadd.f32 %v1637_v14, %v1636_v12  ;;  %v1701_v16 = vpop.f32.mrb[1].mxu1  ;;  %v1639_v17 = vpop.f32.mrb[2].mxu0 }
 0x10a   : > { %v1702_v19 = vadd.f32 %v1701_v16, %v1700_v13  ;;  %v1703_v20 = vpop.f32.mrb[2].mxu1  ;;  %v1640_v21 = vpop.f32.mrb[3].mxu0 }
 0x10b   : > { %v1641_v22 = vadd.f32 %v1640_v21, %v1639_v17  ;;  %v1704_v23 = vpop.f32.mrb[3].mxu1 }
 0x10c   : > { %v1705_v24 = vadd.f32 %v1704_v23, %v1703_v20  ;;  %v2229_v25 = vadd.f32 %v1702_v19, %v1638_v15 }
 0x10e   : > { %v2231_v26 = vadd.f32 %v1705_v24, %v1641_v22 }
 0x10f   : > { %v1642_v27 = vpop.f32.mrb[4].mxu0 }
 0x110   : > { %v1706_v28 = vpop.f32.mrb[4].mxu1  ;;  %v1643_v29 = vpop.f32.mrb[5].mxu0 }
 0x111   : > { %v1644_v30 = vadd.f32 %v1643_v29, %v1642_v27  ;;  %v1707_v31 = vpop.f32.mrb[5].mxu1  ;;  %v1645_v32 = vpop.f32.mrb[6].mxu0 }
 0x112   : > { %v1708_v33 = vadd.f32 %v1707_v31, %v1706_v28  ;;  %v1709_v34 = vpop.f32.mrb[6].mxu1  ;;  %v1646_v35 = vpop.f32.mrb[7].mxu0 }
 0x113   : > { %v1647_v36 = vadd.f32 %v1646_v35, %v1645_v32  ;;  %v1710_v37 = vpop.f32.mrb[7].mxu1 }
 0x114   : > { %v1711_v38 = vadd.f32 %v1710_v37, %v1709_v34  ;;  %v2233_v39 = vadd.f32 %v1708_v33, %v1644_v30 }
 0x116   : > { %v2235_v40 = vadd.f32 %v1711_v38, %v1647_v36 }
 0x117   : > { %v1648_v41 = vpop.f32.mrb[8].mxu0 }
 0x118   : > { %v1712_v42 = vpop.f32.mrb[8].mxu1  ;;  %v1649_v43 = vpop.f32.mrb[9].mxu0 }
 0x119   : > { %v1650_v44 = vadd.f32 %v1649_v43, %v1648_v41  ;;  %v1713_v45 = vpop.f32.mrb[9].mxu1  ;;  %v1651_v46 = vpop.f32.mrb[10].mxu0 }
 0x11a   : > { %v1714_v47 = vadd.f32 %v1713_v45, %v1712_v42  ;;  %v1715_v48 = vpop.f32.mrb[10].mxu1  ;;  %v1652_v49 = vpop.f32.mrb[11].mxu0 }
 0x11b   : > { %v1653_v50 = vadd.f32 %v1652_v49, %v1651_v46  ;;  %v1716_v51 = vpop.f32.mrb[11].mxu1 }
 0x11c   : > { %v1717_v52 = vadd.f32 %v1716_v51, %v1715_v48  ;;  %v2237_v53 = vadd.f32 %v1714_v47, %v1650_v44 }
 0x11e   : > { %v2239_v54 = vadd.f32 %v1717_v52, %v1653_v50 }
 0x11f   : > { %v1654_v55 = vpop.f32.mrb[12].mxu0 }
 0x120   : > { %v1718_v56 = vpop.f32.mrb[12].mxu1  ;;  %v1655_v57 = vpop.f32.mrb[13].mxu0 }
 0x121   : > { %v1656_v58 = vadd.f32 %v1655_v57, %v1654_v55  ;;  %v1719_v59 = vpop.f32.mrb[13].mxu1  ;;  %v1657_v60 = vpop.f32.mrb[14].mxu0 }
 0x122   : > { %v1720_v61 = vadd.f32 %v1719_v59, %v1718_v56  ;;  %v1721_v62 = vpop.f32.mrb[14].mxu1  ;;  %v1658_v63 = vpop.f32.mrb[15].mxu0 }
 0x123   : > { %v1659_v0 = vadd.f32 %v1658_v63, %v1657_v60  ;;  %v1722_v1 = vpop.f32.mrb[15].mxu1 }
 0x124   : > { %v1723_v2 = vadd.f32 %v1722_v1, %v1721_v62  ;;  %v2241_v3 = vadd.f32 %v1720_v61, %v1656_v58 }
 0x126   : > { %v2243_v4 = vadd.f32 %v1723_v2, %v1659_v0 }
 0x127   : > { %v1660_v5 = vpop.f32.mrb[16].mxu0 }
 0x128   : > { %v1724_v6 = vpop.f32.mrb[16].mxu1  ;;  %v1661_v7 = vpop.f32.mrb[17].mxu0 }
 0x129   : > { %v1662_v8 = vadd.f32 %v1661_v7, %v1660_v5  ;;  %v1725_v9 = vpop.f32.mrb[17].mxu1  ;;  %v1663_v10 = vpop.f32.mrb[18].mxu0 }
 0x12a   : > { %v1726_v11 = vadd.f32 %v1725_v9, %v1724_v6  ;;  %v1727_v12 = vpop.f32.mrb[18].mxu1  ;;  %v1664_v13 = vpop.f32.mrb[19].mxu0 }
 0x12b   : > { %v1665_v14 = vadd.f32 %v1664_v13, %v1663_v10  ;;  %v1728_v15 = vpop.f32.mrb[19].mxu1 }
 0x12c   : > { %v1729_v16 = vadd.f32 %v1728_v15, %v1727_v12  ;;  %v1017_v17 = vadd.f32 %v1726_v11, %v1662_v8 }
 0x12e   : > { %v2245_v18 = vadd.f32 %v1729_v16, %v1665_v14 }
 0x12f   : > { %v1666_v19 = vpop.f32.mrb[20].mxu0 }
 0x130   : > { %v1730_v20 = vpop.f32.mrb[20].mxu1  ;;  %v1667_v21 = vpop.f32.mrb[21].mxu0 }
 0x131   : > { %v1668_v22 = vadd.f32 %v1667_v21, %v1666_v19  ;;  %v1731_v23 = vpop.f32.mrb[21].mxu1  ;;  %v1669_v24 = vpop.f32.mrb[22].mxu0 }
 0x132   : > { %v1732_v27 = vadd.f32 %v1731_v23, %v1730_v20  ;;  %v1733_v28 = vpop.f32.mrb[22].mxu1  ;;  %v1670_v29 = vpop.f32.mrb[23].mxu0 }
 0x133   : > { %v1671_v30 = vadd.f32 %v1670_v29, %v1669_v24  ;;  %v1734_v31 = vpop.f32.mrb[23].mxu1 }
 0x134   : > { %v1735_v32 = vadd.f32 %v1734_v31, %v1733_v28  ;;  %v1025_v33 = vadd.f32 %v1732_v27, %v1668_v22 }
 0x136   : > { %v1028_v34 = vadd.f32 %v1735_v32, %v1671_v30 }
 0x137   : > { %v1672_v35 = vpop.f32.mrb[24].mxu0 }
 0x138   : > { %v1736_v36 = vpop.f32.mrb[24].mxu1  ;;  %v1673_v37 = vpop.f32.mrb[25].mxu0 }
 0x139   : > { %v1674_v38 = vadd.f32 %v1673_v37, %v1672_v35  ;;  %v1737_v41 = vpop.f32.mrb[25].mxu1  ;;  %v1675_v42 = vpop.f32.mrb[26].mxu0 }
 0x13a   : > { %v1738_v43 = vadd.f32 %v1737_v41, %v1736_v36  ;;  %v1739_v44 = vpop.f32.mrb[26].mxu1  ;;  %v1676_v45 = vpop.f32.mrb[27].mxu0 }
 0x13b   : > { %v1677_v46 = vadd.f32 %v1676_v45, %v1675_v42  ;;  %v1740_v47 = vpop.f32.mrb[27].mxu1 }
 0x13c   : > { %v1741_v48 = vadd.f32 %v1740_v47, %v1739_v44  ;;  %v1033_v49 = vadd.f32 %v1738_v43, %v1674_v38 }
 0x13e   : > { %v2247_v50 = vadd.f32 %v1741_v48, %v1677_v46 }
 0x13f   : > { %v1678_v51 = vpop.f32.mrb[28].mxu0 }
 0x140   : > { %v1742_v52 = vpop.f32.mrb[28].mxu1  ;;  %v1679_v55 = vpop.f32.mrb[29].mxu0 }
 0x141   : > { %v1680_v56 = vadd.f32 %v1679_v55, %v1678_v51  ;;  %v1743_v57 = vpop.f32.mrb[29].mxu1  ;;  %v1681_v58 = vpop.f32.mrb[30].mxu0 }
 0x142   : > { %v1744_v59 = vadd.f32 %v1743_v57, %v1742_v52  ;;  %v1745_v60 = vpop.f32.mrb[30].mxu1  ;;  %v1682_v61 = vpop.f32.mrb[31].mxu0 }
 0x143   : > { %v1683_v62 = vadd.f32 %v1682_v61, %v1681_v58  ;;  %v1746_v63 = vpop.f32.mrb[31].mxu1 }
 0x144   : > { %v1747_v0 = vadd.f32 %v1746_v63, %v1745_v60  ;;  %v1041_v1 = vadd.f32 %v1744_v59, %v1680_v56 }
 0x146   : > { %v1044_v2 = vadd.f32 %v1747_v0, %v1683_v62 }
 0x147   : > { %v1770_v5 = vpop.f32.mrb[32].mxu0 }
 0x148   : > { %v1090_v6 = vadd.f32 %v1770_v5, %v2233_v39  ;;  %v1778_v7 = vpop.f32.mrb[32].mxu1  ;;  %v1081_v8 = vpop.f32.mrb[33].mxu0 }
 0x149   : > { %v1122_v9 = vadd.f32 %v1778_v7, %v1025_v33  ;;  %v2257_v10 = vadd.f32 %v1081_v8, %v2229_v25  ;;  %v1113_v11 = vpop.f32.mrb[33].mxu1  ;;  %v1771_v12 = vpop.f32.mrb[34].mxu0 }
 0x14a   : > { %1147 = vst.msk [vmem:[%s2253_s23 + $0x10] sm:$0xff] %vm1144_vm2, %v1090_v6  ;;  %v2261_v13 = vadd.f32 %v1113_v11, %v1017_v17  ;;  %v1093_v14 = vadd.f32 %v1771_v12, %v2235_v40  ;;  %v1779_v15 = vpop.f32.mrb[34].mxu1  ;;  %v1084_v39 = vpop.f32.mrb[35].mxu0  ;;  %v1183_v16 = vsel %vm1144_vm2, %v1090_v6, 0.0  ;;  %v1276_v37 = vmul.f32 %v1090_v6, %v1090_v6 }
 0x14b   : > { %1155 = vst.msk [vmem:[%s2253_s23 + $0x50] sm:$0xff] %vm1144_vm2, %v1122_v9  ;;  %1145 = vst.msk [vmem:[%s2253_s23] sm:$0xff] %vm1144_vm2, %v2257_v10  ;;  %v1125_v25 = vadd.f32 %v1779_v15, %v1028_v34  ;;  %v1085_v19 = vadd.f32 %v1084_v39, %v2231_v26  ;;  %v1116_v20 = vpop.f32.mrb[35].mxu1  ;;  %v1207_v17 = vsel %vm1144_vm2, %v1122_v9, 0.0  ;;  %1184 = vadd.xlane.f32.xlu1 %v1183_v16  ;;  %v1177_v22 = vsel %vm1144_vm2, %v2257_v10, 0.0 }
 0x14c   : > { %1153 = vst.msk [vmem:[%s2253_s23 + $0x40] sm:$0xff] %vm1144_vm2, %v2261_v13  ;;  %1148 = vst.msk [vmem:[%s2253_s23 + $0x18] sm:$0xff] %vm1144_vm2, %v1093_v14  ;;  %v1117_v40 = vadd.f32 %v1116_v20, %v2245_v18  ;;  %1208 = vadd.xlane.f32.xlu0 %v1207_v17  ;;  %v1186_v26 = vsel %vm1144_vm2, %v1093_v14, 0.0  ;;  %v1277_v41 = vmul.f32 %v1093_v14, %v1093_v14  ;;  %v1296_v42 = vsel %vm1144_vm2, %v1276_v37, 0.0  ;;  %v1163_v17 = vld [vmem:[%s2157_s14 + $0x10] sm:$0xff] }
 0x14d   : > { %1156 = vst.msk [vmem:[%s2253_s23 + $0x58] sm:$0xff] %vm1144_vm2, %v1125_v25  ;;  %1146 = vst.msk [vmem:[%s2253_s23 + $0x8] sm:$0xff] %vm1144_vm2, %v1085_v19  ;;  %v1210_v34 = vsel %vm1144_vm2, %v1125_v25, 0.0  ;;  %v1284_v43 = vmul.f32 %v1122_v9, %v1122_v9  ;;  %v1285_v45 = vmul.f32 %v1125_v25, %v1125_v25  ;;  %v1275_v48 = vmul.f32 %v1085_v19, %v1085_v19 }
 0x14e   : > { %1154 = vst.msk [vmem:[%s2253_s23 + $0x48] sm:$0xff] %vm1144_vm2, %v1117_v40  ;;  %v1299_v44 = vsel %vm1144_vm2, %v1277_v41, 0.0  ;;  %v1283_v52 = vmul.f32 %v1117_v40, %v1117_v40  ;;  %v1282_v56 = vmul.f32 %v2261_v13, %v2261_v13  ;;  %v1261_v41 = vld [vmem:[%s2163_s21 + $0x18] sm:$0xff] }
 0x14f   : > { %v1774_v21 = vpop.f32.mrb[36].mxu0  ;;  %1187 = vadd.xlane.f32.xlu1 %v1186_v26  ;;  %v1320_v46 = vsel %vm1144_vm2, %v1284_v43, 0.0  ;;  %v1323_v47 = vsel %vm1144_vm2, %v1285_v45, 0.0  ;;  %v1293_v51 = vsel %vm1144_vm2, %v1275_v48, 0.0  ;;  %v1162_v48 = vld [vmem:[%s2157_s14 + $0x8] sm:$0xff] }
 0x150   : > { %v2288_v23 = vadd.f32 %v1774_v21, %v2241_v3  ;;  %v1782_v18 = vpop.f32.mrb[36].mxu1  ;;  %1178 = vadd.xlane.f32.xlu0 %v1177_v22  ;;  %v1097_v24 = vpop.f32.mrb[37].mxu0  ;;  %v1317_v57 = vsel %vm1144_vm2, %v1283_v52, 0.0  ;;  %v1314_v58 = vsel %vm1144_vm2, %v1282_v56, 0.0  ;;  %v1258_v56 = vld [vmem:[%s2163_s21] sm:$0xff] }
 0x151   : > { %v2290_v27 = vadd.f32 %v1782_v18, %v1041_v1  ;;  %v2293_v28 = vadd.f32 %v1097_v24, %v2237_v53  ;;  %v1129_v29 = vpop.f32.mrb[37].mxu1  ;;  %v1775_v30 = vpop.f32.mrb[38].mxu0  ;;  %v1164_v18 = vld [vmem:[%s2157_s14 + $0x18] sm:$0xff]  ;;  %v1161_v24 = vld [vmem:[%s2157_s14] sm:$0xff] }
 0x152   : > { %1151 = vst.msk [vmem:[%s2253_s23 + $0x30] sm:$0xff] %vm1144_vm2, %v2288_v23  ;;  %v2298_v31 = vadd.f32 %v1129_v29, %v1033_v49  ;;  %v1109_v3 = vadd.f32 %v1775_v30, %v2243_v4  ;;  %v1783_v32 = vpop.f32.mrb[38].mxu1  ;;  %v1100_v33 = vpop.f32.mrb[39].mxu0  ;;  %v1201_v4 = vsel %vm1144_vm2, %v2261_v13, 0.0  ;;  %v1180_v49 = vsel %vm1144_vm2, %v1085_v19, 0.0 }
 0x153   : > { %1159 = vst.msk [vmem:[%s2253_s23 + $0x70] sm:$0xff] %vm1144_vm2, %v2290_v27  ;;  %1149 = vst.msk [vmem:[%s2253_s23 + $0x20] sm:$0xff] %vm1144_vm2, %v2293_v28  ;;  %v2308_v53 = vadd.f32 %v1783_v32, %v1044_v2  ;;  %v1101_v35 = vadd.f32 %v1100_v33, %v2239_v54  ;;  %v1132_v36 = vpop.f32.mrb[39].mxu1  ;;  %1211 = vadd.xlane.f32.xlu1 %v1210_v34  ;;  %v1204_v54 = vsel %vm1144_vm2, %v1117_v40, 0.0  ;;  %v1195_v60 = vsel %vm1144_vm2, %v2288_v23, 0.0  ;;  %v1171_v40 = vld [vmem:[%s2157_s14 + $0x50] sm:$0xff] }
 0x154   : > { %1157 = vst.msk [vmem:[%s2253_s23 + $0x60] sm:$0xff] %vm1144_vm2, %v2298_v31  ;;  %1152 = vst.msk [vmem:[%s2253_s23 + $0x38] sm:$0xff] %vm1144_vm2, %v1109_v3  ;;  %v1133_v38 = vadd.f32 %v1132_v36, %v2247_v50  ;;  %1202 = vadd.xlane.f32.xlu0 %v1201_v4  ;;  %v1274_v50 = vmul.f32 %v2257_v10, %v2257_v10  ;;  %v1198_v59 = vsel %vm1144_vm2, %v1109_v3, 0.0  ;;  %v1219_v62 = vsel %vm1144_vm2, %v2290_v27, 0.0  ;;  %v1260_v36 = vld [vmem:[%s2163_s21 + $0x10] sm:$0xff] }
 0x155   : > { %1160 = vst.msk [vmem:[%s2253_s23 + $0x78] sm:$0xff] %vm1144_vm2, %v2308_v53  ;;  %1150 = vst.msk [vmem:[%s2253_s23 + $0x28] sm:$0xff] %vm1144_vm2, %v1101_v35  ;;  %v1222_v61 = vsel %vm1144_vm2, %v2308_v53, 0.0  ;;  %v1192_v63 = vsel %vm1144_vm2, %v1101_v35, 0.0  ;;  %v1189_v0 = vsel %vm1144_vm2, %v2293_v28, 0.0  ;;  %v1281_v2 = vmul.f32 %v1109_v3, %v1109_v3  ;;  %v1169_v3 = vld [vmem:[%s2157_s14 + $0x40] sm:$0xff] }
 0x156   : > { %1158 = vst.msk [vmem:[%s2253_s23 + $0x68] sm:$0xff] %vm1144_vm2, %v1133_v38  ;;  %v1290_v55 = vsel %vm1144_vm2, %v1274_v50, 0.0  ;;  %v1216_v1 = vsel %vm1144_vm2, %v1133_v38, 0.0  ;;  %v1213_v5 = vsel %vm1144_vm2, %v2298_v31, 0.0  ;;  %v1280_v6 = vmul.f32 %v2288_v23, %v2288_v23 }
 0x157   : > { %1205 = vadd.xlane.f32.xlu1 %v1204_v54  ;;  %v1311_v7 = vsel %vm1144_vm2, %v1281_v2, 0.0  ;;  %v1279_v8 = vmul.f32 %v1101_v35, %v1101_v35  ;;  %v1278_v10 = vmul.f32 %v2293_v28, %v2293_v28  ;;  %v1287_v12 = vmul.f32 %v1133_v38, %v1133_v38  ;;  %v1170_v35 = vld [vmem:[%s2157_s14 + $0x48] sm:$0xff] }
 0x158   : > { %1297 = vadd.xlane.f32.xlu0 %v1296_v42  ;;  %v1308_v9 = vsel %vm1144_vm2, %v1280_v6, 0.0  ;;  %v1286_v14 = vmul.f32 %v2298_v31, %v2298_v31  ;;  %v1289_v39 = vmul.f32 %v2308_v53, %v2308_v53  ;;  %v1288_v25 = vmul.f32 %v2290_v27, %v2290_v27  ;;  %v1172_v31 = vld [vmem:[%s2157_s14 + $0x58] sm:$0xff]  ;;  %v1268_v42 = vld [vmem:[%s2163_s21 + $0x50] sm:$0xff] }
 0x159   : > { %v1305_v11 = vsel %vm1144_vm2, %v1279_v8, 0.0  ;;  %v1302_v13 = vsel %vm1144_vm2, %v1278_v10, 0.0  ;;  %v1329_v15 = vsel %vm1144_vm2, %v1287_v12, 0.0  ;;  %v1167_v6 = vld [vmem:[%s2157_s14 + $0x30] sm:$0xff] }
 0x15a   : > { %v1326_v16 = vsel %vm1144_vm2, %v1286_v14, 0.0  ;;  %v1335_v19 = vsel %vm1144_vm2, %v1289_v39, 0.0  ;;  %v1332_v20 = vsel %vm1144_vm2, %v1288_v25, 0.0  ;;  %v1175_v12 = vld [vmem:[%s2157_s14 + $0x70] sm:$0xff]  ;;  %v1165_v25 = vld [vmem:[%s2157_s14 + $0x20] sm:$0xff] }
 0x15b   : > { %1300 = vadd.xlane.f32.xlu1 %v1299_v44 }
 0x15c   : > { %1321 = vadd.xlane.f32.xlu0 %v1320_v46 }
 0x15f   : > { %1324 = vadd.xlane.f32.xlu1 %v1323_v47  ;;  %v1269_v47 = vld [vmem:[%s2163_s21 + $0x58] sm:$0xff] }
 0x160   : > { %1181 = vadd.xlane.f32.xlu0 %v1180_v49 }
 0x163   : > { %1294 = vadd.xlane.f32.xlu1 %v1293_v51 }
 0x164   : > { %1291 = vadd.xlane.f32.xlu0 %v1290_v55  ;;  %v1259_v55 = vld [vmem:[%s2163_s21 + $0x8] sm:$0xff] }
 0x167   : > { %1318 = vadd.xlane.f32.xlu1 %v1317_v57 }
 0x168   : > { %1315 = vadd.xlane.f32.xlu0 %v1314_v58 }
 0x16b   : > { %1199 = vadd.xlane.f32.xlu1 %v1198_v59 }
 0x16c   : > { %1196 = vadd.xlane.f32.xlu0 %v1195_v60 }
 0x16f   : > { %1223 = vadd.xlane.f32.xlu1 %v1222_v61  ;;  %v1267_v61 = vld [vmem:[%s2163_s21 + $0x48] sm:$0xff] }
 0x170   : > { %1220 = vadd.xlane.f32.xlu0 %v1219_v62  ;;  %v1266_v62 = vld [vmem:[%s2163_s21 + $0x40] sm:$0xff] }
 0x173   : > { %1193 = vadd.xlane.f32.xlu1 %v1192_v63 }
 0x174   : > { %1190 = vadd.xlane.f32.xlu0 %v1189_v0 }
 0x177   : > { %1217 = vadd.xlane.f32.xlu1 %v1216_v1 }
 0x178   : > { %1214 = vadd.xlane.f32.xlu0 %v1213_v5  ;;  %v1168_v5 = vld [vmem:[%s2157_s14 + $0x38] sm:$0xff] }
 0x17b   : > { %1312 = vadd.xlane.f32.xlu1 %v1311_v7 }
 0x17c   : > { %1309 = vadd.xlane.f32.xlu0 %v1308_v9 }
 0x17f   : > { %1306 = vadd.xlane.f32.xlu1 %v1305_v11  ;;  %v1176_v11 = vld [vmem:[%s2157_s14 + $0x78] sm:$0xff] }
 0x180   : > { %1303 = vadd.xlane.f32.xlu0 %v1302_v13 }
 0x183   : > { %1330 = vadd.xlane.f32.xlu1 %v1329_v15 }
 0x184   : > { %1327 = vadd.xlane.f32.xlu0 %v1326_v16  ;;  %v1166_v16 = vld [vmem:[%s2157_s14 + $0x28] sm:$0xff] }
 0x187   : > { %1336 = vadd.xlane.f32.xlu1 %v1335_v19 }
 0x188   : > { %1333 = vadd.xlane.f32.xlu0 %v1332_v20 }
 0x1d8   : > { %v1185_v26 = vpop.xlane.xlu1 %1184 }
 0x1d9   : > { %v1209_v21 = vpop.xlane.xlu0 %1208  ;;  %v1227_v22 = vadd.f32 %v1185_v26, %v1163_v17  ;;  %v1174_v26 = vld [vmem:[%s2157_s14 + $0x68] sm:$0xff] }
 0x1da   : > { %v1235_v23 = vadd.f32 %v1209_v21, %v1171_v40  ;;  %v1173_v21 = vld [vmem:[%s2157_s14 + $0x60] sm:$0xff] }
 0x1db   : > { %1244 = vst.msk [vmem:[%s2157_s14 + $0x10] sm:$0xff] %vm259_vm1, %v1227_v22 }
 0x1dc   : > { %1252 = vst.msk [vmem:[%s2157_s14 + $0x50] sm:$0xff] %vm259_vm1, %v1235_v23  ;;  %v1188_v27 = vpop.xlane.xlu1 %1187 }
 0x1dd   : > { %v1228_v28 = vadd.f32 %v1188_v27, %v1164_v18  ;;  %v1179_v29 = vpop.xlane.xlu0 %1178  ;;  %v1265_v27 = vld [vmem:[%s2163_s21 + $0x38] sm:$0xff] }
 0x1de   : > { %v1225_v30 = vadd.f32 %v1179_v29, %v1161_v24 }
 0x1df   : > { %1245 = vst.msk [vmem:[%s2157_s14 + $0x18] sm:$0xff] %vm259_vm1, %v1228_v28  ;;  %v1264_v28 = vld [vmem:[%s2163_s21 + $0x30] sm:$0xff] }
 0x1e0   : > { %1242 = vst.msk [vmem:[%s2157_s14] sm:$0xff] %vm259_vm1, %v1225_v30  ;;  %v1212_v32 = vpop.xlane.xlu1 %1211 }
 0x1e1   : > { %v1236_v33 = vadd.f32 %v1212_v32, %v1172_v31  ;;  %v1203_v34 = vpop.xlane.xlu0 %1202  ;;  %v1263_v32 = vld [vmem:[%s2163_s21 + $0x28] sm:$0xff] }
 0x1e2   : > { %v1233_v53 = vadd.f32 %v1203_v34, %v1169_v3 }
 0x1e3   : > { %1253 = vst.msk [vmem:[%s2157_s14 + $0x58] sm:$0xff] %vm259_vm1, %v1236_v33  ;;  %v1262_v33 = vld [vmem:[%s2163_s21 + $0x20] sm:$0xff] }
 0x1e4   : > { %1250 = vst.msk [vmem:[%s2157_s14 + $0x40] sm:$0xff] %vm259_vm1, %v1233_v53  ;;  %v1206_v4 = vpop.xlane.xlu1 %1205 }
 0x1e5   : > { %v1234_v37 = vadd.f32 %v1206_v4, %v1170_v35  ;;  %v1298_v38 = vpop.xlane.xlu0 %1297  ;;  %v1271_v4 = vld [vmem:[%s2163_s21 + $0x68] sm:$0xff] }
 0x1e6   : > { %v1340_v54 = vadd.f32 %v1298_v38, %v1260_v36 }
 0x1e7   : > { %1251 = vst.msk [vmem:[%s2157_s14 + $0x48] sm:$0xff] %vm259_vm1, %v1234_v37  ;;  %v1270_v37 = vld [vmem:[%s2163_s21 + $0x60] sm:$0xff] }
 0x1e8   : > { %1356 = vst.msk [vmem:[%s2163_s21 + $0x10] sm:$0xff] %vm259_vm1, %v1340_v54  ;;  %v1301_v43 = vpop.xlane.xlu1 %1300 }
 0x1e9   : > { %v1341_v44 = vadd.f32 %v1301_v43, %v1261_v41  ;;  %v1322_v45 = vpop.xlane.xlu0 %1321  ;;  %v1273_v43 = vld [vmem:[%s2163_s21 + $0x78] sm:$0xff] }
 0x1ea   : > { %v1348_v46 = vadd.f32 %v1322_v45, %v1268_v42 }
 0x1eb   : > { %1357 = vst.msk [vmem:[%s2163_s21 + $0x18] sm:$0xff] %vm259_vm1, %v1341_v44  ;;  %v1272_v44 = vld [vmem:[%s2163_s21 + $0x70] sm:$0xff] }
 0x1ec   : > { %1364 = vst.msk [vmem:[%s2163_s21 + $0x50] sm:$0xff] %vm259_vm1, %v1348_v46  ;;  %v1325_v49 = vpop.xlane.xlu1 %1324 }
 0x1ed   : > { %v1349_v50 = vadd.f32 %v1325_v49, %v1269_v47  ;;  %v1182_v51 = vpop.xlane.xlu0 %1181 }
 0x1ee   : > { %v1226_v52 = vadd.f32 %v1182_v51, %v1162_v48 }
 0x1ef   : > { %1365 = vst.msk [vmem:[%s2163_s21 + $0x58] sm:$0xff] %vm259_vm1, %v1349_v50 }
 0x1f0   : > { %1243 = vst.msk [vmem:[%s2157_s14 + $0x8] sm:$0xff] %vm259_vm1, %v1226_v52  ;;  %v1295_v57 = vpop.xlane.xlu1 %1294 }
 0x1f1   : > { %v1339_v58 = vadd.f32 %v1295_v57, %v1259_v55  ;;  %v1292_v59 = vpop.xlane.xlu0 %1291 }
 0x1f2   : > { %v1338_v60 = vadd.f32 %v1292_v59, %v1258_v56 }
 0x1f3   : > { %1355 = vst.msk [vmem:[%s2163_s21 + $0x8] sm:$0xff] %vm259_vm1, %v1339_v58 }
 0x1f4   : > { %1354 = vst.msk [vmem:[%s2163_s21] sm:$0xff] %vm259_vm1, %v1338_v60  ;;  %v1319_v63 = vpop.xlane.xlu1 %1318 }
 0x1f5   : > { %v1347_v0 = vadd.f32 %v1319_v63, %v1267_v61  ;;  %v1316_v1 = vpop.xlane.xlu0 %1315 }
 0x1f6   : > { %v1346_v2 = vadd.f32 %v1316_v1, %v1266_v62 }
 0x1f7   : > { %1363 = vst.msk [vmem:[%s2163_s21 + $0x48] sm:$0xff] %vm259_vm1, %v1347_v0 }
 0x1f8   : > { %1362 = vst.msk [vmem:[%s2163_s21 + $0x40] sm:$0xff] %vm259_vm1, %v1346_v2  ;;  %v1200_v7 = vpop.xlane.xlu1 %1199 }
 0x1f9   : > { %v1232_v8 = vadd.f32 %v1200_v7, %v1168_v5  ;;  %v1197_v9 = vpop.xlane.xlu0 %1196 }
 0x1fa   : > { %v1231_v10 = vadd.f32 %v1197_v9, %v1167_v6 }
 0x1fb   : > { %1249 = vst.msk [vmem:[%s2157_s14 + $0x38] sm:$0xff] %vm259_vm1, %v1232_v8 }
 0x1fc   : > { %1248 = vst.msk [vmem:[%s2157_s14 + $0x30] sm:$0xff] %vm259_vm1, %v1231_v10  ;;  %v1224_v13 = vpop.xlane.xlu1 %1223 }
 0x1fd   : > { %v1240_v14 = vadd.f32 %v1224_v13, %v1176_v11  ;;  %v1221_v15 = vpop.xlane.xlu0 %1220 }
 0x1fe   : > { %v1239_v39 = vadd.f32 %v1221_v15, %v1175_v12 }
 0x1ff   : > { %1257 = vst.msk [vmem:[%s2157_s14 + $0x78] sm:$0xff] %vm259_vm1, %v1240_v14 }
 0x200   : > { %1256 = vst.msk [vmem:[%s2157_s14 + $0x70] sm:$0xff] %vm259_vm1, %v1239_v39  ;;  %v1194_v19 = vpop.xlane.xlu1 %1193 }
 0x201   : > { %v1230_v20 = vadd.f32 %v1194_v19, %v1166_v16  ;;  %v1191_v17 = vpop.xlane.xlu0 %1190 }
 0x202   : > { %v1229_v40 = vadd.f32 %v1191_v17, %v1165_v25 }
 0x203   : > { %1247 = vst.msk [vmem:[%s2157_s14 + $0x28] sm:$0xff] %vm259_vm1, %v1230_v20 }
 0x204   : > { %1246 = vst.msk [vmem:[%s2157_s14 + $0x20] sm:$0xff] %vm259_vm1, %v1229_v40  ;;  %v1218_v22 = vpop.xlane.xlu1 %1217 }
 0x205   : > { %v1238_v23 = vadd.f32 %v1218_v22, %v1174_v26  ;;  %v1215_v18 = vpop.xlane.xlu0 %1214 }
 0x206   : > { %v1237_v24 = vadd.f32 %v1215_v18, %v1173_v21 }
 0x207   : > { %1255 = vst.msk [vmem:[%s2157_s14 + $0x68] sm:$0xff] %vm259_vm1, %v1238_v23 }
 0x208   : > { %1254 = vst.msk [vmem:[%s2157_s14 + $0x60] sm:$0xff] %vm259_vm1, %v1237_v24  ;;  %v1313_v29 = vpop.xlane.xlu1 %1312 }
 0x209   : > { %v1345_v30 = vadd.f32 %v1313_v29, %v1265_v27  ;;  %v1310_v31 = vpop.xlane.xlu0 %1309 }
 0x20a   : > { %v1344_v3 = vadd.f32 %v1310_v31, %v1264_v28 }
 0x20b   : > { %1361 = vst.msk [vmem:[%s2163_s21 + $0x38] sm:$0xff] %vm259_vm1, %v1345_v30 }
 0x20c   : > { %1360 = vst.msk [vmem:[%s2163_s21 + $0x30] sm:$0xff] %vm259_vm1, %v1344_v3  ;;  %v1307_v34 = vpop.xlane.xlu1 %1306 }
 0x20d   : > { %v1343_v53 = vadd.f32 %v1307_v34, %v1263_v32  ;;  %v1304_v35 = vpop.xlane.xlu0 %1303 }
 0x20e   : > { %v1342_v36 = vadd.f32 %v1304_v35, %v1262_v33 }
 0x20f   : > { %1359 = vst.msk [vmem:[%s2163_s21 + $0x28] sm:$0xff] %vm259_vm1, %v1343_v53 }
 0x210   : > { %1358 = vst.msk [vmem:[%s2163_s21 + $0x20] sm:$0xff] %vm259_vm1, %v1342_v36  ;;  %v1331_v38 = vpop.xlane.xlu1 %1330 }
 0x211   : > { %v1351_v54 = vadd.f32 %v1331_v38, %v1271_v4  ;;  %v1328_v41 = vpop.xlane.xlu0 %1327 }
 0x212   : > { %v1350_v42 = vadd.f32 %v1328_v41, %v1270_v37 }
 0x213   : > { %1367 = vst.msk [vmem:[%s2163_s21 + $0x68] sm:$0xff] %vm259_vm1, %v1351_v54 }
 0x214   : > { %1366 = vst.msk [vmem:[%s2163_s21 + $0x60] sm:$0xff] %vm259_vm1, %v1350_v42  ;;  %v1337_v45 = vpop.xlane.xlu1 %1336 }
 0x215   : > { %v1353_v46 = vadd.f32 %v1337_v45, %v1273_v43  ;;  %v1334_v47 = vpop.xlane.xlu0 %1333 }
 0x216   : > { %v1352_v48 = vadd.f32 %v1334_v47, %v1272_v44 }
 0x217   : > { %1369 = vst.msk [vmem:[%s2163_s21 + $0x78] sm:$0xff] %vm259_vm1, %v1353_v46 }
 0x218   : > { %1368 = vst.msk [vmem:[%s2163_s21 + $0x70] sm:$0xff] %vm259_vm1, %v1352_v48 }
 0x219 PF: > { %s15_s17 = sadd.s32 1, %s1932_s17   ;;  %s2481_s15 = smov %s1928_s16 }
 0x21a   : > { %p12_p5 = scmp.ge.s32.totalorder %s15_s17, 4   ;;  %s2482_s16 = smov %s2484_s18 }
 0x21c   :  { %14 = sbr.rel (!%p12_p5) target bundleno = 2 (0x2), region = 86 }

// kernel: stylenet_forward.36
= control target key start
LH: loop header
LB: loop body
LE: loop exit
PB: predicated region body
PF: predicated region fallthrough
CT: control target
= control target key end

     0   :  { %s809_s12 = smov 0   ;;  %s811_s13 = smov 0   ;;  %s945_s0 = inlined_call_operand.vmem [shape: f32[2,128,16], index: 0, kind: input, shape index: {}]   ;;  %s946_s1 = inlined_call_operand.vmem [shape: f32[2,128,1], index: 1, kind: input, shape index: {}]   ;;  %s947_s2 = inlined_call_operand.vmem [shape: f32[2,128,1], index: 2, kind: input, shape index: {}]   ;;  %s948_s3 = inlined_call_operand.vmem [shape: bf16[2,128,16], index: 3, kind: output, shape index: {}]  }
   0x1   :  { %s813_s14 = smov 0  }
   0x2 LB: > { %s25_s15 = sadd.s32 1, %s782_s13  ;;  %p690_p0 = scmp.ge.s32.totalorder %s786_s14, 1  ;;  %s786_s14 = sphi %s813_s14, %s13_s14   ;;  %s782_s13 = sphi %s811_s13, %s950_s13   ;;  %s778_s12 = sphi %s809_s12, %s949_s12  }
   0x3   : > { %p27_p1 = scmp.ge.s32.totalorder %s25_s15, 2  ;;  %p176_p2 = scmp.lt.s32.totalorder %s786_s14, 3 }
   0x5   : > { %s952_s15 = smov (%p27_p1, %s25_s15), 0  ;;  %p177_p3 = pnand %p690_p0, %p176_p2 }
   0x6   : > { %p216_p4 = scmp.lt.s32.totalorder (!%p177_p3), %s778_s12, 1  ;;  %v788_v0 = vmov (!%p177_p3), 0   ;;  %vm562_vm0 = vcmask (!%p177_p3), 125952  }
   0x7   : > { %180 = sbr.rel (%p177_p3) target bundleno = 213 (0xd5), region = 32  ;;  %763 = vset.pattern.permute.xlu1 (!%p177_p3), %v788_v0  ;;  %762 = vset.pattern.permute.xlu0 (!%p177_p3), %v788_v0 }
   0xe   : > { %s954_s12 = smov (!%p216_p4, %s778_s12), 1 }
   0xf   : > { %s830_s16 = sshll.u32 %s954_s12, 7  ;;  %s720_s26 = sshll.u32 %s954_s12, 6 }
  0x10   : > { %s228_s19 = scalar_lea.vmem %s946_s1, %s830_s16  ;;  %s840_s22 = scalar_lea.vmem %s947_s2, %s830_s16 }
  0x11   : > { %v260_v1 = vld [vmem:[%s228_s19 + $0x10] sm:$0xff]  ;;  %v258_v2 = vld [vmem:[%s228_s19] sm:$0xff]  ;;  %v261_v3 = vld [vmem:[%s228_s19 + $0x18] sm:$0xff]  ;;  %s870_s25 = scalar_lea.vmem %s945_s0, %s830_s16  ;;  %s886_s29 = scalar_lea.vmem %s948_s3, %s720_s26 }
  0x12   : > { %286 = vperm.xlu1 %763, %v260_v1   ;;  %276 = vperm.xlu0 %762, %v258_v2   ;;  %v259_v4 = vld [vmem:[%s228_s19 + $0x8] sm:$0xff]  ;;  %v262_v6 = vld [vmem:[%s228_s19 + $0x20] sm:$0xff]  ;;  %v265_v7 = vld [vmem:[%s228_s19 + $0x38] sm:$0xff] }
  0x13   : > { %v263_v5 = vld [vmem:[%s228_s19 + $0x28] sm:$0xff]  ;;  %v264_v8 = vld [vmem:[%s228_s19 + $0x30] sm:$0xff]  ;;  %v266_v10 = vld [vmem:[%s228_s19 + $0x40] sm:$0xff] }
  0x14   : > { %v267_v9 = vld [vmem:[%s228_s19 + $0x48] sm:$0xff]  ;;  %v269_v11 = vld [vmem:[%s228_s19 + $0x58] sm:$0xff]  ;;  %v268_v12 = vld [vmem:[%s228_s19 + $0x50] sm:$0xff] }
  0x15   : > { %v271_v13 = vld [vmem:[%s228_s19 + $0x68] sm:$0xff]  ;;  %v270_v14 = vld [vmem:[%s228_s19 + $0x60] sm:$0xff]  ;;  %v273_v15 = vld [vmem:[%s228_s19 + $0x78] sm:$0xff] }
  0x16   : > { %291 = vperm.xlu1 %763, %v261_v3   ;;  %281 = vperm.xlu0 %762, %v259_v4   ;;  %v272_v16 = vld [vmem:[%s228_s19 + $0x70] sm:$0xff]  ;;  %v371_v17 = vld [vmem:[%s840_s22 + $0x8] sm:$0xff]  ;;  %v370_v18 = vld [vmem:[%s840_s22] sm:$0xff] }
  0x17   : > { %v373_v19 = vld [vmem:[%s840_s22 + $0x18] sm:$0xff]  ;;  %v372_v20 = vld [vmem:[%s840_s22 + $0x10] sm:$0xff]  ;;  %v375_v21 = vld [vmem:[%s840_s22 + $0x28] sm:$0xff] }
  0x18   : > { %v374_v22 = vld [vmem:[%s840_s22 + $0x20] sm:$0xff]  ;;  %v377_v23 = vld [vmem:[%s840_s22 + $0x38] sm:$0xff]  ;;  %v376_v24 = vld [vmem:[%s840_s22 + $0x30] sm:$0xff] }
  0x19   : > { %v379_v25 = vld [vmem:[%s840_s22 + $0x48] sm:$0xff]  ;;  %v378_v26 = vld [vmem:[%s840_s22 + $0x40] sm:$0xff]  ;;  %v381_v27 = vld [vmem:[%s840_s22 + $0x58] sm:$0xff] }
  0x1a   : > { %301 = vperm.xlu1 %763, %v263_v5   ;;  %296 = vperm.xlu0 %762, %v262_v6   ;;  %v380_v28 = vld [vmem:[%s840_s22 + $0x50] sm:$0xff]  ;;  %v383_v29 = vld [vmem:[%s840_s22 + $0x68] sm:$0xff]  ;;  %v382_v30 = vld [vmem:[%s840_s22 + $0x60] sm:$0xff] }
  0x1b   : > { %v385_v31 = vld [vmem:[%s840_s22 + $0x78] sm:$0xff]  ;;  %v384_v32 = vld [vmem:[%s840_s22 + $0x70] sm:$0xff]  ;;  %v242_v47 = vld [vmem:[%s870_s25] sm:$0xff] }
  0x1c   : > { %v243_v48 = vld [vmem:[%s870_s25 + $0x8] sm:$0xff]  ;;  %v244_v53 = vld [vmem:[%s870_s25 + $0x10] sm:$0xff]  ;;  %v245_v54 = vld [vmem:[%s870_s25 + $0x18] sm:$0xff] }
  0x1d   : > { %v247_v63 = vld [vmem:[%s870_s25 + $0x28] sm:$0xff]  ;;  %v246_v0 = vld [vmem:[%s870_s25 + $0x20] sm:$0xff] }
  0x1e   : > { %311 = vperm.xlu1 %763, %v265_v7   ;;  %306 = vperm.xlu0 %762, %v264_v8  }
  0x22   : > { %321 = vperm.xlu1 %763, %v267_v9   ;;  %316 = vperm.xlu0 %762, %v266_v10  }
  0x26   : > { %331 = vperm.xlu1 %763, %v269_v11   ;;  %326 = vperm.xlu0 %762, %v268_v12   ;;  %v249_v11 = vld [vmem:[%s870_s25 + $0x38] sm:$0xff]  ;;  %v248_v12 = vld [vmem:[%s870_s25 + $0x30] sm:$0xff] }
  0x2a   : > { %341 = vperm.xlu1 %763, %v271_v13   ;;  %336 = vperm.xlu0 %762, %v270_v14  }
  0x2e   : > { %351 = vperm.xlu1 %763, %v273_v15   ;;  %346 = vperm.xlu0 %762, %v272_v16  }
  0x32   : > { %393 = vperm.xlu1 %763, %v371_v17   ;;  %388 = vperm.xlu0 %762, %v370_v18  }
  0x36   : > { %403 = vperm.xlu1 %763, %v373_v19   ;;  %398 = vperm.xlu0 %762, %v372_v20  }
  0x3a   : > { %413 = vperm.xlu1 %763, %v375_v21   ;;  %408 = vperm.xlu0 %762, %v374_v22  }
  0x3e   : > { %423 = vperm.xlu1 %763, %v377_v23   ;;  %418 = vperm.xlu0 %762, %v376_v24   ;;  %v251_v23 = vld [vmem:[%s870_s25 + $0x48] sm:$0xff]  ;;  %v250_v24 = vld [vmem:[%s870_s25 + $0x40] sm:$0xff] }
  0x42   : > { %433 = vperm.xlu1 %763, %v379_v25   ;;  %428 = vperm.xlu0 %762, %v378_v26  }
  0x46   : > { %443 = vperm.xlu1 %763, %v381_v27   ;;  %438 = vperm.xlu0 %762, %v380_v28  }
  0x4a   : > { %453 = vperm.xlu1 %763, %v383_v29   ;;  %448 = vperm.xlu0 %762, %v382_v30  }
  0x4e   : > { %463 = vperm.xlu1 %763, %v385_v31   ;;  %458 = vperm.xlu0 %762, %v384_v32  }
  0x91   : > { %v287_v33 = vpop.permute.xlu1 %286  ;;  %v277_v34 = vpop.permute.xlu0 %276 }
  0x92   : > { %v354_v51 = vmul.f32 %v277_v34, %v242_v47  ;;  %v356_v59 = vmul.f32 %v287_v33, %v244_v53  ;;  %v255_v53 = vld [vmem:[%s870_s25 + $0x68] sm:$0xff] }
  0x95   : > { %v292_v35 = vpop.permute.xlu1 %291  ;;  %v282_v36 = vpop.permute.xlu0 %281 }
  0x96   : > { %v355_v52 = vmul.f32 %v282_v36, %v243_v48  ;;  %v357_v60 = vmul.f32 %v292_v35, %v245_v54  ;;  %v253_v35 = vld [vmem:[%s870_s25 + $0x58] sm:$0xff]  ;;  %v252_v36 = vld [vmem:[%s870_s25 + $0x50] sm:$0xff]  ;;  %v254_v54 = vld [vmem:[%s870_s25 + $0x60] sm:$0xff] }
  0x99   : > { %v302_v37 = vpop.permute.xlu1 %301  ;;  %v297_v38 = vpop.permute.xlu0 %296 }
  0x9a   : > { %v359_v7 = vmul.f32 %v302_v37, %v247_v63  ;;  %v358_v8 = vmul.f32 %v297_v38, %v246_v0  ;;  %v257_v63 = vld [vmem:[%s870_s25 + $0x78] sm:$0xff]  ;;  %v256_v0 = vld [vmem:[%s870_s25 + $0x70] sm:$0xff] }
  0x9d   : > { %v312_v39 = vpop.permute.xlu1 %311  ;;  %v307_v40 = vpop.permute.xlu0 %306 }
  0x9e   : > { %v361_v19 = vmul.f32 %v312_v39, %v249_v11  ;;  %v360_v20 = vmul.f32 %v307_v40, %v248_v12 }
  0xa1   : > { %v322_v41 = vpop.permute.xlu1 %321  ;;  %v317_v42 = vpop.permute.xlu0 %316 }
  0xa2   : > { %v363_v31 = vmul.f32 %v322_v41, %v251_v23  ;;  %v362_v32 = vmul.f32 %v317_v42, %v250_v24 }
  0xa5   : > { %v858_v43 = vpop.permute.xlu1 %331  ;;  %v860_v44 = vpop.permute.xlu0 %326 }
  0xa6   : > { %v365_v41 = vmul.f32 %v858_v43, %v253_v35  ;;  %v364_v42 = vmul.f32 %v860_v44, %v252_v36 }
  0xa9   : > { %v862_v45 = vpop.permute.xlu1 %341  ;;  %v864_v46 = vpop.permute.xlu0 %336 }
  0xaa   : > { %v366_v44 = vmul.f32 %v864_v46, %v254_v54 }
  0xad   : > { %v874_v49 = vpop.permute.xlu1 %351  ;;  %v876_v50 = vpop.permute.xlu0 %346 }
  0xae   : > { %v368_v46 = vmul.f32 %v876_v50, %v256_v0 }
  0xb1   : > { %v394_v55 = vpop.permute.xlu1 %393  ;;  %v389_v56 = vpop.permute.xlu0 %388 }
  0xb2   : > { %v467_v57 = vadd.f32 %v394_v55, %v355_v52  ;;  %v466_v58 = vadd.f32 %v389_v56, %v354_v51 }
  0xb4   : > { %v483_v61 = vmax.f32 %v467_v57, 0.0  ;;  %v482_v62 = vmax.f32 %v466_v58, 0.0 }
  0xb5   : > { %v404_v1 = vpop.permute.xlu1 %403  ;;  %v399_v2 = vpop.permute.xlu0 %398 }
  0xb6   : > { %v722_v3 = vpack.c.bf16 %v483_v61, %v483_v61  ;;  %v721_v4 = vpack.c.bf16 %v482_v62, %v482_v62  ;;  %v469_v5 = vadd.f32 %v404_v1, %v357_v60  ;;  %v468_v6 = vadd.f32 %v399_v2, %v356_v59 }
  0xb7   : > { %v367_v60 = vmul.f32 %v862_v45, %v255_v53 }
  0xb8   : > { %564 = vst.msk [vmem:[%s886_s29 + $0x4] sm:$0xf] %vm562_vm0, %v722_v3  ;;  %563 = vst.msk [vmem:[%s886_s29] sm:$0xf] %vm562_vm0, %v721_v4  ;;  %v485_v9 = vmax.f32 %v469_v5, 0.0  ;;  %v484_v10 = vmax.f32 %v468_v6, 0.0  ;;  %v369_v6 = vmul.f32 %v874_v49, %v257_v63 }
  0xb9   : > { %v414_v13 = vpop.permute.xlu1 %413  ;;  %v409_v14 = vpop.permute.xlu0 %408 }
  0xba   : > { %v724_v15 = vpack.c.bf16 %v485_v9, %v485_v9  ;;  %v723_v16 = vpack.c.bf16 %v484_v10, %v484_v10  ;;  %v471_v17 = vadd.f32 %v414_v13, %v359_v7  ;;  %v470_v18 = vadd.f32 %v409_v14, %v358_v8 }
  0xbc   : > { %566 = vst.msk [vmem:[%s886_s29 + $0xc] sm:$0xf] %vm562_vm0, %v724_v15  ;;  %565 = vst.msk [vmem:[%s886_s29 + $0x8] sm:$0xf] %vm562_vm0, %v723_v16  ;;  %v487_v21 = vmax.f32 %v471_v17, 0.0  ;;  %v486_v22 = vmax.f32 %v470_v18, 0.0 }
  0xbd   : > { %v424_v25 = vpop.permute.xlu1 %423  ;;  %v419_v26 = vpop.permute.xlu0 %418 }
  0xbe   : > { %v726_v27 = vpack.c.bf16 %v487_v21, %v487_v21  ;;  %v725_v28 = vpack.c.bf16 %v486_v22, %v486_v22  ;;  %v473_v29 = vadd.f32 %v424_v25, %v361_v19  ;;  %v472_v30 = vadd.f32 %v419_v26, %v360_v20 }
  0xc0   : > { %568 = vst.msk [vmem:[%s886_s29 + $0x14] sm:$0xf] %vm562_vm0, %v726_v27  ;;  %567 = vst.msk [vmem:[%s886_s29 + $0x10] sm:$0xf] %vm562_vm0, %v725_v28  ;;  %v489_v33 = vmax.f32 %v473_v29, 0.0  ;;  %v488_v34 = vmax.f32 %v472_v30, 0.0 }
  0xc1   : > { %v434_v37 = vpop.permute.xlu1 %433  ;;  %v429_v38 = vpop.permute.xlu0 %428 }
  0xc2   : > { %v728_v39 = vpack.c.bf16 %v489_v33, %v489_v33  ;;  %v727_v40 = vpack.c.bf16 %v488_v34, %v488_v34  ;;  %v475_v47 = vadd.f32 %v434_v37, %v363_v31  ;;  %v474_v48 = vadd.f32 %v429_v38, %v362_v32 }
  0xc4   : > { %570 = vst.msk [vmem:[%s886_s29 + $0x1c] sm:$0xf] %vm562_vm0, %v728_v39  ;;  %569 = vst.msk [vmem:[%s886_s29 + $0x18] sm:$0xf] %vm562_vm0, %v727_v40  ;;  %v491_v51 = vmax.f32 %v475_v47, 0.0  ;;  %v490_v52 = vmax.f32 %v474_v48, 0.0 }
  0xc5   : > { %v444_v55 = vpop.permute.xlu1 %443  ;;  %v439_v56 = vpop.permute.xlu0 %438 }
  0xc6   : > { %v730_v57 = vpack.c.bf16 %v491_v51, %v491_v51  ;;  %v729_v58 = vpack.c.bf16 %v490_v52, %v490_v52  ;;  %v477_v59 = vadd.f32 %v444_v55, %v365_v41  ;;  %v476_v43 = vadd.f32 %v439_v56, %v364_v42 }
  0xc8   : > { %572 = vst.msk [vmem:[%s886_s29 + $0x24] sm:$0xf] %vm562_vm0, %v730_v57  ;;  %571 = vst.msk [vmem:[%s886_s29 + $0x20] sm:$0xf] %vm562_vm0, %v729_v58  ;;  %v493_v61 = vmax.f32 %v477_v59, 0.0  ;;  %v492_v62 = vmax.f32 %v476_v43, 0.0 }
  0xc9   : > { %v454_v1 = vpop.permute.xlu1 %453  ;;  %v449_v2 = vpop.permute.xlu0 %448 }
  0xca   : > { %v732_v3 = vpack.c.bf16 %v493_v61, %v493_v61  ;;  %v731_v4 = vpack.c.bf16 %v492_v62, %v492_v62  ;;  %v479_v5 = vadd.f32 %v454_v1, %v367_v60  ;;  %v478_v45 = vadd.f32 %v449_v2, %v366_v44 }
  0xcc   : > { %574 = vst.msk [vmem:[%s886_s29 + $0x2c] sm:$0xf] %vm562_vm0, %v732_v3  ;;  %573 = vst.msk [vmem:[%s886_s29 + $0x28] sm:$0xf] %vm562_vm0, %v731_v4  ;;  %v495_v7 = vmax.f32 %v479_v5, 0.0  ;;  %v494_v8 = vmax.f32 %v478_v45, 0.0 }
  0xcd   : > { %v464_v9 = vpop.permute.xlu1 %463  ;;  %v459_v10 = vpop.permute.xlu0 %458 }
  0xce   : > { %v734_v11 = vpack.c.bf16 %v495_v7, %v495_v7  ;;  %v733_v12 = vpack.c.bf16 %v494_v8, %v494_v8  ;;  %v481_v13 = vadd.f32 %v464_v9, %v369_v6  ;;  %v480_v14 = vadd.f32 %v459_v10, %v368_v46 }
  0xd0   : > { %576 = vst.msk [vmem:[%s886_s29 + $0x34] sm:$0xf] %vm562_vm0, %v734_v11  ;;  %575 = vst.msk [vmem:[%s886_s29 + $0x30] sm:$0xf] %vm562_vm0, %v733_v12  ;;  %v497_v49 = vmax.f32 %v481_v13, 0.0  ;;  %v496_v50 = vmax.f32 %v480_v14, 0.0 }
  0xd2   : > { %v736_v15 = vpack.c.bf16 %v497_v49, %v497_v49  ;;  %v735_v16 = vpack.c.bf16 %v496_v50, %v496_v50 }
  0xd4   : > { %578 = vst.msk [vmem:[%s886_s29 + $0x3c] sm:$0xf] %vm562_vm0, %v736_v15  ;;  %577 = vst.msk [vmem:[%s886_s29 + $0x38] sm:$0xf] %vm562_vm0, %v735_v16 }
  0xd5 PF: > { %s13_s14 = sadd.s32 1, %s786_s14   ;;  %s949_s12 = smov %s782_s13 }
  0xd6   : > { %p10_p5 = scmp.ge.s32.totalorder %s13_s14, 4   ;;  %s950_s13 = smov %s952_s15 }
  0xd8   :  { %12 = sbr.rel (!%p10_p5) target bundleno = 2 (0x2), region = 68 }

// kernel: stylenet_forward.40
= control target key start
LH: loop header
LB: loop body
LE: loop exit
PB: predicated region body
PF: predicated region fallthrough
CT: control target
= control target key end

     0   :  { %s964_s15 = smov 0   ;;  %s966_s16 = smov 0   ;;  %s1129_s0 = inlined_call_operand.vmem [shape: f32[2,128,16], index: 0, kind: input, shape index: {}]   ;;  %s1130_s1 = inlined_call_operand.vmem [shape: f32[2,128,1], index: 1, kind: input, shape index: {}]   ;;  %s1131_s2 = inlined_call_operand.vmem [shape: f32[2,128,1], index: 2, kind: input, shape index: {}]   ;;  %s1132_s3 = inlined_call_operand.vmem [shape: bf16[2,128,16], index: 3, kind: input, shape index: {}]   ;;  %s1133_s4 = inlined_call_operand.vmem [shape: bf16[2,128,16], index: 4, kind: output, shape index: {}]  }
   0x1   :  { %s968_s17 = smov 0  }
   0x2 LB: > { %s26_s18 = sadd.s32 1, %s932_s16  ;;  %p798_p0 = scmp.ge.s32.totalorder %s936_s17, 1  ;;  %s936_s17 = sphi %s968_s17, %s14_s17   ;;  %s932_s16 = sphi %s966_s16, %s1135_s16   ;;  %s928_s15 = sphi %s964_s15, %s1134_s15  }
   0x3   : > { %p28_p1 = scmp.ge.s32.totalorder %s26_s18, 2  ;;  %p216_p2 = scmp.lt.s32.totalorder %s936_s17, 3 }
   0x5   : > { %s1137_s18 = smov (%p28_p1, %s26_s18), 0  ;;  %p217_p3 = pnand %p798_p0, %p216_p2 }
   0x6   : > { %p266_p4 = scmp.lt.s32.totalorder (!%p217_p3), %s928_s15, 1  ;;  %v938_v0 = vmov (!%p217_p3), 0   ;;  %vm652_vm0 = vcmask (!%p217_p3), 125952  }
   0x7   : > { %220 = sbr.rel (%p217_p3) target bundleno = 213 (0xd5), region = 36  ;;  %913 = vset.pattern.permute.xlu1 (!%p217_p3), %v938_v0  ;;  %912 = vset.pattern.permute.xlu0 (!%p217_p3), %v938_v0 }
   0xe   : > { %s1139_s15 = smov (!%p266_p4, %s928_s15), 1 }
   0xf   : > { %s985_s19 = sshll.u32 %s1139_s15, 7  ;;  %s830_s26 = sshll.u32 %s1139_s15, 6 }
  0x10   : > { %s278_s22 = scalar_lea.vmem %s1130_s1, %s985_s19  ;;  %s995_s25 = scalar_lea.vmem %s1131_s2, %s985_s19 }
  0x11   : > { %v318_v1 = vld [vmem:[%s278_s22 + $0x10] sm:$0xff]  ;;  %v316_v2 = vld [vmem:[%s278_s22] sm:$0xff]  ;;  %v319_v3 = vld [vmem:[%s278_s22 + $0x18] sm:$0xff]  ;;  %s1034_s29 = scalar_lea.vmem %s1129_s0, %s985_s19  ;;  %s1041_s6 = scalar_lea.vmem %s1132_s3, %s830_s26 }
  0x12   : > { %344 = vperm.xlu1 %913, %v318_v1   ;;  %334 = vperm.xlu0 %912, %v316_v2   ;;  %v317_v4 = vld [vmem:[%s278_s22 + $0x8] sm:$0xff]  ;;  %v320_v6 = vld [vmem:[%s278_s22 + $0x20] sm:$0xff]  ;;  %v323_v7 = vld [vmem:[%s278_s22 + $0x38] sm:$0xff]  ;;  %s1061_s9 = scalar_lea.vmem %s1133_s4, %s830_s26 }
  0x13   : > { %v321_v5 = vld [vmem:[%s278_s22 + $0x28] sm:$0xff]  ;;  %v322_v8 = vld [vmem:[%s278_s22 + $0x30] sm:$0xff]  ;;  %v324_v10 = vld [vmem:[%s278_s22 + $0x40] sm:$0xff] }
  0x14   : > { %v325_v9 = vld [vmem:[%s278_s22 + $0x48] sm:$0xff]  ;;  %v327_v11 = vld [vmem:[%s278_s22 + $0x58] sm:$0xff]  ;;  %v326_v12 = vld [vmem:[%s278_s22 + $0x50] sm:$0xff] }
  0x15   : > { %v329_v13 = vld [vmem:[%s278_s22 + $0x68] sm:$0xff]  ;;  %v328_v14 = vld [vmem:[%s278_s22 + $0x60] sm:$0xff]  ;;  %v331_v15 = vld [vmem:[%s278_s22 + $0x78] sm:$0xff] }
  0x16   : > { %349 = vperm.xlu1 %913, %v319_v3   ;;  %339 = vperm.xlu0 %912, %v317_v4   ;;  %v330_v16 = vld [vmem:[%s278_s22 + $0x70] sm:$0xff]  ;;  %v429_v17 = vld [vmem:[%s995_s25 + $0x8] sm:$0xff]  ;;  %v428_v18 = vld [vmem:[%s995_s25] sm:$0xff] }
  0x17   : > { %v431_v19 = vld [vmem:[%s995_s25 + $0x18] sm:$0xff]  ;;  %v430_v20 = vld [vmem:[%s995_s25 + $0x10] sm:$0xff]  ;;  %v433_v21 = vld [vmem:[%s995_s25 + $0x28] sm:$0xff] }
  0x18   : > { %v432_v22 = vld [vmem:[%s995_s25 + $0x20] sm:$0xff]  ;;  %v435_v23 = vld [vmem:[%s995_s25 + $0x38] sm:$0xff]  ;;  %v434_v24 = vld [vmem:[%s995_s25 + $0x30] sm:$0xff] }
  0x19   : > { %v437_v25 = vld [vmem:[%s995_s25 + $0x48] sm:$0xff]  ;;  %v436_v26 = vld [vmem:[%s995_s25 + $0x40] sm:$0xff]  ;;  %v439_v27 = vld [vmem:[%s995_s25 + $0x58] sm:$0xff] }
  0x1a   : > { %359 = vperm.xlu1 %913, %v321_v5   ;;  %354 = vperm.xlu0 %912, %v320_v6   ;;  %v438_v28 = vld [vmem:[%s995_s25 + $0x50] sm:$0xff]  ;;  %v441_v29 = vld [vmem:[%s995_s25 + $0x68] sm:$0xff]  ;;  %v440_v30 = vld [vmem:[%s995_s25 + $0x60] sm:$0xff] }
  0x1b   : > { %v443_v31 = vld [vmem:[%s995_s25 + $0x78] sm:$0xff]  ;;  %v442_v32 = vld [vmem:[%s995_s25 + $0x70] sm:$0xff]  ;;  %v300_v47 = vld [vmem:[%s1034_s29] sm:$0xff] }
  0x1c   : > { %v301_v48 = vld [vmem:[%s1034_s29 + $0x8] sm:$0xff]  ;;  %v849_v51 = vld [vmem:[%s1041_s6] sm:$0xff]   ;;  %v302_v57 = vld [vmem:[%s1034_s29 + $0x10] sm:$0xff] }
  0x1d   : > { %v851_v54 = vunpack.c.h.bf16 %v849_v51  ;;  %v850_v55 = vunpack.c.l.bf16 %v849_v51  ;;  %v880_v56 = vld [vmem:[%s1041_s6 + $0x8] sm:$0xff]   ;;  %v303_v58 = vld [vmem:[%s1034_s29 + $0x18] sm:$0xff]  ;;  %v881_v5 = vld [vmem:[%s1041_s6 + $0x10] sm:$0xff]  }
  0x1e   : > { %369 = vperm.xlu1 %913, %v323_v7   ;;  %364 = vperm.xlu0 %912, %v322_v8   ;;  %v855_v63 = vunpack.c.h.bf16 %v880_v56  ;;  %v854_v0 = vunpack.c.l.bf16 %v880_v56  ;;  %v305_v6 = vld [vmem:[%s1034_s29 + $0x28] sm:$0xff]  ;;  %v304_v7 = vld [vmem:[%s1034_s29 + $0x20] sm:$0xff] }
  0x22   : > { %379 = vperm.xlu1 %913, %v325_v9   ;;  %374 = vperm.xlu0 %912, %v324_v10  }
  0x26   : > { %389 = vperm.xlu1 %913, %v327_v11   ;;  %384 = vperm.xlu0 %912, %v326_v12  }
  0x2a   : > { %399 = vperm.xlu1 %913, %v329_v13   ;;  %394 = vperm.xlu0 %912, %v328_v14   ;;  %v859_v14 = vunpack.c.h.bf16 %v881_v5 }
  0x2e   : > { %409 = vperm.xlu1 %913, %v331_v15   ;;  %404 = vperm.xlu0 %912, %v330_v16   ;;  %v858_v15 = vunpack.c.l.bf16 %v881_v5 }
  0x32   : > { %451 = vperm.xlu1 %913, %v429_v17   ;;  %446 = vperm.xlu0 %912, %v428_v18  }
  0x36   : > { %461 = vperm.xlu1 %913, %v431_v19   ;;  %456 = vperm.xlu0 %912, %v430_v20   ;;  %v882_v20 = vld [vmem:[%s1041_s6 + $0x18] sm:$0xff]  }
  0x3a   : > { %471 = vperm.xlu1 %913, %v433_v21   ;;  %466 = vperm.xlu0 %912, %v432_v22   ;;  %v307_v21 = vld [vmem:[%s1034_s29 + $0x38] sm:$0xff]  ;;  %v306_v22 = vld [vmem:[%s1034_s29 + $0x30] sm:$0xff] }
  0x3e   : > { %481 = vperm.xlu1 %913, %v435_v23   ;;  %476 = vperm.xlu0 %912, %v434_v24  }
  0x42   : > { %491 = vperm.xlu1 %913, %v437_v25   ;;  %486 = vperm.xlu0 %912, %v436_v26  }
  0x46   : > { %501 = vperm.xlu1 %913, %v439_v27   ;;  %496 = vperm.xlu0 %912, %v438_v28  }
  0x4a   : > { %511 = vperm.xlu1 %913, %v441_v29   ;;  %506 = vperm.xlu0 %912, %v440_v30   ;;  %v863_v29 = vunpack.c.h.bf16 %v882_v20  ;;  %v862_v30 = vunpack.c.l.bf16 %v882_v20  ;;  %v886_v20 = vld [vmem:[%s1041_s6 + $0x38] sm:$0xff]  }
  0x4e   : > { %521 = vperm.xlu1 %913, %v443_v31   ;;  %516 = vperm.xlu0 %912, %v442_v32  }
  0x91   : > { %v345_v33 = vpop.permute.xlu1 %344  ;;  %v335_v34 = vpop.permute.xlu0 %334 }
  0x92   : > { %v412_v52 = vmul.f32 %v335_v34, %v300_v47  ;;  %v414_v1 = vmul.f32 %v345_v33, %v302_v57 }
  0x95   : > { %v350_v35 = vpop.permute.xlu1 %349  ;;  %v340_v36 = vpop.permute.xlu0 %339 }
  0x96   : > { %v413_v53 = vmul.f32 %v340_v36, %v301_v48  ;;  %v415_v2 = vmul.f32 %v350_v35, %v303_v58  ;;  %v883_v35 = vld [vmem:[%s1041_s6 + $0x20] sm:$0xff]   ;;  %v309_v36 = vld [vmem:[%s1034_s29 + $0x48] sm:$0xff] }
  0x97   : > { %v884_v58 = vld [vmem:[%s1041_s6 + $0x28] sm:$0xff]  }
  0x99   : > { %v360_v37 = vpop.permute.xlu1 %359  ;;  %v355_v38 = vpop.permute.xlu0 %354 }
  0x9a   : > { %v417_v16 = vmul.f32 %v360_v37, %v305_v6  ;;  %v416_v17 = vmul.f32 %v355_v38, %v304_v7  ;;  %v308_v37 = vld [vmem:[%s1034_s29 + $0x40] sm:$0xff]  ;;  %v885_v7 = vld [vmem:[%s1041_s6 + $0x30] sm:$0xff]  }
  0x9d   : > { %v1013_v39 = vpop.permute.xlu1 %369  ;;  %v1015_v40 = vpop.permute.xlu0 %364 }
  0x9e   : > { %v419_v31 = vmul.f32 %v1013_v39, %v307_v21  ;;  %v418_v32 = vmul.f32 %v1015_v40, %v306_v22  ;;  %v315_v21 = vld [vmem:[%s1034_s29 + $0x78] sm:$0xff]  ;;  %v314_v22 = vld [vmem:[%s1034_s29 + $0x70] sm:$0xff] }
  0xa1   : > { %v1017_v41 = vpop.permute.xlu1 %379  ;;  %v1019_v42 = vpop.permute.xlu0 %374 }
  0xa5   : > { %v1021_v43 = vpop.permute.xlu1 %389  ;;  %v1023_v44 = vpop.permute.xlu0 %384 }
  0xa9   : > { %v1026_v45 = vpop.permute.xlu1 %399  ;;  %v1028_v46 = vpop.permute.xlu0 %394 }
  0xad   : > { %v1045_v49 = vpop.permute.xlu1 %409  ;;  %v1047_v50 = vpop.permute.xlu0 %404 }
  0xb1   : > { %v452_v59 = vpop.permute.xlu1 %451  ;;  %v447_v60 = vpop.permute.xlu0 %446 }
  0xb2   : > { %v525_v61 = vadd.f32 %v452_v59, %v413_v53  ;;  %v524_v62 = vadd.f32 %v447_v60, %v412_v52  ;;  %v867_v52 = vunpack.c.h.bf16 %v883_v35  ;;  %v866_v53 = vunpack.c.l.bf16 %v883_v35  ;;  %v311_v59 = vld [vmem:[%s1034_s29 + $0x58] sm:$0xff]  ;;  %v310_v60 = vld [vmem:[%s1034_s29 + $0x50] sm:$0xff] }
  0xb4   : > { %v573_v3 = vadd.f32 %v851_v54, %v525_v61  ;;  %v572_v4 = vadd.f32 %v850_v55, %v524_v62  ;;  %v421_v54 = vmul.f32 %v1017_v41, %v309_v36  ;;  %v420_v55 = vmul.f32 %v1019_v42, %v308_v37 }
  0xb5   : > { %v462_v8 = vpop.permute.xlu1 %461  ;;  %v457_v9 = vpop.permute.xlu0 %456 }
  0xb6   : > { %v833_v10 = vpack.c.bf16 %v573_v3, %v573_v3  ;;  %v832_v11 = vpack.c.bf16 %v572_v4, %v572_v4  ;;  %v527_v12 = vadd.f32 %v462_v8, %v415_v2  ;;  %v526_v13 = vadd.f32 %v457_v9, %v414_v1  ;;  %v313_v8 = vld [vmem:[%s1034_s29 + $0x68] sm:$0xff]  ;;  %v312_v9 = vld [vmem:[%s1034_s29 + $0x60] sm:$0xff] }
  0xb7   : > { %v871_v1 = vunpack.c.h.bf16 %v884_v58  ;;  %v870_v2 = vunpack.c.l.bf16 %v884_v58  ;;  %v423_v3 = vmul.f32 %v1021_v43, %v311_v59  ;;  %v422_v4 = vmul.f32 %v1023_v44, %v310_v60 }
  0xb8   : > { %654 = vst.msk [vmem:[%s1061_s9 + $0x4] sm:$0xf] %vm652_vm0, %v833_v10  ;;  %653 = vst.msk [vmem:[%s1061_s9] sm:$0xf] %vm652_vm0, %v832_v11  ;;  %v575_v18 = vadd.f32 %v855_v63, %v527_v12  ;;  %v574_v19 = vadd.f32 %v854_v0, %v526_v13 }
  0xb9   : > { %v472_v23 = vpop.permute.xlu1 %471  ;;  %v467_v24 = vpop.permute.xlu0 %466 }
  0xba   : > { %v835_v25 = vpack.c.bf16 %v575_v18, %v575_v18  ;;  %v834_v26 = vpack.c.bf16 %v574_v19, %v574_v19  ;;  %v529_v27 = vadd.f32 %v472_v23, %v417_v16  ;;  %v528_v28 = vadd.f32 %v467_v24, %v416_v17 }
  0xbb   : > { %v425_v16 = vmul.f32 %v1026_v45, %v313_v8  ;;  %v424_v17 = vmul.f32 %v1028_v46, %v312_v9  ;;  %v879_v46 = vunpack.c.h.bf16 %v886_v20 }
  0xbc   : > { %656 = vst.msk [vmem:[%s1061_s9 + $0xc] sm:$0xf] %vm652_vm0, %v835_v25  ;;  %655 = vst.msk [vmem:[%s1061_s9 + $0x8] sm:$0xf] %vm652_vm0, %v834_v26  ;;  %v577_v33 = vadd.f32 %v859_v14, %v529_v27  ;;  %v576_v34 = vadd.f32 %v858_v15, %v528_v28  ;;  %v875_v14 = vunpack.c.h.bf16 %v885_v7  ;;  %v874_v15 = vunpack.c.l.bf16 %v885_v7 }
  0xbd   : > { %v482_v38 = vpop.permute.xlu1 %481  ;;  %v477_v47 = vpop.permute.xlu0 %476  ;;  %v878_v28 = vunpack.c.l.bf16 %v886_v20 }
  0xbe   : > { %v837_v48 = vpack.c.bf16 %v577_v33, %v577_v33  ;;  %v836_v39 = vpack.c.bf16 %v576_v34, %v576_v34  ;;  %v531_v51 = vadd.f32 %v482_v38, %v419_v31  ;;  %v530_v40 = vadd.f32 %v477_v47, %v418_v32 }
  0xc0   : > { %658 = vst.msk [vmem:[%s1061_s9 + $0x14] sm:$0xf] %vm652_vm0, %v837_v48  ;;  %657 = vst.msk [vmem:[%s1061_s9 + $0x10] sm:$0xf] %vm652_vm0, %v836_v39  ;;  %v579_v56 = vadd.f32 %v863_v29, %v531_v51  ;;  %v578_v57 = vadd.f32 %v862_v30, %v530_v40  ;;  %v427_v29 = vmul.f32 %v1045_v49, %v315_v21 }
  0xc1   : > { %v492_v61 = vpop.permute.xlu1 %491  ;;  %v487_v62 = vpop.permute.xlu0 %486  ;;  %v426_v30 = vmul.f32 %v1047_v50, %v314_v22 }
  0xc2   : > { %v839_v63 = vpack.c.bf16 %v579_v56, %v579_v56  ;;  %v838_v41 = vpack.c.bf16 %v578_v57, %v578_v57  ;;  %v533_v0 = vadd.f32 %v492_v61, %v421_v54  ;;  %v532_v42 = vadd.f32 %v487_v62, %v420_v55 }
  0xc4   : > { %660 = vst.msk [vmem:[%s1061_s9 + $0x1c] sm:$0xf] %vm652_vm0, %v839_v63  ;;  %659 = vst.msk [vmem:[%s1061_s9 + $0x18] sm:$0xf] %vm652_vm0, %v838_v41  ;;  %v581_v5 = vadd.f32 %v867_v52, %v533_v0  ;;  %v580_v6 = vadd.f32 %v866_v53, %v532_v42 }
  0xc5   : > { %v502_v10 = vpop.permute.xlu1 %501  ;;  %v497_v11 = vpop.permute.xlu0 %496 }
  0xc6   : > { %v841_v12 = vpack.c.bf16 %v581_v5, %v581_v5  ;;  %v840_v43 = vpack.c.bf16 %v580_v6, %v580_v6  ;;  %v535_v13 = vadd.f32 %v502_v10, %v423_v3  ;;  %v534_v44 = vadd.f32 %v497_v11, %v422_v4 }
  0xc8   : > { %662 = vst.msk [vmem:[%s1061_s9 + $0x24] sm:$0xf] %vm652_vm0, %v841_v12  ;;  %661 = vst.msk [vmem:[%s1061_s9 + $0x20] sm:$0xf] %vm652_vm0, %v840_v43  ;;  %v583_v18 = vadd.f32 %v871_v1, %v535_v13  ;;  %v582_v19 = vadd.f32 %v870_v2, %v534_v44 }
  0xc9   : > { %v512_v23 = vpop.permute.xlu1 %511  ;;  %v507_v24 = vpop.permute.xlu0 %506 }
  0xca   : > { %v843_v25 = vpack.c.bf16 %v583_v18, %v583_v18  ;;  %v842_v26 = vpack.c.bf16 %v582_v19, %v582_v19  ;;  %v537_v27 = vadd.f32 %v512_v23, %v425_v16  ;;  %v536_v45 = vadd.f32 %v507_v24, %v424_v17 }
  0xcc   : > { %664 = vst.msk [vmem:[%s1061_s9 + $0x2c] sm:$0xf] %vm652_vm0, %v843_v25  ;;  %663 = vst.msk [vmem:[%s1061_s9 + $0x28] sm:$0xf] %vm652_vm0, %v842_v26  ;;  %v585_v31 = vadd.f32 %v875_v14, %v537_v27  ;;  %v584_v32 = vadd.f32 %v874_v15, %v536_v45 }
  0xcd   : > { %v522_v33 = vpop.permute.xlu1 %521  ;;  %v517_v34 = vpop.permute.xlu0 %516 }
  0xce   : > { %v845_v35 = vpack.c.bf16 %v585_v31, %v585_v31  ;;  %v844_v36 = vpack.c.bf16 %v584_v32, %v584_v32  ;;  %v539_v37 = vadd.f32 %v522_v33, %v427_v29  ;;  %v538_v38 = vadd.f32 %v517_v34, %v426_v30 }
  0xd0   : > { %666 = vst.msk [vmem:[%s1061_s9 + $0x34] sm:$0xf] %vm652_vm0, %v845_v35  ;;  %665 = vst.msk [vmem:[%s1061_s9 + $0x30] sm:$0xf] %vm652_vm0, %v844_v36  ;;  %v587_v49 = vadd.f32 %v879_v46, %v539_v37  ;;  %v586_v50 = vadd.f32 %v878_v28, %v538_v38 }
  0xd2   : > { %v847_v47 = vpack.c.bf16 %v587_v49, %v587_v49  ;;  %v846_v48 = vpack.c.bf16 %v586_v50, %v586_v50 }
  0xd4   : > { %668 = vst.msk [vmem:[%s1061_s9 + $0x3c] sm:$0xf] %vm652_vm0, %v847_v47  ;;  %667 = vst.msk [vmem:[%s1061_s9 + $0x38] sm:$0xf] %vm652_vm0, %v846_v48 }
  0xd5 PF: > { %s14_s17 = sadd.s32 1, %s936_s17   ;;  %s1134_s15 = smov %s932_s16 }
  0xd6   : > { %p11_p5 = scmp.ge.s32.totalorder %s14_s17, 4   ;;  %s1135_s16 = smov %s1137_s18 }
  0xd8   :  { %13 = sbr.rel (!%p11_p5) target bundleno = 2 (0x2), region = 75 }

// kernel: stylenet_forward.37
= control target key start
LH: loop header
LB: loop body
LE: loop exit
PB: predicated region body
PF: predicated region fallthrough
CT: control target
= control target key end

     0   :  { %s2909_s15 = smov 0   ;;  %s2911_s16 = smov 0   ;;  %s3597_s0 = inlined_call_operand.vmem [shape: bf16[2,1152,16], index: 0, kind: input, shape index: {}]   ;;  %s3598_s1 = inlined_call_operand.vmem [shape: bf16[128,1152], index: 1, kind: input, shape index: {}]   ;;  %s3599_s2 = inlined_call_operand.vmem [shape: f32[2,128,16], index: 2, kind: output, shape index: {0}]   ;;  %s3600_s3 = inlined_call_operand.vmem [shape: f32[2,128,1], index: 3, kind: output, shape index: {1}]   ;;  %s3601_s4 = inlined_call_operand.vmem [shape: f32[2,128,1], index: 4, kind: output, shape index: {2}]  }
   0x1   :  { %s2913_s17 = smov 0  }
   0x2 LB: > { %s27_s18 = sadd.s32 1, %s2877_s16  ;;  %p2180_p0 = scmp.ge.s32.totalorder %s2881_s17, 1  ;;  %s2881_s17 = sphi %s2913_s17, %s15_s17   ;;  %s2877_s16 = sphi %s2911_s16, %s3603_s16   ;;  %s2873_s15 = sphi %s2909_s15, %s3602_s15  }
   0x3   : > { %p29_p1 = scmp.ge.s32.totalorder %s27_s18, 2  ;;  %p186_p2 = scmp.lt.s32.totalorder %s2881_s17, 3 }
   0x5   : > { %s3605_s18 = smov (%p29_p1, %s27_s18), 0  ;;  %p187_p3 = pnand %p2180_p0, %p186_p2 }
   0x6   : > { %p228_p4 = scmp.lt.s32.totalorder (!%p187_p3), %s2873_s15, 1  ;;  %v2717_v0 = vld [vmem:[%s3598_s1 + $0x4] ss:$36 sps:$4 sm:$0xff] (!%p187_p3)   ;;  %v2720_v1 = vld [vmem:[%s3598_s1 + $0xc] ss:$36 sps:$4 sm:$0xff] (!%p187_p3)   ;;  %vm259_vm0 = vcmask (!%p187_p3), 7168  }
   0x7   : > { %190 = sbr.rel (%p187_p3) target bundleno = 601 (0x259), region = 28  ;;  %1348 = vmatprep.mubr.bf16.mxu0 (!%p187_p3), %v2717_v0  ;;  %1445 = vmatprep.mubr.bf16.mxu1 (!%p187_p3), %v2720_v1  ;;  %v2715_v32 = vld [vmem:[%s3598_s1] ss:$36 sps:$4 sm:$0xff] (!%p187_p3)   ;;  %v2718_v34 = vld [vmem:[%s3598_s1 + $0x8] ss:$36 sps:$4 sm:$0xff] (!%p187_p3)   ;;  %vm1801_vm1 = vcmask (!%p187_p3), 130048  }
   0x8   : > { %v2725_v36 = vld [vmem:[%s3598_s1 + $0x4c] ss:$36 sps:$4 sm:$0xff] (!%p187_p3)   ;;  %v2727_v38 = vld [vmem:[%s3598_s1 + $0x54] ss:$36 sps:$4 sm:$0xff] (!%p187_p3)   ;;  %v2737_v49 = vld [vmem:[%s3598_s1 + $0x9c] ss:$36 sps:$4 sm:$0xff] (!%p187_p3)  }
   0x9   : > { %v2729_v43 = vld [vmem:[%s3598_s1 + $0x48] ss:$36 sps:$4 sm:$0xff] (!%p187_p3)   ;;  %v2730_v47 = vld [vmem:[%s3598_s1 + $0x50] ss:$36 sps:$4 sm:$0xff] (!%p187_p3)   ;;  %v2740_v55 = vld [vmem:[%s3598_s1 + $0x98] ss:$36 sps:$4 sm:$0xff] (!%p187_p3)  }
   0xa   : > { %v2735_v48 = vld [vmem:[%s3598_s1 + $0x94] ss:$36 sps:$4 sm:$0xff] (!%p187_p3)   ;;  %v2745_v56 = vld [vmem:[%s3598_s1 + $0xdc] ss:$36 sps:$4 sm:$0xff] (!%p187_p3)   ;;  %v2747_v57 = vld [vmem:[%s3598_s1 + $0xe4] ss:$36 sps:$4 sm:$0xff] (!%p187_p3)  }
   0xb   : > { %v2739_v54 = vld [vmem:[%s3598_s1 + $0x90] ss:$36 sps:$4 sm:$0xff] (!%p187_p3)   ;;  %v2749_v62 = vld [vmem:[%s3598_s1 + $0xd8] ss:$36 sps:$4 sm:$0xff] (!%p187_p3)   ;;  %v2750_v63 = vld [vmem:[%s3598_s1 + $0xe0] ss:$36 sps:$4 sm:$0xff] (!%p187_p3)  }
   0xc   : > { %v2755_v0 = vld [vmem:[%s3598_s1 + $0x124] ss:$36 sps:$4 sm:$0xff] (!%p187_p3)   ;;  %v2757_v1 = vld [vmem:[%s3598_s1 + $0x12c] ss:$36 sps:$4 sm:$0xff] (!%p187_p3)  }
   0xe   : > { %s3607_s15 = smov (!%p228_p4, %s2873_s15), 1 }
   0xf   : > { %s2657_s23 = smul.u32 576, %s3607_s15  ;;  %s3254_s13 = sshll.u32 %s3607_s15, 7 }
  0x10   : > { %s3262_s20 = scalar_lea.vmem %s3600_s3, %s3254_s13  ;;  %s3268_s15 = scalar_lea.vmem %s3601_s4, %s3254_s13 }
  0x11   : > { %s2939_s26 = scalar_lea.vmem %s3597_s0, %s2657_s23  ;;  %s3374_s24 = scalar_lea.vmem %s3599_s2, %s3254_s13 }
  0x12   : > { %v2683_v2 = vld [vmem:[%s2939_s26 + $0x40] sm:$0xff]   ;;  %v2687_v6 = vld [vmem:[%s2939_s26 + $0x48] sm:$0xff]   ;;  %v2691_v10 = vld [vmem:[%s2939_s26 + $0x50] sm:$0xff]  }
  0x13   : > { %v2684_v3 = vld [vmem:[%s2939_s26 + $0xc0] sm:$0xff]   ;;  %2337 = vmatprep.subr.bf16.mxu0 %v2683_v2  ;;  %v2688_v7 = vld [vmem:[%s2939_s26 + $0xc8] sm:$0xff]   ;;  %v2692_v11 = vld [vmem:[%s2939_s26 + $0xd0] sm:$0xff]  }
  0x14   : > { %v2685_v4 = vld [vmem:[%s2939_s26] sm:$0xff]   ;;  %2401 = vmatprep.subr.bf16.mxu1 %v2684_v3  ;;  %v2689_v8 = vld [vmem:[%s2939_s26 + $0x8] sm:$0xff]   ;;  %v2693_v12 = vld [vmem:[%s2939_s26 + $0x10] sm:$0xff]  }
  0x15   : > { %v2686_v5 = vld [vmem:[%s2939_s26 + $0x80] sm:$0xff]   ;;  %2338 = vmatpush3.bf16.msra.mxu0 %v2685_v4  ;;  %v2690_v9 = vld [vmem:[%s2939_s26 + $0x88] sm:$0xff]   ;;  %v2694_v13 = vld [vmem:[%s2939_s26 + $0x90] sm:$0xff]  }
  0x16   : > { %2402 = vmatpush3.bf16.msra.mxu1 %v2686_v5  ;;  %2339 = vmatprep.subr.bf16.mxu0 %v2687_v6  ;;  %v2695_v14 = vld [vmem:[%s2939_s26 + $0x58] sm:$0xff]   ;;  %v2699_v18 = vld [vmem:[%s2939_s26 + $0x60] sm:$0xff]   ;;  %v2703_v22 = vld [vmem:[%s2939_s26 + $0x68] sm:$0xff]  }
  0x17   : > { %2403 = vmatprep.subr.bf16.mxu1 %v2688_v7  ;;  %v2696_v15 = vld [vmem:[%s2939_s26 + $0xd8] sm:$0xff]   ;;  %v2700_v19 = vld [vmem:[%s2939_s26 + $0xe0] sm:$0xff]   ;;  %v2704_v23 = vld [vmem:[%s2939_s26 + $0xe8] sm:$0xff]  }
  0x18   : > { %v2697_v16 = vld [vmem:[%s2939_s26 + $0x18] sm:$0xff]   ;;  %v2701_v20 = vld [vmem:[%s2939_s26 + $0x20] sm:$0xff]   ;;  %v2705_v24 = vld [vmem:[%s2939_s26 + $0x28] sm:$0xff]  }
  0x19   : > { %2340 = vmatpush3.bf16.msra.mxu0 %v2689_v8  ;;  %v2698_v17 = vld [vmem:[%s2939_s26 + $0x98] sm:$0xff]   ;;  %v2702_v21 = vld [vmem:[%s2939_s26 + $0xa0] sm:$0xff]   ;;  %v2706_v25 = vld [vmem:[%s2939_s26 + $0xa8] sm:$0xff]  }
  0x1a   : > { %2404 = vmatpush3.bf16.msra.mxu1 %v2690_v9  ;;  %2341 = vmatprep.subr.bf16.mxu0 %v2691_v10  ;;  %v2707_v26 = vld [vmem:[%s2939_s26 + $0x70] sm:$0xff]   ;;  %v2711_v30 = vld [vmem:[%s2939_s26 + $0x78] sm:$0xff]   ;;  %v2721_v37 = vld [vmem:[%s2939_s26 + $0x140] sm:$0xff]  }
  0x1b   : > { %2405 = vmatprep.subr.bf16.mxu1 %v2692_v11  ;;  %v2708_v27 = vld [vmem:[%s2939_s26 + $0xf0] sm:$0xff]   ;;  %v2712_v31 = vld [vmem:[%s2939_s26 + $0xf8] sm:$0xff]   ;;  %v2722_v39 = vld [vmem:[%s2939_s26 + $0x1c0] sm:$0xff]  }
  0x1c   : > { %v2709_v28 = vld [vmem:[%s2939_s26 + $0x30] sm:$0xff]   ;;  %v2713_v33 = vld [vmem:[%s2939_s26 + $0x38] sm:$0xff]   ;;  %v2723_v40 = vld [vmem:[%s2939_s26 + $0x100] sm:$0xff]  }
  0x1d   : > { %2342 = vmatpush3.bf16.msra.mxu0 %v2693_v12  ;;  %v2710_v29 = vld [vmem:[%s2939_s26 + $0xb0] sm:$0xff]   ;;  %v2714_v35 = vld [vmem:[%s2939_s26 + $0xb8] sm:$0xff]   ;;  %v2724_v41 = vld [vmem:[%s2939_s26 + $0x180] sm:$0xff]  }
  0x1e   : > { %2406 = vmatpush3.bf16.msra.mxu1 %v2694_v13  ;;  %2343 = vmatprep.subr.bf16.mxu0 %v2695_v14  ;;  %v2731_v42 = vld [vmem:[%s2939_s26 + $0x148] sm:$0xff]   ;;  %v2741_v50 = vld [vmem:[%s2939_s26 + $0x150] sm:$0xff]   ;;  %v2751_v58 = vld [vmem:[%s2939_s26 + $0x158] sm:$0xff]  }
  0x1f   : > { %2407 = vmatprep.subr.bf16.mxu1 %v2696_v15  ;;  %v2732_v44 = vld [vmem:[%s2939_s26 + $0x1c8] sm:$0xff]   ;;  %v2742_v51 = vld [vmem:[%s2939_s26 + $0x1d0] sm:$0xff]   ;;  %v2752_v59 = vld [vmem:[%s2939_s26 + $0x1d8] sm:$0xff]  }
  0x20   : > { %v2733_v45 = vld [vmem:[%s2939_s26 + $0x108] sm:$0xff]   ;;  %v2743_v52 = vld [vmem:[%s2939_s26 + $0x110] sm:$0xff]   ;;  %v2753_v60 = vld [vmem:[%s2939_s26 + $0x118] sm:$0xff]  }
  0x21   : > { %2344 = vmatpush3.bf16.msra.mxu0 %v2697_v16  ;;  %v2734_v46 = vld [vmem:[%s2939_s26 + $0x188] sm:$0xff]   ;;  %v2744_v53 = vld [vmem:[%s2939_s26 + $0x190] sm:$0xff]   ;;  %v2754_v61 = vld [vmem:[%s2939_s26 + $0x198] sm:$0xff]  }
  0x22   : > { %2408 = vmatpush3.bf16.msra.mxu1 %v2698_v17  ;;  %2345 = vmatprep.subr.bf16.mxu0 %v2699_v18  ;;  %v2761_v2 = vld [vmem:[%s2939_s26 + $0x160] sm:$0xff]   ;;  %v2771_v7 = vld [vmem:[%s2939_s26 + $0x168] sm:$0xff]   ;;  %v2767_v13 = vld [vmem:[%s3598_s1 + $0x174] ss:$36 sps:$4 sm:$0xff]  }
  0x23   : > { %2409 = vmatprep.subr.bf16.mxu1 %v2700_v19  ;;  %v2762_v3 = vld [vmem:[%s2939_s26 + $0x1e0] sm:$0xff]   ;;  %v2760_v8 = vld [vmem:[%s3598_s1 + $0x128] ss:$36 sps:$4 sm:$0xff]   ;;  %v2781_v14 = vld [vmem:[%s2939_s26 + $0x170] sm:$0xff]  }
  0x24   : > { %v2763_v4 = vld [vmem:[%s2939_s26 + $0x120] sm:$0xff]   ;;  %v2765_v9 = vld [vmem:[%s3598_s1 + $0x16c] ss:$36 sps:$4 sm:$0xff]  }
  0x25   : > { %2346 = vmatpush3.bf16.msra.mxu0 %v2701_v20  ;;  %v2764_v5 = vld [vmem:[%s2939_s26 + $0x1a0] sm:$0xff]   ;;  %v2772_v10 = vld [vmem:[%s2939_s26 + $0x1e8] sm:$0xff]   ;;  %v2782_v16 = vld [vmem:[%s2939_s26 + $0x1f0] sm:$0xff]  }
  0x26   : > { %2410 = vmatpush3.bf16.msra.mxu1 %v2702_v21  ;;  %2347 = vmatprep.subr.bf16.mxu0 %v2703_v22  ;;  %v2759_v6 = vld [vmem:[%s3598_s1 + $0x120] ss:$36 sps:$4 sm:$0xff]   ;;  %v2773_v11 = vld [vmem:[%s2939_s26 + $0x128] sm:$0xff]   ;;  %v2770_v17 = vld [vmem:[%s3598_s1 + $0x170] ss:$36 sps:$4 sm:$0xff]  }
  0x27   : > { %2411 = vmatprep.subr.bf16.mxu1 %v2704_v23  ;;  %v2774_v12 = vld [vmem:[%s2939_s26 + $0x1a8] sm:$0xff]   ;;  %v2783_v18 = vld [vmem:[%s2939_s26 + $0x130] sm:$0xff]   ;;  %v2777_v21 = vld [vmem:[%s3598_s1 + $0x1bc] ss:$36 sps:$4 sm:$0xff]  }
  0x28   : > { %v2769_v15 = vld [vmem:[%s3598_s1 + $0x168] ss:$36 sps:$4 sm:$0xff]   ;;  %v2784_v19 = vld [vmem:[%s2939_s26 + $0x1b0] sm:$0xff]   ;;  %v2791_v22 = vld [vmem:[%s2939_s26 + $0x178] sm:$0xff]  }
  0x29   : > { %2348 = vmatpush3.bf16.msra.mxu0 %v2705_v24  ;;  %v2775_v20 = vld [vmem:[%s3598_s1 + $0x1b4] ss:$36 sps:$4 sm:$0xff]  }
  0x2a   : > { %2412 = vmatpush3.bf16.msra.mxu1 %v2706_v25  ;;  %2349 = vmatprep.subr.bf16.mxu0 %v2707_v26  ;;  %v2792_v23 = vld [vmem:[%s2939_s26 + $0x1f8] sm:$0xff]   ;;  %v2779_v26 = vld [vmem:[%s3598_s1 + $0x1b0] ss:$36 sps:$4 sm:$0xff]  }
  0x2b   : > { %2413 = vmatprep.subr.bf16.mxu1 %v2708_v27  ;;  %v2793_v24 = vld [vmem:[%s2939_s26 + $0x138] sm:$0xff]  }
  0x2c   : > { %v2794_v25 = vld [vmem:[%s2939_s26 + $0x1b8] sm:$0xff]  }
  0x2d   : > { %2350 = vmatpush3.bf16.msra.mxu0 %v2709_v28  ;;  %v2780_v27 = vld [vmem:[%s3598_s1 + $0x1b8] ss:$36 sps:$4 sm:$0xff]  }
  0x2e   : > { %2414 = vmatpush3.bf16.msra.mxu1 %v2710_v29  ;;  %2351 = vmatprep.subr.bf16.mxu0 %v2711_v30  ;;  %v2785_v28 = vld [vmem:[%s3598_s1 + $0x1fc] ss:$36 sps:$4 sm:$0xff]   ;;  %v2787_v29 = vld [vmem:[%s3598_s1 + $0x204] ss:$36 sps:$4 sm:$0xff]  }
  0x2f   : > { %2415 = vmatprep.subr.bf16.mxu1 %v2712_v31  ;;  %v2801_v30 = vld [vmem:[%s2939_s26 + $0x200] sm:$0xff]   ;;  %v2789_v31 = vld [vmem:[%s3598_s1 + $0x1f8] ss:$36 sps:$4 sm:$0xff]  }
  0x31   : > { %2352 = vmatpush3.bf16.msra.mxu0 %v2713_v33  ;;  %v2797_v33 = vld [vmem:[%s3598_s1 + $0x14] ss:$36 sps:$4 sm:$0xff]  }
  0x32   : > { %2416 = vmatpush3.bf16.msra.mxu1 %v2714_v35  ;;  %2465 = vmatprep.subr.bf16.mxu0 %v2721_v37  ;;  %v2795_v35 = vld [vmem:[%s3598_s1 + $0x10] ss:$36 sps:$4 sm:$0xff]   ;;  %v2802_v37 = vld [vmem:[%s3598_s1 + $0x5c] ss:$36 sps:$4 sm:$0xff]  }
  0x33   : > { %2529 = vmatprep.subr.bf16.mxu1 %v2722_v39  ;;  %v2808_v39 = vld [vmem:[%s2939_s26 + $0x208] sm:$0xff]  }
  0x34   : > { %1349 = vmatmul.mubr.bf16.vlgmr.msra.gmra.mrb[0].mxu0 %v2715_v32  ;;  %v2790_v32 = vld [vmem:[%s3598_s1 + $0x200] ss:$36 sps:$4 sm:$0xff]  }
  0x35   : > { %1446 = vmatmul.mubr.bf16.vlgmr.msra.gmra.mrb[0].mxu1 %v2718_v34  ;;  %2466 = vmatpush3.bf16.msra.mxu0 %v2723_v40  ;;  %v2800_v34 = vld [vmem:[%s3598_s1 + $0x1c] ss:$36 sps:$4 sm:$0xff]   ;;  %v2815_v40 = vld [vmem:[%s2939_s26 + $0x210] sm:$0xff]  }
  0x36   : > { %2530 = vmatpush3.bf16.msra.mxu1 %v2724_v41  ;;  %1356 = vmatprep.mubr.bf16.mxu0 %v2725_v36  ;;  %v2798_v36 = vld [vmem:[%s3598_s1 + $0x18] ss:$36 sps:$4 sm:$0xff]  }
  0x37   : > { %1453 = vmatprep.mubr.bf16.mxu1 %v2727_v38  ;;  %2467 = vmatprep.subr.bf16.mxu0 %v2731_v42  ;;  %v2804_v38 = vld [vmem:[%s3598_s1 + $0x64] ss:$36 sps:$4 sm:$0xff]   ;;  %v2806_v41 = vld [vmem:[%s3598_s1 + $0x58] ss:$36 sps:$4 sm:$0xff]  }
  0x38   : > { %2531 = vmatprep.subr.bf16.mxu1 %v2732_v44  ;;  %v2807_v42 = vld [vmem:[%s3598_s1 + $0x60] ss:$36 sps:$4 sm:$0xff]   ;;  %v2811_v44 = vld [vmem:[%s3598_s1 + $0xac] ss:$36 sps:$4 sm:$0xff]  }
  0x39   : > { %2468 = vmatpush3.bf16.msra.mxu0 %v2733_v45  ;;  %v2822_v45 = vld [vmem:[%s2939_s26 + $0x218] sm:$0xff]  }
  0x3a   : > { %2532 = vmatpush3.bf16.msra.mxu1 %v2734_v46  ;;  %2469 = vmatprep.subr.bf16.mxu0 %v2741_v50  ;;  %v2813_v46 = vld [vmem:[%s3598_s1 + $0xa0] ss:$36 sps:$4 sm:$0xff]   ;;  %v2818_v50 = vld [vmem:[%s3598_s1 + $0xf4] ss:$36 sps:$4 sm:$0xff]  }
  0x3b   : > { %2533 = vmatprep.subr.bf16.mxu1 %v2742_v51  ;;  %v2836_v51 = vld [vmem:[%s2939_s26 + $0x228] sm:$0xff]  }
  0x3c   : > { %1357 = vmatmul.mubr.bf16.gmra.mrb[4].mxu0 %v2729_v43  ;;  %v2809_v43 = vld [vmem:[%s3598_s1 + $0xa4] ss:$36 sps:$4 sm:$0xff]  }
  0x3d   : > { %1454 = vmatmul.mubr.bf16.gmra.mrb[4].mxu1 %v2730_v47  ;;  %1364 = vmatprep.mubr.bf16.mxu0 %v2735_v48  ;;  %v2829_v47 = vld [vmem:[%s2939_s26 + $0x220] sm:$0xff]   ;;  %v2814_v48 = vld [vmem:[%s3598_s1 + $0xa8] ss:$36 sps:$4 sm:$0xff]  }
  0x3e   : > { %1461 = vmatprep.mubr.bf16.mxu1 %v2737_v49  ;;  %2470 = vmatpush3.bf16.msra.mxu0 %v2743_v52  ;;  %v2816_v49 = vld [vmem:[%s3598_s1 + $0xec] ss:$36 sps:$4 sm:$0xff]  }
  0x3f   : > { %2534 = vmatpush3.bf16.msra.mxu1 %v2744_v53  ;;  %2471 = vmatprep.subr.bf16.mxu0 %v2751_v58  ;;  %v2843_v52 = vld [vmem:[%s2939_s26 + $0x230] sm:$0xff]   ;;  %v2820_v53 = vld [vmem:[%s3598_s1 + $0xe8] ss:$36 sps:$4 sm:$0xff]  }
  0x40   : > { %2535 = vmatprep.subr.bf16.mxu1 %v2752_v59  ;;  %v2827_v58 = vld [vmem:[%s3598_s1 + $0x130] ss:$36 sps:$4 sm:$0xff]   ;;  %v2828_v59 = vld [vmem:[%s3598_s1 + $0x138] ss:$36 sps:$4 sm:$0xff]  }
  0x42   : > { %2472 = vmatpush3.bf16.msra.mxu0 %v2753_v60  ;;  %v2830_v60 = vld [vmem:[%s3598_s1 + $0x17c] ss:$36 sps:$4 sm:$0xff]  }
  0x43   : > { %2536 = vmatpush3.bf16.msra.mxu1 %v2754_v61  ;;  %2473 = vmatprep.subr.bf16.mxu0 %v2761_v2  ;;  %v2832_v61 = vld [vmem:[%s3598_s1 + $0x184] ss:$36 sps:$4 sm:$0xff]  }
  0x44   : > { %1365 = vmatmul.mubr.bf16.gmra.mrb[8].mxu0 %v2739_v54  ;;  %2537 = vmatprep.subr.bf16.mxu1 %v2762_v3  ;;  %v2821_v54 = vld [vmem:[%s3598_s1 + $0xf0] ss:$36 sps:$4 sm:$0xff]   ;;  %v2841_v2 = vld [vmem:[%s3598_s1 + $0x1c0] ss:$36 sps:$4 sm:$0xff]   ;;  %v2842_v3 = vld [vmem:[%s3598_s1 + $0x1c8] ss:$36 sps:$4 sm:$0xff]  }
  0x45   : > { %1462 = vmatmul.mubr.bf16.gmra.mrb[8].mxu1 %v2740_v55  ;;  %1372 = vmatprep.mubr.bf16.mxu0 %v2745_v56  ;;  %v2823_v55 = vld [vmem:[%s3598_s1 + $0x134] ss:$36 sps:$4 sm:$0xff]   ;;  %v2825_v56 = vld [vmem:[%s3598_s1 + $0x13c] ss:$36 sps:$4 sm:$0xff]  }
  0x46   : > { %1469 = vmatprep.mubr.bf16.mxu1 %v2747_v57  ;;  %2474 = vmatpush3.bf16.msra.mxu0 %v2763_v4  ;;  %v2850_v57 = vld [vmem:[%s2939_s26 + $0x238] sm:$0xff]   ;;  %v2844_v4 = vld [vmem:[%s3598_s1 + $0x20c] ss:$36 sps:$4 sm:$0xff]  }
  0x47   : > { %2538 = vmatpush3.bf16.msra.mxu1 %v2764_v5  ;;  %2475 = vmatprep.subr.bf16.mxu0 %v2771_v7  ;;  %v2846_v5 = vld [vmem:[%s3598_s1 + $0x214] ss:$36 sps:$4 sm:$0xff]  }
  0x48   : > { %2539 = vmatprep.subr.bf16.mxu1 %v2772_v10  ;;  %v2849_v7 = vld [vmem:[%s3598_s1 + $0x210] ss:$36 sps:$4 sm:$0xff]   ;;  %v2853_v10 = vld [vmem:[%s3598_s1 + $0x68] ss:$36 sps:$4 sm:$0xff]  }
  0x4a   : > { %2476 = vmatpush3.bf16.msra.mxu0 %v2773_v11  ;;  %v2854_v11 = vld [vmem:[%s3598_s1 + $0x188] ss:$36 sps:$4 sm:$0xff]  }
  0x4b   : > { %2540 = vmatpush3.bf16.msra.mxu1 %v2774_v12  ;;  %2477 = vmatprep.subr.bf16.mxu0 %v2781_v14  ;;  %v2855_v12 = vld [vmem:[%s3598_s1 + $0xb0] ss:$36 sps:$4 sm:$0xff]   ;;  %v2857_v14 = vld [vmem:[%s3598_s1 + $0xf8] ss:$36 sps:$4 sm:$0xff]  }
  0x4c   : > { %1373 = vmatmul.mubr.bf16.gmra.mrb[12].mxu0 %v2749_v62  ;;  %2541 = vmatprep.subr.bf16.mxu1 %v2782_v16  ;;  %v2834_v62 = vld [vmem:[%s3598_s1 + $0x178] ss:$36 sps:$4 sm:$0xff]  }
  0x4d   : > { %1470 = vmatmul.mubr.bf16.gmra.mrb[12].mxu1 %v2750_v63  ;;  %1380 = vmatprep.mubr.bf16.mxu0 %v2755_v0  ;;  %v2835_v63 = vld [vmem:[%s3598_s1 + $0x180] ss:$36 sps:$4 sm:$0xff]  }
  0x4e   : > { %1477 = vmatprep.mubr.bf16.mxu1 %v2757_v1  ;;  %2478 = vmatpush3.bf16.msra.mxu0 %v2783_v18  ;;  %v2837_v0 = vld [vmem:[%s3598_s1 + $0x1c4] ss:$36 sps:$4 sm:$0xff]   ;;  %v2839_v1 = vld [vmem:[%s3598_s1 + $0x1cc] ss:$36 sps:$4 sm:$0xff]  }
  0x4f   : > { %2542 = vmatpush3.bf16.msra.mxu1 %v2784_v19  ;;  %2479 = vmatprep.subr.bf16.mxu0 %v2791_v22 }
  0x50   : > { %2543 = vmatprep.subr.bf16.mxu1 %v2792_v23 }
  0x52   : > { %2480 = vmatpush3.bf16.msra.mxu0 %v2793_v24 }
  0x53   : > { %2544 = vmatpush3.bf16.msra.mxu1 %v2794_v25  ;;  %2609 = vmatprep.subr.bf16.mxu0 %v2801_v30 }
  0x54   : > { %1381 = vmatmul.mubr.bf16.gmra.mrb[16].mxu0 %v2759_v6  ;;  %2641 = vmatprep.subr.bf16.mxu1 %v2801_v30  ;;  %v2848_v6 = vld [vmem:[%s3598_s1 + $0x208] ss:$36 sps:$4 sm:$0xff]  }
  0x55   : > { %1478 = vmatmul.mubr.bf16.gmra.mrb[16].mxu1 %v2760_v8  ;;  %1388 = vmatprep.mubr.bf16.mxu0 %v2765_v9  ;;  %v2851_v8 = vld [vmem:[%s3598_s1 + $0x20] ss:$36 sps:$4 sm:$0xff]  }
  0x56   : > { %1485 = vmatprep.mubr.bf16.mxu1 %v2767_v13  ;;  %v2852_v9 = vld [vmem:[%s3598_s1 + $0x140] ss:$36 sps:$4 sm:$0xff]   ;;  %v2856_v13 = vld [vmem:[%s3598_s1 + $0x1d0] ss:$36 sps:$4 sm:$0xff]  }
  0x5c   : > { %1389 = vmatmul.mubr.bf16.gmra.mrb[20].mxu0 %v2769_v15  ;;  %v2858_v15 = vld [vmem:[%s3598_s1 + $0x218] ss:$36 sps:$4 sm:$0xff]  }
  0x5d   : > { %1486 = vmatmul.mubr.bf16.gmra.mrb[20].mxu1 %v2770_v17  ;;  %1396 = vmatprep.mubr.bf16.mxu0 %v2775_v20 }
  0x5e   : > { %1493 = vmatprep.mubr.bf16.mxu1 %v2777_v21 }
  0x64   : > { %1397 = vmatmul.mubr.bf16.gmra.mrb[24].mxu0 %v2779_v26 }
  0x65   : > { %1494 = vmatmul.mubr.bf16.gmra.mrb[24].mxu1 %v2780_v27  ;;  %1404 = vmatprep.mubr.bf16.mxu0 %v2785_v28 }
  0x66   : > { %1501 = vmatprep.mubr.bf16.mxu1 %v2787_v29 }
  0x6c   : > { %1405 = vmatmul.mubr.bf16.gmra.mrb[28].mxu0 %v2789_v31 }
  0x6d   : > { %1502 = vmatmul.mubr.bf16.gmra.mrb[28].mxu1 %v2790_v32  ;;  %1542 = vmatprep.mubr.bf16.mxu0 %v2797_v33 }
  0x6e   : > { %1639 = vmatprep.mubr.bf16.mxu1 %v2800_v34 }
  0x74   : > { %1543 = vmatmul.mubr.bf16.vlgmr.msra.gmra.mrb[32].mxu0 %v2795_v35 }
  0x75   : > { %1640 = vmatmul.mubr.bf16.vlgmr.msra.gmra.mrb[32].mxu1 %v2798_v36  ;;  %2610 = vmatpush3.bf16.msra.mxu0 %v2801_v30 }
  0x76   : > { %2649 = vmatpush3.bf16.msra.mxu1 %v2801_v30  ;;  %1550 = vmatprep.mubr.bf16.mxu0 %v2802_v37 }
  0x77   : > { %1647 = vmatprep.mubr.bf16.mxu1 %v2804_v38  ;;  %2611 = vmatprep.subr.bf16.mxu0 %v2808_v39 }
  0x78   : > { %2642 = vmatprep.subr.bf16.mxu1 %v2808_v39 }
  0x79   : > { %2612 = vmatpush3.bf16.msra.mxu0 %v2808_v39 }
  0x7a   : > { %2650 = vmatpush3.bf16.msra.mxu1 %v2808_v39  ;;  %2613 = vmatprep.subr.bf16.mxu0 %v2815_v40 }
  0x7b   : > { %2643 = vmatprep.subr.bf16.mxu1 %v2815_v40 }
  0x7c   : > { %1551 = vmatmul.mubr.bf16.gmra.mrb[36].mxu0 %v2806_v41 }
  0x7d   : > { %1648 = vmatmul.mubr.bf16.gmra.mrb[36].mxu1 %v2807_v42  ;;  %1558 = vmatprep.mubr.bf16.mxu0 %v2809_v43 }
  0x7e   : > { %1655 = vmatprep.mubr.bf16.mxu1 %v2811_v44  ;;  %2614 = vmatpush3.bf16.msra.mxu0 %v2815_v40 }
  0x7f   : > { %2651 = vmatpush3.bf16.msra.mxu1 %v2815_v40  ;;  %2615 = vmatprep.subr.bf16.mxu0 %v2822_v45 }
  0x80   : > { %2644 = vmatprep.subr.bf16.mxu1 %v2822_v45 }
  0x82   : > { %2616 = vmatpush3.bf16.msra.mxu0 %v2822_v45 }
  0x83   : > { %2652 = vmatpush3.bf16.msra.mxu1 %v2822_v45  ;;  %2617 = vmatprep.subr.bf16.mxu0 %v2829_v47 }
  0x84   : > { %1559 = vmatmul.mubr.bf16.gmra.mrb[40].mxu0 %v2813_v46  ;;  %2645 = vmatprep.subr.bf16.mxu1 %v2829_v47 }
  0x85   : > { %1656 = vmatmul.mubr.bf16.gmra.mrb[40].mxu1 %v2814_v48  ;;  %1566 = vmatprep.mubr.bf16.mxu0 %v2816_v49 }
  0x86   : > { %1663 = vmatprep.mubr.bf16.mxu1 %v2818_v50  ;;  %2618 = vmatpush3.bf16.msra.mxu0 %v2829_v47 }
  0x87   : > { %2653 = vmatpush3.bf16.msra.mxu1 %v2829_v47  ;;  %2619 = vmatprep.subr.bf16.mxu0 %v2836_v51 }
  0x88   : > { %2646 = vmatprep.subr.bf16.mxu1 %v2836_v51 }
  0x8a   : > { %2620 = vmatpush3.bf16.msra.mxu0 %v2836_v51 }
  0x8b   : > { %2654 = vmatpush3.bf16.msra.mxu1 %v2836_v51  ;;  %2621 = vmatprep.subr.bf16.mxu0 %v2843_v52 }
  0x8c   : > { %1567 = vmatmul.mubr.bf16.gmra.mrb[44].mxu0 %v2820_v53  ;;  %2647 = vmatprep.subr.bf16.mxu1 %v2843_v52 }
  0x8d   : > { %1664 = vmatmul.mubr.bf16.gmra.mrb[44].mxu1 %v2821_v54  ;;  %1574 = vmatprep.mubr.bf16.mxu0 %v2823_v55 }
  0x8e   : > { %1671 = vmatprep.mubr.bf16.mxu1 %v2825_v56  ;;  %2622 = vmatpush3.bf16.msra.mxu0 %v2843_v52 }
  0x8f   : > { %2655 = vmatpush3.bf16.msra.mxu1 %v2843_v52  ;;  %2623 = vmatprep.subr.bf16.mxu0 %v2850_v57 }
  0x90   : > { %2648 = vmatprep.subr.bf16.mxu1 %v2850_v57 }
  0x92   : > { %2624 = vmatpush3.bf16.msra.mxu0 %v2850_v57 }
  0x93   : > { %2656 = vmatpush3.bf16.msra.mxu1 %v2850_v57 }
  0x94   : > { %1575 = vmatmul.mubr.bf16.gmra.mrb[48].mxu0 %v2827_v58 }
  0x95   : > { %1672 = vmatmul.mubr.bf16.gmra.mrb[48].mxu1 %v2828_v59  ;;  %1582 = vmatprep.mubr.bf16.mxu0 %v2830_v60 }
  0x96   : > { %1679 = vmatprep.mubr.bf16.mxu1 %v2832_v61 }
  0x9c   : > { %1583 = vmatmul.mubr.bf16.gmra.mrb[52].mxu0 %v2834_v62 }
  0x9d   : > { %1680 = vmatmul.mubr.bf16.gmra.mrb[52].mxu1 %v2835_v63  ;;  %1590 = vmatprep.mubr.bf16.mxu0 %v2837_v0 }
  0x9e   : > { %1687 = vmatprep.mubr.bf16.mxu1 %v2839_v1 }
  0xa4   : > { %1591 = vmatmul.mubr.bf16.gmra.mrb[56].mxu0 %v2841_v2 }
  0xa5   : > { %1688 = vmatmul.mubr.bf16.gmra.mrb[56].mxu1 %v2842_v3  ;;  %1598 = vmatprep.mubr.bf16.mxu0 %v2844_v4 }
  0xa6   : > { %1695 = vmatprep.mubr.bf16.mxu1 %v2846_v5 }
  0xac   : > { %1599 = vmatmul.mubr.bf16.gmra.mrb[60].mxu0 %v2848_v6 }
  0xad   : > { %1696 = vmatmul.mubr.bf16.gmra.mrb[60].mxu1 %v2849_v7  ;;  %2625 = vmatprep.mubr.bf16.mxu0 %v2851_v8 }
  0xae   : > { %2633 = vmatprep.mubr.bf16.mxu1 %v2852_v9 }
  0xb4   : > { %2626 = vmatmul.mubr.bf16.vlgmr.msra.gmra.mrb[64].mxu0 %v2853_v10 }
  0xb5   : > { %2634 = vmatmul.mubr.bf16.vlgmr.msra.gmra.mrb[64].mxu1 %v2854_v11  ;;  %2629 = vmatprep.mubr.bf16.mxu0 %v2855_v12 }
  0xb6   : > { %2637 = vmatprep.mubr.bf16.mxu1 %v2856_v13 }
  0xbc   : > { %2630 = vmatmul.mubr.bf16.gmra.mrb[68].mxu0 %v2857_v14 }
  0xbd   : > { %2638 = vmatmul.mubr.bf16.gmra.mrb[68].mxu1 %v2858_v15 }
 0x107   : > { %v2353_v16 = vpop.f32.mrb[0].mxu0 }
 0x108   : > { %v2417_v17 = vpop.f32.mrb[0].mxu1  ;;  %v2354_v18 = vpop.f32.mrb[1].mxu0 }
 0x109   : > { %v2355_v19 = vadd.f32 %v2354_v18, %v2353_v16  ;;  %v2418_v20 = vpop.f32.mrb[1].mxu1  ;;  %v2356_v21 = vpop.f32.mrb[2].mxu0 }
 0x10a   : > { %v2419_v22 = vadd.f32 %v2418_v20, %v2417_v17  ;;  %v2420_v23 = vpop.f32.mrb[2].mxu1  ;;  %v2357_v24 = vpop.f32.mrb[3].mxu0 }
 0x10b   : > { %v2358_v25 = vadd.f32 %v2357_v24, %v2356_v21  ;;  %v2421_v26 = vpop.f32.mrb[3].mxu1 }
 0x10c   : > { %v3223_v27 = vadd.f32 %v2419_v22, %v2355_v19  ;;  %v2422_v28 = vadd.f32 %v2421_v26, %v2420_v23 }
 0x10e   : > { %v3225_v29 = vadd.f32 %v2422_v28, %v2358_v25 }
 0x10f   : > { %v2359_v30 = vpop.f32.mrb[4].mxu0 }
 0x110   : > { %v2423_v31 = vpop.f32.mrb[4].mxu1  ;;  %v2360_v32 = vpop.f32.mrb[5].mxu0 }
 0x111   : > { %v2361_v33 = vadd.f32 %v2360_v32, %v2359_v30  ;;  %v2424_v34 = vpop.f32.mrb[5].mxu1  ;;  %v2362_v35 = vpop.f32.mrb[6].mxu0 }
 0x112   : > { %v2425_v36 = vadd.f32 %v2424_v34, %v2423_v31  ;;  %v2426_v37 = vpop.f32.mrb[6].mxu1  ;;  %v2363_v38 = vpop.f32.mrb[7].mxu0 }
 0x113   : > { %v2364_v39 = vadd.f32 %v2363_v38, %v2362_v35  ;;  %v2427_v40 = vpop.f32.mrb[7].mxu1 }
 0x114   : > { %v3227_v41 = vadd.f32 %v2425_v36, %v2361_v33  ;;  %v2428_v42 = vadd.f32 %v2427_v40, %v2426_v37 }
 0x116   : > { %v3229_v43 = vadd.f32 %v2428_v42, %v2364_v39 }
 0x117   : > { %v2365_v44 = vpop.f32.mrb[8].mxu0 }
 0x118   : > { %v2429_v45 = vpop.f32.mrb[8].mxu1  ;;  %v2366_v46 = vpop.f32.mrb[9].mxu0 }
 0x119   : > { %v2367_v47 = vadd.f32 %v2366_v46, %v2365_v44  ;;  %v2430_v48 = vpop.f32.mrb[9].mxu1  ;;  %v2368_v49 = vpop.f32.mrb[10].mxu0 }
 0x11a   : > { %v2431_v50 = vadd.f32 %v2430_v48, %v2429_v45  ;;  %v2432_v51 = vpop.f32.mrb[10].mxu1  ;;  %v2369_v52 = vpop.f32.mrb[11].mxu0 }
 0x11b   : > { %v2370_v53 = vadd.f32 %v2369_v52, %v2368_v49  ;;  %v2433_v54 = vpop.f32.mrb[11].mxu1 }
 0x11c   : > { %v3231_v55 = vadd.f32 %v2431_v50, %v2367_v47  ;;  %v2434_v56 = vadd.f32 %v2433_v54, %v2432_v51 }
 0x11e   : > { %v3233_v57 = vadd.f32 %v2434_v56, %v2370_v53 }
 0x11f   : > { %v2371_v58 = vpop.f32.mrb[12].mxu0 }
 0x120   : > { %v2435_v59 = vpop.f32.mrb[12].mxu1  ;;  %v2372_v60 = vpop.f32.mrb[13].mxu0 }
 0x121   : > { %v2373_v61 = vadd.f32 %v2372_v60, %v2371_v58  ;;  %v2436_v62 = vpop.f32.mrb[13].mxu1  ;;  %v2374_v63 = vpop.f32.mrb[14].mxu0 }
 0x122   : > { %v2437_v0 = vadd.f32 %v2436_v62, %v2435_v59  ;;  %v2438_v1 = vpop.f32.mrb[14].mxu1  ;;  %v2375_v2 = vpop.f32.mrb[15].mxu0 }
 0x123   : > { %v2376_v3 = vadd.f32 %v2375_v2, %v2374_v63  ;;  %v2439_v4 = vpop.f32.mrb[15].mxu1 }
 0x124   : > { %v3235_v5 = vadd.f32 %v2437_v0, %v2373_v61  ;;  %v2440_v6 = vadd.f32 %v2439_v4, %v2438_v1 }
 0x126   : > { %v3237_v7 = vadd.f32 %v2440_v6, %v2376_v3 }
 0x127   : > { %v2377_v8 = vpop.f32.mrb[16].mxu0 }
 0x128   : > { %v2441_v9 = vpop.f32.mrb[16].mxu1  ;;  %v2378_v10 = vpop.f32.mrb[17].mxu0 }
 0x129   : > { %v2379_v11 = vadd.f32 %v2378_v10, %v2377_v8  ;;  %v2442_v12 = vpop.f32.mrb[17].mxu1  ;;  %v2380_v13 = vpop.f32.mrb[18].mxu0 }
 0x12a   : > { %v2443_v14 = vadd.f32 %v2442_v12, %v2441_v9  ;;  %v2444_v15 = vpop.f32.mrb[18].mxu1  ;;  %v2381_v16 = vpop.f32.mrb[19].mxu0 }
 0x12b   : > { %v2382_v17 = vadd.f32 %v2381_v16, %v2380_v13  ;;  %v2445_v18 = vpop.f32.mrb[19].mxu1 }
 0x12c   : > { %v3239_v19 = vadd.f32 %v2443_v14, %v2379_v11  ;;  %v2446_v20 = vadd.f32 %v2445_v18, %v2444_v15  ;;  %v2883_v14 = vmov 0.0  }
 0x12d   : > { %270 = vst.msk [vmem:[%s3262_s20 + $0x50] sm:$0xff] %vm259_vm0, %v2883_v14  ;;  %260 = vst.msk [vmem:[%s3262_s20] sm:$0xff] %vm259_vm0, %v2883_v14 }
 0x12e   : > { %v3241_v21 = vadd.f32 %v2446_v20, %v2382_v17  ;;  %261 = vst.msk [vmem:[%s3262_s20 + $0x8] sm:$0xff] %vm259_vm0, %v2883_v14  ;;  %262 = vst.msk [vmem:[%s3262_s20 + $0x10] sm:$0xff] %vm259_vm0, %v2883_v14 }
 0x12f   : > { %v2383_v22 = vpop.f32.mrb[20].mxu0  ;;  %263 = vst.msk [vmem:[%s3262_s20 + $0x18] sm:$0xff] %vm259_vm0, %v2883_v14  ;;  %264 = vst.msk [vmem:[%s3262_s20 + $0x20] sm:$0xff] %vm259_vm0, %v2883_v14 }
 0x130   : > { %v2447_v23 = vpop.f32.mrb[20].mxu1  ;;  %v2384_v24 = vpop.f32.mrb[21].mxu0  ;;  %265 = vst.msk [vmem:[%s3262_s20 + $0x28] sm:$0xff] %vm259_vm0, %v2883_v14  ;;  %266 = vst.msk [vmem:[%s3262_s20 + $0x30] sm:$0xff] %vm259_vm0, %v2883_v14 }
 0x131   : > { %v2385_v25 = vadd.f32 %v2384_v24, %v2383_v22  ;;  %v2448_v26 = vpop.f32.mrb[21].mxu1  ;;  %v2386_v28 = vpop.f32.mrb[22].mxu0  ;;  %267 = vst.msk [vmem:[%s3262_s20 + $0x38] sm:$0xff] %vm259_vm0, %v2883_v14  ;;  %268 = vst.msk [vmem:[%s3262_s20 + $0x40] sm:$0xff] %vm259_vm0, %v2883_v14 }
 0x132   : > { %v2449_v30 = vadd.f32 %v2448_v26, %v2447_v23  ;;  %v2450_v31 = vpop.f32.mrb[22].mxu1  ;;  %v2387_v32 = vpop.f32.mrb[23].mxu0  ;;  %269 = vst.msk [vmem:[%s3262_s20 + $0x48] sm:$0xff] %vm259_vm0, %v2883_v14  ;;  %271 = vst.msk [vmem:[%s3262_s20 + $0x58] sm:$0xff] %vm259_vm0, %v2883_v14 }
 0x133   : > { %v2388_v33 = vadd.f32 %v2387_v32, %v2386_v28  ;;  %v2451_v34 = vpop.f32.mrb[23].mxu1  ;;  %272 = vst.msk [vmem:[%s3262_s20 + $0x60] sm:$0xff] %vm259_vm0, %v2883_v14  ;;  %273 = vst.msk [vmem:[%s3262_s20 + $0x68] sm:$0xff] %vm259_vm0, %v2883_v14 }
 0x134   : > { %v3243_v35 = vadd.f32 %v2449_v30, %v2385_v25  ;;  %v2452_v36 = vadd.f32 %v2451_v34, %v2450_v31  ;;  %274 = vst.msk [vmem:[%s3262_s20 + $0x70] sm:$0xff] %vm259_vm0, %v2883_v14  ;;  %275 = vst.msk [vmem:[%s3262_s20 + $0x78] sm:$0xff] %vm259_vm0, %v2883_v14 }
 0x135   : > { %276 = vst.msk [vmem:[%s3268_s15] sm:$0xff] %vm259_vm0, %v2883_v14  ;;  %277 = vst.msk [vmem:[%s3268_s15 + $0x8] sm:$0xff] %vm259_vm0, %v2883_v14 }
 0x136   : > { %v3245_v37 = vadd.f32 %v2452_v36, %v2388_v33  ;;  %278 = vst.msk [vmem:[%s3268_s15 + $0x10] sm:$0xff] %vm259_vm0, %v2883_v14  ;;  %279 = vst.msk [vmem:[%s3268_s15 + $0x18] sm:$0xff] %vm259_vm0, %v2883_v14 }
 0x137   : > { %v2389_v38 = vpop.f32.mrb[24].mxu0  ;;  %280 = vst.msk [vmem:[%s3268_s15 + $0x20] sm:$0xff] %vm259_vm0, %v2883_v14  ;;  %281 = vst.msk [vmem:[%s3268_s15 + $0x28] sm:$0xff] %vm259_vm0, %v2883_v14 }
 0x138   : > { %v2453_v39 = vpop.f32.mrb[24].mxu1  ;;  %v2390_v40 = vpop.f32.mrb[25].mxu0  ;;  %282 = vst.msk [vmem:[%s3268_s15 + $0x30] sm:$0xff] %vm259_vm0, %v2883_v14  ;;  %283 = vst.msk [vmem:[%s3268_s15 + $0x38] sm:$0xff] %vm259_vm0, %v2883_v14 }
 0x139   : > { %v2391_v42 = vadd.f32 %v2390_v40, %v2389_v38  ;;  %v2454_v44 = vpop.f32.mrb[25].mxu1  ;;  %v2392_v45 = vpop.f32.mrb[26].mxu0  ;;  %284 = vst.msk [vmem:[%s3268_s15 + $0x40] sm:$0xff] %vm259_vm0, %v2883_v14  ;;  %285 = vst.msk [vmem:[%s3268_s15 + $0x48] sm:$0xff] %vm259_vm0, %v2883_v14 }
 0x13a   : > { %v2455_v46 = vadd.f32 %v2454_v44, %v2453_v39  ;;  %v2456_v47 = vpop.f32.mrb[26].mxu1  ;;  %v2393_v48 = vpop.f32.mrb[27].mxu0  ;;  %286 = vst.msk [vmem:[%s3268_s15 + $0x50] sm:$0xff] %vm259_vm0, %v2883_v14  ;;  %287 = vst.msk [vmem:[%s3268_s15 + $0x58] sm:$0xff] %vm259_vm0, %v2883_v14 }
 0x13b   : > { %v2394_v49 = vadd.f32 %v2393_v48, %v2392_v45  ;;  %v2457_v50 = vpop.f32.mrb[27].mxu1  ;;  %288 = vst.msk [vmem:[%s3268_s15 + $0x60] sm:$0xff] %vm259_vm0, %v2883_v14  ;;  %289 = vst.msk [vmem:[%s3268_s15 + $0x68] sm:$0xff] %vm259_vm0, %v2883_v14 }
 0x13c   : > { %v3247_v51 = vadd.f32 %v2455_v46, %v2391_v42  ;;  %v2458_v52 = vadd.f32 %v2457_v50, %v2456_v47  ;;  %290 = vst.msk [vmem:[%s3268_s15 + $0x70] sm:$0xff] %vm259_vm0, %v2883_v14  ;;  %291 = vst.msk [vmem:[%s3268_s15 + $0x78] sm:$0xff] %vm259_vm0, %v2883_v14 }
 0x13e   : > { %v3249_v53 = vadd.f32 %v2458_v52, %v2394_v49 }
 0x13f   : > { %v2395_v54 = vpop.f32.mrb[28].mxu0 }
 0x140   : > { %v2459_v56 = vpop.f32.mrb[28].mxu1  ;;  %v2396_v58 = vpop.f32.mrb[29].mxu0 }
 0x141   : > { %v2397_v59 = vadd.f32 %v2396_v58, %v2395_v54  ;;  %v2460_v60 = vpop.f32.mrb[29].mxu1  ;;  %v2398_v61 = vpop.f32.mrb[30].mxu0 }
 0x142   : > { %v2461_v62 = vadd.f32 %v2460_v60, %v2459_v56  ;;  %v2462_v63 = vpop.f32.mrb[30].mxu1  ;;  %v2399_v0 = vpop.f32.mrb[31].mxu0 }
 0x143   : > { %v2400_v1 = vadd.f32 %v2399_v0, %v2398_v61  ;;  %v2463_v2 = vpop.f32.mrb[31].mxu1 }
 0x144   : > { %v3251_v3 = vadd.f32 %v2461_v62, %v2397_v59  ;;  %v2464_v4 = vadd.f32 %v2463_v2, %v2462_v63 }
 0x146   : > { %v3256_v6 = vadd.f32 %v2464_v4, %v2400_v1 }
 0x147   : > { %v2481_v8 = vpop.f32.mrb[32].mxu0 }
 0x148   : > { %v2545_v9 = vpop.f32.mrb[32].mxu1  ;;  %v2482_v10 = vpop.f32.mrb[33].mxu0 }
 0x149   : > { %v2483_v11 = vadd.f32 %v2482_v10, %v2481_v8  ;;  %v2546_v12 = vpop.f32.mrb[33].mxu1  ;;  %v2484_v13 = vpop.f32.mrb[34].mxu0 }
 0x14a   : > { %v2547_v15 = vadd.f32 %v2546_v12, %v2545_v9  ;;  %v2548_v16 = vpop.f32.mrb[34].mxu1  ;;  %v2485_v17 = vpop.f32.mrb[35].mxu0 }
 0x14b   : > { %v1545_v18 = vadd.f32 %v2483_v11, %v3223_v27  ;;  %v2486_v20 = vadd.f32 %v2485_v17, %v2484_v13  ;;  %v2549_v22 = vpop.f32.mrb[35].mxu1 }
 0x14c   : > { %v2550_v23 = vadd.f32 %v2549_v22, %v2548_v16 }
 0x14d   : > { %v1548_v24 = vadd.f32 %v2486_v20, %v3225_v29  ;;  %v3336_v25 = vadd.f32 %v2547_v15, %v1545_v18 }
 0x14f   : > { %v2487_v26 = vpop.f32.mrb[36].mxu0  ;;  %v3338_v28 = vadd.f32 %v2550_v23, %v1548_v24 }
 0x150   : > { %v2551_v30 = vpop.f32.mrb[36].mxu1  ;;  %v2488_v31 = vpop.f32.mrb[37].mxu0 }
 0x151   : > { %v2489_v32 = vadd.f32 %v2488_v31, %v2487_v26  ;;  %v2552_v33 = vpop.f32.mrb[37].mxu1  ;;  %v2490_v34 = vpop.f32.mrb[38].mxu0 }
 0x152   : > { %v2553_v36 = vadd.f32 %v2552_v33, %v2551_v30  ;;  %v2554_v38 = vpop.f32.mrb[38].mxu1  ;;  %v2491_v39 = vpop.f32.mrb[39].mxu0 }
 0x153   : > { %v1553_v27 = vadd.f32 %v2489_v32, %v3227_v41  ;;  %v2492_v40 = vadd.f32 %v2491_v39, %v2490_v34  ;;  %v2555_v42 = vpop.f32.mrb[39].mxu1 }
 0x154   : > { %v2556_v44 = vadd.f32 %v2555_v42, %v2554_v38 }
 0x155   : > { %v1556_v29 = vadd.f32 %v2492_v40, %v3229_v43  ;;  %v3342_v45 = vadd.f32 %v2553_v36, %v1553_v27 }
 0x157   : > { %v2493_v46 = vpop.f32.mrb[40].mxu0  ;;  %v3344_v47 = vadd.f32 %v2556_v44, %v1556_v29 }
 0x158   : > { %v2557_v48 = vpop.f32.mrb[40].mxu1  ;;  %v2494_v49 = vpop.f32.mrb[41].mxu0 }
 0x159   : > { %v2495_v50 = vadd.f32 %v2494_v49, %v2493_v46  ;;  %v2558_v52 = vpop.f32.mrb[41].mxu1  ;;  %v2496_v54 = vpop.f32.mrb[42].mxu0 }
 0x15a   : > { %v2559_v56 = vadd.f32 %v2558_v52, %v2557_v48  ;;  %v2560_v58 = vpop.f32.mrb[42].mxu1  ;;  %v2497_v59 = vpop.f32.mrb[43].mxu0 }
 0x15b   : > { %v1561_v41 = vadd.f32 %v2495_v50, %v3231_v55  ;;  %v2498_v60 = vadd.f32 %v2497_v59, %v2496_v54  ;;  %v2561_v61 = vpop.f32.mrb[43].mxu1 }
 0x15c   : > { %v2562_v62 = vadd.f32 %v2561_v61, %v2560_v58 }
 0x15d   : > { %v1564_v43 = vadd.f32 %v2498_v60, %v3233_v57  ;;  %v3348_v63 = vadd.f32 %v2559_v56, %v1561_v41 }
 0x15f   : > { %v2499_v0 = vpop.f32.mrb[44].mxu0  ;;  %v3350_v1 = vadd.f32 %v2562_v62, %v1564_v43 }
 0x160   : > { %v2563_v2 = vpop.f32.mrb[44].mxu1  ;;  %v2500_v4 = vpop.f32.mrb[45].mxu0 }
 0x161   : > { %v2501_v8 = vadd.f32 %v2500_v4, %v2499_v0  ;;  %v2564_v9 = vpop.f32.mrb[45].mxu1  ;;  %v2502_v10 = vpop.f32.mrb[46].mxu0 }
 0x162   : > { %v2565_v11 = vadd.f32 %v2564_v9, %v2563_v2  ;;  %v2566_v12 = vpop.f32.mrb[46].mxu1  ;;  %v2503_v13 = vpop.f32.mrb[47].mxu0 }
 0x163   : > { %v1569_v55 = vadd.f32 %v2501_v8, %v3235_v5  ;;  %v2504_v14 = vadd.f32 %v2503_v13, %v2502_v10  ;;  %v2567_v15 = vpop.f32.mrb[47].mxu1 }
 0x164   : > { %v2568_v16 = vadd.f32 %v2567_v15, %v2566_v12 }
 0x165   : > { %v1572_v57 = vadd.f32 %v2504_v14, %v3237_v7  ;;  %v3354_v17 = vadd.f32 %v2565_v11, %v1569_v55 }
 0x167   : > { %v2505_v18 = vpop.f32.mrb[48].mxu0  ;;  %v3356_v20 = vadd.f32 %v2568_v16, %v1572_v57 }
 0x168   : > { %v2569_v22 = vpop.f32.mrb[48].mxu1  ;;  %v2506_v23 = vpop.f32.mrb[49].mxu0 }
 0x169   : > { %v2507_v24 = vadd.f32 %v2506_v23, %v2505_v18  ;;  %v2570_v26 = vpop.f32.mrb[49].mxu1  ;;  %v2508_v30 = vpop.f32.mrb[50].mxu0 }
 0x16a   : > { %v2571_v31 = vadd.f32 %v2570_v26, %v2569_v22  ;;  %v2572_v32 = vpop.f32.mrb[50].mxu1  ;;  %v2509_v33 = vpop.f32.mrb[51].mxu0 }
 0x16b   : > { %v1577_v5 = vadd.f32 %v2507_v24, %v3239_v19  ;;  %v2510_v34 = vadd.f32 %v2509_v33, %v2508_v30  ;;  %v2573_v36 = vpop.f32.mrb[51].mxu1 }
 0x16c   : > { %v2574_v38 = vadd.f32 %v2573_v36, %v2572_v32 }
 0x16d   : > { %v1580_v7 = vadd.f32 %v2510_v34, %v3241_v21  ;;  %v1674_v39 = vadd.f32 %v2571_v31, %v1577_v5 }
 0x16f   : > { %v2511_v27 = vpop.f32.mrb[52].mxu0  ;;  %v3360_v40 = vadd.f32 %v2574_v38, %v1580_v7 }
 0x170   : > { %v2575_v42 = vpop.f32.mrb[52].mxu1  ;;  %v2512_v44 = vpop.f32.mrb[53].mxu0 }
 0x171   : > { %v2513_v29 = vadd.f32 %v2512_v44, %v2511_v27  ;;  %v2576_v46 = vpop.f32.mrb[53].mxu1  ;;  %v2514_v48 = vpop.f32.mrb[54].mxu0 }
 0x172   : > { %v2577_v49 = vadd.f32 %v2576_v46, %v2575_v42  ;;  %v2578_v50 = vpop.f32.mrb[54].mxu1  ;;  %v2515_v52 = vpop.f32.mrb[55].mxu0 }
 0x173   : > { %v1585_v54 = vadd.f32 %v2513_v29, %v3243_v35  ;;  %v2516_v19 = vadd.f32 %v2515_v52, %v2514_v48  ;;  %v2579_v56 = vpop.f32.mrb[55].mxu1 }
 0x174   : > { %v2580_v58 = vadd.f32 %v2579_v56, %v2578_v50 }
 0x175   : > { %v1588_v59 = vadd.f32 %v2516_v19, %v3245_v37  ;;  %v1682_v21 = vadd.f32 %v2577_v49, %v1585_v54 }
 0x177   : > { %v2517_v41 = vpop.f32.mrb[56].mxu0  ;;  %v1685_v60 = vadd.f32 %v2580_v58, %v1588_v59 }
 0x178   : > { %v2581_v61 = vpop.f32.mrb[56].mxu1  ;;  %v2518_v62 = vpop.f32.mrb[57].mxu0 }
 0x179   : > { %v2519_v43 = vadd.f32 %v2518_v62, %v2517_v41  ;;  %v2582_v0 = vpop.f32.mrb[57].mxu1  ;;  %v2520_v2 = vpop.f32.mrb[58].mxu0 }
 0x17a   : > { %v2583_v4 = vadd.f32 %v2582_v0, %v2581_v61  ;;  %v2584_v8 = vpop.f32.mrb[58].mxu1  ;;  %v2521_v9 = vpop.f32.mrb[59].mxu0 }
 0x17b   : > { %v1593_v10 = vadd.f32 %v2519_v43, %v3247_v51  ;;  %v2522_v11 = vadd.f32 %v2521_v9, %v2520_v2  ;;  %v2585_v35 = vpop.f32.mrb[59].mxu1 }
 0x17c   : > { %v2586_v12 = vadd.f32 %v2585_v35, %v2584_v8 }
 0x17d   : > { %v1596_v13 = vadd.f32 %v2522_v11, %v3249_v53  ;;  %v1690_v55 = vadd.f32 %v2583_v4, %v1593_v10 }
 0x17f   : > { %v2523_v37 = vpop.f32.mrb[60].mxu0  ;;  %v3366_v14 = vadd.f32 %v2586_v12, %v1596_v13 }
 0x180   : > { %v2587_v15 = vpop.f32.mrb[60].mxu1  ;;  %v2524_v16 = vpop.f32.mrb[61].mxu0 }
 0x181   : > { %v2525_v57 = vadd.f32 %v2524_v16, %v2523_v37  ;;  %v2588_v18 = vpop.f32.mrb[61].mxu1  ;;  %v2526_v22 = vpop.f32.mrb[62].mxu0 }
 0x182   : > { %v2589_v23 = vadd.f32 %v2588_v18, %v2587_v15  ;;  %v2590_v24 = vpop.f32.mrb[62].mxu1  ;;  %v2527_v26 = vpop.f32.mrb[63].mxu0 }
 0x183   : > { %v1601_v51 = vadd.f32 %v2525_v57, %v3251_v3  ;;  %v2528_v30 = vadd.f32 %v2527_v26, %v2526_v22  ;;  %v2591_v31 = vpop.f32.mrb[63].mxu1 }
 0x184   : > { %v2592_v32 = vadd.f32 %v2591_v31, %v2590_v24 }
 0x185   : > { %v1604_v53 = vadd.f32 %v2528_v30, %v3256_v6  ;;  %v1698_v33 = vadd.f32 %v2589_v23, %v1601_v51 }
 0x187   : > { %v2627_v5 = vpop.f32.mrb[64].mxu0  ;;  %v1701_v34 = vadd.f32 %v2592_v32, %v1604_v53 }
 0x188   : > { %v1747_v36 = vadd.f32 %v2627_v5, %v3342_v45  ;;  %v2635_v3 = vpop.f32.mrb[64].mxu1  ;;  %v1738_v38 = vpop.f32.mrb[65].mxu0 }
 0x189   : > { %v1779_v7 = vadd.f32 %v2635_v3, %v1682_v21  ;;  %v3378_v27 = vadd.f32 %v1738_v38, %v3336_v25  ;;  %v1770_v6 = vpop.f32.mrb[65].mxu1  ;;  %v2628_v42 = vpop.f32.mrb[66].mxu0 }
 0x18a   : > { %1804 = vst.msk [vmem:[%s3374_s24 + $0x10] sm:$0xff] %vm1801_vm1, %v1747_v36  ;;  %v3382_v44 = vadd.f32 %v1770_v6, %v1674_v39  ;;  %v1750_v29 = vadd.f32 %v2628_v42, %v3344_v47  ;;  %v2636_v46 = vpop.f32.mrb[66].mxu1  ;;  %v1741_v45 = vpop.f32.mrb[67].mxu0  ;;  %v1840_v48 = vsel %vm1801_vm1, %v1747_v36, 0.0  ;;  %v1933_v4 = vmul.f32 %v1747_v36, %v1747_v36 }
 0x18b   : > { %1812 = vst.msk [vmem:[%s3374_s24 + $0x50] sm:$0xff] %vm1801_vm1, %v1779_v7  ;;  %1802 = vst.msk [vmem:[%s3374_s24] sm:$0xff] %vm1801_vm1, %v3378_v27  ;;  %v1782_v25 = vadd.f32 %v2636_v46, %v1685_v60  ;;  %v1742_v49 = vadd.f32 %v1741_v45, %v3338_v28  ;;  %v1773_v50 = vpop.f32.mrb[67].mxu1  ;;  %v1864_v39 = vsel %vm1801_vm1, %v1779_v7, 0.0  ;;  %1841 = vadd.xlane.f32.xlu1 %v1840_v48  ;;  %v1834_v54 = vsel %vm1801_vm1, %v3378_v27, 0.0 }
 0x18c   : > { %1810 = vst.msk [vmem:[%s3374_s24 + $0x40] sm:$0xff] %vm1801_vm1, %v3382_v44  ;;  %1805 = vst.msk [vmem:[%s3374_s24 + $0x18] sm:$0xff] %vm1801_vm1, %v1750_v29  ;;  %v1774_v47 = vadd.f32 %v1773_v50, %v3360_v40  ;;  %1865 = vadd.xlane.f32.xlu0 %v1864_v39  ;;  %v1843_v28 = vsel %vm1801_vm1, %v1750_v29, 0.0  ;;  %v1934_v9 = vmul.f32 %v1750_v29, %v1750_v29  ;;  %v1953_v10 = vsel %vm1801_vm1, %v1933_v4, 0.0  ;;  %v1820_v39 = vld [vmem:[%s3262_s20 + $0x10] sm:$0xff] }
 0x18d   : > { %1813 = vst.msk [vmem:[%s3374_s24 + $0x58] sm:$0xff] %vm1801_vm1, %v1782_v25  ;;  %1803 = vst.msk [vmem:[%s3374_s24 + $0x8] sm:$0xff] %vm1801_vm1, %v1742_v49  ;;  %v1867_v43 = vsel %vm1801_vm1, %v1782_v25, 0.0  ;;  %v1941_v11 = vmul.f32 %v1779_v7, %v1779_v7  ;;  %v1942_v12 = vmul.f32 %v1782_v25, %v1782_v25  ;;  %v1932_v37 = vmul.f32 %v1742_v49, %v1742_v49 }
 0x18e   : > { %1811 = vst.msk [vmem:[%s3374_s24 + $0x48] sm:$0xff] %vm1801_vm1, %v1774_v47  ;;  %v1956_v35 = vsel %vm1801_vm1, %v1934_v9, 0.0  ;;  %v1931_v15 = vmul.f32 %v3378_v27, %v3378_v27  ;;  %v1940_v57 = vmul.f32 %v1774_v47, %v1774_v47  ;;  %v1939_v22 = vmul.f32 %v3382_v44, %v3382_v44  ;;  %v1918_v9 = vld [vmem:[%s3268_s15 + $0x18] sm:$0xff] }
 0x18f   : > { %v2631_v52 = vpop.f32.mrb[68].mxu0  ;;  %1844 = vadd.xlane.f32.xlu1 %v1843_v28  ;;  %v1977_v13 = vsel %vm1801_vm1, %v1941_v11, 0.0  ;;  %v1950_v16 = vsel %vm1801_vm1, %v1932_v37, 0.0  ;;  %v1819_v37 = vld [vmem:[%s3262_s20 + $0x8] sm:$0xff] }
 0x190   : > { %v3409_v19 = vadd.f32 %v2631_v52, %v3354_v17  ;;  %v2639_v40 = vpop.f32.mrb[68].mxu1  ;;  %1835 = vadd.xlane.f32.xlu0 %v1834_v54  ;;  %v1754_v56 = vpop.f32.mrb[69].mxu0  ;;  %v1947_v18 = vsel %vm1801_vm1, %v1931_v15, 0.0  ;;  %v1974_v23 = vsel %vm1801_vm1, %v1940_v57, 0.0  ;;  %v1971_v24 = vsel %vm1801_vm1, %v1939_v22, 0.0  ;;  %v1915_v22 = vld [vmem:[%s3268_s15] sm:$0xff] }
 0x191   : > { %v3411_v58 = vadd.f32 %v2639_v40, %v1698_v33  ;;  %v3414_v59 = vadd.f32 %v1754_v56, %v3348_v63  ;;  %v1786_v21 = vpop.f32.mrb[69].mxu1  ;;  %v2632_v41 = vpop.f32.mrb[70].mxu0  ;;  %v1821_v40 = vld [vmem:[%s3262_s20 + $0x18] sm:$0xff]  ;;  %v1818_v56 = vld [vmem:[%s3262_s20] sm:$0xff] }
 0x192   : > { %1808 = vst.msk [vmem:[%s3374_s24 + $0x30] sm:$0xff] %vm1801_vm1, %v3409_v19  ;;  %v3419_v60 = vadd.f32 %v1786_v21, %v1690_v55  ;;  %v1766_v17 = vadd.f32 %v2632_v41, %v3356_v20  ;;  %v2640_v61 = vpop.f32.mrb[70].mxu1  ;;  %v1757_v62 = vpop.f32.mrb[71].mxu0  ;;  %v1858_v20 = vsel %vm1801_vm1, %v3382_v44, 0.0  ;;  %v1980_v55 = vsel %vm1801_vm1, %v1942_v12, 0.0 }
 0x193   : > { %1816 = vst.msk [vmem:[%s3374_s24 + $0x70] sm:$0xff] %vm1801_vm1, %v3411_v58  ;;  %1806 = vst.msk [vmem:[%s3374_s24 + $0x20] sm:$0xff] %vm1801_vm1, %v3414_v59  ;;  %v3429_v63 = vadd.f32 %v2640_v61, %v1701_v34  ;;  %v1758_v0 = vadd.f32 %v1757_v62, %v3350_v1  ;;  %v1789_v2 = vpop.f32.mrb[71].mxu1  ;;  %1868 = vadd.xlane.f32.xlu1 %v1867_v43  ;;  %v1861_v1 = vsel %vm1801_vm1, %v1774_v47, 0.0  ;;  %v1852_v51 = vsel %vm1801_vm1, %v3409_v19, 0.0  ;;  %v1828_v47 = vld [vmem:[%s3262_s20 + $0x50] sm:$0xff] }
 0x194   : > { %1814 = vst.msk [vmem:[%s3374_s24 + $0x60] sm:$0xff] %vm1801_vm1, %v3419_v60  ;;  %1809 = vst.msk [vmem:[%s3374_s24 + $0x38] sm:$0xff] %vm1801_vm1, %v1766_v17  ;;  %v1790_v8 = vadd.f32 %v1789_v2, %v3366_v14  ;;  %1859 = vadd.xlane.f32.xlu0 %v1858_v20  ;;  %v1837_v14 = vsel %vm1801_vm1, %v1742_v49, 0.0  ;;  %v1855_v26 = vsel %vm1801_vm1, %v1766_v17, 0.0  ;;  %v1876_v31 = vsel %vm1801_vm1, %v3411_v58, 0.0  ;;  %v1917_v2 = vld [vmem:[%s3268_s15 + $0x10] sm:$0xff] }
 0x195   : > { %1817 = vst.msk [vmem:[%s3374_s24 + $0x78] sm:$0xff] %vm1801_vm1, %v3429_v63  ;;  %1807 = vst.msk [vmem:[%s3374_s24 + $0x28] sm:$0xff] %vm1801_vm1, %v1758_v0  ;;  %v1879_v30 = vsel %vm1801_vm1, %v3429_v63, 0.0  ;;  %v1849_v32 = vsel %vm1801_vm1, %v1758_v0, 0.0  ;;  %v1846_v53 = vsel %vm1801_vm1, %v3414_v59, 0.0  ;;  %v1938_v5 = vmul.f32 %v1766_v17, %v1766_v17  ;;  %v1826_v17 = vld [vmem:[%s3262_s20 + $0x40] sm:$0xff] }
 0x196   : > { %1815 = vst.msk [vmem:[%s3374_s24 + $0x68] sm:$0xff] %vm1801_vm1, %v1790_v8  ;;  %v1873_v33 = vsel %vm1801_vm1, %v1790_v8, 0.0  ;;  %v1870_v34 = vsel %vm1801_vm1, %v3419_v60, 0.0  ;;  %v1937_v36 = vmul.f32 %v3409_v19, %v3409_v19  ;;  %v1936_v38 = vmul.f32 %v1758_v0, %v1758_v0  ;;  %v1827_v0 = vld [vmem:[%s3262_s20 + $0x48] sm:$0xff] }
 0x197   : > { %1862 = vadd.xlane.f32.xlu1 %v1861_v1  ;;  %v1968_v3 = vsel %vm1801_vm1, %v1938_v5, 0.0  ;;  %v1935_v27 = vmul.f32 %v3414_v59, %v3414_v59  ;;  %v1944_v42 = vmul.f32 %v1790_v8, %v1790_v8  ;;  %v1943_v29 = vmul.f32 %v3419_v60, %v3419_v60  ;;  %v1829_v60 = vld [vmem:[%s3262_s20 + $0x58] sm:$0xff] }
 0x198   : > { %1954 = vadd.xlane.f32.xlu0 %v1953_v10  ;;  %v1965_v7 = vsel %vm1801_vm1, %v1937_v36, 0.0  ;;  %v1962_v6 = vsel %vm1801_vm1, %v1936_v38, 0.0  ;;  %v1946_v45 = vmul.f32 %v3429_v63, %v3429_v63  ;;  %v1945_v25 = vmul.f32 %v3411_v58, %v3411_v58  ;;  %v1925_v10 = vld [vmem:[%s3268_s15 + $0x50] sm:$0xff] }
 0x199   : > { %v1959_v44 = vsel %vm1801_vm1, %v1935_v27, 0.0  ;;  %v1986_v46 = vsel %vm1801_vm1, %v1944_v42, 0.0  ;;  %v1983_v48 = vsel %vm1801_vm1, %v1943_v29, 0.0  ;;  %v1824_v36 = vld [vmem:[%s3262_s20 + $0x30] sm:$0xff] }
 0x19a   : > { %v1992_v49 = vsel %vm1801_vm1, %v1946_v45, 0.0  ;;  %v1989_v50 = vsel %vm1801_vm1, %v1945_v25, 0.0  ;;  %v1832_v42 = vld [vmem:[%s3262_s20 + $0x70] sm:$0xff]  ;;  %v1822_v25 = vld [vmem:[%s3262_s20 + $0x20] sm:$0xff] }
 0x19b   : > { %1957 = vadd.xlane.f32.xlu1 %v1956_v35 }
 0x19c   : > { %1978 = vadd.xlane.f32.xlu0 %v1977_v13 }
 0x19f   : > { %1981 = vadd.xlane.f32.xlu1 %v1980_v55  ;;  %v1926_v55 = vld [vmem:[%s3268_s15 + $0x58] sm:$0xff] }
 0x1a0   : > { %1838 = vadd.xlane.f32.xlu0 %v1837_v14 }
 0x1a3   : > { %1951 = vadd.xlane.f32.xlu1 %v1950_v16 }
 0x1a4   : > { %1948 = vadd.xlane.f32.xlu0 %v1947_v18  ;;  %v1916_v18 = vld [vmem:[%s3268_s15 + $0x8] sm:$0xff] }
 0x1a7   : > { %1975 = vadd.xlane.f32.xlu1 %v1974_v23 }
 0x1a8   : > { %1972 = vadd.xlane.f32.xlu0 %v1971_v24 }
 0x1ab   : > { %1856 = vadd.xlane.f32.xlu1 %v1855_v26 }
 0x1ac   : > { %1853 = vadd.xlane.f32.xlu0 %v1852_v51 }
 0x1af   : > { %1880 = vadd.xlane.f32.xlu1 %v1879_v30  ;;  %v1924_v30 = vld [vmem:[%s3268_s15 + $0x48] sm:$0xff] }
 0x1b0   : > { %1877 = vadd.xlane.f32.xlu0 %v1876_v31  ;;  %v1923_v31 = vld [vmem:[%s3268_s15 + $0x40] sm:$0xff] }
 0x1b3   : > { %1850 = vadd.xlane.f32.xlu1 %v1849_v32 }
 0x1b4   : > { %1847 = vadd.xlane.f32.xlu0 %v1846_v53 }
 0x1b7   : > { %1874 = vadd.xlane.f32.xlu1 %v1873_v33 }
 0x1b8   : > { %1871 = vadd.xlane.f32.xlu0 %v1870_v34  ;;  %v1825_v34 = vld [vmem:[%s3262_s20 + $0x38] sm:$0xff] }
 0x1bb   : > { %1969 = vadd.xlane.f32.xlu1 %v1968_v3 }
 0x1bc   : > { %1966 = vadd.xlane.f32.xlu0 %v1965_v7 }
 0x1bf   : > { %1963 = vadd.xlane.f32.xlu1 %v1962_v6  ;;  %v1833_v6 = vld [vmem:[%s3262_s20 + $0x78] sm:$0xff] }
 0x1c0   : > { %1960 = vadd.xlane.f32.xlu0 %v1959_v44 }
 0x1c3   : > { %1987 = vadd.xlane.f32.xlu1 %v1986_v46 }
 0x1c4   : > { %1984 = vadd.xlane.f32.xlu0 %v1983_v48  ;;  %v1823_v48 = vld [vmem:[%s3262_s20 + $0x28] sm:$0xff] }
 0x1c7   : > { %1993 = vadd.xlane.f32.xlu1 %v1992_v49 }
 0x1c8   : > { %1990 = vadd.xlane.f32.xlu0 %v1989_v50 }
 0x218   : > { %v1842_v28 = vpop.xlane.xlu1 %1841 }
 0x219   : > { %v1866_v52 = vpop.xlane.xlu0 %1865  ;;  %v1884_v54 = vadd.f32 %v1842_v28, %v1820_v39  ;;  %v1831_v28 = vld [vmem:[%s3262_s20 + $0x68] sm:$0xff] }
 0x21a   : > { %v1892_v19 = vadd.f32 %v1866_v52, %v1828_v47  ;;  %v1830_v52 = vld [vmem:[%s3262_s20 + $0x60] sm:$0xff] }
 0x21b   : > { %1901 = vst.msk [vmem:[%s3262_s20 + $0x10] sm:$0xff] %vm259_vm0, %v1884_v54 }
 0x21c   : > { %1909 = vst.msk [vmem:[%s3262_s20 + $0x50] sm:$0xff] %vm259_vm0, %v1892_v19  ;;  %v1845_v58 = vpop.xlane.xlu1 %1844 }
 0x21d   : > { %v1885_v59 = vadd.f32 %v1845_v58, %v1821_v40  ;;  %v1836_v21 = vpop.xlane.xlu0 %1835  ;;  %v1922_v58 = vld [vmem:[%s3268_s15 + $0x38] sm:$0xff] }
 0x21e   : > { %v1882_v41 = vadd.f32 %v1836_v21, %v1818_v56 }
 0x21f   : > { %1902 = vst.msk [vmem:[%s3262_s20 + $0x18] sm:$0xff] %vm259_vm0, %v1885_v59  ;;  %v1921_v59 = vld [vmem:[%s3268_s15 + $0x30] sm:$0xff] }
 0x220   : > { %1899 = vst.msk [vmem:[%s3262_s20] sm:$0xff] %vm259_vm0, %v1882_v41  ;;  %v1869_v61 = vpop.xlane.xlu1 %1868 }
 0x221   : > { %v1893_v62 = vadd.f32 %v1869_v61, %v1829_v60  ;;  %v1860_v43 = vpop.xlane.xlu0 %1859  ;;  %v1920_v61 = vld [vmem:[%s3268_s15 + $0x28] sm:$0xff] }
 0x222   : > { %v1890_v63 = vadd.f32 %v1860_v43, %v1826_v17 }
 0x223   : > { %1910 = vst.msk [vmem:[%s3262_s20 + $0x58] sm:$0xff] %vm259_vm0, %v1893_v62  ;;  %v1919_v62 = vld [vmem:[%s3268_s15 + $0x20] sm:$0xff] }
 0x224   : > { %1907 = vst.msk [vmem:[%s3262_s20 + $0x40] sm:$0xff] %vm259_vm0, %v1890_v63  ;;  %v1863_v20 = vpop.xlane.xlu1 %1862 }
 0x225   : > { %v1891_v4 = vadd.f32 %v1863_v20, %v1827_v0  ;;  %v1955_v8 = vpop.xlane.xlu0 %1954  ;;  %v1928_v20 = vld [vmem:[%s3268_s15 + $0x68] sm:$0xff] }
 0x226   : > { %v1997_v1 = vadd.f32 %v1955_v8, %v1917_v2 }
 0x227   : > { %1908 = vst.msk [vmem:[%s3262_s20 + $0x48] sm:$0xff] %vm259_vm0, %v1891_v4  ;;  %v1927_v4 = vld [vmem:[%s3268_s15 + $0x60] sm:$0xff] }
 0x228   : > { %2013 = vst.msk [vmem:[%s3268_s15 + $0x10] sm:$0xff] %vm259_vm0, %v1997_v1  ;;  %v1958_v11 = vpop.xlane.xlu1 %1957 }
 0x229   : > { %v1998_v35 = vadd.f32 %v1958_v11, %v1918_v9  ;;  %v1979_v12 = vpop.xlane.xlu0 %1978  ;;  %v1930_v11 = vld [vmem:[%s3268_s15 + $0x78] sm:$0xff] }
 0x22a   : > { %v2005_v13 = vadd.f32 %v1979_v12, %v1925_v10 }
 0x22b   : > { %2014 = vst.msk [vmem:[%s3268_s15 + $0x18] sm:$0xff] %vm259_vm0, %v1998_v35  ;;  %v1929_v35 = vld [vmem:[%s3268_s15 + $0x70] sm:$0xff] }
 0x22c   : > { %2021 = vst.msk [vmem:[%s3268_s15 + $0x50] sm:$0xff] %vm259_vm0, %v2005_v13  ;;  %v1982_v14 = vpop.xlane.xlu1 %1981 }
 0x22d   : > { %v2006_v15 = vadd.f32 %v1982_v14, %v1926_v55  ;;  %v1839_v16 = vpop.xlane.xlu0 %1838 }
 0x22e   : > { %v1883_v57 = vadd.f32 %v1839_v16, %v1819_v37 }
 0x22f   : > { %2022 = vst.msk [vmem:[%s3268_s15 + $0x58] sm:$0xff] %vm259_vm0, %v2006_v15 }
 0x230   : > { %1900 = vst.msk [vmem:[%s3262_s20 + $0x8] sm:$0xff] %vm259_vm0, %v1883_v57  ;;  %v1952_v23 = vpop.xlane.xlu1 %1951 }
 0x231   : > { %v1996_v24 = vadd.f32 %v1952_v23, %v1916_v18  ;;  %v1949_v26 = vpop.xlane.xlu0 %1948 }
 0x232   : > { %v1995_v51 = vadd.f32 %v1949_v26, %v1915_v22 }
 0x233   : > { %2012 = vst.msk [vmem:[%s3268_s15 + $0x8] sm:$0xff] %vm259_vm0, %v1996_v24 }
 0x234   : > { %2011 = vst.msk [vmem:[%s3268_s15] sm:$0xff] %vm259_vm0, %v1995_v51  ;;  %v1976_v32 = vpop.xlane.xlu1 %1975 }
 0x235   : > { %v2004_v53 = vadd.f32 %v1976_v32, %v1924_v30  ;;  %v1973_v33 = vpop.xlane.xlu0 %1972 }
 0x236   : > { %v2003_v5 = vadd.f32 %v1973_v33, %v1923_v31 }
 0x237   : > { %2020 = vst.msk [vmem:[%s3268_s15 + $0x48] sm:$0xff] %vm259_vm0, %v2004_v53 }
 0x238   : > { %2019 = vst.msk [vmem:[%s3268_s15 + $0x40] sm:$0xff] %vm259_vm0, %v2003_v5  ;;  %v1857_v3 = vpop.xlane.xlu1 %1856 }
 0x239   : > { %v1889_v38 = vadd.f32 %v1857_v3, %v1825_v34  ;;  %v1854_v7 = vpop.xlane.xlu0 %1853 }
 0x23a   : > { %v1888_v27 = vadd.f32 %v1854_v7, %v1824_v36 }
 0x23b   : > { %1906 = vst.msk [vmem:[%s3262_s20 + $0x38] sm:$0xff] %vm259_vm0, %v1889_v38 }
 0x23c   : > { %1905 = vst.msk [vmem:[%s3262_s20 + $0x30] sm:$0xff] %vm259_vm0, %v1888_v27  ;;  %v1881_v44 = vpop.xlane.xlu1 %1880 }
 0x23d   : > { %v1897_v29 = vadd.f32 %v1881_v44, %v1833_v6  ;;  %v1878_v46 = vpop.xlane.xlu0 %1877 }
 0x23e   : > { %v1896_v45 = vadd.f32 %v1878_v46, %v1832_v42 }
 0x23f   : > { %1914 = vst.msk [vmem:[%s3262_s20 + $0x78] sm:$0xff] %vm259_vm0, %v1897_v29 }
 0x240   : > { %1913 = vst.msk [vmem:[%s3262_s20 + $0x70] sm:$0xff] %vm259_vm0, %v1896_v45  ;;  %v1851_v49 = vpop.xlane.xlu1 %1850 }
 0x241   : > { %v1887_v50 = vadd.f32 %v1851_v49, %v1823_v48  ;;  %v1848_v39 = vpop.xlane.xlu0 %1847 }
 0x242   : > { %v1886_v47 = vadd.f32 %v1848_v39, %v1822_v25 }
 0x243   : > { %1904 = vst.msk [vmem:[%s3262_s20 + $0x28] sm:$0xff] %vm259_vm0, %v1887_v50 }
 0x244   : > { %1903 = vst.msk [vmem:[%s3262_s20 + $0x20] sm:$0xff] %vm259_vm0, %v1886_v47  ;;  %v1875_v54 = vpop.xlane.xlu1 %1874 }
 0x245   : > { %v1895_v19 = vadd.f32 %v1875_v54, %v1831_v28  ;;  %v1872_v40 = vpop.xlane.xlu0 %1871 }
 0x246   : > { %v1894_v56 = vadd.f32 %v1872_v40, %v1830_v52 }
 0x247   : > { %1912 = vst.msk [vmem:[%s3262_s20 + $0x68] sm:$0xff] %vm259_vm0, %v1895_v19 }
 0x248   : > { %1911 = vst.msk [vmem:[%s3262_s20 + $0x60] sm:$0xff] %vm259_vm0, %v1894_v56  ;;  %v1970_v21 = vpop.xlane.xlu1 %1969 }
 0x249   : > { %v2002_v41 = vadd.f32 %v1970_v21, %v1922_v58  ;;  %v1967_v60 = vpop.xlane.xlu0 %1966 }
 0x24a   : > { %v2001_v17 = vadd.f32 %v1967_v60, %v1921_v59 }
 0x24b   : > { %2018 = vst.msk [vmem:[%s3268_s15 + $0x38] sm:$0xff] %vm259_vm0, %v2002_v41 }
 0x24c   : > { %2017 = vst.msk [vmem:[%s3268_s15 + $0x30] sm:$0xff] %vm259_vm0, %v2001_v17  ;;  %v1964_v43 = vpop.xlane.xlu1 %1963 }
 0x24d   : > { %v2000_v63 = vadd.f32 %v1964_v43, %v1920_v61  ;;  %v1961_v0 = vpop.xlane.xlu0 %1960 }
 0x24e   : > { %v1999_v2 = vadd.f32 %v1961_v0, %v1919_v62 }
 0x24f   : > { %2016 = vst.msk [vmem:[%s3268_s15 + $0x28] sm:$0xff] %vm259_vm0, %v2000_v63 }
 0x250   : > { %2015 = vst.msk [vmem:[%s3268_s15 + $0x20] sm:$0xff] %vm259_vm0, %v1999_v2  ;;  %v1988_v8 = vpop.xlane.xlu1 %1987 }
 0x251   : > { %v2008_v1 = vadd.f32 %v1988_v8, %v1928_v20  ;;  %v1985_v9 = vpop.xlane.xlu0 %1984 }
 0x252   : > { %v2007_v10 = vadd.f32 %v1985_v9, %v1927_v4 }
 0x253   : > { %2024 = vst.msk [vmem:[%s3268_s15 + $0x68] sm:$0xff] %vm259_vm0, %v2008_v1 }
 0x254   : > { %2023 = vst.msk [vmem:[%s3268_s15 + $0x60] sm:$0xff] %vm259_vm0, %v2007_v10  ;;  %v1994_v12 = vpop.xlane.xlu1 %1993 }
 0x255   : > { %v2010_v13 = vadd.f32 %v1994_v12, %v1930_v11  ;;  %v1991_v55 = vpop.xlane.xlu0 %1990 }
 0x256   : > { %v2009_v37 = vadd.f32 %v1991_v55, %v1929_v35 }
 0x257   : > { %2026 = vst.msk [vmem:[%s3268_s15 + $0x78] sm:$0xff] %vm259_vm0, %v2010_v13 }
 0x258   : > { %2025 = vst.msk [vmem:[%s3268_s15 + $0x70] sm:$0xff] %vm259_vm0, %v2009_v37 }
 0x259 PF: > { %s15_s17 = sadd.s32 1, %s2881_s17   ;;  %s3602_s15 = smov %s2877_s16 }
 0x25a   : > { %p12_p5 = scmp.ge.s32.totalorder %s15_s17, 4   ;;  %s3603_s16 = smov %s3605_s18 }
 0x25c   :  { %14 = sbr.rel (!%p12_p5) target bundleno = 2 (0x2), region = 86 }

// kernel: stylenet_forward.57
= control target key start
LH: loop header
LB: loop body
LE: loop exit
PB: predicated region body
PF: predicated region fallthrough
CT: control target
= control target key end

     0   :  { %s2201_s15 = smov 0   ;;  %s2203_s16 = smov 0   ;;  %s2542_s0 = inlined_call_operand.vmem [shape: bf16[2,1152,64], index: 0, kind: input, shape index: {}]   ;;  %s2543_s1 = inlined_call_operand.vmem [shape: bf16[64,1152], index: 1, kind: input, shape index: {}]   ;;  %s2544_s2 = inlined_call_operand.vmem [shape: f32[2,64,64], index: 2, kind: output, shape index: {0}]   ;;  %s2545_s3 = inlined_call_operand.vmem [shape: f32[2,64,1], index: 3, kind: output, shape index: {1}]   ;;  %s2546_s4 = inlined_call_operand.vmem [shape: f32[2,64,1], index: 4, kind: output, shape index: {2}]  }
   0x1   :  { %s2205_s17 = smov 0  }
   0x2 LB: > { %s27_s18 = sadd.s32 1, %s2169_s16  ;;  %p1668_p0 = scmp.ge.s32.totalorder %s2173_s17, 1  ;;  %s2173_s17 = sphi %s2205_s17, %s15_s17   ;;  %s2169_s16 = sphi %s2203_s16, %s2548_s16   ;;  %s2165_s15 = sphi %s2201_s15, %s2547_s15  }
   0x3   : > { %p29_p1 = scmp.ge.s32.totalorder %s27_s18, 2  ;;  %p186_p2 = scmp.lt.s32.totalorder %s2173_s17, 3 }
   0x5   : > { %s2550_s18 = smov (%p29_p1, %s27_s18), 0  ;;  %p187_p3 = pnand %p1668_p0, %p186_p2 }
   0x6   : > { %p228_p4 = scmp.lt.s32.totalorder (!%p187_p3), %s2165_s15, 1  ;;  %v2061_v0 = vld [vmem:[%s2543_s1 + $0x4] ss:$36 sps:$4 sm:$0xff] (!%p187_p3)   ;;  %v2064_v1 = vld [vmem:[%s2543_s1 + $0xc] ss:$36 sps:$4 sm:$0xff] (!%p187_p3)   ;;  %vm259_vm0 = vcmask (!%p187_p3), 7168  }
   0x7   : > { %190 = sbr.rel (%p187_p3) target bundleno = 506 (0x1fa), region = 28  ;;  %1108 = vmatprep.mubr.bf16.mxu0 (!%p187_p3), %v2061_v0  ;;  %1173 = vmatprep.mubr.bf16.mxu1 (!%p187_p3), %v2064_v1  ;;  %v2059_v32 = vld [vmem:[%s2543_s1] ss:$36 sps:$4 sm:$0xff] (!%p187_p3)   ;;  %v2062_v34 = vld [vmem:[%s2543_s1 + $0x8] ss:$36 sps:$4 sm:$0xff] (!%p187_p3)   ;;  %vm1401_vm1 = vcmask (!%p187_p3), 523264  }
   0x8   : > { %v2073_v36 = vld [vmem:[%s2543_s1 + $0x4c] ss:$36 sps:$4 sm:$0xff] (!%p187_p3)   ;;  %v2075_v38 = vld [vmem:[%s2543_s1 + $0x54] ss:$36 sps:$4 sm:$0xff] (!%p187_p3)   ;;  %v2089_v57 = vld [vmem:[%s2543_s1 + $0x9c] ss:$36 sps:$4 sm:$0xff] (!%p187_p3)  }
   0x9   : > { %v2077_v44 = vld [vmem:[%s2543_s1 + $0x48] ss:$36 sps:$4 sm:$0xff] (!%p187_p3)   ;;  %v2078_v46 = vld [vmem:[%s2543_s1 + $0x50] ss:$36 sps:$4 sm:$0xff] (!%p187_p3)   ;;  %v2092_v59 = vld [vmem:[%s2543_s1 + $0x98] ss:$36 sps:$4 sm:$0xff] (!%p187_p3)  }
   0xa   : > { %v2087_v48 = vld [vmem:[%s2543_s1 + $0x94] ss:$36 sps:$4 sm:$0xff] (!%p187_p3)  }
   0xb   : > { %v2091_v58 = vld [vmem:[%s2543_s1 + $0x90] ss:$36 sps:$4 sm:$0xff] (!%p187_p3)  }
   0xe   : > { %s2552_s15 = smov (!%p228_p4, %s2165_s15), 1 }
   0xf   : > { %s2001_s23 = smul.u32 576, %s2552_s15 }
  0x11   : > { %s2231_s26 = scalar_lea.vmem %s2542_s0, %s2001_s23 }
  0x12   : > { %v2027_v2 = vld [vmem:[%s2231_s26 + $0x40] sm:$0xff]   ;;  %v2031_v6 = vld [vmem:[%s2231_s26 + $0x48] sm:$0xff]   ;;  %v2035_v10 = vld [vmem:[%s2231_s26 + $0x50] sm:$0xff]  }
  0x13   : > { %v2028_v3 = vld [vmem:[%s2231_s26 + $0xc0] sm:$0xff]   ;;  %1789 = vmatprep.subr.bf16.mxu0 %v2027_v2  ;;  %v2032_v7 = vld [vmem:[%s2231_s26 + $0xc8] sm:$0xff]   ;;  %v2036_v11 = vld [vmem:[%s2231_s26 + $0xd0] sm:$0xff]  }
  0x14   : > { %v2029_v4 = vld [vmem:[%s2231_s26] sm:$0xff]   ;;  %1829 = vmatprep.subr.bf16.mxu1 %v2028_v3  ;;  %v2033_v8 = vld [vmem:[%s2231_s26 + $0x8] sm:$0xff]   ;;  %v2037_v12 = vld [vmem:[%s2231_s26 + $0x10] sm:$0xff]  }
  0x15   : > { %v2030_v5 = vld [vmem:[%s2231_s26 + $0x80] sm:$0xff]   ;;  %1790 = vmatpush3.bf16.msra.mxu0 %v2029_v4  ;;  %v2034_v9 = vld [vmem:[%s2231_s26 + $0x88] sm:$0xff]   ;;  %v2038_v13 = vld [vmem:[%s2231_s26 + $0x90] sm:$0xff]  }
  0x16   : > { %1830 = vmatpush3.bf16.msra.mxu1 %v2030_v5  ;;  %1791 = vmatprep.subr.bf16.mxu0 %v2031_v6  ;;  %v2039_v14 = vld [vmem:[%s2231_s26 + $0x58] sm:$0xff]   ;;  %v2043_v18 = vld [vmem:[%s2231_s26 + $0x60] sm:$0xff]   ;;  %v2047_v22 = vld [vmem:[%s2231_s26 + $0x68] sm:$0xff]  }
  0x17   : > { %1831 = vmatprep.subr.bf16.mxu1 %v2032_v7  ;;  %v2040_v15 = vld [vmem:[%s2231_s26 + $0xd8] sm:$0xff]   ;;  %v2044_v19 = vld [vmem:[%s2231_s26 + $0xe0] sm:$0xff]   ;;  %v2048_v23 = vld [vmem:[%s2231_s26 + $0xe8] sm:$0xff]  }
  0x18   : > { %v2041_v16 = vld [vmem:[%s2231_s26 + $0x18] sm:$0xff]   ;;  %v2045_v20 = vld [vmem:[%s2231_s26 + $0x20] sm:$0xff]   ;;  %v2049_v24 = vld [vmem:[%s2231_s26 + $0x28] sm:$0xff]  }
  0x19   : > { %1792 = vmatpush3.bf16.msra.mxu0 %v2033_v8  ;;  %v2042_v17 = vld [vmem:[%s2231_s26 + $0x98] sm:$0xff]   ;;  %v2046_v21 = vld [vmem:[%s2231_s26 + $0xa0] sm:$0xff]   ;;  %v2050_v25 = vld [vmem:[%s2231_s26 + $0xa8] sm:$0xff]  }
  0x1a   : > { %1832 = vmatpush3.bf16.msra.mxu1 %v2034_v9  ;;  %1793 = vmatprep.subr.bf16.mxu0 %v2035_v10  ;;  %v2051_v26 = vld [vmem:[%s2231_s26 + $0x70] sm:$0xff]   ;;  %v2055_v30 = vld [vmem:[%s2231_s26 + $0x78] sm:$0xff]   ;;  %v2065_v37 = vld [vmem:[%s2231_s26 + $0x140] sm:$0xff]  }
  0x1b   : > { %1833 = vmatprep.subr.bf16.mxu1 %v2036_v11  ;;  %v2052_v27 = vld [vmem:[%s2231_s26 + $0xf0] sm:$0xff]   ;;  %v2056_v31 = vld [vmem:[%s2231_s26 + $0xf8] sm:$0xff]   ;;  %v2066_v39 = vld [vmem:[%s2231_s26 + $0x1c0] sm:$0xff]  }
  0x1c   : > { %v2053_v28 = vld [vmem:[%s2231_s26 + $0x30] sm:$0xff]   ;;  %v2057_v33 = vld [vmem:[%s2231_s26 + $0x38] sm:$0xff]   ;;  %v2067_v40 = vld [vmem:[%s2231_s26 + $0x100] sm:$0xff]  }
  0x1d   : > { %1794 = vmatpush3.bf16.msra.mxu0 %v2037_v12  ;;  %v2054_v29 = vld [vmem:[%s2231_s26 + $0xb0] sm:$0xff]   ;;  %v2058_v35 = vld [vmem:[%s2231_s26 + $0xb8] sm:$0xff]   ;;  %v2068_v41 = vld [vmem:[%s2231_s26 + $0x180] sm:$0xff]  }
  0x1e   : > { %1834 = vmatpush3.bf16.msra.mxu1 %v2038_v13  ;;  %1795 = vmatprep.subr.bf16.mxu0 %v2039_v14  ;;  %v2069_v42 = vld [vmem:[%s2231_s26 + $0x148] sm:$0xff]   ;;  %v2079_v49 = vld [vmem:[%s2231_s26 + $0x150] sm:$0xff]   ;;  %v2083_v53 = vld [vmem:[%s2231_s26 + $0x158] sm:$0xff]  }
  0x1f   : > { %1835 = vmatprep.subr.bf16.mxu1 %v2040_v15  ;;  %v2070_v43 = vld [vmem:[%s2231_s26 + $0x1c8] sm:$0xff]   ;;  %v2080_v50 = vld [vmem:[%s2231_s26 + $0x1d0] sm:$0xff]   ;;  %v2084_v54 = vld [vmem:[%s2231_s26 + $0x1d8] sm:$0xff]  }
  0x20   : > { %v2071_v45 = vld [vmem:[%s2231_s26 + $0x108] sm:$0xff]   ;;  %v2081_v51 = vld [vmem:[%s2231_s26 + $0x110] sm:$0xff]   ;;  %v2085_v55 = vld [vmem:[%s2231_s26 + $0x118] sm:$0xff]  }
  0x21   : > { %1796 = vmatpush3.bf16.msra.mxu0 %v2041_v16  ;;  %v2072_v47 = vld [vmem:[%s2231_s26 + $0x188] sm:$0xff]   ;;  %v2082_v52 = vld [vmem:[%s2231_s26 + $0x190] sm:$0xff]   ;;  %v2086_v56 = vld [vmem:[%s2231_s26 + $0x198] sm:$0xff]  }
  0x22   : > { %1836 = vmatpush3.bf16.msra.mxu1 %v2042_v17  ;;  %1797 = vmatprep.subr.bf16.mxu0 %v2043_v18  ;;  %v2093_v60 = vld [vmem:[%s2231_s26 + $0x160] sm:$0xff]   ;;  %v2097_v0 = vld [vmem:[%s2231_s26 + $0x168] sm:$0xff]   ;;  %v2105_v6 = vld [vmem:[%s2543_s1 + $0xd8] ss:$36 sps:$4 sm:$0xff]  }
  0x23   : > { %1837 = vmatprep.subr.bf16.mxu1 %v2044_v19  ;;  %v2094_v61 = vld [vmem:[%s2231_s26 + $0x1e0] sm:$0xff]   ;;  %v2098_v1 = vld [vmem:[%s2231_s26 + $0x1e8] sm:$0xff]   ;;  %v2107_v8 = vld [vmem:[%s2231_s26 + $0x170] sm:$0xff]  }
  0x24   : > { %v2095_v62 = vld [vmem:[%s2231_s26 + $0x120] sm:$0xff]   ;;  %v2099_v2 = vld [vmem:[%s2231_s26 + $0x128] sm:$0xff]   ;;  %v2108_v9 = vld [vmem:[%s2231_s26 + $0x1f0] sm:$0xff]  }
  0x25   : > { %1798 = vmatpush3.bf16.msra.mxu0 %v2045_v20  ;;  %v2096_v63 = vld [vmem:[%s2231_s26 + $0x1a0] sm:$0xff]   ;;  %v2100_v3 = vld [vmem:[%s2231_s26 + $0x1a8] sm:$0xff]   ;;  %v2109_v10 = vld [vmem:[%s2231_s26 + $0x130] sm:$0xff]  }
  0x26   : > { %1838 = vmatpush3.bf16.msra.mxu1 %v2046_v21  ;;  %1799 = vmatprep.subr.bf16.mxu0 %v2047_v22  ;;  %v2101_v4 = vld [vmem:[%s2543_s1 + $0xdc] ss:$36 sps:$4 sm:$0xff]   ;;  %v2103_v5 = vld [vmem:[%s2543_s1 + $0xe4] ss:$36 sps:$4 sm:$0xff]   ;;  %v2110_v11 = vld [vmem:[%s2231_s26 + $0x1b0] sm:$0xff]  }
  0x27   : > { %1839 = vmatprep.subr.bf16.mxu1 %v2048_v23  ;;  %v2106_v7 = vld [vmem:[%s2543_s1 + $0xe0] ss:$36 sps:$4 sm:$0xff]   ;;  %v2111_v12 = vld [vmem:[%s2231_s26 + $0x178] sm:$0xff]   ;;  %v2115_v16 = vld [vmem:[%s2543_s1 + $0x10] ss:$36 sps:$4 sm:$0xff]  }
  0x28   : > { %v2112_v13 = vld [vmem:[%s2231_s26 + $0x1f8] sm:$0xff]   ;;  %v2121_v20 = vld [vmem:[%s2231_s26 + $0x200] sm:$0xff]   ;;  %v2122_v21 = vld [vmem:[%s2231_s26 + $0x208] sm:$0xff]  }
  0x29   : > { %1800 = vmatpush3.bf16.msra.mxu0 %v2049_v24  ;;  %v2113_v14 = vld [vmem:[%s2231_s26 + $0x138] sm:$0xff]   ;;  %v2125_v23 = vld [vmem:[%s2543_s1 + $0x64] ss:$36 sps:$4 sm:$0xff]  }
  0x2a   : > { %1840 = vmatpush3.bf16.msra.mxu1 %v2050_v25  ;;  %1801 = vmatprep.subr.bf16.mxu0 %v2051_v26  ;;  %v2114_v15 = vld [vmem:[%s2231_s26 + $0x1b8] sm:$0xff]   ;;  %v2128_v25 = vld [vmem:[%s2543_s1 + $0x60] ss:$36 sps:$4 sm:$0xff]   ;;  %v2129_v26 = vld [vmem:[%s2231_s26 + $0x210] sm:$0xff]  }
  0x2b   : > { %1841 = vmatprep.subr.bf16.mxu1 %v2052_v27  ;;  %v2117_v17 = vld [vmem:[%s2543_s1 + $0x14] ss:$36 sps:$4 sm:$0xff]   ;;  %v2120_v19 = vld [vmem:[%s2543_s1 + $0x1c] ss:$36 sps:$4 sm:$0xff]   ;;  %v2131_v27 = vld [vmem:[%s2543_s1 + $0xa4] ss:$36 sps:$4 sm:$0xff]  }
  0x2c   : > { %v2118_v18 = vld [vmem:[%s2543_s1 + $0x18] ss:$36 sps:$4 sm:$0xff]  }
  0x2d   : > { %1802 = vmatpush3.bf16.msra.mxu0 %v2053_v28  ;;  %v2123_v22 = vld [vmem:[%s2543_s1 + $0x5c] ss:$36 sps:$4 sm:$0xff]   ;;  %v2133_v28 = vld [vmem:[%s2543_s1 + $0xac] ss:$36 sps:$4 sm:$0xff]  }
  0x2e   : > { %1842 = vmatpush3.bf16.msra.mxu1 %v2054_v29  ;;  %1803 = vmatprep.subr.bf16.mxu0 %v2055_v30  ;;  %v2127_v24 = vld [vmem:[%s2543_s1 + $0x58] ss:$36 sps:$4 sm:$0xff]   ;;  %v2135_v30 = vld [vmem:[%s2543_s1 + $0xa0] ss:$36 sps:$4 sm:$0xff]  }
  0x2f   : > { %1843 = vmatprep.subr.bf16.mxu1 %v2056_v31  ;;  %v2130_v29 = vld [vmem:[%s2231_s26 + $0x218] sm:$0xff]   ;;  %v2136_v31 = vld [vmem:[%s2543_s1 + $0xa8] ss:$36 sps:$4 sm:$0xff]  }
  0x31   : > { %1804 = vmatpush3.bf16.msra.mxu0 %v2057_v33  ;;  %v2139_v33 = vld [vmem:[%s2543_s1 + $0xec] ss:$36 sps:$4 sm:$0xff]  }
  0x32   : > { %1844 = vmatpush3.bf16.msra.mxu1 %v2058_v35  ;;  %1869 = vmatprep.subr.bf16.mxu0 %v2065_v37  ;;  %v2138_v35 = vld [vmem:[%s2231_s26 + $0x228] sm:$0xff]   ;;  %v2145_v37 = vld [vmem:[%s2231_s26 + $0x230] sm:$0xff]  }
  0x33   : > { %1909 = vmatprep.subr.bf16.mxu1 %v2066_v39  ;;  %v2147_v39 = vld [vmem:[%s2543_s1 + $0x20] ss:$36 sps:$4 sm:$0xff]  }
  0x34   : > { %1109 = vmatmul.mubr.bf16.vlgmr.msra.gmra.mrb[0].mxu0 %v2059_v32  ;;  %v2137_v32 = vld [vmem:[%s2231_s26 + $0x220] sm:$0xff]  }
  0x35   : > { %1174 = vmatmul.mubr.bf16.vlgmr.msra.gmra.mrb[0].mxu1 %v2062_v34  ;;  %1870 = vmatpush3.bf16.msra.mxu0 %v2067_v40  ;;  %v2141_v34 = vld [vmem:[%s2543_s1 + $0xf4] ss:$36 sps:$4 sm:$0xff]  }
  0x36   : > { %1910 = vmatpush3.bf16.msra.mxu1 %v2068_v41  ;;  %1116 = vmatprep.mubr.bf16.mxu0 %v2073_v36  ;;  %v2143_v36 = vld [vmem:[%s2543_s1 + $0xe8] ss:$36 sps:$4 sm:$0xff]   ;;  %v2148_v40 = vld [vmem:[%s2543_s1 + $0xb0] ss:$36 sps:$4 sm:$0xff]   ;;  %v2146_v41 = vld [vmem:[%s2231_s26 + $0x238] sm:$0xff]   ;;  %s2408_s26 = sshll.u32 %s2552_s15, 6 }
  0x37   : > { %1871 = vmatprep.subr.bf16.mxu0 %v2069_v42  ;;  %1181 = vmatprep.mubr.bf16.mxu1 %v2075_v38  ;;  %v2144_v38 = vld [vmem:[%s2543_s1 + $0xf0] ss:$36 sps:$4 sm:$0xff]   ;;  %v2149_v42 = vld [vmem:[%s2543_s1 + $0x68] ss:$36 sps:$4 sm:$0xff]   ;;  %s2414_s8 = scalar_lea.vmem %s2545_s3, %s2408_s26  ;;  %s2420_s15 = scalar_lea.vmem %s2546_s4, %s2408_s26 }
  0x38   : > { %1911 = vmatprep.subr.bf16.mxu1 %v2070_v43  ;;  %v2150_v43 = vld [vmem:[%s2543_s1 + $0xf8] ss:$36 sps:$4 sm:$0xff]   ;;  %s243_s13 = scalar_lea.vmem %s2544_s2, %s2408_s26 }
  0x39   : > { %1872 = vmatpush3.bf16.msra.mxu0 %v2071_v45 }
  0x3a   : > { %1912 = vmatpush3.bf16.msra.mxu1 %v2072_v47  ;;  %1873 = vmatprep.subr.bf16.mxu0 %v2079_v49 }
  0x3b   : > { %1913 = vmatprep.subr.bf16.mxu1 %v2080_v50 }
  0x3c   : > { %1117 = vmatmul.mubr.bf16.gmra.mrb[4].mxu0 %v2077_v44  ;;  %v2175_v44 = vmov 0.0  }
  0x3d   : > { %1182 = vmatmul.mubr.bf16.gmra.mrb[4].mxu1 %v2078_v46  ;;  %1874 = vmatpush3.bf16.msra.mxu0 %v2081_v51  ;;  %266 = vst.msk [vmem:[%s2414_s8 + $0x30] sm:$0xff] %vm259_vm0, %v2175_v44  ;;  %260 = vst.msk [vmem:[%s2414_s8] sm:$0xff] %vm259_vm0, %v2175_v44 }
  0x3e   : > { %1914 = vmatpush3.bf16.msra.mxu1 %v2082_v52  ;;  %1124 = vmatprep.mubr.bf16.mxu0 %v2087_v48  ;;  %261 = vst.msk [vmem:[%s2414_s8 + $0x8] sm:$0xff] %vm259_vm0, %v2175_v44  ;;  %262 = vst.msk [vmem:[%s2414_s8 + $0x10] sm:$0xff] %vm259_vm0, %v2175_v44 }
  0x3f   : > { %1875 = vmatprep.subr.bf16.mxu0 %v2083_v53  ;;  %1915 = vmatprep.subr.bf16.mxu1 %v2084_v54  ;;  %263 = vst.msk [vmem:[%s2414_s8 + $0x18] sm:$0xff] %vm259_vm0, %v2175_v44  ;;  %264 = vst.msk [vmem:[%s2414_s8 + $0x20] sm:$0xff] %vm259_vm0, %v2175_v44 }
  0x40   : > { %1189 = vmatprep.mubr.bf16.mxu1 %v2089_v57  ;;  %265 = vst.msk [vmem:[%s2414_s8 + $0x28] sm:$0xff] %vm259_vm0, %v2175_v44  ;;  %267 = vst.msk [vmem:[%s2414_s8 + $0x38] sm:$0xff] %vm259_vm0, %v2175_v44 }
  0x41   : > { %1876 = vmatpush3.bf16.msra.mxu0 %v2085_v55  ;;  %268 = vst.msk [vmem:[%s2420_s15] sm:$0xff] %vm259_vm0, %v2175_v44  ;;  %269 = vst.msk [vmem:[%s2420_s15 + $0x8] sm:$0xff] %vm259_vm0, %v2175_v44 }
  0x42   : > { %1916 = vmatpush3.bf16.msra.mxu1 %v2086_v56  ;;  %1877 = vmatprep.subr.bf16.mxu0 %v2093_v60  ;;  %270 = vst.msk [vmem:[%s2420_s15 + $0x10] sm:$0xff] %vm259_vm0, %v2175_v44  ;;  %271 = vst.msk [vmem:[%s2420_s15 + $0x18] sm:$0xff] %vm259_vm0, %v2175_v44 }
  0x43   : > { %1917 = vmatprep.subr.bf16.mxu1 %v2094_v61  ;;  %272 = vst.msk [vmem:[%s2420_s15 + $0x20] sm:$0xff] %vm259_vm0, %v2175_v44  ;;  %273 = vst.msk [vmem:[%s2420_s15 + $0x28] sm:$0xff] %vm259_vm0, %v2175_v44 }
  0x44   : > { %1125 = vmatmul.mubr.bf16.gmra.mrb[8].mxu0 %v2091_v58  ;;  %274 = vst.msk [vmem:[%s2420_s15 + $0x30] sm:$0xff] %vm259_vm0, %v2175_v44  ;;  %275 = vst.msk [vmem:[%s2420_s15 + $0x38] sm:$0xff] %vm259_vm0, %v2175_v44 }
  0x45   : > { %1190 = vmatmul.mubr.bf16.gmra.mrb[8].mxu1 %v2092_v59  ;;  %1878 = vmatpush3.bf16.msra.mxu0 %v2095_v62 }
  0x46   : > { %1918 = vmatpush3.bf16.msra.mxu1 %v2096_v63  ;;  %1879 = vmatprep.subr.bf16.mxu0 %v2097_v0 }
  0x47   : > { %1919 = vmatprep.subr.bf16.mxu1 %v2098_v1  ;;  %1132 = vmatprep.mubr.bf16.mxu0 %v2101_v4 }
  0x48   : > { %1197 = vmatprep.mubr.bf16.mxu1 %v2103_v5 }
  0x49   : > { %1880 = vmatpush3.bf16.msra.mxu0 %v2099_v2 }
  0x4a   : > { %1920 = vmatpush3.bf16.msra.mxu1 %v2100_v3  ;;  %1881 = vmatprep.subr.bf16.mxu0 %v2107_v8 }
  0x4b   : > { %1921 = vmatprep.subr.bf16.mxu1 %v2108_v9 }
  0x4c   : > { %1133 = vmatmul.mubr.bf16.gmra.mrb[12].mxu0 %v2105_v6 }
  0x4d   : > { %1198 = vmatmul.mubr.bf16.gmra.mrb[12].mxu1 %v2106_v7  ;;  %1882 = vmatpush3.bf16.msra.mxu0 %v2109_v10 }
  0x4e   : > { %1922 = vmatpush3.bf16.msra.mxu1 %v2110_v11  ;;  %1883 = vmatprep.subr.bf16.mxu0 %v2111_v12 }
  0x4f   : > { %1923 = vmatprep.subr.bf16.mxu1 %v2112_v13  ;;  %1238 = vmatprep.mubr.bf16.mxu0 %v2117_v17 }
  0x50   : > { %1303 = vmatprep.mubr.bf16.mxu1 %v2120_v19 }
  0x51   : > { %1884 = vmatpush3.bf16.msra.mxu0 %v2113_v14 }
  0x52   : > { %1924 = vmatpush3.bf16.msra.mxu1 %v2114_v15  ;;  %1961 = vmatprep.subr.bf16.mxu0 %v2121_v20 }
  0x53   : > { %1985 = vmatprep.subr.bf16.mxu1 %v2121_v20 }
  0x54   : > { %1239 = vmatmul.mubr.bf16.vlgmr.msra.gmra.mrb[16].mxu0 %v2115_v16 }
  0x55   : > { %1304 = vmatmul.mubr.bf16.vlgmr.msra.gmra.mrb[16].mxu1 %v2118_v18  ;;  %1962 = vmatpush3.bf16.msra.mxu0 %v2121_v20 }
  0x56   : > { %1993 = vmatpush3.bf16.msra.mxu1 %v2121_v20  ;;  %1963 = vmatprep.subr.bf16.mxu0 %v2122_v21 }
  0x57   : > { %1986 = vmatprep.subr.bf16.mxu1 %v2122_v21  ;;  %1246 = vmatprep.mubr.bf16.mxu0 %v2123_v22 }
  0x58   : > { %1311 = vmatprep.mubr.bf16.mxu1 %v2125_v23 }
  0x59   : > { %1964 = vmatpush3.bf16.msra.mxu0 %v2122_v21 }
  0x5a   : > { %1994 = vmatpush3.bf16.msra.mxu1 %v2122_v21  ;;  %1965 = vmatprep.subr.bf16.mxu0 %v2129_v26 }
  0x5b   : > { %1987 = vmatprep.subr.bf16.mxu1 %v2129_v26 }
  0x5c   : > { %1247 = vmatmul.mubr.bf16.gmra.mrb[20].mxu0 %v2127_v24 }
  0x5d   : > { %1312 = vmatmul.mubr.bf16.gmra.mrb[20].mxu1 %v2128_v25  ;;  %1254 = vmatprep.mubr.bf16.mxu0 %v2131_v27 }
  0x5e   : > { %1966 = vmatpush3.bf16.msra.mxu0 %v2129_v26  ;;  %1319 = vmatprep.mubr.bf16.mxu1 %v2133_v28 }
  0x5f   : > { %1995 = vmatpush3.bf16.msra.mxu1 %v2129_v26  ;;  %1967 = vmatprep.subr.bf16.mxu0 %v2130_v29 }
  0x60   : > { %1988 = vmatprep.subr.bf16.mxu1 %v2130_v29 }
  0x62   : > { %1968 = vmatpush3.bf16.msra.mxu0 %v2130_v29 }
  0x63   : > { %1996 = vmatpush3.bf16.msra.mxu1 %v2130_v29  ;;  %1969 = vmatprep.subr.bf16.mxu0 %v2137_v32 }
  0x64   : > { %1255 = vmatmul.mubr.bf16.gmra.mrb[24].mxu0 %v2135_v30  ;;  %1989 = vmatprep.subr.bf16.mxu1 %v2137_v32 }
  0x65   : > { %1320 = vmatmul.mubr.bf16.gmra.mrb[24].mxu1 %v2136_v31  ;;  %1262 = vmatprep.mubr.bf16.mxu0 %v2139_v33 }
  0x66   : > { %1970 = vmatpush3.bf16.msra.mxu0 %v2137_v32  ;;  %1327 = vmatprep.mubr.bf16.mxu1 %v2141_v34 }
  0x67   : > { %1997 = vmatpush3.bf16.msra.mxu1 %v2137_v32  ;;  %1971 = vmatprep.subr.bf16.mxu0 %v2138_v35 }
  0x68   : > { %1990 = vmatprep.subr.bf16.mxu1 %v2138_v35 }
  0x6a   : > { %1972 = vmatpush3.bf16.msra.mxu0 %v2138_v35 }
  0x6b   : > { %1998 = vmatpush3.bf16.msra.mxu1 %v2138_v35  ;;  %1973 = vmatprep.subr.bf16.mxu0 %v2145_v37 }
  0x6c   : > { %1263 = vmatmul.mubr.bf16.gmra.mrb[28].mxu0 %v2143_v36  ;;  %1991 = vmatprep.subr.bf16.mxu1 %v2145_v37 }
  0x6d   : > { %1328 = vmatmul.mubr.bf16.gmra.mrb[28].mxu1 %v2144_v38  ;;  %1977 = vmatprep.mubr.bf16.mxu0 %v2147_v39 }
  0x6e   : > { %1974 = vmatpush3.bf16.msra.mxu0 %v2145_v37  ;;  %1981 = vmatprep.mubr.bf16.mxu1 %v2148_v40 }
  0x6f   : > { %1999 = vmatpush3.bf16.msra.mxu1 %v2145_v37  ;;  %1975 = vmatprep.subr.bf16.mxu0 %v2146_v41 }
  0x70   : > { %1992 = vmatprep.subr.bf16.mxu1 %v2146_v41 }
  0x72   : > { %1976 = vmatpush3.bf16.msra.mxu0 %v2146_v41 }
  0x73   : > { %2000 = vmatpush3.bf16.msra.mxu1 %v2146_v41 }
  0x75   : > { %1978 = vmatmul.mubr.bf16.vlgmr.msra.gmra.mrb[32].mxu0 %v2149_v42 }
  0x76   : > { %1982 = vmatmul.mubr.bf16.vlgmr.msra.gmra.mrb[32].mxu1 %v2150_v43 }
 0x107   : > { %v1805_v45 = vpop.f32.mrb[0].mxu0 }
 0x108   : > { %v1845_v46 = vpop.f32.mrb[0].mxu1  ;;  %v1806_v47 = vpop.f32.mrb[1].mxu0 }
 0x109   : > { %v1807_v48 = vadd.f32 %v1806_v47, %v1805_v45  ;;  %v1846_v49 = vpop.f32.mrb[1].mxu1  ;;  %v1808_v50 = vpop.f32.mrb[2].mxu0 }
 0x10a   : > { %v1847_v51 = vadd.f32 %v1846_v49, %v1845_v46  ;;  %v1848_v52 = vpop.f32.mrb[2].mxu1  ;;  %v1809_v53 = vpop.f32.mrb[3].mxu0 }
 0x10b   : > { %v1810_v54 = vadd.f32 %v1809_v53, %v1808_v50  ;;  %v1849_v55 = vpop.f32.mrb[3].mxu1 }
 0x10c   : > { %v1176_v56 = vadd.f32 %v1847_v51, %v1807_v48  ;;  %v1850_v57 = vadd.f32 %v1849_v55, %v1848_v52 }
 0x10e   : > { %v1179_v58 = vadd.f32 %v1850_v57, %v1810_v54 }
 0x10f   : > { %v1811_v59 = vpop.f32.mrb[4].mxu0 }
 0x110   : > { %v1851_v60 = vpop.f32.mrb[4].mxu1  ;;  %v1812_v61 = vpop.f32.mrb[5].mxu0 }
 0x111   : > { %v1813_v62 = vadd.f32 %v1812_v61, %v1811_v59  ;;  %v1852_v63 = vpop.f32.mrb[5].mxu1  ;;  %v1814_v0 = vpop.f32.mrb[6].mxu0 }
 0x112   : > { %v1853_v1 = vadd.f32 %v1852_v63, %v1851_v60  ;;  %v1854_v2 = vpop.f32.mrb[6].mxu1  ;;  %v1815_v3 = vpop.f32.mrb[7].mxu0 }
 0x113   : > { %v1816_v4 = vadd.f32 %v1815_v3, %v1814_v0  ;;  %v1855_v5 = vpop.f32.mrb[7].mxu1 }
 0x114   : > { %v1184_v6 = vadd.f32 %v1853_v1, %v1813_v62  ;;  %v1856_v7 = vadd.f32 %v1855_v5, %v1854_v2 }
 0x116   : > { %v1187_v8 = vadd.f32 %v1856_v7, %v1816_v4 }
 0x117   : > { %v1817_v9 = vpop.f32.mrb[8].mxu0 }
 0x118   : > { %v1857_v10 = vpop.f32.mrb[8].mxu1  ;;  %v1818_v11 = vpop.f32.mrb[9].mxu0 }
 0x119   : > { %v1819_v12 = vadd.f32 %v1818_v11, %v1817_v9  ;;  %v1858_v13 = vpop.f32.mrb[9].mxu1  ;;  %v1820_v14 = vpop.f32.mrb[10].mxu0 }
 0x11a   : > { %v1859_v15 = vadd.f32 %v1858_v13, %v1857_v10  ;;  %v1860_v16 = vpop.f32.mrb[10].mxu1  ;;  %v1821_v17 = vpop.f32.mrb[11].mxu0 }
 0x11b   : > { %v1822_v18 = vadd.f32 %v1821_v17, %v1820_v14  ;;  %v1861_v19 = vpop.f32.mrb[11].mxu1 }
 0x11c   : > { %v1192_v20 = vadd.f32 %v1859_v15, %v1819_v12  ;;  %v1862_v21 = vadd.f32 %v1861_v19, %v1860_v16 }
 0x11e   : > { %v1195_v22 = vadd.f32 %v1862_v21, %v1822_v18 }
 0x11f   : > { %v1823_v23 = vpop.f32.mrb[12].mxu0 }
 0x120   : > { %v1863_v24 = vpop.f32.mrb[12].mxu1  ;;  %v1824_v25 = vpop.f32.mrb[13].mxu0 }
 0x121   : > { %v1864_v26 = vpop.f32.mrb[13].mxu1  ;;  %v1825_v27 = vadd.f32 %v1824_v25, %v1823_v23  ;;  %v1826_v29 = vpop.f32.mrb[14].mxu0 }
 0x122   : > { %v1865_v28 = vadd.f32 %v1864_v26, %v1863_v24  ;;  %v1866_v30 = vpop.f32.mrb[14].mxu1  ;;  %v1827_v31 = vpop.f32.mrb[15].mxu0 }
 0x123   : > { %v1867_v32 = vpop.f32.mrb[15].mxu1  ;;  %v1828_v34 = vadd.f32 %v1827_v31, %v1826_v29 }
 0x124   : > { %v1200_v33 = vadd.f32 %v1865_v28, %v1825_v27  ;;  %v1868_v35 = vadd.f32 %v1867_v32, %v1866_v30 }
 0x126   : > { %v1203_v36 = vadd.f32 %v1868_v35, %v1828_v34 }
 0x127   : > { %v1885_v37 = vpop.f32.mrb[16].mxu0 }
 0x128   : > { %v1886_v38 = vpop.f32.mrb[17].mxu0  ;;  %v1925_v39 = vpop.f32.mrb[16].mxu1 }
 0x129   : > { %v1887_v40 = vadd.f32 %v1886_v38, %v1885_v37  ;;  %v1888_v41 = vpop.f32.mrb[18].mxu0  ;;  %v1926_v42 = vpop.f32.mrb[17].mxu1 }
 0x12a   : > { %v1889_v43 = vpop.f32.mrb[19].mxu0  ;;  %v1927_v45 = vadd.f32 %v1926_v42, %v1925_v39  ;;  %v1928_v46 = vpop.f32.mrb[18].mxu1 }
 0x12b   : > { %v1241_v44 = vadd.f32 %v1887_v40, %v1176_v56  ;;  %v1890_v47 = vadd.f32 %v1889_v43, %v1888_v41  ;;  %v1929_v48 = vpop.f32.mrb[19].mxu1 }
 0x12c   : > { %v1930_v50 = vadd.f32 %v1929_v48, %v1928_v46 }
 0x12d   : > { %v1244_v49 = vadd.f32 %v1890_v47, %v1179_v58  ;;  %v1306_v51 = vadd.f32 %v1927_v45, %v1241_v44 }
 0x12f   : > { %v1891_v52 = vpop.f32.mrb[20].mxu0  ;;  %v2454_v53 = vadd.f32 %v1930_v50, %v1244_v49 }
 0x130   : > { %v1892_v54 = vpop.f32.mrb[21].mxu0  ;;  %v1931_v55 = vpop.f32.mrb[20].mxu1 }
 0x131   : > { %v1893_v57 = vadd.f32 %v1892_v54, %v1891_v52  ;;  %v1894_v59 = vpop.f32.mrb[22].mxu0  ;;  %v1932_v60 = vpop.f32.mrb[21].mxu1 }
 0x132   : > { %v1895_v61 = vpop.f32.mrb[23].mxu0  ;;  %v1933_v63 = vadd.f32 %v1932_v60, %v1931_v55  ;;  %v1934_v0 = vpop.f32.mrb[22].mxu1 }
 0x133   : > { %v1249_v62 = vadd.f32 %v1893_v57, %v1184_v6  ;;  %v1896_v56 = vadd.f32 %v1895_v61, %v1894_v59  ;;  %v1935_v1 = vpop.f32.mrb[23].mxu1 }
 0x134   : > { %v1936_v3 = vadd.f32 %v1935_v1, %v1934_v0 }
 0x135   : > { %v1252_v2 = vadd.f32 %v1896_v56, %v1187_v8  ;;  %v1314_v4 = vadd.f32 %v1933_v63, %v1249_v62 }
 0x137   : > { %v1897_v58 = vpop.f32.mrb[24].mxu0  ;;  %v1317_v5 = vadd.f32 %v1936_v3, %v1252_v2 }
 0x138   : > { %v1898_v7 = vpop.f32.mrb[25].mxu0  ;;  %v1937_v9 = vpop.f32.mrb[24].mxu1 }
 0x139   : > { %v1899_v10 = vadd.f32 %v1898_v7, %v1897_v58  ;;  %v1900_v11 = vpop.f32.mrb[26].mxu0  ;;  %v1938_v12 = vpop.f32.mrb[25].mxu1 }
 0x13a   : > { %v1901_v13 = vpop.f32.mrb[27].mxu0  ;;  %v1939_v15 = vadd.f32 %v1938_v12, %v1937_v9  ;;  %v1940_v16 = vpop.f32.mrb[26].mxu1 }
 0x13b   : > { %v1257_v14 = vadd.f32 %v1899_v10, %v1192_v20  ;;  %v1902_v17 = vadd.f32 %v1901_v13, %v1900_v11  ;;  %v1941_v6 = vpop.f32.mrb[27].mxu1 }
 0x13c   : > { %v1942_v19 = vadd.f32 %v1941_v6, %v1940_v16  ;;  %v1416_v16 = vld [vmem:[%s2414_s8 + $0x30] sm:$0xff] }
 0x13d   : > { %v1260_v18 = vadd.f32 %v1902_v17, %v1195_v22  ;;  %v1322_v21 = vadd.f32 %v1939_v15, %v1257_v14  ;;  %v1412_v15 = vld [vmem:[%s2414_s8 + $0x10] sm:$0xff] }
 0x13f   : > { %v1903_v23 = vpop.f32.mrb[28].mxu0  ;;  %v1325_v8 = vadd.f32 %v1942_v19, %v1260_v18 }
 0x140   : > { %v1904_v24 = vpop.f32.mrb[29].mxu0  ;;  %v1943_v25 = vpop.f32.mrb[28].mxu1 }
 0x141   : > { %v1905_v26 = vadd.f32 %v1904_v24, %v1903_v23  ;;  %v1906_v27 = vpop.f32.mrb[30].mxu0  ;;  %v1944_v28 = vpop.f32.mrb[29].mxu1  ;;  %v1410_v23 = vld [vmem:[%s2414_s8] sm:$0xff] }
 0x142   : > { %v1907_v29 = vpop.f32.mrb[31].mxu0  ;;  %v1945_v31 = vadd.f32 %v1944_v28, %v1943_v25  ;;  %v1946_v32 = vpop.f32.mrb[30].mxu1  ;;  %v1414_v28 = vld [vmem:[%s2414_s8 + $0x20] sm:$0xff] }
 0x143   : > { %v1265_v30 = vadd.f32 %v1905_v26, %v1200_v33  ;;  %v1908_v20 = vadd.f32 %v1907_v29, %v1906_v27  ;;  %v1947_v34 = vpop.f32.mrb[31].mxu1  ;;  %v1417_v27 = vld [vmem:[%s2414_s8 + $0x38] sm:$0xff] }
 0x144   : > { %v1948_v37 = vadd.f32 %v1947_v34, %v1946_v32  ;;  %v1461_v34 = vld [vmem:[%s2420_s15 + $0x10] sm:$0xff] }
 0x145   : > { %v1268_v35 = vadd.f32 %v1908_v20, %v1203_v36  ;;  %v1330_v38 = vadd.f32 %v1945_v31, %v1265_v30  ;;  %v1415_v20 = vld [vmem:[%s2414_s8 + $0x28] sm:$0xff] }
 0x147   : > { %v1333_v22 = vadd.f32 %v1948_v37, %v1268_v35 }
 0x148   : > { %v1979_v39 = vpop.f32.mrb[32].mxu0 }
 0x149   : > { %v1379_v40 = vadd.f32 %v1979_v39, %v1314_v4  ;;  %v1983_v41 = vpop.f32.mrb[32].mxu1  ;;  %v1370_v42 = vpop.f32.mrb[33].mxu0  ;;  %v1462_v39 = vld [vmem:[%s2420_s15 + $0x18] sm:$0xff] }
 0x14a   : > { %v1395_v43 = vadd.f32 %v1983_v41, %v1330_v38  ;;  %v1371_v44 = vadd.f32 %v1370_v42, %v1306_v51  ;;  %v1386_v33 = vpop.f32.mrb[33].mxu1  ;;  %v1980_v45 = vpop.f32.mrb[34].mxu0 }
 0x14b   : > { %1404 = vst.msk [vmem:[%s243_s13 + $0x10] sm:$0xff] %vm1401_vm1, %v1379_v40  ;;  %v1387_v46 = vadd.f32 %v1386_v33, %v1322_v21  ;;  %v1382_v36 = vadd.f32 %v1980_v45, %v1317_v5  ;;  %v1984_v47 = vpop.f32.mrb[34].mxu1  ;;  %v1373_v48 = vpop.f32.mrb[35].mxu0  ;;  %v1424_v49 = vsel %vm1401_vm1, %v1379_v40, 0.0  ;;  %v1469_v61 = vmul.f32 %v1379_v40, %v1379_v40  ;;  %v1413_v21 = vld [vmem:[%s2414_s8 + $0x18] sm:$0xff]  ;;  %v1411_v40 = vld [vmem:[%s2414_s8 + $0x8] sm:$0xff] }
 0x14c   : > { %1408 = vst.msk [vmem:[%s243_s13 + $0x30] sm:$0xff] %vm1401_vm1, %v1395_v43  ;;  %1402 = vst.msk [vmem:[%s243_s13] sm:$0xff] %vm1401_vm1, %v1371_v44  ;;  %v1398_v50 = vadd.f32 %v1984_v47, %v1333_v22  ;;  %v1374_v52 = vadd.f32 %v1373_v48, %v2454_v53  ;;  %v1389_v54 = vpop.f32.mrb[35].mxu1  ;;  %v1436_v51 = vsel %vm1401_vm1, %v1395_v43, 0.0  ;;  %1425 = vadd.xlane.f32.xlu1 %v1424_v49  ;;  %v1418_v53 = vsel %vm1401_vm1, %v1371_v44, 0.0  ;;  %v1460_v33 = vld [vmem:[%s2420_s15 + $0x8] sm:$0xff] }
 0x14d   : > { %1406 = vst.msk [vmem:[%s243_s13 + $0x20] sm:$0xff] %vm1401_vm1, %v1387_v46  ;;  %1405 = vst.msk [vmem:[%s243_s13 + $0x18] sm:$0xff] %vm1401_vm1, %v1382_v36  ;;  %v1390_v55 = vadd.f32 %v1389_v54, %v1325_v8  ;;  %1437 = vadd.xlane.f32.xlu0 %v1436_v51  ;;  %v1427_v57 = vsel %vm1401_vm1, %v1382_v36, 0.0  ;;  %v1430_v60 = vsel %vm1401_vm1, %v1387_v46, 0.0  ;;  %v1470_v63 = vmul.f32 %v1382_v36, %v1382_v36  ;;  %v1459_v45 = vld [vmem:[%s2420_s15] sm:$0xff]  ;;  %v1464_v49 = vld [vmem:[%s2420_s15 + $0x28] sm:$0xff] }
 0x14e   : > { %1409 = vst.msk [vmem:[%s243_s13 + $0x38] sm:$0xff] %vm1401_vm1, %v1398_v50  ;;  %1403 = vst.msk [vmem:[%s243_s13 + $0x8] sm:$0xff] %vm1401_vm1, %v1374_v52  ;;  %v1439_v59 = vsel %vm1401_vm1, %v1398_v50, 0.0  ;;  %v1481_v0 = vsel %vm1401_vm1, %v1469_v61, 0.0  ;;  %v1468_v1 = vmul.f32 %v1374_v52, %v1374_v52  ;;  %v1421_v2 = vsel %vm1401_vm1, %v1374_v52, 0.0 }
 0x14f   : > { %1407 = vst.msk [vmem:[%s243_s13 + $0x28] sm:$0xff] %vm1401_vm1, %v1390_v55  ;;  %v1433_v62 = vsel %vm1401_vm1, %v1390_v55, 0.0  ;;  %v1484_v56 = vsel %vm1401_vm1, %v1470_v63, 0.0  ;;  %v1467_v3 = vmul.f32 %v1371_v44, %v1371_v44  ;;  %v1472_v58 = vmul.f32 %v1390_v55, %v1390_v55 }
 0x150   : > { %1428 = vadd.xlane.f32.xlu1 %v1427_v57  ;;  %v1478_v4 = vsel %vm1401_vm1, %v1468_v1, 0.0  ;;  %v1471_v7 = vmul.f32 %v1387_v46, %v1387_v46  ;;  %v1474_v10 = vmul.f32 %v1398_v50, %v1398_v50  ;;  %v1473_v12 = vmul.f32 %v1395_v43, %v1395_v43  ;;  %v1463_v50 = vld [vmem:[%s2420_s15 + $0x20] sm:$0xff]  ;;  %v1466_v57 = vld [vmem:[%s2420_s15 + $0x38] sm:$0xff] }
 0x151   : > { %1419 = vadd.xlane.f32.xlu0 %v1418_v53  ;;  %v1475_v5 = vsel %vm1401_vm1, %v1467_v3, 0.0  ;;  %v1490_v9 = vsel %vm1401_vm1, %v1472_v58, 0.0  ;;  %v1465_v53 = vld [vmem:[%s2420_s15 + $0x30] sm:$0xff] }
 0x152   : > { %v1487_v11 = vsel %vm1401_vm1, %v1471_v7, 0.0  ;;  %v1496_v13 = vsel %vm1401_vm1, %v1474_v10, 0.0  ;;  %v1493_v14 = vsel %vm1401_vm1, %v1473_v12, 0.0 }
 0x154   : > { %1440 = vadd.xlane.f32.xlu1 %v1439_v59 }
 0x155   : > { %1431 = vadd.xlane.f32.xlu0 %v1430_v60 }
 0x158   : > { %1434 = vadd.xlane.f32.xlu1 %v1433_v62 }
 0x159   : > { %1482 = vadd.xlane.f32.xlu0 %v1481_v0 }
 0x15c   : > { %1485 = vadd.xlane.f32.xlu1 %v1484_v56 }
 0x15d   : > { %1422 = vadd.xlane.f32.xlu0 %v1421_v2 }
 0x160   : > { %1479 = vadd.xlane.f32.xlu1 %v1478_v4 }
 0x161   : > { %1476 = vadd.xlane.f32.xlu0 %v1475_v5 }
 0x164   : > { %1491 = vadd.xlane.f32.xlu1 %v1490_v9 }
 0x165   : > { %1488 = vadd.xlane.f32.xlu0 %v1487_v11 }
 0x168   : > { %1497 = vadd.xlane.f32.xlu1 %v1496_v13 }
 0x169   : > { %1494 = vadd.xlane.f32.xlu0 %v1493_v14 }
 0x1d9   : > { %v1426_v17 = vpop.xlane.xlu1 %1425 }
 0x1da   : > { %v1438_v6 = vpop.xlane.xlu0 %1437  ;;  %v1444_v18 = vadd.f32 %v1426_v17, %v1412_v15 }
 0x1db   : > { %v1448_v19 = vadd.f32 %v1438_v6, %v1416_v16 }
 0x1dc   : > { %1453 = vst.msk [vmem:[%s2414_s8 + $0x10] sm:$0xff] %vm259_vm0, %v1444_v18 }
 0x1dd   : > { %1457 = vst.msk [vmem:[%s2414_s8 + $0x30] sm:$0xff] %vm259_vm0, %v1448_v19  ;;  %v1429_v8 = vpop.xlane.xlu1 %1428 }
 0x1de   : > { %v1445_v24 = vadd.f32 %v1429_v8, %v1413_v21  ;;  %v1420_v25 = vpop.xlane.xlu0 %1419 }
 0x1df   : > { %v1442_v26 = vadd.f32 %v1420_v25, %v1410_v23 }
 0x1e0   : > { %1454 = vst.msk [vmem:[%s2414_s8 + $0x18] sm:$0xff] %vm259_vm0, %v1445_v24 }
 0x1e1   : > { %1451 = vst.msk [vmem:[%s2414_s8] sm:$0xff] %vm259_vm0, %v1442_v26  ;;  %v1441_v29 = vpop.xlane.xlu1 %1440 }
 0x1e2   : > { %v1449_v30 = vadd.f32 %v1441_v29, %v1417_v27  ;;  %v1432_v31 = vpop.xlane.xlu0 %1431 }
 0x1e3   : > { %v1446_v32 = vadd.f32 %v1432_v31, %v1414_v28 }
 0x1e4   : > { %1458 = vst.msk [vmem:[%s2414_s8 + $0x38] sm:$0xff] %vm259_vm0, %v1449_v30 }
 0x1e5   : > { %1455 = vst.msk [vmem:[%s2414_s8 + $0x20] sm:$0xff] %vm259_vm0, %v1446_v32  ;;  %v1435_v35 = vpop.xlane.xlu1 %1434 }
 0x1e6   : > { %v1447_v37 = vadd.f32 %v1435_v35, %v1415_v20  ;;  %v1483_v38 = vpop.xlane.xlu0 %1482 }
 0x1e7   : > { %v1501_v22 = vadd.f32 %v1483_v38, %v1461_v34 }
 0x1e8   : > { %1456 = vst.msk [vmem:[%s2414_s8 + $0x28] sm:$0xff] %vm259_vm0, %v1447_v37 }
 0x1e9   : > { %1509 = vst.msk [vmem:[%s2420_s15 + $0x10] sm:$0xff] %vm259_vm0, %v1501_v22  ;;  %v1486_v41 = vpop.xlane.xlu1 %1485 }
 0x1ea   : > { %v1502_v42 = vadd.f32 %v1486_v41, %v1462_v39  ;;  %v1423_v43 = vpop.xlane.xlu0 %1422 }
 0x1eb   : > { %v1443_v44 = vadd.f32 %v1423_v43, %v1411_v40 }
 0x1ec   : > { %1510 = vst.msk [vmem:[%s2420_s15 + $0x18] sm:$0xff] %vm259_vm0, %v1502_v42 }
 0x1ed   : > { %1452 = vst.msk [vmem:[%s2414_s8 + $0x8] sm:$0xff] %vm259_vm0, %v1443_v44  ;;  %v1480_v46 = vpop.xlane.xlu1 %1479 }
 0x1ee   : > { %v1500_v36 = vadd.f32 %v1480_v46, %v1460_v33  ;;  %v1477_v47 = vpop.xlane.xlu0 %1476 }
 0x1ef   : > { %v1499_v48 = vadd.f32 %v1477_v47, %v1459_v45 }
 0x1f0   : > { %1508 = vst.msk [vmem:[%s2420_s15 + $0x8] sm:$0xff] %vm259_vm0, %v1500_v36 }
 0x1f1   : > { %1507 = vst.msk [vmem:[%s2420_s15] sm:$0xff] %vm259_vm0, %v1499_v48  ;;  %v1492_v52 = vpop.xlane.xlu1 %1491 }
 0x1f2   : > { %v1504_v54 = vadd.f32 %v1492_v52, %v1464_v49  ;;  %v1489_v51 = vpop.xlane.xlu0 %1488 }
 0x1f3   : > { %v1503_v55 = vadd.f32 %v1489_v51, %v1463_v50 }
 0x1f4   : > { %1512 = vst.msk [vmem:[%s2420_s15 + $0x28] sm:$0xff] %vm259_vm0, %v1504_v54 }
 0x1f5   : > { %1511 = vst.msk [vmem:[%s2420_s15 + $0x20] sm:$0xff] %vm259_vm0, %v1503_v55  ;;  %v1498_v59 = vpop.xlane.xlu1 %1497 }
 0x1f6   : > { %v1506_v60 = vadd.f32 %v1498_v59, %v1466_v57  ;;  %v1495_v61 = vpop.xlane.xlu0 %1494 }
 0x1f7   : > { %v1505_v62 = vadd.f32 %v1495_v61, %v1465_v53 }
 0x1f8   : > { %1514 = vst.msk [vmem:[%s2420_s15 + $0x38] sm:$0xff] %vm259_vm0, %v1506_v60 }
 0x1f9   : > { %1513 = vst.msk [vmem:[%s2420_s15 + $0x30] sm:$0xff] %vm259_vm0, %v1505_v62 }
 0x1fa PF: > { %s15_s17 = sadd.s32 1, %s2173_s17   ;;  %s2547_s15 = smov %s2169_s16 }
 0x1fb   : > { %p12_p5 = scmp.ge.s32.totalorder %s15_s17, 4   ;;  %s2548_s16 = smov %s2550_s18 }
 0x1fd   :  { %14 = sbr.rel (!%p12_p5) target bundleno = 2 (0x2), region = 86 }

// kernel: stylenet_forward.59
= control target key start
LH: loop header
LB: loop body
LE: loop exit
PB: predicated region body
PF: predicated region fallthrough
CT: control target
= control target key end

     0   :  { %s1479_s15 = smov 0   ;;  %s1481_s16 = smov 0   ;;  %s1693_s0 = inlined_call_operand.vmem [shape: bf16[2,576,256], index: 0, kind: input, shape index: {}]   ;;  %s1694_s1 = inlined_call_operand.vmem [shape: bf16[32,576], index: 1, kind: input, shape index: {}]   ;;  %s1695_s2 = inlined_call_operand.vmem [shape: f32[2,32,256], index: 2, kind: output, shape index: {0}]   ;;  %s1696_s3 = inlined_call_operand.vmem [shape: f32[2,32,1], index: 3, kind: output, shape index: {1}]   ;;  %s1697_s4 = inlined_call_operand.vmem [shape: f32[2,32,1], index: 4, kind: output, shape index: {2}]  }
   0x1   :  { %s1483_s17 = smov 0  }
   0x2 LB: > { %s27_s18 = sadd.s32 1, %s1446_s16  ;;  %p1158_p0 = scmp.ge.s32.totalorder %s1450_s17, 1  ;;  %s1450_s17 = sphi %s1483_s17, %s15_s17   ;;  %s1446_s16 = sphi %s1481_s16, %s1699_s16   ;;  %s1442_s15 = sphi %s1479_s15, %s1698_s15  }
   0x3   : > { %p29_p1 = scmp.ge.s32.totalorder %s27_s18, 2  ;;  %p188_p2 = scmp.lt.s32.totalorder %s1450_s17, 3 }
   0x5   : > { %s1701_s18 = smov (%p29_p1, %s27_s18), 0  ;;  %p189_p3 = pnand %p1158_p0, %p188_p2 }
   0x6   : > { %p233_p4 = scmp.lt.s32.totalorder (!%p189_p3), %s1442_s15, 1  ;;  %v1404_v0 = vld [vmem:[%s1694_s1 + $0x4] ss:$20 sps:$4 sm:$0xff] (!%p189_p3)   ;;  %v1407_v1 = vld [vmem:[%s1694_s1 + $0xc] ss:$20 sps:$4 sm:$0xff] (!%p189_p3)   ;;  %vm770_vm0 = vcmask (!%p189_p3), 523264  }
   0x7   : > { %192 = sbr.rel (%p189_p3) target bundleno = 474 (0x1da), region = 28  ;;  %809 = vmatprep.mubr.bf16.mxu1 (!%p189_p3), %v1404_v0  ;;  %862 = vmatprep.mubr.bf16.mxu0 (!%p189_p3), %v1407_v1  ;;  %vm267_vm1 = vcmask (!%p189_p3), 7168  }
   0xe   : > { %s1703_s15 = smov (!%p233_p4, %s1442_s15), 1 }
   0xf   : > { %s1279_s23 = smul.u32 576, %s1703_s15  ;;  %s1253_s21 = sshll.u32 %s1703_s15, 5 }
  0x10   : > { %s1613_s24 = scalar_lea.vmem %s1696_s3, %s1253_s21  ;;  %s1252_s25 = sshll.u32 %s1703_s15, 6 }
  0x11   : > { %s1509_s26 = scalar_lea.vmem %s1693_s0, %s1279_s23  ;;  %s1631_s28 = scalar_lea.vmem %s1695_s2, %s1252_s25 }
  0x12   : > { %v1306_v2 = vld [vmem:[%s1509_s26 + $0x4] ss:$8 sps:$4 sm:$0xff]   ;;  %v1310_v4 = vld [vmem:[%s1509_s26] ss:$8 sps:$4 sm:$0xff]   ;;  %v1312_v6 = vld [vmem:[%s1509_s26 + $0x14] ss:$8 sps:$4 sm:$0xff]   ;;  %s1646_s5 = scalar_lea.vmem %s1697_s4, %s1253_s21 }
  0x13   : > { %v1308_v3 = vld [vmem:[%s1509_s26 + $0x104] ss:$8 sps:$4 sm:$0xff]   ;;  %777 = vmatprep.subr.bf16.mxu1 %v1306_v2  ;;  %v1311_v5 = vld [vmem:[%s1509_s26 + $0x100] ss:$8 sps:$4 sm:$0xff]   ;;  %v1314_v7 = vld [vmem:[%s1509_s26 + $0x114] ss:$8 sps:$4 sm:$0xff]  }
  0x14   : > { %830 = vmatprep.subr.bf16.mxu0 %v1308_v3  ;;  %778 = vmatpush1.bf16.msra.mxu1 %v1310_v4  ;;  %v1316_v8 = vld [vmem:[%s1509_s26 + $0x10] ss:$8 sps:$4 sm:$0xff]   ;;  %v1318_v10 = vld [vmem:[%s1509_s26 + $0x24] ss:$8 sps:$4 sm:$0xff]   ;;  %v1322_v12 = vld [vmem:[%s1509_s26 + $0x20] ss:$8 sps:$4 sm:$0xff]  }
  0x15   : > { %831 = vmatpush1.bf16.msra.mxu0 %v1311_v5  ;;  %779 = vmatprep.subr.bf16.mxu1 %v1312_v6  ;;  %v1317_v9 = vld [vmem:[%s1509_s26 + $0x110] ss:$8 sps:$4 sm:$0xff]   ;;  %v1320_v11 = vld [vmem:[%s1509_s26 + $0x124] ss:$8 sps:$4 sm:$0xff]   ;;  %v1323_v13 = vld [vmem:[%s1509_s26 + $0x120] ss:$8 sps:$4 sm:$0xff]  }
  0x16   : > { %832 = vmatprep.subr.bf16.mxu0 %v1314_v7  ;;  %v1324_v14 = vld [vmem:[%s1509_s26 + $0x34] ss:$8 sps:$4 sm:$0xff]   ;;  %v1328_v16 = vld [vmem:[%s1509_s26 + $0x30] ss:$8 sps:$4 sm:$0xff]   ;;  %v1330_v18 = vld [vmem:[%s1509_s26 + $0x44] ss:$8 sps:$4 sm:$0xff]  }
  0x17   : > { %v1326_v15 = vld [vmem:[%s1509_s26 + $0x134] ss:$8 sps:$4 sm:$0xff]   ;;  %v1329_v17 = vld [vmem:[%s1509_s26 + $0x130] ss:$8 sps:$4 sm:$0xff]   ;;  %v1332_v19 = vld [vmem:[%s1509_s26 + $0x144] ss:$8 sps:$4 sm:$0xff]  }
  0x18   : > { %780 = vmatpush1.bf16.msra.mxu1 %v1316_v8  ;;  %v1334_v20 = vld [vmem:[%s1509_s26 + $0x40] ss:$8 sps:$4 sm:$0xff]   ;;  %v1336_v22 = vld [vmem:[%s1509_s26 + $0x54] ss:$8 sps:$4 sm:$0xff]   ;;  %v1340_v24 = vld [vmem:[%s1509_s26 + $0x50] ss:$8 sps:$4 sm:$0xff]  }
  0x19   : > { %833 = vmatpush1.bf16.msra.mxu0 %v1317_v9  ;;  %781 = vmatprep.subr.bf16.mxu1 %v1318_v10  ;;  %v1335_v21 = vld [vmem:[%s1509_s26 + $0x140] ss:$8 sps:$4 sm:$0xff]   ;;  %v1338_v23 = vld [vmem:[%s1509_s26 + $0x154] ss:$8 sps:$4 sm:$0xff]   ;;  %v1341_v25 = vld [vmem:[%s1509_s26 + $0x150] ss:$8 sps:$4 sm:$0xff]  }
  0x1a   : > { %834 = vmatprep.subr.bf16.mxu0 %v1320_v11  ;;  %v1342_v26 = vld [vmem:[%s1509_s26 + $0x64] ss:$8 sps:$4 sm:$0xff]   ;;  %v1346_v28 = vld [vmem:[%s1509_s26 + $0x60] ss:$8 sps:$4 sm:$0xff]   ;;  %v1348_v30 = vld [vmem:[%s1509_s26 + $0x74] ss:$8 sps:$4 sm:$0xff]  }
  0x1b   : > { %v1344_v27 = vld [vmem:[%s1509_s26 + $0x164] ss:$8 sps:$4 sm:$0xff]   ;;  %v1347_v29 = vld [vmem:[%s1509_s26 + $0x160] ss:$8 sps:$4 sm:$0xff]   ;;  %v1350_v31 = vld [vmem:[%s1509_s26 + $0x174] ss:$8 sps:$4 sm:$0xff]  }
  0x1c   : > { %782 = vmatpush1.bf16.msra.mxu1 %v1322_v12  ;;  %v1352_v32 = vld [vmem:[%s1509_s26 + $0x70] ss:$8 sps:$4 sm:$0xff]   ;;  %v1354_v34 = vld [vmem:[%s1509_s26 + $0x84] ss:$8 sps:$4 sm:$0xff]   ;;  %v1358_v36 = vld [vmem:[%s1509_s26 + $0x80] ss:$8 sps:$4 sm:$0xff]  }
  0x1d   : > { %835 = vmatpush1.bf16.msra.mxu0 %v1323_v13  ;;  %783 = vmatprep.subr.bf16.mxu1 %v1324_v14  ;;  %v1353_v33 = vld [vmem:[%s1509_s26 + $0x170] ss:$8 sps:$4 sm:$0xff]   ;;  %v1356_v35 = vld [vmem:[%s1509_s26 + $0x184] ss:$8 sps:$4 sm:$0xff]   ;;  %v1359_v37 = vld [vmem:[%s1509_s26 + $0x180] ss:$8 sps:$4 sm:$0xff]  }
  0x1e   : > { %836 = vmatprep.subr.bf16.mxu0 %v1326_v15  ;;  %v1360_v38 = vld [vmem:[%s1509_s26 + $0x94] ss:$8 sps:$4 sm:$0xff]   ;;  %v1364_v40 = vld [vmem:[%s1509_s26 + $0x90] ss:$8 sps:$4 sm:$0xff]   ;;  %v1366_v42 = vld [vmem:[%s1509_s26 + $0xa4] ss:$8 sps:$4 sm:$0xff]  }
  0x1f   : > { %v1362_v39 = vld [vmem:[%s1509_s26 + $0x194] ss:$8 sps:$4 sm:$0xff]   ;;  %v1365_v41 = vld [vmem:[%s1509_s26 + $0x190] ss:$8 sps:$4 sm:$0xff]   ;;  %v1368_v43 = vld [vmem:[%s1509_s26 + $0x1a4] ss:$8 sps:$4 sm:$0xff]  }
  0x20   : > { %784 = vmatpush1.bf16.msra.mxu1 %v1328_v16  ;;  %v1370_v44 = vld [vmem:[%s1509_s26 + $0xa0] ss:$8 sps:$4 sm:$0xff]   ;;  %v1372_v46 = vld [vmem:[%s1509_s26 + $0xb4] ss:$8 sps:$4 sm:$0xff]   ;;  %v1376_v48 = vld [vmem:[%s1509_s26 + $0xb0] ss:$8 sps:$4 sm:$0xff]  }
  0x21   : > { %837 = vmatpush1.bf16.msra.mxu0 %v1329_v17  ;;  %785 = vmatprep.subr.bf16.mxu1 %v1330_v18  ;;  %v1371_v45 = vld [vmem:[%s1509_s26 + $0x1a0] ss:$8 sps:$4 sm:$0xff]   ;;  %v1374_v47 = vld [vmem:[%s1509_s26 + $0x1b4] ss:$8 sps:$4 sm:$0xff]   ;;  %v1377_v49 = vld [vmem:[%s1509_s26 + $0x1b0] ss:$8 sps:$4 sm:$0xff]  }
  0x22   : > { %838 = vmatprep.subr.bf16.mxu0 %v1332_v19  ;;  %v1378_v50 = vld [vmem:[%s1509_s26 + $0xc4] ss:$8 sps:$4 sm:$0xff]   ;;  %v1382_v52 = vld [vmem:[%s1509_s26 + $0xc0] ss:$8 sps:$4 sm:$0xff]   ;;  %v1384_v54 = vld [vmem:[%s1509_s26 + $0xd4] ss:$8 sps:$4 sm:$0xff]  }
  0x23   : > { %v1380_v51 = vld [vmem:[%s1509_s26 + $0x1c4] ss:$8 sps:$4 sm:$0xff]   ;;  %v1383_v53 = vld [vmem:[%s1509_s26 + $0x1c0] ss:$8 sps:$4 sm:$0xff]   ;;  %v1386_v55 = vld [vmem:[%s1509_s26 + $0x1d4] ss:$8 sps:$4 sm:$0xff]  }
  0x24   : > { %786 = vmatpush1.bf16.msra.mxu1 %v1334_v20  ;;  %v1388_v56 = vld [vmem:[%s1509_s26 + $0xd0] ss:$8 sps:$4 sm:$0xff]   ;;  %v1390_v58 = vld [vmem:[%s1509_s26 + $0xe4] ss:$8 sps:$4 sm:$0xff]   ;;  %v1394_v60 = vld [vmem:[%s1509_s26 + $0xe0] ss:$8 sps:$4 sm:$0xff]  }
  0x25   : > { %839 = vmatpush1.bf16.msra.mxu0 %v1335_v21  ;;  %787 = vmatprep.subr.bf16.mxu1 %v1336_v22  ;;  %v1389_v57 = vld [vmem:[%s1509_s26 + $0x1d0] ss:$8 sps:$4 sm:$0xff]   ;;  %v1392_v59 = vld [vmem:[%s1509_s26 + $0x1e4] ss:$8 sps:$4 sm:$0xff]   ;;  %v1395_v61 = vld [vmem:[%s1509_s26 + $0x1e0] ss:$8 sps:$4 sm:$0xff]  }
  0x26   : > { %840 = vmatprep.subr.bf16.mxu0 %v1338_v23  ;;  %v1396_v62 = vld [vmem:[%s1509_s26 + $0xf4] ss:$8 sps:$4 sm:$0xff]   ;;  %v1400_v0 = vld [vmem:[%s1509_s26 + $0xf0] ss:$8 sps:$4 sm:$0xff]   ;;  %v1410_v2 = vld [vmem:[%s1509_s26 + $0x204] ss:$8 sps:$4 sm:$0xff]  }
  0x27   : > { %v1398_v63 = vld [vmem:[%s1509_s26 + $0x1f4] ss:$8 sps:$4 sm:$0xff]   ;;  %v1401_v1 = vld [vmem:[%s1509_s26 + $0x1f0] ss:$8 sps:$4 sm:$0xff]   ;;  %v1408_v5 = vld [vmem:[%s1509_s26 + $0x200] ss:$8 sps:$4 sm:$0xff]  }
  0x28   : > { %788 = vmatpush1.bf16.msra.mxu1 %v1340_v24  ;;  %v1402_v3 = vld [vmem:[%s1694_s1] ss:$20 sps:$4 sm:$0xff]   ;;  %v1405_v4 = vld [vmem:[%s1694_s1 + $0x8] ss:$20 sps:$4 sm:$0xff]   ;;  %v1411_v9 = vld [vmem:[%s1509_s26 + $0x210] ss:$8 sps:$4 sm:$0xff]  }
  0x29   : > { %841 = vmatpush1.bf16.msra.mxu0 %v1341_v25  ;;  %789 = vmatprep.subr.bf16.mxu1 %v1342_v26  ;;  %v1413_v6 = vld [vmem:[%s1509_s26 + $0x214] ss:$8 sps:$4 sm:$0xff]   ;;  %v1414_v7 = vld [vmem:[%s1694_s1 + $0x2c] ss:$20 sps:$4 sm:$0xff]   ;;  %v1419_v12 = vld [vmem:[%s1694_s1 + $0x30] ss:$20 sps:$4 sm:$0xff]  }
  0x2a   : > { %842 = vmatprep.subr.bf16.mxu0 %v1344_v27  ;;  %v1416_v8 = vld [vmem:[%s1694_s1 + $0x34] ss:$20 sps:$4 sm:$0xff]   ;;  %v1422_v10 = vld [vmem:[%s1509_s26 + $0x224] ss:$8 sps:$4 sm:$0xff]   ;;  %v1423_v15 = vld [vmem:[%s1509_s26 + $0x230] ss:$8 sps:$4 sm:$0xff]  }
  0x2b   : > { %v1418_v11 = vld [vmem:[%s1694_s1 + $0x28] ss:$20 sps:$4 sm:$0xff]   ;;  %v1452_v16 = vmov 0   ;;  %v1426_v17 = vld [vmem:[%s1694_s1 + $0x10] ss:$20 sps:$4 sm:$0xff]   ;;  %v1453_v19 = vmov 0.0  }
  0x2c   : > { %790 = vmatpush1.bf16.msra.mxu1 %v1346_v28  ;;  %v1420_v13 = vld [vmem:[%s1509_s26 + $0x220] ss:$8 sps:$4 sm:$0xff]   ;;  %v1425_v14 = vld [vmem:[%s1509_s26 + $0x234] ss:$8 sps:$4 sm:$0xff]   ;;  %v1427_v18 = vld [vmem:[%s1694_s1 + $0x38] ss:$20 sps:$4 sm:$0xff]  }
  0x2d   : > { %843 = vmatpush1.bf16.msra.mxu0 %v1347_v29  ;;  %791 = vmatprep.subr.bf16.mxu1 %v1348_v30  ;;  %268 = vst.msk [vmem:[%s1613_s24] sm:$0xff] %vm267_vm1, %v1453_v19  ;;  %269 = vst.msk [vmem:[%s1613_s24 + $0x8] sm:$0xff] %vm267_vm1, %v1453_v19 }
  0x2e   : > { %844 = vmatprep.subr.bf16.mxu0 %v1350_v31  ;;  %270 = vst.msk [vmem:[%s1613_s24 + $0x10] sm:$0xff] %vm267_vm1, %v1453_v19  ;;  %271 = vst.msk [vmem:[%s1613_s24 + $0x18] sm:$0xff] %vm267_vm1, %v1453_v19 }
  0x2f   : > { %272 = vst.msk [vmem:[%s1646_s5] sm:$0xff] %vm267_vm1, %v1453_v19  ;;  %273 = vst.msk [vmem:[%s1646_s5 + $0x8] sm:$0xff] %vm267_vm1, %v1453_v19 }
  0x30   : > { %792 = vmatpush1.bf16.msra.mxu1 %v1352_v32  ;;  %274 = vst.msk [vmem:[%s1646_s5 + $0x10] sm:$0xff] %vm267_vm1, %v1453_v19  ;;  %275 = vst.msk [vmem:[%s1646_s5 + $0x18] sm:$0xff] %vm267_vm1, %v1453_v19 }
  0x31   : > { %845 = vmatpush1.bf16.msra.mxu0 %v1353_v33  ;;  %793 = vmatprep.subr.bf16.mxu1 %v1354_v34 }
  0x32   : > { %846 = vmatprep.subr.bf16.mxu0 %v1356_v35 }
  0x34   : > { %794 = vmatpush1.bf16.msra.mxu1 %v1358_v36 }
  0x35   : > { %847 = vmatpush1.bf16.msra.mxu0 %v1359_v37  ;;  %795 = vmatprep.subr.bf16.mxu1 %v1360_v38 }
  0x36   : > { %848 = vmatprep.subr.bf16.mxu0 %v1362_v39 }
  0x38   : > { %796 = vmatpush1.bf16.msra.mxu1 %v1364_v40 }
  0x39   : > { %849 = vmatpush1.bf16.msra.mxu0 %v1365_v41  ;;  %797 = vmatprep.subr.bf16.mxu1 %v1366_v42 }
  0x3a   : > { %850 = vmatprep.subr.bf16.mxu0 %v1368_v43 }
  0x3c   : > { %798 = vmatpush1.bf16.msra.mxu1 %v1370_v44 }
  0x3d   : > { %851 = vmatpush1.bf16.msra.mxu0 %v1371_v45  ;;  %799 = vmatprep.subr.bf16.mxu1 %v1372_v46 }
  0x3e   : > { %852 = vmatprep.subr.bf16.mxu0 %v1374_v47 }
  0x40   : > { %800 = vmatpush1.bf16.msra.mxu1 %v1376_v48 }
  0x41   : > { %853 = vmatpush1.bf16.msra.mxu0 %v1377_v49  ;;  %801 = vmatprep.subr.bf16.mxu1 %v1378_v50 }
  0x42   : > { %854 = vmatprep.subr.bf16.mxu0 %v1380_v51 }
  0x44   : > { %802 = vmatpush1.bf16.msra.mxu1 %v1382_v52 }
  0x45   : > { %855 = vmatpush1.bf16.msra.mxu0 %v1383_v53  ;;  %803 = vmatprep.subr.bf16.mxu1 %v1384_v54 }
  0x46   : > { %856 = vmatprep.subr.bf16.mxu0 %v1386_v55 }
  0x48   : > { %804 = vmatpush1.bf16.msra.mxu1 %v1388_v56 }
  0x49   : > { %857 = vmatpush1.bf16.msra.mxu0 %v1389_v57  ;;  %805 = vmatprep.subr.bf16.mxu1 %v1390_v58 }
  0x4a   : > { %858 = vmatprep.subr.bf16.mxu0 %v1392_v59 }
  0x4c   : > { %806 = vmatpush1.bf16.msra.mxu1 %v1394_v60 }
  0x4d   : > { %859 = vmatpush1.bf16.msra.mxu0 %v1395_v61  ;;  %807 = vmatprep.subr.bf16.mxu1 %v1396_v62 }
  0x4e   : > { %860 = vmatprep.subr.bf16.mxu0 %v1398_v63 }
  0x50   : > { %808 = vmatpush1.bf16.msra.mxu1 %v1400_v0 }
  0x51   : > { %861 = vmatpush1.bf16.msra.mxu0 %v1401_v1  ;;  %1255 = vmatprep.subr.bf16.mxu1 %v1410_v2 }
  0x52   : > { %883 = vmatprep.subr.bf16.mxu0 %v1410_v2 }
  0x53   : > { %810 = vmatmul.mubr.bf16.vlgmr.msra.gmra.mrb[0].mxu1 %v1402_v3 }
  0x54   : > { %863 = vmatmul.mubr.bf16.vlgmr.msra.gmra.mrb[0].mxu0 %v1405_v4  ;;  %1259 = vmatpush1.bf16.msra.mxu1 %v1408_v5  ;;  %v944_v4 = vld [vmem:[%s1613_s24] sm:$0xff] }
  0x55   : > { %884 = vmatpush1.bf16.msra.mxu0 %v1408_v5  ;;  %1256 = vmatprep.subr.bf16.mxu1 %v1413_v6  ;;  %v946_v5 = vld [vmem:[%s1613_s24 + $0x10] sm:$0xff] }
  0x56   : > { %885 = vmatprep.subr.bf16.mxu0 %v1413_v6  ;;  %819 = vmatprep.mubr.bf16.mxu1 %v1414_v7 }
  0x57   : > { %872 = vmatprep.mubr.bf16.mxu0 %v1416_v8 }
  0x58   : > { %1260 = vmatpush1.bf16.msra.mxu1 %v1411_v9 }
  0x59   : > { %886 = vmatpush1.bf16.msra.mxu0 %v1411_v9  ;;  %1257 = vmatprep.subr.bf16.mxu1 %v1422_v10 }
  0x5a   : > { %887 = vmatprep.subr.bf16.mxu0 %v1422_v10  ;;  %v945_v10 = vld [vmem:[%s1613_s24 + $0x8] sm:$0xff] }
  0x5b   : > { %820 = vmatmul.mubr.bf16.gmra.mrb[4].mxu1 %v1418_v11  ;;  %v947_v11 = vld [vmem:[%s1613_s24 + $0x18] sm:$0xff] }
  0x5c   : > { %873 = vmatmul.mubr.bf16.gmra.mrb[4].mxu0 %v1419_v12  ;;  %1261 = vmatpush1.bf16.msra.mxu1 %v1420_v13 }
  0x5d   : > { %888 = vmatpush1.bf16.msra.mxu0 %v1420_v13  ;;  %1258 = vmatprep.subr.bf16.mxu1 %v1425_v14 }
  0x5e   : > { %889 = vmatprep.subr.bf16.mxu0 %v1425_v14  ;;  %915 = vmatprep.mubr.bf16.mxu0 %v1452_v16 }
  0x5f   : > { %925 = vmatprep.mubr.bf16.mxu1 %v1452_v16  ;;  %v969_v16 = vld [vmem:[%s1646_s5] sm:$0xff] }
  0x60   : > { %1262 = vmatpush1.bf16.msra.mxu1 %v1423_v15 }
  0x61   : > { %890 = vmatpush1.bf16.msra.mxu0 %v1423_v15 }
  0x63   : > { %1249 = vmatmul.mubr.msk.bf16.vlgmr.msra.gmra.mrb[8].mxu1 %vm770_vm0, %v1427_v18 }
  0x64   : > { %1248 = vmatmul.mubr.msk.bf16.vlgmr.msra.gmra.mrb[0].mxu0 %vm770_vm0, %v1426_v17  ;;  %v970_v17 = vld [vmem:[%s1646_s5 + $0x8] sm:$0xff] }
 0x126   : > { %v811_v20 = vpop.f32.mrb[0].mxu1 }
 0x127   : > { %v813_v21 = vpop.f32.mrb[1].mxu1 }
 0x128   : > { %v815_v22 = vpop.f32.mrb[2].mxu1 }
 0x129   : > { %v817_v23 = vpop.f32.mrb[3].mxu1 }
 0x12e   : > { %v821_v24 = vpop.f32.mrb[4].mxu1 }
 0x12f   : > { %v874_v25 = vpop.f32.mrb[4].mxu0  ;;  %v823_v27 = vpop.f32.mrb[5].mxu1 }
 0x130   : > { %v875_v26 = vadd.f32 %v874_v25, %v821_v24  ;;  %v876_v28 = vpop.f32.mrb[5].mxu0  ;;  %v825_v30 = vpop.f32.mrb[6].mxu1 }
 0x131   : > { %v877_v29 = vadd.f32 %v876_v28, %v823_v27  ;;  %v878_v31 = vpop.f32.mrb[6].mxu0  ;;  %v827_v33 = vpop.f32.mrb[7].mxu1 }
 0x132   : > { %v879_v32 = vadd.f32 %v878_v31, %v825_v30  ;;  %v880_v34 = vpop.f32.mrb[7].mxu0 }
 0x133   : > { %v881_v35 = vadd.f32 %v880_v34, %v827_v33 }
 0x136   : > { %v927_v37 = vpop.f32.mrb[8].mxu1 }
 0x137   : > { %v917_v36 = vpop.f32.mrb[0].mxu0  ;;  %v928_v39 = vadd.f32 %v927_v37, %v875_v26  ;;  %v929_v41 = vpop.f32.mrb[9].mxu1 }
 0x138   : > { %v1263_v38 = vadd.f32 %v917_v36, %v811_v20  ;;  %v919_v40 = vpop.f32.mrb[1].mxu0  ;;  %v930_v43 = vadd.f32 %v929_v41, %v877_v29  ;;  %v931_v45 = vpop.f32.mrb[10].mxu1 }
 0x139   : > { %v1264_v42 = vadd.f32 %v919_v40, %v813_v21  ;;  %v921_v44 = vpop.f32.mrb[2].mxu0  ;;  %940 = vst [vmem:[%s1631_s28 + $0x20] sm:$0xff] %v928_v39  ;;  %v932_v47 = vadd.f32 %v931_v45, %v879_v32  ;;  %v933_v49 = vpop.f32.mrb[11].mxu1  ;;  %v977_v51 = vmul.f32 %v928_v39, %v928_v39 }
 0x13a   : > { %936 = vst [vmem:[%s1631_s28] sm:$0xff] %v1263_v38  ;;  %v1265_v46 = vadd.f32 %v921_v44, %v815_v22  ;;  %v923_v48 = vpop.f32.mrb[3].mxu0  ;;  %v973_v50 = vmul.f32 %v1263_v38, %v1263_v38  ;;  %941 = vst [vmem:[%s1631_s28 + $0x28] sm:$0xff] %v930_v43  ;;  %v934_v53 = vadd.f32 %v933_v49, %v881_v35  ;;  %v971_v22 = vld [vmem:[%s1646_s5 + $0x10] sm:$0xff] }
 0x13b   : > { %937 = vst [vmem:[%s1631_s28 + $0x8] sm:$0xff] %v1264_v42  ;;  %v1266_v52 = vadd.f32 %v923_v48, %v817_v23  ;;  %v948_v54 = vadd.f32 %v1264_v42, %v1263_v38  ;;  %v954_v55 = vadd.f32 %v930_v43, %v928_v39  ;;  %942 = vst [vmem:[%s1631_s28 + $0x30] sm:$0xff] %v932_v47  ;;  %v972_v23 = vld [vmem:[%s1646_s5 + $0x18] sm:$0xff] }
 0x13c   : > { %938 = vst [vmem:[%s1631_s28 + $0x10] sm:$0xff] %v1265_v46  ;;  %v974_v56 = vmul.f32 %v1264_v42, %v1264_v42  ;;  %v975_v57 = vmul.f32 %v1265_v46, %v1265_v46  ;;  %v978_v58 = vmul.f32 %v930_v43, %v930_v43  ;;  %v979_v59 = vmul.f32 %v932_v47, %v932_v47 }
 0x13d   : > { %939 = vst [vmem:[%s1631_s28 + $0x18] sm:$0xff] %v1266_v52  ;;  %943 = vst [vmem:[%s1631_s28 + $0x38] sm:$0xff] %v934_v53  ;;  %949 = vadd.xlane.f32.xlu0 %v948_v54  ;;  %955 = vadd.xlane.f32.xlu1 %v954_v55  ;;  %v951_v60 = vadd.f32 %v1266_v52, %v1265_v46  ;;  %v957_v61 = vadd.f32 %v934_v53, %v932_v47 }
 0x13e   : > { %v976_v62 = vmul.f32 %v1266_v52, %v1266_v52  ;;  %v981_v63 = vadd.f32 %v974_v56, %v973_v50  ;;  %v987_v0 = vadd.f32 %v978_v58, %v977_v51  ;;  %v980_v1 = vmul.f32 %v934_v53, %v934_v53 }
 0x140   : > { %v984_v2 = vadd.f32 %v976_v62, %v975_v57  ;;  %v990_v3 = vadd.f32 %v980_v1, %v979_v59 }
 0x141   : > { %952 = vadd.xlane.f32.xlu0 %v951_v60  ;;  %958 = vadd.xlane.f32.xlu1 %v957_v61 }
 0x145   : > { %982 = vadd.xlane.f32.xlu0 %v981_v63  ;;  %985 = vadd.xlane.f32.xlu1 %v984_v2 }
 0x149   : > { %988 = vadd.xlane.f32.xlu0 %v987_v0  ;;  %991 = vadd.xlane.f32.xlu1 %v990_v3 }
 0x1ca   : > { %v950_v6 = vpop.xlane.xlu0 %949  ;;  %v956_v7 = vpop.xlane.xlu1 %955 }
 0x1cb   : > { %v960_v8 = vadd.f32 %v950_v6, %v944_v4  ;;  %v962_v9 = vadd.f32 %v956_v7, %v946_v5 }
 0x1cd   : > { %965 = vst.msk [vmem:[%s1613_s24] sm:$0xff] %vm267_vm1, %v960_v8  ;;  %967 = vst.msk [vmem:[%s1613_s24 + $0x10] sm:$0xff] %vm267_vm1, %v962_v9 }
 0x1ce   : > { %v953_v12 = vpop.xlane.xlu0 %952  ;;  %v959_v13 = vpop.xlane.xlu1 %958 }
 0x1cf   : > { %v961_v14 = vadd.f32 %v953_v12, %v945_v10  ;;  %v963_v15 = vadd.f32 %v959_v13, %v947_v11 }
 0x1d1   : > { %966 = vst.msk [vmem:[%s1613_s24 + $0x8] sm:$0xff] %vm267_vm1, %v961_v14  ;;  %968 = vst.msk [vmem:[%s1613_s24 + $0x18] sm:$0xff] %vm267_vm1, %v963_v15 }
 0x1d2   : > { %v983_v18 = vpop.xlane.xlu0 %982  ;;  %v986_v19 = vpop.xlane.xlu1 %985 }
 0x1d3   : > { %v993_v20 = vadd.f32 %v983_v18, %v969_v16  ;;  %v994_v21 = vadd.f32 %v986_v19, %v970_v17 }
 0x1d5   : > { %997 = vst.msk [vmem:[%s1646_s5] sm:$0xff] %vm267_vm1, %v993_v20  ;;  %998 = vst.msk [vmem:[%s1646_s5 + $0x8] sm:$0xff] %vm267_vm1, %v994_v21 }
 0x1d6   : > { %v989_v24 = vpop.xlane.xlu0 %988  ;;  %v992_v25 = vpop.xlane.xlu1 %991 }
 0x1d7   : > { %v995_v26 = vadd.f32 %v989_v24, %v971_v22  ;;  %v996_v27 = vadd.f32 %v992_v25, %v972_v23 }
 0x1d9   : > { %999 = vst.msk [vmem:[%s1646_s5 + $0x10] sm:$0xff] %vm267_vm1, %v995_v26  ;;  %1000 = vst.msk [vmem:[%s1646_s5 + $0x18] sm:$0xff] %vm267_vm1, %v996_v27 }
 0x1da PF: > { %s15_s17 = sadd.s32 1, %s1450_s17   ;;  %s1698_s15 = smov %s1446_s16 }
 0x1db   : > { %p12_p5 = scmp.ge.s32.totalorder %s15_s17, 4   ;;  %s1699_s16 = smov %s1701_s18 }
 0x1dd   :  { %14 = sbr.rel (!%p12_p5) target bundleno = 2 (0x2), region = 86 }

// kernel: stylenet_forward.61
= control target key start
LH: loop header
LB: loop body
LE: loop exit
PB: predicated region body
PF: predicated region fallthrough
CT: control target
= control target key end

     0   :  { %s3776_s12 = smov 0   ;;  %s3778_s13 = smov 0   ;;  %s4246_s0 = inlined_call_operand.vmem [shape: bf16[2,2592,256], index: 0, kind: input, shape index: {}]   ;;  %s4247_s1 = inlined_call_operand.vmem [shape: bf16[3,2592], index: 1, kind: input, shape index: {}]   ;;  %s4248_s2 = inlined_call_operand.vmem [shape: f32[3,1], index: 2, kind: input, shape index: {}]   ;;  %s4249_s3 = inlined_call_operand.vmem [shape: f32[2,3,256], index: 3, kind: output, shape index: {}]  }
   0x1   :  { %s3780_s14 = smov 0  }
   0x2 LB: > { %s25_s15 = sadd.s32 1, %s3748_s13  ;;  %p2836_p0 = scmp.ge.s32.totalorder %s3752_s14, 1  ;;  %s3752_s14 = sphi %s3780_s14, %s13_s14   ;;  %s3748_s13 = sphi %s3778_s13, %s4251_s13   ;;  %s3744_s12 = sphi %s3776_s12, %s4250_s12  }
   0x3   : > { %p27_p1 = scmp.ge.s32.totalorder %s25_s15, 2  ;;  %p158_p2 = scmp.lt.s32.totalorder %s3752_s14, 3 }
   0x5   : > { %s4253_s15 = smov (%p27_p1, %s25_s15), 0  ;;  %p159_p3 = pnand %p2836_p0, %p158_p2 }
   0x6   : > { %p191_p4 = scmp.lt.s32.totalorder (!%p159_p3), %s3744_s12, 1  ;;  %v557_v0 = vlaneseq (!%p159_p3)  ;;  %v213_v1 = vld [vmem:[%s4247_s1 + $0x10] sm:$0xff] (!%p159_p3)  ;;  %v3754_v2 = vmov (!%p159_p3), 1983009808   ;;  %v3803_v7 = vld [vmem:[%s4247_s1] sm:$0xff] (!%p159_p3)  ;;  %vm2285_vm0 = vcmask (!%p159_p3), 261120  }
   0x7   : > { %162 = sbr.rel (%p159_p3) target bundleno = 570 (0x23a), region = 32  ;;  %v555_v3 = vunpack.c.l.s4 (!%p159_p3), %v3754_v2  ;;  %v587_v6 = vcombine.high (!%p159_p3), %v213_v1, %v213_v1 }
   0x8   : > { %v558_v4 = vshrl.u32 (!%p159_p3), %v557_v0, 7 }
   0x9   : > { %v556_v5 = vunpack.c.0.s8 (!%p159_p3), %v555_v3 }
   0xb   : > { %v3805_v8 = vsub.s32 (!%p159_p3), %v556_v5, %v558_v4 }
   0xd   : > { %v3815_v10 = vrot.slane (!%p159_p3), %v3803_v7, %v3805_v8  ;;  %v3818_v11 = vrot.slane (!%p159_p3), %v587_v6, %v3805_v8 }
   0xe   : > { %s4255_s12 = smov (!%p191_p4, %s3744_s12), 1 }
   0xf   : > { %s3209_s18 = smul.u32 2592, %s4255_s12  ;;  %v568_v15 = vcombine.high %v3815_v10, %v3815_v10  ;;  %v603_v16 = vcombine.high %v3818_v11, %v3818_v11  ;;  %s3168_s9 = sshll.u32 %s4255_s12, 3 }
  0x10   : > { %s208_s16 = scalar_lea.vmem %s4249_s3, %s3168_s9 }
  0x11   : > { %s3810_s23 = scalar_lea.vmem %s4246_s0, %s3209_s18  ;;  %2321 = vmatprep.mubr.bf16.mxu1 %v568_v15  ;;  %2526 = vmatprep.mubr.bf16.mxu0 %v603_v16  ;;  %v553_v15 = vcombine.high %v3803_v7, %v3803_v7  ;;  %v3890_v16 = vld [vmem:[%s4247_s1 + $0x18] sm:$0xff] }
  0x12   : > { %v3237_v9 = vld [vmem:[%s3810_s23 + $0x4] ss:$8 sps:$4 sm:$0xff]   ;;  %v3241_v13 = vld [vmem:[%s3810_s23] ss:$8 sps:$4 sm:$0xff]   ;;  %v3243_v17 = vld [vmem:[%s3810_s23 + $0x14] ss:$8 sps:$4 sm:$0xff]   ;;  %v3901_v7 = vrot.slane %v3890_v16, %v3805_v8 }
  0x13   : > { %v3239_v12 = vld [vmem:[%s3810_s23 + $0x504] ss:$8 sps:$4 sm:$0xff]   ;;  %2289 = vmatprep.subr.bf16.mxu1 %v3237_v9  ;;  %v3242_v14 = vld [vmem:[%s3810_s23 + $0x500] ss:$8 sps:$4 sm:$0xff]   ;;  %v3245_v18 = vld [vmem:[%s3810_s23 + $0x514] ss:$8 sps:$4 sm:$0xff]  }
  0x14   : > { %2494 = vmatprep.subr.bf16.mxu0 %v3239_v12  ;;  %2290 = vmatpush1.bf16.msra.mxu1 %v3241_v13  ;;  %v3247_v19 = vld [vmem:[%s3810_s23 + $0x10] ss:$8 sps:$4 sm:$0xff]   ;;  %v3249_v21 = vld [vmem:[%s3810_s23 + $0x24] ss:$8 sps:$4 sm:$0xff]   ;;  %v3253_v23 = vld [vmem:[%s3810_s23 + $0x20] ss:$8 sps:$4 sm:$0xff]  }
  0x15   : > { %2495 = vmatpush1.bf16.msra.mxu0 %v3242_v14  ;;  %2291 = vmatprep.subr.bf16.mxu1 %v3243_v17  ;;  %v3248_v20 = vld [vmem:[%s3810_s23 + $0x510] ss:$8 sps:$4 sm:$0xff]   ;;  %v3251_v22 = vld [vmem:[%s3810_s23 + $0x524] ss:$8 sps:$4 sm:$0xff]   ;;  %v3254_v24 = vld [vmem:[%s3810_s23 + $0x520] ss:$8 sps:$4 sm:$0xff]  }
  0x16   : > { %2496 = vmatprep.subr.bf16.mxu0 %v3245_v18  ;;  %v3255_v25 = vld [vmem:[%s3810_s23 + $0x34] ss:$8 sps:$4 sm:$0xff]   ;;  %v3259_v27 = vld [vmem:[%s3810_s23 + $0x30] ss:$8 sps:$4 sm:$0xff]   ;;  %v3261_v29 = vld [vmem:[%s3810_s23 + $0x44] ss:$8 sps:$4 sm:$0xff]  }
  0x17   : > { %v3257_v26 = vld [vmem:[%s3810_s23 + $0x534] ss:$8 sps:$4 sm:$0xff]   ;;  %v3260_v28 = vld [vmem:[%s3810_s23 + $0x530] ss:$8 sps:$4 sm:$0xff]   ;;  %v3263_v30 = vld [vmem:[%s3810_s23 + $0x544] ss:$8 sps:$4 sm:$0xff]  }
  0x18   : > { %2292 = vmatpush1.bf16.msra.mxu1 %v3247_v19  ;;  %v3265_v31 = vld [vmem:[%s3810_s23 + $0x40] ss:$8 sps:$4 sm:$0xff]   ;;  %v3267_v33 = vld [vmem:[%s3810_s23 + $0x54] ss:$8 sps:$4 sm:$0xff]   ;;  %v3271_v35 = vld [vmem:[%s3810_s23 + $0x50] ss:$8 sps:$4 sm:$0xff]  }
  0x19   : > { %2497 = vmatpush1.bf16.msra.mxu0 %v3248_v20  ;;  %2293 = vmatprep.subr.bf16.mxu1 %v3249_v21  ;;  %v3266_v32 = vld [vmem:[%s3810_s23 + $0x540] ss:$8 sps:$4 sm:$0xff]   ;;  %v3269_v34 = vld [vmem:[%s3810_s23 + $0x554] ss:$8 sps:$4 sm:$0xff]   ;;  %v3272_v36 = vld [vmem:[%s3810_s23 + $0x550] ss:$8 sps:$4 sm:$0xff]   ;;  %v3897_v21 = vrot.slane %v553_v15, %v3805_v8 }
  0x1a   : > { %2498 = vmatprep.subr.bf16.mxu0 %v3251_v22  ;;  %v3273_v37 = vld [vmem:[%s3810_s23 + $0x64] ss:$8 sps:$4 sm:$0xff]   ;;  %v3277_v39 = vld [vmem:[%s3810_s23 + $0x60] ss:$8 sps:$4 sm:$0xff]   ;;  %v3279_v41 = vld [vmem:[%s3810_s23 + $0x74] ss:$8 sps:$4 sm:$0xff]  }
  0x1b   : > { %v3275_v38 = vld [vmem:[%s3810_s23 + $0x564] ss:$8 sps:$4 sm:$0xff]   ;;  %v3278_v40 = vld [vmem:[%s3810_s23 + $0x560] ss:$8 sps:$4 sm:$0xff]   ;;  %v3281_v42 = vld [vmem:[%s3810_s23 + $0x574] ss:$8 sps:$4 sm:$0xff]  }
  0x1c   : > { %2294 = vmatpush1.bf16.msra.mxu1 %v3253_v23  ;;  %v3283_v43 = vld [vmem:[%s3810_s23 + $0x70] ss:$8 sps:$4 sm:$0xff]   ;;  %v3285_v45 = vld [vmem:[%s3810_s23 + $0x84] ss:$8 sps:$4 sm:$0xff]   ;;  %v3289_v47 = vld [vmem:[%s3810_s23 + $0x80] ss:$8 sps:$4 sm:$0xff]  }
  0x1d   : > { %2499 = vmatpush1.bf16.msra.mxu0 %v3254_v24  ;;  %2295 = vmatprep.subr.bf16.mxu1 %v3255_v25  ;;  %v3284_v44 = vld [vmem:[%s3810_s23 + $0x570] ss:$8 sps:$4 sm:$0xff]   ;;  %v3287_v46 = vld [vmem:[%s3810_s23 + $0x584] ss:$8 sps:$4 sm:$0xff]   ;;  %v3290_v48 = vld [vmem:[%s3810_s23 + $0x580] ss:$8 sps:$4 sm:$0xff]  }
  0x1e   : > { %2500 = vmatprep.subr.bf16.mxu0 %v3257_v26  ;;  %v3291_v49 = vld [vmem:[%s3810_s23 + $0x94] ss:$8 sps:$4 sm:$0xff]   ;;  %v3295_v51 = vld [vmem:[%s3810_s23 + $0x90] ss:$8 sps:$4 sm:$0xff]   ;;  %v3297_v53 = vld [vmem:[%s3810_s23 + $0xa4] ss:$8 sps:$4 sm:$0xff]   ;;  %v569_v26 = vcombine.high %v3897_v21, %v3897_v21 }
  0x1f   : > { %v3293_v50 = vld [vmem:[%s3810_s23 + $0x594] ss:$8 sps:$4 sm:$0xff]   ;;  %v3296_v52 = vld [vmem:[%s3810_s23 + $0x590] ss:$8 sps:$4 sm:$0xff]   ;;  %v3299_v54 = vld [vmem:[%s3810_s23 + $0x5a4] ss:$8 sps:$4 sm:$0xff]  }
  0x20   : > { %2296 = vmatpush1.bf16.msra.mxu1 %v3259_v27  ;;  %v3301_v55 = vld [vmem:[%s3810_s23 + $0xa0] ss:$8 sps:$4 sm:$0xff]   ;;  %v3303_v57 = vld [vmem:[%s3810_s23 + $0xb4] ss:$8 sps:$4 sm:$0xff]   ;;  %v3307_v59 = vld [vmem:[%s3810_s23 + $0xb0] ss:$8 sps:$4 sm:$0xff]   ;;  %v619_v27 = vcombine.high %v3901_v7, %v3901_v7 }
  0x21   : > { %2501 = vmatpush1.bf16.msra.mxu0 %v3260_v28  ;;  %2297 = vmatprep.subr.bf16.mxu1 %v3261_v29  ;;  %v3302_v56 = vld [vmem:[%s3810_s23 + $0x5a0] ss:$8 sps:$4 sm:$0xff]   ;;  %v3305_v58 = vld [vmem:[%s3810_s23 + $0x5b4] ss:$8 sps:$4 sm:$0xff]   ;;  %v3308_v60 = vld [vmem:[%s3810_s23 + $0x5b0] ss:$8 sps:$4 sm:$0xff]  }
  0x22   : > { %2502 = vmatprep.subr.bf16.mxu0 %v3263_v30  ;;  %v3309_v61 = vld [vmem:[%s3810_s23 + $0xc4] ss:$8 sps:$4 sm:$0xff]   ;;  %v3313_v63 = vld [vmem:[%s3810_s23 + $0xc0] ss:$8 sps:$4 sm:$0xff]   ;;  %v3315_v1 = vld [vmem:[%s3810_s23 + $0xd4] ss:$8 sps:$4 sm:$0xff]  }
  0x23   : > { %v3311_v62 = vld [vmem:[%s3810_s23 + $0x5c4] ss:$8 sps:$4 sm:$0xff]   ;;  %v3314_v0 = vld [vmem:[%s3810_s23 + $0x5c0] ss:$8 sps:$4 sm:$0xff]   ;;  %v3317_v2 = vld [vmem:[%s3810_s23 + $0x5d4] ss:$8 sps:$4 sm:$0xff]  }
  0x24   : > { %2298 = vmatpush1.bf16.msra.mxu1 %v3265_v31  ;;  %v3319_v3 = vld [vmem:[%s3810_s23 + $0xd0] ss:$8 sps:$4 sm:$0xff]   ;;  %v3321_v5 = vld [vmem:[%s3810_s23 + $0xe4] ss:$8 sps:$4 sm:$0xff]   ;;  %v3325_v9 = vld [vmem:[%s3810_s23 + $0xe0] ss:$8 sps:$4 sm:$0xff]  }
  0x25   : > { %2503 = vmatpush1.bf16.msra.mxu0 %v3266_v32  ;;  %2299 = vmatprep.subr.bf16.mxu1 %v3267_v33  ;;  %v3320_v4 = vld [vmem:[%s3810_s23 + $0x5d0] ss:$8 sps:$4 sm:$0xff]   ;;  %v3323_v6 = vld [vmem:[%s3810_s23 + $0x5e4] ss:$8 sps:$4 sm:$0xff]   ;;  %v3326_v12 = vld [vmem:[%s3810_s23 + $0x5e0] ss:$8 sps:$4 sm:$0xff]  }
  0x26   : > { %2504 = vmatprep.subr.bf16.mxu0 %v3269_v34  ;;  %v3327_v13 = vld [vmem:[%s3810_s23 + $0xf4] ss:$8 sps:$4 sm:$0xff]   ;;  %v3331_v17 = vld [vmem:[%s3810_s23 + $0xf0] ss:$8 sps:$4 sm:$0xff]   ;;  %v3336_v19 = vld [vmem:[%s3810_s23 + $0x104] ss:$8 sps:$4 sm:$0xff]  }
  0x27   : > { %v3329_v14 = vld [vmem:[%s3810_s23 + $0x5f4] ss:$8 sps:$4 sm:$0xff]   ;;  %v3332_v18 = vld [vmem:[%s3810_s23 + $0x5f0] ss:$8 sps:$4 sm:$0xff]   ;;  %v3340_v20 = vld [vmem:[%s3810_s23 + $0x604] ss:$8 sps:$4 sm:$0xff]  }
  0x28   : > { %2300 = vmatpush1.bf16.msra.mxu1 %v3271_v35  ;;  %v3334_v22 = vld [vmem:[%s3810_s23 + $0x100] ss:$8 sps:$4 sm:$0xff]   ;;  %v3343_v24 = vld [vmem:[%s3810_s23 + $0x114] ss:$8 sps:$4 sm:$0xff]   ;;  %v3341_v28 = vld [vmem:[%s3810_s23 + $0x110] ss:$8 sps:$4 sm:$0xff]  }
  0x29   : > { %2505 = vmatpush1.bf16.msra.mxu0 %v3272_v36  ;;  %2301 = vmatprep.subr.bf16.mxu1 %v3273_v37  ;;  %v3338_v23 = vld [vmem:[%s3810_s23 + $0x600] ss:$8 sps:$4 sm:$0xff]   ;;  %v3346_v25 = vld [vmem:[%s3810_s23 + $0x614] ss:$8 sps:$4 sm:$0xff]   ;;  %v3344_v29 = vld [vmem:[%s3810_s23 + $0x610] ss:$8 sps:$4 sm:$0xff]  }
  0x2a   : > { %2506 = vmatprep.subr.bf16.mxu0 %v3275_v38  ;;  %v3349_v30 = vld [vmem:[%s3810_s23 + $0x124] ss:$8 sps:$4 sm:$0xff]   ;;  %v3347_v32 = vld [vmem:[%s3810_s23 + $0x120] ss:$8 sps:$4 sm:$0xff]   ;;  %v3358_v33 = vld [vmem:[%s3810_s23 + $0x634] ss:$8 sps:$4 sm:$0xff]  }
  0x2b   : > { %v3352_v31 = vld [vmem:[%s3810_s23 + $0x624] ss:$8 sps:$4 sm:$0xff]   ;;  %v3353_v34 = vld [vmem:[%s3810_s23 + $0x130] ss:$8 sps:$4 sm:$0xff]   ;;  %v3359_v38 = vld [vmem:[%s3810_s23 + $0x140] ss:$8 sps:$4 sm:$0xff]  }
  0x2c   : > { %2302 = vmatpush1.bf16.msra.mxu1 %v3277_v39  ;;  %v3356_v35 = vld [vmem:[%s3810_s23 + $0x630] ss:$8 sps:$4 sm:$0xff]   ;;  %v3361_v36 = vld [vmem:[%s3810_s23 + $0x144] ss:$8 sps:$4 sm:$0xff]   ;;  %v3362_v39 = vld [vmem:[%s3810_s23 + $0x640] ss:$8 sps:$4 sm:$0xff]  }
  0x2d   : > { %2507 = vmatpush1.bf16.msra.mxu0 %v3278_v40  ;;  %2303 = vmatprep.subr.bf16.mxu1 %v3279_v41  ;;  %v3364_v37 = vld [vmem:[%s3810_s23 + $0x644] ss:$8 sps:$4 sm:$0xff]   ;;  %v3367_v40 = vld [vmem:[%s3810_s23 + $0x154] ss:$8 sps:$4 sm:$0xff]   ;;  %v3416_v15 = vld [vmem:[%s3810_s23 + $0x6d0] ss:$8 sps:$4 sm:$0xff]  }
  0x2e   : > { %2508 = vmatprep.subr.bf16.mxu0 %v3281_v42  ;;  %v3370_v41 = vld [vmem:[%s3810_s23 + $0x654] ss:$8 sps:$4 sm:$0xff]   ;;  %v3365_v42 = vld [vmem:[%s3810_s23 + $0x150] ss:$8 sps:$4 sm:$0xff]  }
  0x30   : > { %2304 = vmatpush1.bf16.msra.mxu1 %v3283_v43  ;;  %v3368_v43 = vld [vmem:[%s3810_s23 + $0x650] ss:$8 sps:$4 sm:$0xff]  }
  0x31   : > { %2509 = vmatpush1.bf16.msra.mxu0 %v3284_v44  ;;  %2305 = vmatprep.subr.bf16.mxu1 %v3285_v45  ;;  %v3373_v44 = vld [vmem:[%s3810_s23 + $0x164] ss:$8 sps:$4 sm:$0xff]  }
  0x32   : > { %2510 = vmatprep.subr.bf16.mxu0 %v3287_v46  ;;  %v3376_v45 = vld [vmem:[%s3810_s23 + $0x664] ss:$8 sps:$4 sm:$0xff]   ;;  %v3371_v46 = vld [vmem:[%s3810_s23 + $0x160] ss:$8 sps:$4 sm:$0xff]  }
  0x34   : > { %2306 = vmatpush1.bf16.msra.mxu1 %v3289_v47  ;;  %v3374_v47 = vld [vmem:[%s3810_s23 + $0x660] ss:$8 sps:$4 sm:$0xff]  }
  0x35   : > { %2511 = vmatpush1.bf16.msra.mxu0 %v3290_v48  ;;  %2307 = vmatprep.subr.bf16.mxu1 %v3291_v49  ;;  %v3379_v48 = vld [vmem:[%s3810_s23 + $0x174] ss:$8 sps:$4 sm:$0xff]  }
  0x36   : > { %2512 = vmatprep.subr.bf16.mxu0 %v3293_v50  ;;  %v3382_v49 = vld [vmem:[%s3810_s23 + $0x674] ss:$8 sps:$4 sm:$0xff]   ;;  %v3377_v50 = vld [vmem:[%s3810_s23 + $0x170] ss:$8 sps:$4 sm:$0xff]  }
  0x38   : > { %2308 = vmatpush1.bf16.msra.mxu1 %v3295_v51  ;;  %v3380_v51 = vld [vmem:[%s3810_s23 + $0x670] ss:$8 sps:$4 sm:$0xff]  }
  0x39   : > { %2513 = vmatpush1.bf16.msra.mxu0 %v3296_v52  ;;  %2309 = vmatprep.subr.bf16.mxu1 %v3297_v53  ;;  %v3385_v52 = vld [vmem:[%s3810_s23 + $0x184] ss:$8 sps:$4 sm:$0xff]  }
  0x3a   : > { %2514 = vmatprep.subr.bf16.mxu0 %v3299_v54  ;;  %v3388_v53 = vld [vmem:[%s3810_s23 + $0x684] ss:$8 sps:$4 sm:$0xff]   ;;  %v3383_v54 = vld [vmem:[%s3810_s23 + $0x180] ss:$8 sps:$4 sm:$0xff]  }
  0x3c   : > { %2310 = vmatpush1.bf16.msra.mxu1 %v3301_v55  ;;  %v3386_v55 = vld [vmem:[%s3810_s23 + $0x680] ss:$8 sps:$4 sm:$0xff]  }
  0x3d   : > { %2515 = vmatpush1.bf16.msra.mxu0 %v3302_v56  ;;  %2311 = vmatprep.subr.bf16.mxu1 %v3303_v57  ;;  %v3391_v56 = vld [vmem:[%s3810_s23 + $0x194] ss:$8 sps:$4 sm:$0xff]  }
  0x3e   : > { %2516 = vmatprep.subr.bf16.mxu0 %v3305_v58  ;;  %v3394_v57 = vld [vmem:[%s3810_s23 + $0x694] ss:$8 sps:$4 sm:$0xff]   ;;  %v3389_v58 = vld [vmem:[%s3810_s23 + $0x190] ss:$8 sps:$4 sm:$0xff]  }
  0x40   : > { %2312 = vmatpush1.bf16.msra.mxu1 %v3307_v59  ;;  %v3392_v59 = vld [vmem:[%s3810_s23 + $0x690] ss:$8 sps:$4 sm:$0xff]  }
  0x41   : > { %2517 = vmatpush1.bf16.msra.mxu0 %v3308_v60  ;;  %2313 = vmatprep.subr.bf16.mxu1 %v3309_v61  ;;  %v3397_v60 = vld [vmem:[%s3810_s23 + $0x1a4] ss:$8 sps:$4 sm:$0xff]  }
  0x42   : > { %2518 = vmatprep.subr.bf16.mxu0 %v3311_v62  ;;  %v3400_v61 = vld [vmem:[%s3810_s23 + $0x6a4] ss:$8 sps:$4 sm:$0xff]   ;;  %v3395_v62 = vld [vmem:[%s3810_s23 + $0x1a0] ss:$8 sps:$4 sm:$0xff]  }
  0x44   : > { %2314 = vmatpush1.bf16.msra.mxu1 %v3313_v63  ;;  %v3398_v63 = vld [vmem:[%s3810_s23 + $0x6a0] ss:$8 sps:$4 sm:$0xff]  }
  0x45   : > { %2519 = vmatpush1.bf16.msra.mxu0 %v3314_v0  ;;  %2315 = vmatprep.subr.bf16.mxu1 %v3315_v1  ;;  %v3403_v0 = vld [vmem:[%s3810_s23 + $0x1b4] ss:$8 sps:$4 sm:$0xff]  }
  0x46   : > { %2520 = vmatprep.subr.bf16.mxu0 %v3317_v2  ;;  %v3406_v1 = vld [vmem:[%s3810_s23 + $0x6b4] ss:$8 sps:$4 sm:$0xff]   ;;  %v3401_v2 = vld [vmem:[%s3810_s23 + $0x1b0] ss:$8 sps:$4 sm:$0xff]  }
  0x48   : > { %2316 = vmatpush1.bf16.msra.mxu1 %v3319_v3  ;;  %v3404_v3 = vld [vmem:[%s3810_s23 + $0x6b0] ss:$8 sps:$4 sm:$0xff]  }
  0x49   : > { %2521 = vmatpush1.bf16.msra.mxu0 %v3320_v4  ;;  %2317 = vmatprep.subr.bf16.mxu1 %v3321_v5  ;;  %v3409_v4 = vld [vmem:[%s3810_s23 + $0x1c4] ss:$8 sps:$4 sm:$0xff]  }
  0x4a   : > { %2522 = vmatprep.subr.bf16.mxu0 %v3323_v6  ;;  %v3412_v5 = vld [vmem:[%s3810_s23 + $0x6c4] ss:$8 sps:$4 sm:$0xff]   ;;  %v3407_v6 = vld [vmem:[%s3810_s23 + $0x1c0] ss:$8 sps:$4 sm:$0xff]  }
  0x4c   : > { %2318 = vmatpush1.bf16.msra.mxu1 %v3325_v9  ;;  %v3410_v9 = vld [vmem:[%s3810_s23 + $0x6c0] ss:$8 sps:$4 sm:$0xff]  }
  0x4d   : > { %2523 = vmatpush1.bf16.msra.mxu0 %v3326_v12  ;;  %2319 = vmatprep.subr.bf16.mxu1 %v3327_v13  ;;  %v3415_v12 = vld [vmem:[%s3810_s23 + $0x1d4] ss:$8 sps:$4 sm:$0xff]  }
  0x4e   : > { %2524 = vmatprep.subr.bf16.mxu0 %v3329_v14  ;;  %v3418_v13 = vld [vmem:[%s3810_s23 + $0x6d4] ss:$8 sps:$4 sm:$0xff]   ;;  %v3413_v14 = vld [vmem:[%s3810_s23 + $0x1d0] ss:$8 sps:$4 sm:$0xff]  }
  0x50   : > { %2320 = vmatpush1.bf16.msra.mxu1 %v3331_v17  ;;  %v3421_v17 = vld [vmem:[%s3810_s23 + $0x1e4] ss:$8 sps:$4 sm:$0xff]  }
  0x51   : > { %2525 = vmatpush1.bf16.msra.mxu0 %v3332_v18  ;;  %2330 = vmatprep.subr.bf16.mxu1 %v3336_v19  ;;  %v3424_v18 = vld [vmem:[%s3810_s23 + $0x6e4] ss:$8 sps:$4 sm:$0xff]   ;;  %v3419_v19 = vld [vmem:[%s3810_s23 + $0x1e0] ss:$8 sps:$4 sm:$0xff]  }
  0x52   : > { %2535 = vmatprep.subr.bf16.mxu0 %v3340_v20  ;;  %v3422_v20 = vld [vmem:[%s3810_s23 + $0x6e0] ss:$8 sps:$4 sm:$0xff]  }
  0x53   : > { %2322 = vmatmul.mubr.bf16.vlgmr.msra.gmra.mrb[0].mxu1 %v3815_v10  ;;  %v3350_v10 = vld [vmem:[%s3810_s23 + $0x620] ss:$8 sps:$4 sm:$0xff]  }
  0x54   : > { %2527 = vmatmul.mubr.bf16.vlgmr.msra.gmra.mrb[0].mxu0 %v3818_v11  ;;  %2331 = vmatpush1.bf16.msra.mxu1 %v3334_v22  ;;  %v3355_v11 = vld [vmem:[%s3810_s23 + $0x134] ss:$8 sps:$4 sm:$0xff]  }
  0x55   : > { %2536 = vmatpush1.bf16.msra.mxu0 %v3338_v23  ;;  %2332 = vmatprep.subr.bf16.mxu1 %v3343_v24  ;;  %v3427_v22 = vld [vmem:[%s3810_s23 + $0x1f4] ss:$8 sps:$4 sm:$0xff]   ;;  %v604_v24 = vcombine.high %v3890_v16, %v3890_v16  ;;  %v3983_v16 = vld [vmem:[%s4247_s1 + $0x8] sm:$0xff] }
  0x56   : > { %2537 = vmatprep.subr.bf16.mxu0 %v3346_v25  ;;  %2362 = vmatprep.mubr.bf16.mxu1 %v569_v26  ;;  %v3430_v23 = vld [vmem:[%s3810_s23 + $0x6f4] ss:$8 sps:$4 sm:$0xff]   ;;  %v3425_v25 = vld [vmem:[%s3810_s23 + $0x1f0] ss:$8 sps:$4 sm:$0xff]  }
  0x57   : > { %2567 = vmatprep.mubr.bf16.mxu0 %v619_v27  ;;  %v3428_v26 = vld [vmem:[%s3810_s23 + $0x6f0] ss:$8 sps:$4 sm:$0xff]   ;;  %v3433_v27 = vld [vmem:[%s3810_s23 + $0x204] ss:$8 sps:$4 sm:$0xff]  }
  0x58   : > { %2333 = vmatpush1.bf16.msra.mxu1 %v3341_v28  ;;  %v3436_v28 = vld [vmem:[%s3810_s23 + $0x704] ss:$8 sps:$4 sm:$0xff]  }
  0x59   : > { %2538 = vmatpush1.bf16.msra.mxu0 %v3344_v29  ;;  %2334 = vmatprep.subr.bf16.mxu1 %v3349_v30  ;;  %v3976_v29 = vrot.slane %v604_v24, %v3805_v8  ;;  %v3431_v30 = vld [vmem:[%s3810_s23 + $0x200] ss:$8 sps:$4 sm:$0xff]   ;;  %v3512_v24 = vld [vmem:[%s3810_s23 + $0x7d0] ss:$8 sps:$4 sm:$0xff]  }
  0x5a   : > { %2539 = vmatprep.subr.bf16.mxu0 %v3352_v31  ;;  %v3434_v31 = vld [vmem:[%s3810_s23 + $0x700] ss:$8 sps:$4 sm:$0xff]  }
  0x5c   : > { %2335 = vmatpush1.bf16.msra.mxu1 %v3347_v32  ;;  %v3439_v32 = vld [vmem:[%s3810_s23 + $0x214] ss:$8 sps:$4 sm:$0xff]  }
  0x5d   : > { %2540 = vmatpush1.bf16.msra.mxu0 %v3350_v10  ;;  %2336 = vmatprep.subr.bf16.mxu1 %v3355_v11  ;;  %v3442_v10 = vld [vmem:[%s3810_s23 + $0x714] ss:$8 sps:$4 sm:$0xff]   ;;  %v3989_v11 = vrot.slane %v3983_v16, %v3805_v8 }
  0x5e   : > { %2541 = vmatprep.subr.bf16.mxu0 %v3358_v33  ;;  %v620_v33 = vcombine.high %v3976_v29, %v3976_v29 }
  0x60   : > { %2337 = vmatpush1.bf16.msra.mxu1 %v3353_v34  ;;  %v3437_v34 = vld [vmem:[%s3810_s23 + $0x210] ss:$8 sps:$4 sm:$0xff]  }
  0x61   : > { %2542 = vmatpush1.bf16.msra.mxu0 %v3356_v35  ;;  %2338 = vmatprep.subr.bf16.mxu1 %v3361_v36  ;;  %v585_v35 = vcombine.high %v3989_v11, %v3989_v11  ;;  %v3440_v36 = vld [vmem:[%s3810_s23 + $0x710] ss:$8 sps:$4 sm:$0xff]  }
  0x62   : > { %2543 = vmatprep.subr.bf16.mxu0 %v3364_v37  ;;  %v3445_v37 = vld [vmem:[%s3810_s23 + $0x224] ss:$8 sps:$4 sm:$0xff]  }
  0x64   : > { %2339 = vmatpush1.bf16.msra.mxu1 %v3359_v38  ;;  %v3448_v38 = vld [vmem:[%s3810_s23 + $0x724] ss:$8 sps:$4 sm:$0xff]  }
  0x65   : > { %2544 = vmatpush1.bf16.msra.mxu0 %v3362_v39  ;;  %2340 = vmatprep.subr.bf16.mxu1 %v3367_v40  ;;  %v3451_v39 = vld [vmem:[%s3810_s23 + $0x234] ss:$8 sps:$4 sm:$0xff]  }
  0x66   : > { %2545 = vmatprep.subr.bf16.mxu0 %v3370_v41  ;;  %v3454_v40 = vld [vmem:[%s3810_s23 + $0x734] ss:$8 sps:$4 sm:$0xff]   ;;  %v3449_v41 = vld [vmem:[%s3810_s23 + $0x230] ss:$8 sps:$4 sm:$0xff]  }
  0x68   : > { %2341 = vmatpush1.bf16.msra.mxu1 %v3365_v42  ;;  %v3452_v42 = vld [vmem:[%s3810_s23 + $0x730] ss:$8 sps:$4 sm:$0xff]  }
  0x69   : > { %2546 = vmatpush1.bf16.msra.mxu0 %v3368_v43  ;;  %2342 = vmatprep.subr.bf16.mxu1 %v3373_v44  ;;  %v3457_v43 = vld [vmem:[%s3810_s23 + $0x244] ss:$8 sps:$4 sm:$0xff]  }
  0x6a   : > { %2547 = vmatprep.subr.bf16.mxu0 %v3376_v45  ;;  %v3460_v44 = vld [vmem:[%s3810_s23 + $0x744] ss:$8 sps:$4 sm:$0xff]   ;;  %v3455_v45 = vld [vmem:[%s3810_s23 + $0x240] ss:$8 sps:$4 sm:$0xff]  }
  0x6c   : > { %2343 = vmatpush1.bf16.msra.mxu1 %v3371_v46  ;;  %v3458_v46 = vld [vmem:[%s3810_s23 + $0x740] ss:$8 sps:$4 sm:$0xff]  }
  0x6d   : > { %2548 = vmatpush1.bf16.msra.mxu0 %v3374_v47  ;;  %2344 = vmatprep.subr.bf16.mxu1 %v3379_v48  ;;  %v3463_v47 = vld [vmem:[%s3810_s23 + $0x254] ss:$8 sps:$4 sm:$0xff]  }
  0x6e   : > { %2549 = vmatprep.subr.bf16.mxu0 %v3382_v49  ;;  %v3466_v48 = vld [vmem:[%s3810_s23 + $0x754] ss:$8 sps:$4 sm:$0xff]   ;;  %v3461_v49 = vld [vmem:[%s3810_s23 + $0x250] ss:$8 sps:$4 sm:$0xff]  }
  0x70   : > { %2345 = vmatpush1.bf16.msra.mxu1 %v3377_v50  ;;  %v3464_v50 = vld [vmem:[%s3810_s23 + $0x750] ss:$8 sps:$4 sm:$0xff]  }
  0x71   : > { %2550 = vmatpush1.bf16.msra.mxu0 %v3380_v51  ;;  %2346 = vmatprep.subr.bf16.mxu1 %v3385_v52  ;;  %v3469_v51 = vld [vmem:[%s3810_s23 + $0x264] ss:$8 sps:$4 sm:$0xff]  }
  0x72   : > { %2551 = vmatprep.subr.bf16.mxu0 %v3388_v53  ;;  %v3472_v52 = vld [vmem:[%s3810_s23 + $0x764] ss:$8 sps:$4 sm:$0xff]   ;;  %v3467_v53 = vld [vmem:[%s3810_s23 + $0x260] ss:$8 sps:$4 sm:$0xff]  }
  0x74   : > { %2347 = vmatpush1.bf16.msra.mxu1 %v3383_v54  ;;  %v3470_v54 = vld [vmem:[%s3810_s23 + $0x760] ss:$8 sps:$4 sm:$0xff]  }
  0x75   : > { %2552 = vmatpush1.bf16.msra.mxu0 %v3386_v55  ;;  %2348 = vmatprep.subr.bf16.mxu1 %v3391_v56  ;;  %v3475_v55 = vld [vmem:[%s3810_s23 + $0x274] ss:$8 sps:$4 sm:$0xff]  }
  0x76   : > { %2553 = vmatprep.subr.bf16.mxu0 %v3394_v57  ;;  %v3478_v56 = vld [vmem:[%s3810_s23 + $0x774] ss:$8 sps:$4 sm:$0xff]   ;;  %v3473_v57 = vld [vmem:[%s3810_s23 + $0x270] ss:$8 sps:$4 sm:$0xff]  }
  0x78   : > { %2349 = vmatpush1.bf16.msra.mxu1 %v3389_v58  ;;  %v3476_v58 = vld [vmem:[%s3810_s23 + $0x770] ss:$8 sps:$4 sm:$0xff]  }
  0x79   : > { %2554 = vmatpush1.bf16.msra.mxu0 %v3392_v59  ;;  %2350 = vmatprep.subr.bf16.mxu1 %v3397_v60  ;;  %v3481_v59 = vld [vmem:[%s3810_s23 + $0x284] ss:$8 sps:$4 sm:$0xff]  }
  0x7a   : > { %2555 = vmatprep.subr.bf16.mxu0 %v3400_v61  ;;  %v3484_v60 = vld [vmem:[%s3810_s23 + $0x784] ss:$8 sps:$4 sm:$0xff]   ;;  %v3479_v61 = vld [vmem:[%s3810_s23 + $0x280] ss:$8 sps:$4 sm:$0xff]  }
  0x7c   : > { %2351 = vmatpush1.bf16.msra.mxu1 %v3395_v62  ;;  %v3482_v62 = vld [vmem:[%s3810_s23 + $0x780] ss:$8 sps:$4 sm:$0xff]  }
  0x7d   : > { %2556 = vmatpush1.bf16.msra.mxu0 %v3398_v63  ;;  %2352 = vmatprep.subr.bf16.mxu1 %v3403_v0  ;;  %v3487_v63 = vld [vmem:[%s3810_s23 + $0x294] ss:$8 sps:$4 sm:$0xff]  }
  0x7e   : > { %2557 = vmatprep.subr.bf16.mxu0 %v3406_v1  ;;  %v3490_v0 = vld [vmem:[%s3810_s23 + $0x794] ss:$8 sps:$4 sm:$0xff]   ;;  %v3485_v1 = vld [vmem:[%s3810_s23 + $0x290] ss:$8 sps:$4 sm:$0xff]  }
  0x80   : > { %2353 = vmatpush1.bf16.msra.mxu1 %v3401_v2  ;;  %v3488_v2 = vld [vmem:[%s3810_s23 + $0x790] ss:$8 sps:$4 sm:$0xff]  }
  0x81   : > { %2558 = vmatpush1.bf16.msra.mxu0 %v3404_v3  ;;  %2354 = vmatprep.subr.bf16.mxu1 %v3409_v4  ;;  %v3493_v3 = vld [vmem:[%s3810_s23 + $0x2a4] ss:$8 sps:$4 sm:$0xff]  }
  0x82   : > { %2559 = vmatprep.subr.bf16.mxu0 %v3412_v5  ;;  %v3496_v4 = vld [vmem:[%s3810_s23 + $0x7a4] ss:$8 sps:$4 sm:$0xff]   ;;  %v3491_v5 = vld [vmem:[%s3810_s23 + $0x2a0] ss:$8 sps:$4 sm:$0xff]  }
  0x84   : > { %2355 = vmatpush1.bf16.msra.mxu1 %v3407_v6  ;;  %v3494_v6 = vld [vmem:[%s3810_s23 + $0x7a0] ss:$8 sps:$4 sm:$0xff]  }
  0x85   : > { %2560 = vmatpush1.bf16.msra.mxu0 %v3410_v9  ;;  %2356 = vmatprep.subr.bf16.mxu1 %v3415_v12  ;;  %v3499_v9 = vld [vmem:[%s3810_s23 + $0x2b4] ss:$8 sps:$4 sm:$0xff]  }
  0x86   : > { %2561 = vmatprep.subr.bf16.mxu0 %v3418_v13  ;;  %v3502_v12 = vld [vmem:[%s3810_s23 + $0x7b4] ss:$8 sps:$4 sm:$0xff]   ;;  %v3497_v13 = vld [vmem:[%s3810_s23 + $0x2b0] ss:$8 sps:$4 sm:$0xff]  }
  0x88   : > { %2357 = vmatpush1.bf16.msra.mxu1 %v3413_v14  ;;  %v3500_v14 = vld [vmem:[%s3810_s23 + $0x7b0] ss:$8 sps:$4 sm:$0xff]  }
  0x89   : > { %2562 = vmatpush1.bf16.msra.mxu0 %v3416_v15  ;;  %2358 = vmatprep.subr.bf16.mxu1 %v3421_v17  ;;  %v3505_v15 = vld [vmem:[%s3810_s23 + $0x2c4] ss:$8 sps:$4 sm:$0xff]  }
  0x8a   : > { %2563 = vmatprep.subr.bf16.mxu0 %v3424_v18  ;;  %v3508_v17 = vld [vmem:[%s3810_s23 + $0x7c4] ss:$8 sps:$4 sm:$0xff]   ;;  %v3503_v18 = vld [vmem:[%s3810_s23 + $0x2c0] ss:$8 sps:$4 sm:$0xff]  }
  0x8c   : > { %2359 = vmatpush1.bf16.msra.mxu1 %v3419_v19  ;;  %v3506_v19 = vld [vmem:[%s3810_s23 + $0x7c0] ss:$8 sps:$4 sm:$0xff]  }
  0x8d   : > { %2564 = vmatpush1.bf16.msra.mxu0 %v3422_v20  ;;  %2360 = vmatprep.subr.bf16.mxu1 %v3427_v22  ;;  %v3511_v20 = vld [vmem:[%s3810_s23 + $0x2d4] ss:$8 sps:$4 sm:$0xff]  }
  0x8e   : > { %2565 = vmatprep.subr.bf16.mxu0 %v3430_v23  ;;  %v3514_v22 = vld [vmem:[%s3810_s23 + $0x7d4] ss:$8 sps:$4 sm:$0xff]   ;;  %v3509_v23 = vld [vmem:[%s3810_s23 + $0x2d0] ss:$8 sps:$4 sm:$0xff]  }
  0x90   : > { %2361 = vmatpush1.bf16.msra.mxu1 %v3425_v25  ;;  %v3517_v25 = vld [vmem:[%s3810_s23 + $0x2e4] ss:$8 sps:$4 sm:$0xff]  }
  0x91   : > { %2566 = vmatpush1.bf16.msra.mxu0 %v3428_v26  ;;  %2371 = vmatprep.subr.bf16.mxu1 %v3433_v27  ;;  %v3520_v26 = vld [vmem:[%s3810_s23 + $0x7e4] ss:$8 sps:$4 sm:$0xff]   ;;  %v3515_v27 = vld [vmem:[%s3810_s23 + $0x2e0] ss:$8 sps:$4 sm:$0xff]  }
  0x92   : > { %2576 = vmatprep.subr.bf16.mxu0 %v3436_v28  ;;  %v3518_v28 = vld [vmem:[%s3810_s23 + $0x7e0] ss:$8 sps:$4 sm:$0xff]  }
  0x93   : > { %2363 = vmatmul.mubr.bf16.vlgmr.msra.gmra.mrb[0].mxu1 %v3897_v21  ;;  %v3443_v21 = vld [vmem:[%s3810_s23 + $0x220] ss:$8 sps:$4 sm:$0xff]  }
  0x94   : > { %2568 = vmatmul.mubr.bf16.vlgmr.msra.gmra.mrb[0].mxu0 %v3901_v7  ;;  %2372 = vmatpush1.bf16.msra.mxu1 %v3431_v30  ;;  %v3446_v7 = vld [vmem:[%s3810_s23 + $0x720] ss:$8 sps:$4 sm:$0xff]   ;;  %v3523_v30 = vld [vmem:[%s3810_s23 + $0x2f4] ss:$8 sps:$4 sm:$0xff]  }
  0x95   : > { %2577 = vmatpush1.bf16.msra.mxu0 %v3434_v31  ;;  %2373 = vmatprep.subr.bf16.mxu1 %v3439_v32  ;;  %v3526_v31 = vld [vmem:[%s3810_s23 + $0x7f4] ss:$8 sps:$4 sm:$0xff]   ;;  %v570_v32 = vcombine.high %v3983_v16, %v3983_v16 }
  0x96   : > { %2578 = vmatprep.subr.bf16.mxu0 %v3442_v10  ;;  %2403 = vmatprep.mubr.bf16.mxu1 %v585_v35  ;;  %v4058_v10 = vld [vmem:[%s4247_s1 + $0x20] sm:$0xff] }
  0x97   : > { %2608 = vmatprep.mubr.bf16.mxu0 %v620_v33  ;;  %v3521_v33 = vld [vmem:[%s3810_s23 + $0x2f0] ss:$8 sps:$4 sm:$0xff]   ;;  %v3529_v35 = vld [vmem:[%s3810_s23 + $0x304] ss:$8 sps:$4 sm:$0xff]   ;;  %v4069_v16 = vrot.slane %v4058_v10, %v3805_v8 }
  0x98   : > { %2374 = vmatpush1.bf16.msra.mxu1 %v3437_v34  ;;  %v3524_v34 = vld [vmem:[%s3810_s23 + $0x7f0] ss:$8 sps:$4 sm:$0xff]  }
  0x99   : > { %2579 = vmatpush1.bf16.msra.mxu0 %v3440_v36  ;;  %2375 = vmatprep.subr.bf16.mxu1 %v3445_v37  ;;  %v3533_v36 = vld [vmem:[%s3810_s23 + $0x804] ss:$8 sps:$4 sm:$0xff]   ;;  %v4065_v37 = vrot.slane %v570_v32, %v3805_v8  ;;  %v3611_v32 = vld [vmem:[%s3810_s23 + $0x8d4] ss:$8 sps:$4 sm:$0xff]  }
  0x9a   : > { %2580 = vmatprep.subr.bf16.mxu0 %v3448_v38  ;;  %v3527_v38 = vld [vmem:[%s3810_s23 + $0x300] ss:$8 sps:$4 sm:$0xff]  }
  0x9c   : > { %2376 = vmatpush1.bf16.msra.mxu1 %v3443_v21  ;;  %v3531_v21 = vld [vmem:[%s3810_s23 + $0x800] ss:$8 sps:$4 sm:$0xff]  }
  0x9d   : > { %2581 = vmatpush1.bf16.msra.mxu0 %v3446_v7  ;;  %2377 = vmatprep.subr.bf16.mxu1 %v3451_v39  ;;  %v3536_v7 = vld [vmem:[%s3810_s23 + $0x314] ss:$8 sps:$4 sm:$0xff]  }
  0x9e   : > { %2582 = vmatprep.subr.bf16.mxu0 %v3454_v40  ;;  %v3539_v39 = vld [vmem:[%s3810_s23 + $0x814] ss:$8 sps:$4 sm:$0xff]   ;;  %v586_v40 = vcombine.high %v4065_v37, %v4065_v37 }
  0xa0   : > { %2378 = vmatpush1.bf16.msra.mxu1 %v3449_v41  ;;  %v636_v41 = vcombine.high %v4069_v16, %v4069_v16 }
  0xa1   : > { %2583 = vmatpush1.bf16.msra.mxu0 %v3452_v42  ;;  %2379 = vmatprep.subr.bf16.mxu1 %v3457_v43  ;;  %v3534_v42 = vld [vmem:[%s3810_s23 + $0x310] ss:$8 sps:$4 sm:$0xff]  }
  0xa2   : > { %2584 = vmatprep.subr.bf16.mxu0 %v3460_v44  ;;  %v3537_v43 = vld [vmem:[%s3810_s23 + $0x810] ss:$8 sps:$4 sm:$0xff]   ;;  %v3542_v44 = vld [vmem:[%s3810_s23 + $0x324] ss:$8 sps:$4 sm:$0xff]  }
  0xa4   : > { %2380 = vmatpush1.bf16.msra.mxu1 %v3455_v45  ;;  %v3545_v45 = vld [vmem:[%s3810_s23 + $0x824] ss:$8 sps:$4 sm:$0xff]  }
  0xa5   : > { %2585 = vmatpush1.bf16.msra.mxu0 %v3458_v46  ;;  %2381 = vmatprep.subr.bf16.mxu1 %v3463_v47  ;;  %v3548_v46 = vld [vmem:[%s3810_s23 + $0x334] ss:$8 sps:$4 sm:$0xff]  }
  0xa6   : > { %2586 = vmatprep.subr.bf16.mxu0 %v3466_v48  ;;  %v3551_v47 = vld [vmem:[%s3810_s23 + $0x834] ss:$8 sps:$4 sm:$0xff]   ;;  %v3755_v48 = vmov 0  }
  0xa7   : > { %3236 = vset.pattern.permute.xlu0 %v3755_v48 }
  0xa8   : > { %2382 = vmatpush1.bf16.msra.mxu1 %v3461_v49  ;;  %v3546_v49 = vld [vmem:[%s3810_s23 + $0x330] ss:$8 sps:$4 sm:$0xff]  }
  0xa9   : > { %2587 = vmatpush1.bf16.msra.mxu0 %v3464_v50  ;;  %2383 = vmatprep.subr.bf16.mxu1 %v3469_v51  ;;  %v3549_v50 = vld [vmem:[%s3810_s23 + $0x830] ss:$8 sps:$4 sm:$0xff]   ;;  %v3554_v51 = vld [vmem:[%s3810_s23 + $0x344] ss:$8 sps:$4 sm:$0xff]  }
  0xaa   : > { %2588 = vmatprep.subr.bf16.mxu0 %v3472_v52  ;;  %v3557_v52 = vld [vmem:[%s3810_s23 + $0x844] ss:$8 sps:$4 sm:$0xff]  }
  0xac   : > { %2384 = vmatpush1.bf16.msra.mxu1 %v3467_v53  ;;  %v3552_v53 = vld [vmem:[%s3810_s23 + $0x340] ss:$8 sps:$4 sm:$0xff]  }
  0xad   : > { %2589 = vmatpush1.bf16.msra.mxu0 %v3470_v54  ;;  %2385 = vmatprep.subr.bf16.mxu1 %v3475_v55  ;;  %v3555_v54 = vld [vmem:[%s3810_s23 + $0x840] ss:$8 sps:$4 sm:$0xff]   ;;  %v3560_v55 = vld [vmem:[%s3810_s23 + $0x354] ss:$8 sps:$4 sm:$0xff]  }
  0xae   : > { %2590 = vmatprep.subr.bf16.mxu0 %v3478_v56  ;;  %v3563_v56 = vld [vmem:[%s3810_s23 + $0x854] ss:$8 sps:$4 sm:$0xff]  }
  0xb0   : > { %2386 = vmatpush1.bf16.msra.mxu1 %v3473_v57  ;;  %v3558_v57 = vld [vmem:[%s3810_s23 + $0x350] ss:$8 sps:$4 sm:$0xff]  }
  0xb1   : > { %2591 = vmatpush1.bf16.msra.mxu0 %v3476_v58  ;;  %2387 = vmatprep.subr.bf16.mxu1 %v3481_v59  ;;  %v3561_v58 = vld [vmem:[%s3810_s23 + $0x850] ss:$8 sps:$4 sm:$0xff]   ;;  %v3566_v59 = vld [vmem:[%s3810_s23 + $0x364] ss:$8 sps:$4 sm:$0xff]  }
  0xb2   : > { %2592 = vmatprep.subr.bf16.mxu0 %v3484_v60  ;;  %v3569_v60 = vld [vmem:[%s3810_s23 + $0x864] ss:$8 sps:$4 sm:$0xff]  }
  0xb4   : > { %2388 = vmatpush1.bf16.msra.mxu1 %v3479_v61  ;;  %v3564_v61 = vld [vmem:[%s3810_s23 + $0x360] ss:$8 sps:$4 sm:$0xff]  }
  0xb5   : > { %2593 = vmatpush1.bf16.msra.mxu0 %v3482_v62  ;;  %2389 = vmatprep.subr.bf16.mxu1 %v3487_v63  ;;  %v3567_v62 = vld [vmem:[%s3810_s23 + $0x860] ss:$8 sps:$4 sm:$0xff]  }
  0xb6   : > { %2594 = vmatprep.subr.bf16.mxu0 %v3490_v0  ;;  %v541_v63 = vld [vmem:[%s4248_s2] sm:$0x7]  ;;  %v3572_v0 = vld [vmem:[%s3810_s23 + $0x374] ss:$8 sps:$4 sm:$0xff]  }
  0xb7   : > { %544 = vperm.xlu0 %3236, %v541_v63   ;;  %v3660_v63 = vld [vmem:[%s3810_s23 + $0x954] ss:$8 sps:$4 sm:$0xff]  }
  0xb8   : > { %2390 = vmatpush1.bf16.msra.mxu1 %v3485_v1  ;;  %v3575_v1 = vld [vmem:[%s3810_s23 + $0x874] ss:$8 sps:$4 sm:$0xff]  }
  0xb9   : > { %2595 = vmatpush1.bf16.msra.mxu0 %v3488_v2  ;;  %2391 = vmatprep.subr.bf16.mxu1 %v3493_v3  ;;  %v3570_v2 = vld [vmem:[%s3810_s23 + $0x370] ss:$8 sps:$4 sm:$0xff]  }
  0xba   : > { %2596 = vmatprep.subr.bf16.mxu0 %v3496_v4  ;;  %v3573_v3 = vld [vmem:[%s3810_s23 + $0x870] ss:$8 sps:$4 sm:$0xff]   ;;  %v3578_v4 = vld [vmem:[%s3810_s23 + $0x384] ss:$8 sps:$4 sm:$0xff]  }
  0xbc   : > { %2392 = vmatpush1.bf16.msra.mxu1 %v3491_v5  ;;  %v3581_v5 = vld [vmem:[%s3810_s23 + $0x884] ss:$8 sps:$4 sm:$0xff]  }
  0xbd   : > { %2597 = vmatpush1.bf16.msra.mxu0 %v3494_v6  ;;  %2393 = vmatprep.subr.bf16.mxu1 %v3499_v9  ;;  %v3576_v6 = vld [vmem:[%s3810_s23 + $0x380] ss:$8 sps:$4 sm:$0xff]  }
  0xbe   : > { %2598 = vmatprep.subr.bf16.mxu0 %v3502_v12  ;;  %v3579_v9 = vld [vmem:[%s3810_s23 + $0x880] ss:$8 sps:$4 sm:$0xff]   ;;  %v3584_v12 = vld [vmem:[%s3810_s23 + $0x394] ss:$8 sps:$4 sm:$0xff]  }
  0xc0   : > { %2394 = vmatpush1.bf16.msra.mxu1 %v3497_v13  ;;  %v3587_v13 = vld [vmem:[%s3810_s23 + $0x894] ss:$8 sps:$4 sm:$0xff]  }
  0xc1   : > { %2599 = vmatpush1.bf16.msra.mxu0 %v3500_v14  ;;  %2395 = vmatprep.subr.bf16.mxu1 %v3505_v15  ;;  %v3582_v14 = vld [vmem:[%s3810_s23 + $0x390] ss:$8 sps:$4 sm:$0xff]  }
  0xc2   : > { %2600 = vmatprep.subr.bf16.mxu0 %v3508_v17  ;;  %v3585_v15 = vld [vmem:[%s3810_s23 + $0x890] ss:$8 sps:$4 sm:$0xff]   ;;  %v3590_v17 = vld [vmem:[%s3810_s23 + $0x3a4] ss:$8 sps:$4 sm:$0xff]  }
  0xc4   : > { %2396 = vmatpush1.bf16.msra.mxu1 %v3503_v18  ;;  %v3593_v18 = vld [vmem:[%s3810_s23 + $0x8a4] ss:$8 sps:$4 sm:$0xff]  }
  0xc5   : > { %2601 = vmatpush1.bf16.msra.mxu0 %v3506_v19  ;;  %2397 = vmatprep.subr.bf16.mxu1 %v3511_v20  ;;  %v3588_v19 = vld [vmem:[%s3810_s23 + $0x3a0] ss:$8 sps:$4 sm:$0xff]  }
  0xc6   : > { %2602 = vmatprep.subr.bf16.mxu0 %v3514_v22  ;;  %v3591_v20 = vld [vmem:[%s3810_s23 + $0x8a0] ss:$8 sps:$4 sm:$0xff]   ;;  %v3596_v22 = vld [vmem:[%s3810_s23 + $0x3b4] ss:$8 sps:$4 sm:$0xff]  }
  0xc8   : > { %2398 = vmatpush1.bf16.msra.mxu1 %v3509_v23  ;;  %v3599_v23 = vld [vmem:[%s3810_s23 + $0x8b4] ss:$8 sps:$4 sm:$0xff]  }
  0xc9   : > { %2603 = vmatpush1.bf16.msra.mxu0 %v3512_v24  ;;  %2399 = vmatprep.subr.bf16.mxu1 %v3517_v25  ;;  %v3594_v24 = vld [vmem:[%s3810_s23 + $0x3b0] ss:$8 sps:$4 sm:$0xff]  }
  0xca   : > { %2604 = vmatprep.subr.bf16.mxu0 %v3520_v26  ;;  %v3597_v25 = vld [vmem:[%s3810_s23 + $0x8b0] ss:$8 sps:$4 sm:$0xff]   ;;  %v3602_v26 = vld [vmem:[%s3810_s23 + $0x3c4] ss:$8 sps:$4 sm:$0xff]  }
  0xcc   : > { %2400 = vmatpush1.bf16.msra.mxu1 %v3515_v27  ;;  %v3605_v27 = vld [vmem:[%s3810_s23 + $0x8c4] ss:$8 sps:$4 sm:$0xff]  }
  0xcd   : > { %2605 = vmatpush1.bf16.msra.mxu0 %v3518_v28  ;;  %2401 = vmatprep.subr.bf16.mxu1 %v3523_v30  ;;  %v3600_v28 = vld [vmem:[%s3810_s23 + $0x3c0] ss:$8 sps:$4 sm:$0xff]  }
  0xce   : > { %2606 = vmatprep.subr.bf16.mxu0 %v3526_v31  ;;  %v3603_v30 = vld [vmem:[%s3810_s23 + $0x8c0] ss:$8 sps:$4 sm:$0xff]   ;;  %v3608_v31 = vld [vmem:[%s3810_s23 + $0x3d4] ss:$8 sps:$4 sm:$0xff]  }
  0xd0   : > { %2402 = vmatpush1.bf16.msra.mxu1 %v3521_v33  ;;  %v3606_v33 = vld [vmem:[%s3810_s23 + $0x3d0] ss:$8 sps:$4 sm:$0xff]  }
  0xd1   : > { %2607 = vmatpush1.bf16.msra.mxu0 %v3524_v34  ;;  %2412 = vmatprep.subr.bf16.mxu1 %v3529_v35  ;;  %v3609_v34 = vld [vmem:[%s3810_s23 + $0x8d0] ss:$8 sps:$4 sm:$0xff]   ;;  %v3614_v35 = vld [vmem:[%s3810_s23 + $0x3e4] ss:$8 sps:$4 sm:$0xff]  }
  0xd2   : > { %2617 = vmatprep.subr.bf16.mxu0 %v3533_v36  ;;  %v3617_v36 = vld [vmem:[%s3810_s23 + $0x8e4] ss:$8 sps:$4 sm:$0xff]  }
  0xd3   : > { %2404 = vmatmul.mubr.bf16.vlgmr.msra.gmra.mrb[0].mxu1 %v3989_v11  ;;  %v3540_v11 = vld [vmem:[%s3810_s23 + $0x320] ss:$8 sps:$4 sm:$0xff]  }
  0xd4   : > { %2609 = vmatmul.mubr.bf16.vlgmr.msra.gmra.mrb[0].mxu0 %v3976_v29  ;;  %2413 = vmatpush1.bf16.msra.mxu1 %v3527_v38  ;;  %v3543_v29 = vld [vmem:[%s3810_s23 + $0x820] ss:$8 sps:$4 sm:$0xff]  }
  0xd5   : > { %2618 = vmatpush1.bf16.msra.mxu0 %v3531_v21  ;;  %2414 = vmatprep.subr.bf16.mxu1 %v3536_v7  ;;  %v3612_v38 = vld [vmem:[%s3810_s23 + $0x3e0] ss:$8 sps:$4 sm:$0xff]   ;;  %v3620_v7 = vld [vmem:[%s3810_s23 + $0x3f4] ss:$8 sps:$4 sm:$0xff]  }
  0xd6   : > { %2619 = vmatprep.subr.bf16.mxu0 %v3539_v39  ;;  %2444 = vmatprep.mubr.bf16.mxu1 %v586_v40  ;;  %v3615_v21 = vld [vmem:[%s3810_s23 + $0x8e0] ss:$8 sps:$4 sm:$0xff]   ;;  %v3623_v39 = vld [vmem:[%s3810_s23 + $0x8f4] ss:$8 sps:$4 sm:$0xff]   ;;  %v621_v40 = vcombine.high %v4058_v10, %v4058_v10 }
  0xd7   : > { %2649 = vmatprep.mubr.bf16.mxu0 %v636_v41  ;;  %v3618_v41 = vld [vmem:[%s3810_s23 + $0x3f0] ss:$8 sps:$4 sm:$0xff]   ;;  %v3625_v10 = vld [vmem:[%s3810_s23 + $0x400] ss:$8 sps:$4 sm:$0xff]  }
  0xd8   : > { %2415 = vmatpush1.bf16.msra.mxu1 %v3534_v42  ;;  %v3621_v42 = vld [vmem:[%s3810_s23 + $0x8f0] ss:$8 sps:$4 sm:$0xff]  }
  0xd9   : > { %2620 = vmatpush1.bf16.msra.mxu0 %v3537_v43  ;;  %2416 = vmatprep.subr.bf16.mxu1 %v3542_v44  ;;  %v3627_v43 = vld [vmem:[%s3810_s23 + $0x404] ss:$8 sps:$4 sm:$0xff]  }
  0xda   : > { %2621 = vmatprep.subr.bf16.mxu0 %v3545_v45  ;;  %v3630_v44 = vld [vmem:[%s3810_s23 + $0x904] ss:$8 sps:$4 sm:$0xff]   ;;  %v4150_v45 = vld.sshfl [vmem:[%s4247_s1 + $0x10] sm:$0xff pattern:$0x76325410] }
  0xdc   : > { %2417 = vmatpush1.bf16.msra.mxu1 %v3540_v11  ;;  %v4153_v11 = vrot.slane %v621_v40, %v3805_v8  ;;  %v3631_v8 = vld [vmem:[%s3810_s23 + $0x410] ss:$8 sps:$4 sm:$0xff]   ;;  %v3711_v40 = vld [vmem:[%s3810_s23 + $0x4e4] ss:$8 sps:$4 sm:$0xff]  }
  0xdd   : > { %2622 = vmatpush1.bf16.msra.mxu0 %v3543_v29  ;;  %2418 = vmatprep.subr.bf16.mxu1 %v3548_v46  ;;  %v3628_v29 = vld [vmem:[%s3810_s23 + $0x900] ss:$8 sps:$4 sm:$0xff]   ;;  %v3633_v46 = vld [vmem:[%s3810_s23 + $0x414] ss:$8 sps:$4 sm:$0xff]  }
  0xde   : > { %2623 = vmatprep.subr.bf16.mxu0 %v3551_v47  ;;  %v3636_v47 = vld [vmem:[%s3810_s23 + $0x914] ss:$8 sps:$4 sm:$0xff]  }
  0xe0   : > { %2419 = vmatpush1.bf16.msra.mxu1 %v3546_v49  ;;  %v602_v49 = vcombine.high %v4150_v45, %v4150_v45 }
  0xe1   : > { %2624 = vmatpush1.bf16.msra.mxu0 %v3549_v50  ;;  %2420 = vmatprep.subr.bf16.mxu1 %v3554_v51  ;;  %v637_v50 = vcombine.high %v4153_v11, %v4153_v11  ;;  %v3634_v51 = vld [vmem:[%s3810_s23 + $0x910] ss:$8 sps:$4 sm:$0xff]  }
  0xe2   : > { %2625 = vmatprep.subr.bf16.mxu0 %v3557_v52  ;;  %v3639_v52 = vld [vmem:[%s3810_s23 + $0x424] ss:$8 sps:$4 sm:$0xff]  }
  0xe4   : > { %2421 = vmatpush1.bf16.msra.mxu1 %v3552_v53  ;;  %v3642_v53 = vld [vmem:[%s3810_s23 + $0x924] ss:$8 sps:$4 sm:$0xff]  }
  0xe5   : > { %2626 = vmatpush1.bf16.msra.mxu0 %v3555_v54  ;;  %2422 = vmatprep.subr.bf16.mxu1 %v3560_v55  ;;  %v3645_v54 = vld [vmem:[%s3810_s23 + $0x434] ss:$8 sps:$4 sm:$0xff]  }
  0xe6   : > { %2627 = vmatprep.subr.bf16.mxu0 %v3563_v56  ;;  %v3648_v55 = vld [vmem:[%s3810_s23 + $0x934] ss:$8 sps:$4 sm:$0xff]   ;;  %v3643_v56 = vld [vmem:[%s3810_s23 + $0x430] ss:$8 sps:$4 sm:$0xff]  }
  0xe8   : > { %2423 = vmatpush1.bf16.msra.mxu1 %v3558_v57  ;;  %v3646_v57 = vld [vmem:[%s3810_s23 + $0x930] ss:$8 sps:$4 sm:$0xff]  }
  0xe9   : > { %2628 = vmatpush1.bf16.msra.mxu0 %v3561_v58  ;;  %2424 = vmatprep.subr.bf16.mxu1 %v3566_v59  ;;  %v3651_v58 = vld [vmem:[%s3810_s23 + $0x444] ss:$8 sps:$4 sm:$0xff]  }
  0xea   : > { %2629 = vmatprep.subr.bf16.mxu0 %v3569_v60  ;;  %v3654_v59 = vld [vmem:[%s3810_s23 + $0x944] ss:$8 sps:$4 sm:$0xff]   ;;  %v3649_v60 = vld [vmem:[%s3810_s23 + $0x440] ss:$8 sps:$4 sm:$0xff]  }
  0xec   : > { %2425 = vmatpush1.bf16.msra.mxu1 %v3564_v61  ;;  %v3652_v61 = vld [vmem:[%s3810_s23 + $0x940] ss:$8 sps:$4 sm:$0xff]  }
  0xed   : > { %2630 = vmatpush1.bf16.msra.mxu0 %v3567_v62  ;;  %2426 = vmatprep.subr.bf16.mxu1 %v3572_v0  ;;  %v3657_v62 = vld [vmem:[%s3810_s23 + $0x454] ss:$8 sps:$4 sm:$0xff]   ;;  %v3655_v0 = vld [vmem:[%s3810_s23 + $0x450] ss:$8 sps:$4 sm:$0xff]  }
  0xee   : > { %2631 = vmatprep.subr.bf16.mxu0 %v3575_v1  ;;  %v3658_v1 = vld [vmem:[%s3810_s23 + $0x950] ss:$8 sps:$4 sm:$0xff]  }
  0xf0   : > { %2427 = vmatpush1.bf16.msra.mxu1 %v3570_v2  ;;  %v3663_v2 = vld [vmem:[%s3810_s23 + $0x464] ss:$8 sps:$4 sm:$0xff]  }
  0xf1   : > { %2632 = vmatpush1.bf16.msra.mxu0 %v3573_v3  ;;  %2428 = vmatprep.subr.bf16.mxu1 %v3578_v4  ;;  %v3666_v3 = vld [vmem:[%s3810_s23 + $0x964] ss:$8 sps:$4 sm:$0xff]   ;;  %v3661_v4 = vld [vmem:[%s3810_s23 + $0x460] ss:$8 sps:$4 sm:$0xff]  }
  0xf2   : > { %2633 = vmatprep.subr.bf16.mxu0 %v3581_v5  ;;  %v3664_v5 = vld [vmem:[%s3810_s23 + $0x960] ss:$8 sps:$4 sm:$0xff]  }
  0xf4   : > { %2429 = vmatpush1.bf16.msra.mxu1 %v3576_v6  ;;  %v3669_v6 = vld [vmem:[%s3810_s23 + $0x474] ss:$8 sps:$4 sm:$0xff]  }
  0xf5   : > { %2634 = vmatpush1.bf16.msra.mxu0 %v3579_v9  ;;  %2430 = vmatprep.subr.bf16.mxu1 %v3584_v12  ;;  %v3672_v9 = vld [vmem:[%s3810_s23 + $0x974] ss:$8 sps:$4 sm:$0xff]   ;;  %v3667_v12 = vld [vmem:[%s3810_s23 + $0x470] ss:$8 sps:$4 sm:$0xff]  }
  0xf6   : > { %2635 = vmatprep.subr.bf16.mxu0 %v3587_v13  ;;  %v3670_v13 = vld [vmem:[%s3810_s23 + $0x970] ss:$8 sps:$4 sm:$0xff]  }
  0xf8   : > { %2431 = vmatpush1.bf16.msra.mxu1 %v3582_v14  ;;  %v3675_v14 = vld [vmem:[%s3810_s23 + $0x484] ss:$8 sps:$4 sm:$0xff]  }
  0xf9   : > { %2636 = vmatpush1.bf16.msra.mxu0 %v3585_v15  ;;  %2432 = vmatprep.subr.bf16.mxu1 %v3590_v17  ;;  %v3678_v15 = vld [vmem:[%s3810_s23 + $0x984] ss:$8 sps:$4 sm:$0xff]   ;;  %v3673_v17 = vld [vmem:[%s3810_s23 + $0x480] ss:$8 sps:$4 sm:$0xff]  }
  0xfa   : > { %2637 = vmatprep.subr.bf16.mxu0 %v3593_v18  ;;  %v3676_v18 = vld [vmem:[%s3810_s23 + $0x980] ss:$8 sps:$4 sm:$0xff]  }
  0xfc   : > { %2433 = vmatpush1.bf16.msra.mxu1 %v3588_v19  ;;  %v3681_v19 = vld [vmem:[%s3810_s23 + $0x494] ss:$8 sps:$4 sm:$0xff]  }
  0xfd   : > { %2638 = vmatpush1.bf16.msra.mxu0 %v3591_v20  ;;  %2434 = vmatprep.subr.bf16.mxu1 %v3596_v22  ;;  %v3684_v20 = vld [vmem:[%s3810_s23 + $0x994] ss:$8 sps:$4 sm:$0xff]   ;;  %v3679_v22 = vld [vmem:[%s3810_s23 + $0x490] ss:$8 sps:$4 sm:$0xff]  }
  0xfe   : > { %2639 = vmatprep.subr.bf16.mxu0 %v3599_v23  ;;  %v3682_v23 = vld [vmem:[%s3810_s23 + $0x990] ss:$8 sps:$4 sm:$0xff]  }
 0x100   : > { %2435 = vmatpush1.bf16.msra.mxu1 %v3594_v24  ;;  %v3687_v24 = vld [vmem:[%s3810_s23 + $0x4a4] ss:$8 sps:$4 sm:$0xff]  }
 0x101   : > { %2640 = vmatpush1.bf16.msra.mxu0 %v3597_v25  ;;  %2436 = vmatprep.subr.bf16.mxu1 %v3602_v26  ;;  %v3690_v25 = vld [vmem:[%s3810_s23 + $0x9a4] ss:$8 sps:$4 sm:$0xff]   ;;  %v3685_v26 = vld [vmem:[%s3810_s23 + $0x4a0] ss:$8 sps:$4 sm:$0xff]  }
 0x102   : > { %2641 = vmatprep.subr.bf16.mxu0 %v3605_v27  ;;  %v3688_v27 = vld [vmem:[%s3810_s23 + $0x9a0] ss:$8 sps:$4 sm:$0xff]  }
 0x104   : > { %2437 = vmatpush1.bf16.msra.mxu1 %v3600_v28  ;;  %v3693_v28 = vld [vmem:[%s3810_s23 + $0x4b4] ss:$8 sps:$4 sm:$0xff]  }
 0x105   : > { %2642 = vmatpush1.bf16.msra.mxu0 %v3603_v30  ;;  %2438 = vmatprep.subr.bf16.mxu1 %v3608_v31  ;;  %v3696_v30 = vld [vmem:[%s3810_s23 + $0x9b4] ss:$8 sps:$4 sm:$0xff]   ;;  %v3691_v31 = vld [vmem:[%s3810_s23 + $0x4b0] ss:$8 sps:$4 sm:$0xff]  }
 0x106   : > { %2643 = vmatprep.subr.bf16.mxu0 %v3611_v32  ;;  %v3694_v32 = vld [vmem:[%s3810_s23 + $0x9b0] ss:$8 sps:$4 sm:$0xff]  }
 0x108   : > { %2439 = vmatpush1.bf16.msra.mxu1 %v3606_v33  ;;  %v3699_v33 = vld [vmem:[%s3810_s23 + $0x4c4] ss:$8 sps:$4 sm:$0xff]  }
 0x109   : > { %2644 = vmatpush1.bf16.msra.mxu0 %v3609_v34  ;;  %2440 = vmatprep.subr.bf16.mxu1 %v3614_v35  ;;  %v3702_v34 = vld [vmem:[%s3810_s23 + $0x9c4] ss:$8 sps:$4 sm:$0xff]   ;;  %v3697_v35 = vld [vmem:[%s3810_s23 + $0x4c0] ss:$8 sps:$4 sm:$0xff]  }
 0x10a   : > { %2645 = vmatprep.subr.bf16.mxu0 %v3617_v36  ;;  %v3700_v36 = vld [vmem:[%s3810_s23 + $0x9c0] ss:$8 sps:$4 sm:$0xff]  }
 0x10c   : > { %2441 = vmatpush1.bf16.msra.mxu1 %v3612_v38  ;;  %v3705_v38 = vld [vmem:[%s3810_s23 + $0x4d4] ss:$8 sps:$4 sm:$0xff]  }
 0x10d   : > { %2646 = vmatpush1.bf16.msra.mxu0 %v3615_v21  ;;  %2442 = vmatprep.subr.bf16.mxu1 %v3620_v7  ;;  %v3708_v21 = vld [vmem:[%s3810_s23 + $0x9d4] ss:$8 sps:$4 sm:$0xff]   ;;  %v3703_v7 = vld [vmem:[%s3810_s23 + $0x4d0] ss:$8 sps:$4 sm:$0xff]  }
 0x10e   : > { %2647 = vmatprep.subr.bf16.mxu0 %v3623_v39  ;;  %v3706_v39 = vld [vmem:[%s3810_s23 + $0x9d0] ss:$8 sps:$4 sm:$0xff]  }
 0x110   : > { %2443 = vmatpush1.bf16.msra.mxu1 %v3618_v41  ;;  %v3714_v41 = vld [vmem:[%s3810_s23 + $0x9e4] ss:$8 sps:$4 sm:$0xff]  }
 0x111   : > { %2648 = vmatpush1.bf16.msra.mxu0 %v3621_v42  ;;  %2453 = vmatprep.subr.bf16.mxu1 %v3627_v43  ;;  %v3709_v42 = vld [vmem:[%s3810_s23 + $0x4e0] ss:$8 sps:$4 sm:$0xff]  }
 0x112   : > { %2658 = vmatprep.subr.bf16.mxu0 %v3630_v44  ;;  %v3712_v43 = vld [vmem:[%s3810_s23 + $0x9e0] ss:$8 sps:$4 sm:$0xff]   ;;  %v3717_v44 = vld [vmem:[%s3810_s23 + $0x4f4] ss:$8 sps:$4 sm:$0xff]  }
 0x113   : > { %2445 = vmatmul.mubr.bf16.vlgmr.msra.gmra.mrb[0].mxu1 %v4065_v37  ;;  %v3637_v37 = vld [vmem:[%s3810_s23 + $0x420] ss:$8 sps:$4 sm:$0xff]  }
 0x114   : > { %2650 = vmatmul.mubr.bf16.vlgmr.msra.gmra.mrb[0].mxu0 %v4069_v16  ;;  %2454 = vmatpush1.bf16.msra.mxu1 %v3625_v10  ;;  %v3640_v16 = vld [vmem:[%s3810_s23 + $0x920] ss:$8 sps:$4 sm:$0xff]   ;;  %v3720_v10 = vld [vmem:[%s3810_s23 + $0x9f4] ss:$8 sps:$4 sm:$0xff]  }
 0x115   : > { %2659 = vmatpush1.bf16.msra.mxu0 %v3628_v29  ;;  %2455 = vmatprep.subr.bf16.mxu1 %v3633_v46  ;;  %v3715_v29 = vld [vmem:[%s3810_s23 + $0x4f0] ss:$8 sps:$4 sm:$0xff]  }
 0x116   : > { %2660 = vmatprep.subr.bf16.mxu0 %v3636_v47  ;;  %2485 = vmatprep.mubr.bf16.mxu1 %v602_v49  ;;  %v3718_v46 = vld [vmem:[%s3810_s23 + $0x9f0] ss:$8 sps:$4 sm:$0xff]   ;;  %v3724_v47 = vld [vmem:[%s3810_s23 + $0xa04] ss:$8 sps:$4 sm:$0xff]   ;;  %v3722_v49 = vld [vmem:[%s3810_s23 + $0xa00] ss:$8 sps:$4 sm:$0xff]  }
 0x117   : > { %2690 = vmatprep.mubr.bf16.mxu0 %v637_v50  ;;  %v3727_v50 = vld [vmem:[%s3810_s23 + $0xa14] ss:$8 sps:$4 sm:$0xff]  }
 0x118   : > { %2456 = vmatpush1.bf16.msra.mxu1 %v3631_v8  ;;  %v3725_v8 = vld [vmem:[%s3810_s23 + $0xa10] ss:$8 sps:$4 sm:$0xff]  }
 0x119   : > { %2661 = vmatpush1.bf16.msra.mxu0 %v3634_v51  ;;  %2457 = vmatprep.subr.bf16.mxu1 %v3639_v52  ;;  %v2840_v51 = vld.sshfl [vmem:[%s4247_s1 + $0x28] sm:$0x3 pattern:$0x76325410] }
 0x11a   : > { %2662 = vmatprep.subr.bf16.mxu0 %v3642_v53 }
 0x11c   : > { %2458 = vmatpush1.bf16.msra.mxu1 %v3637_v37 }
 0x11d   : > { %2663 = vmatpush1.bf16.msra.mxu0 %v3640_v16  ;;  %2459 = vmatprep.subr.bf16.mxu1 %v3645_v54 }
 0x11e   : > { %2664 = vmatprep.subr.bf16.mxu0 %v3648_v55 }
 0x120   : > { %2460 = vmatpush1.bf16.msra.mxu1 %v3643_v56 }
 0x121   : > { %2665 = vmatpush1.bf16.msra.mxu0 %v3646_v57  ;;  %2461 = vmatprep.subr.bf16.mxu1 %v3651_v58 }
 0x122   : > { %2666 = vmatprep.subr.bf16.mxu0 %v3654_v59 }
 0x124   : > { %2462 = vmatpush1.bf16.msra.mxu1 %v3649_v60 }
 0x125   : > { %2667 = vmatpush1.bf16.msra.mxu0 %v3652_v61  ;;  %2463 = vmatprep.subr.bf16.mxu1 %v3657_v62 }
 0x126   : > { %2668 = vmatprep.subr.bf16.mxu0 %v3660_v63 }
 0x128   : > { %2464 = vmatpush1.bf16.msra.mxu1 %v3655_v0 }
 0x129   : > { %2669 = vmatpush1.bf16.msra.mxu0 %v3658_v1  ;;  %2465 = vmatprep.subr.bf16.mxu1 %v3663_v2 }
 0x12a   : > { %2670 = vmatprep.subr.bf16.mxu0 %v3666_v3 }
 0x12c   : > { %2466 = vmatpush1.bf16.msra.mxu1 %v3661_v4 }
 0x12d   : > { %2671 = vmatpush1.bf16.msra.mxu0 %v3664_v5  ;;  %2467 = vmatprep.subr.bf16.mxu1 %v3669_v6 }
 0x12e   : > { %2672 = vmatprep.subr.bf16.mxu0 %v3672_v9 }
 0x130   : > { %2468 = vmatpush1.bf16.msra.mxu1 %v3667_v12 }
 0x131   : > { %2673 = vmatpush1.bf16.msra.mxu0 %v3670_v13  ;;  %2469 = vmatprep.subr.bf16.mxu1 %v3675_v14 }
 0x132   : > { %2674 = vmatprep.subr.bf16.mxu0 %v3678_v15 }
 0x134   : > { %2470 = vmatpush1.bf16.msra.mxu1 %v3673_v17 }
 0x135   : > { %2675 = vmatpush1.bf16.msra.mxu0 %v3676_v18  ;;  %2471 = vmatprep.subr.bf16.mxu1 %v3681_v19 }
 0x136   : > { %2676 = vmatprep.subr.bf16.mxu0 %v3684_v20 }
 0x138   : > { %2472 = vmatpush1.bf16.msra.mxu1 %v3679_v22 }
 0x139   : > { %2677 = vmatpush1.bf16.msra.mxu0 %v3682_v23  ;;  %2473 = vmatprep.subr.bf16.mxu1 %v3687_v24 }
 0x13a   : > { %2678 = vmatprep.subr.bf16.mxu0 %v3690_v25 }
 0x13c   : > { %2474 = vmatpush1.bf16.msra.mxu1 %v3685_v26 }
 0x13d   : > { %2679 = vmatpush1.bf16.msra.mxu0 %v3688_v27  ;;  %2475 = vmatprep.subr.bf16.mxu1 %v3693_v28 }
 0x13e   : > { %2680 = vmatprep.subr.bf16.mxu0 %v3696_v30 }
 0x140   : > { %2476 = vmatpush1.bf16.msra.mxu1 %v3691_v31 }
 0x141   : > { %2681 = vmatpush1.bf16.msra.mxu0 %v3694_v32  ;;  %2477 = vmatprep.subr.bf16.mxu1 %v3699_v33 }
 0x142   : > { %2682 = vmatprep.subr.bf16.mxu0 %v3702_v34 }
 0x144   : > { %2478 = vmatpush1.bf16.msra.mxu1 %v3697_v35 }
 0x145   : > { %2683 = vmatpush1.bf16.msra.mxu0 %v3700_v36  ;;  %2479 = vmatprep.subr.bf16.mxu1 %v3705_v38 }
 0x146   : > { %2684 = vmatprep.subr.bf16.mxu0 %v3708_v21 }
 0x148   : > { %2480 = vmatpush1.bf16.msra.mxu1 %v3703_v7 }
 0x149   : > { %2685 = vmatpush1.bf16.msra.mxu0 %v3706_v39  ;;  %2481 = vmatprep.subr.bf16.mxu1 %v3711_v40 }
 0x14a   : > { %2686 = vmatprep.subr.bf16.mxu0 %v3714_v41 }
 0x14c   : > { %2482 = vmatpush1.bf16.msra.mxu1 %v3709_v42 }
 0x14d   : > { %2687 = vmatpush1.bf16.msra.mxu0 %v3712_v43  ;;  %2483 = vmatprep.subr.bf16.mxu1 %v3717_v44 }
 0x14e   : > { %2688 = vmatprep.subr.bf16.mxu0 %v3720_v10 }
 0x150   : > { %2484 = vmatpush1.bf16.msra.mxu1 %v3715_v29 }
 0x151   : > { %2689 = vmatpush1.bf16.msra.mxu0 %v3718_v46 }
 0x152   : > { %2699 = vmatprep.subr.bf16.mxu0 %v3724_v47 }
 0x153   : > { %2486 = vmatmul.mubr.bf16.vlgmr.msra.gmra.mrb[0].mxu1 %v4150_v45  ;;  %v545_v45 = vpop.permute.xlu0 %544 }
 0x154   : > { %2691 = vmatmul.mubr.bf16.vlgmr.msra.gmra.mrb[0].mxu0 %v4153_v11 }
 0x155   : > { %2700 = vmatpush1.bf16.msra.mxu0 %v3722_v49  ;;  %2731 = vmatprep.mubr.bf16.mxu0 %v3755_v48 }
 0x156   : > { %2701 = vmatprep.subr.bf16.mxu0 %v3727_v50 }
 0x159   : > { %2702 = vmatpush1.bf16.msra.mxu0 %v3725_v8 }
 0x160   : > { %3165 = vmatmul.mubr.msk.bf16.vlgmr.msra.gmra.mrb[0].mxu0 %vm2285_vm0, %v2840_v51 }
 0x226   : > { %v2487_v52 = vpop.f32.mrb[0].mxu1 }
 0x227   : > { %v2489_v53 = vpop.f32.mrb[1].mxu1  ;;  %v3169_v54 = vadd.f32 %v2487_v52, %v545_v45 }
 0x228   : > { %v2491_v37 = vpop.f32.mrb[2].mxu1  ;;  %v3171_v11 = vadd.f32 %v2489_v53, %v545_v45 }
 0x229   : > { %v2492_v16 = vpop.f32.mrb[3].mxu1 }
 0x233   : > { %v2733_v55 = vpop.f32.mrb[0].mxu0 }
 0x234   : > { %v3170_v56 = vadd.f32 %v3169_v54, %v2733_v55  ;;  %v2735_v57 = vpop.f32.mrb[1].mxu0 }
 0x235   : > { %v3172_v48 = vadd.f32 %v3171_v11, %v2735_v57  ;;  %v2737_v58 = vpop.f32.mrb[2].mxu0 }
 0x236   : > { %v2738_v59 = vpop.f32.mrb[3].mxu0 }
 0x237   : > { %v2742_v60 = vcombine.low %v3170_v56, %v3172_v48 }
 0x239   : > { %2744 = vst [vmem:[%s208_s16] sm:$0x77] %v2742_v60 }
 0x23a PF: > { %s13_s14 = sadd.s32 1, %s3752_s14   ;;  %s4250_s12 = smov %s3748_s13 }
 0x23b   : > { %p10_p5 = scmp.ge.s32.totalorder %s13_s14, 4   ;;  %s4251_s13 = smov %s4253_s15 }
 0x23d   :  { %12 = sbr.rel (!%p10_p5) target bundleno = 2 (0x2), region = 62 }

</bundles_post_ra>
